<compile_context>
chip_gen: v6e
topology: v6e:2x2x1
jax: 0.10.0
libtpu: 0.0.40
codegen_flags: <defaults>
</compile_context>

<pallas_src>
import numpy as np

import jax
import jax.numpy as jnp
from jax import lax
from jax.experimental import pallas as pl
from jax.experimental.pallas import tpu as pltpu


BT = 64  # batch tile: samples per grid step (M = 4*BT = 256 rows per matmul)


# ----------------------------------------------------------------------------
# Fused whole-network kernel (BT batch elements per grid step)
# ----------------------------------------------------------------------------
def _make_kernel(bt):
    m = 4 * bt
    f32 = jnp.float32
    bf16 = jnp.bfloat16

    def kernel(x_ref, k1_ref, b1_ref, k2_ref, b2_ref, k3_ref, b3_ref,
               w4_ref, b4_ref, o_ref, a1_ref, a2_ref):
        def dot(a, b):
            return jnp.dot(a, b, preferred_element_type=f32)

        def conv3(lhs0, lhs1, lhs2, k_ref, b_ref):
            acc = dot(lhs0, k_ref[0]) + dot(lhs1, k_ref[1]) + dot(lhs2, k_ref[2])
            return jnp.maximum(acc + b_ref[...], 0.0)

        # Only two pad-row blocks are ever read without being written; zero just
        # those, every step (NOT only at step 0: under v7x megacore "parallel"
        # each TensorCore has its own scratch and only one core runs step 0).
        zblk = jnp.zeros((bt, 256), bf16)
        a1_ref[0, 0:bt, :] = zblk
        a2_ref[0, 0:bt, :] = zblk

        # x_ref[0, p, t*bt + b, :] = zero-padded input row (8*t + p) of local
        # sample b, interior columns only (32 lanes).
        def xin(p, s=0):
            return x_ref[0, p, s * bt:s * bt + m, :]

        # ---- layer 1: Conv(1->16, 3x3, s2, p1): 32x32 -> 16x16x16 ----------
        # Four output-row phase groups (rows q, q+4, q+8, q+12); each kernel row
        # is a (4*bt, 32) @ (32, 256) dot and the group result lands directly in
        # the mod-4 phase-split padded buffer a1 as one contiguous slab.
        a1_ref[1, 0:m, :] = conv3(xin(0), xin(1), xin(2), k1_ref, b1_ref).astype(bf16)
        a1_ref[2, 0:m, :] = conv3(xin(2), xin(3), xin(4), k1_ref, b1_ref).astype(bf16)
        a1_ref[3, 0:m, :] = conv3(xin(4), xin(5), xin(6), k1_ref, b1_ref).astype(bf16)
        a1_ref[0, bt:bt + m, :] = conv3(xin(6), xin(7), xin(0, 1),
                                        k1_ref, b1_ref).astype(bf16)

        # ---- layer 2: Conv(16->32, 3x3, s2, p1): 16x16 -> 8x8x32 ------------
        # Two output-row parity groups; LHS slabs are contiguous reads of a1,
        # results land in the mod-2 phase-split padded buffer a2.
        a2_ref[1, 0:m, :] = conv3(a1_ref[0, 0:m, :], a1_ref[1, 0:m, :],
                                  a1_ref[2, 0:m, :], k2_ref, b2_ref).astype(bf16)
        a2_ref[0, bt:bt + m, :] = conv3(a1_ref[2, 0:m, :], a1_ref[3, 0:m, :],
                                        a1_ref[0, bt:bt + m, :],
                                        k2_ref, b2_ref).astype(bf16)

        # ---- layer 3: Conv(32->64, 3x3, s2, p1): 8x8 -> 4x4x64 --------------
        # Single group; kept as a value (no scratch round trip).
        r3 = conv3(a2_ref[0, 0:m, :], a2_ref[1, 0:m, :],
                   a2_ref[0, bt:bt + m, :], k3_ref, b3_ref)        # (4*bt, 256) f32

        # ---- layer 4: Conv(64->1, 4x4, valid) + Sigmoid: VPU/XLU/EUP ---------
        acc4 = (r3[0 * bt:1 * bt, :] * w4_ref[0:1, :]
                + r3[1 * bt:2 * bt, :] * w4_ref[1:2, :]
                + r3[2 * bt:3 * bt, :] * w4_ref[2:3, :]
                + r3[3 * bt:4 * bt, :] * w4_ref[3:4, :])           # (bt, 256)
        logit = jnp.sum(acc4, axis=1, keepdims=True) + b4_ref[...]  # (bt, 1)
        # TODO(synk): a (1, bt) lane-dense output block would avoid this 1-lane
        # masked store, but the writeback is only bt*4 bytes per grid step.
        o_ref[...] = jax.nn.sigmoid(logit)

    return kernel


# ----------------------------------------------------------------------------
# Host-side weight folding: absorb horizontal taps + stride into the weights
# ----------------------------------------------------------------------------
def _fold_conv_rows(w_oihw, in_w):
    """Fold a 3x3 / stride-2 / pad-1 conv (PyTorch OIHW weights) into 3 matrices
    (one per kernel row) mapping a flattened interior input row (in_w*Cin) to a
    flattened output row (OW*Cout).  Horizontal taps + stride are absorbed into
    the matrix; taps landing on the always-zero horizontal pad columns are
    dropped, keeping K a clean multiple of the lane width downstream."""
    w = np.asarray(w_oihw, np.float32)                     # (Cout, Cin, 3, 3)
    cout, cin, kh, kw = w.shape
    ow_n = in_w // 2
    mats = np.zeros((kh, in_w * cin, ow_n * cout), np.float32)
    for i in range(kh):
        for ow in range(ow_n):
            for j in range(kw):
                col = 2 * ow + j                           # padded column
                if 1 <= col <= in_w:                       # interior only
                    wc = col - 1
                    mats[i, wc * cin:(wc + 1) * cin,
                         ow * cout:(ow + 1) * cout] += w[:, :, i, j].T
    return mats


def fold_params(params):
    """PyTorch-layout conv params -> folded kernel operands (weights in bf16)."""
    (w1, b1), (w2, b2), (w3, b3), (w4, b4) = params
    k1 = _fold_conv_rows(w1, 32)                           # (3,  32, 256)
    k2 = _fold_conv_rows(w2, 16)                           # (3, 256, 256)
    k3 = _fold_conv_rows(w3, 8)                            # (3, 256, 256)
    b1r = np.tile(np.asarray(b1, np.float32), 16)[None, :]  # (1, 256)
    b2r = np.tile(np.asarray(b2, np.float32), 8)[None, :]   # (1, 256)
    b3r = np.tile(np.asarray(b3, np.float32), 4)[None, :]   # (1, 256)
    # w4f[i, j*64 + c] = W4[0, c, i, j]   (matches conv3's flat lane layout)
    w4f = np.transpose(np.asarray(w4, np.float32)[0], (1, 2, 0)).reshape(4, 256)
    b4r = np.asarray(b4, np.float32).reshape(1, 1)
    bf = jnp.bfloat16
    return (jnp.asarray(k1, bf), jnp.asarray(b1r),
            jnp.asarray(k2, bf), jnp.asarray(b2r),
            jnp.asarray(k3, bf), jnp.asarray(b3r),
            jnp.asarray(w4f), jnp.asarray(b4r))


# ----------------------------------------------------------------------------
# Host-side input prep: pad vertically, drop pad cols, phase-split rows mod 8
# ----------------------------------------------------------------------------
def _prep_x(x_nchw, bt):
    """(B,1,32,32) f32 -> (G, 8, 5*bt, 32) bf16.

    prep[g, p, t*bt + b, :] = zero-padded input row (8*t + p) of sample g*bt+b,
    interior columns only.  The batch is zero-padded up to a multiple of bt."""
    b_total = x_nchw.shape[0]
    g = -(-b_total // bt)
    bp = g * bt
    x = x_nchw[:, 0]                                       # (B, 32, 32)
    if bp != b_total:
        x = jnp.concatenate(
            [x, jnp.zeros((bp - b_total, 32, 32), x.dtype)], axis=0)
    xp = jnp.pad(x, ((0, 0), (1, 7), (0, 0)))              # rows 0..39 (0, 33.. pad)
    xr = xp.reshape(g, bt, 5, 8, 32).transpose(0, 3, 2, 1, 4)   # (G, 8, 5, bt, 32)
    return xr.reshape(g, 8, 5 * bt, 32).astype(jnp.bfloat16), g, bp


# ----------------------------------------------------------------------------
# Forward wrapper
# ----------------------------------------------------------------------------
def discriminator_forward(x_nchw, folded, bt=BT):
    """x_nchw: (B, 1, 32, 32) f32 -> (B, 1, 1, 1) f32 (matches PyTorch)."""
    b_total, c, h, w = x_nchw.shape
    assert (c, h, w) == (1, 32, 32), (c, h, w)
    k1, b1r, k2, b2r, k3, b3r, w4f, b4r = folded

    xprep, g, bp = _prep_x(x_nchw, bt)
    m = 4 * bt

    flops = int(g * 2 * m * 256 * (12 * 32 + 9 * 256) + g * 6 * m * 256)
    bytes_accessed = int(sum(int(a.size) * a.dtype.itemsize
                             for a in (xprep, k1, b1r, k2, b2r, k3, b3r, w4f, b4r))
                         + bp * 4)

    out = pl.pallas_call(
        _make_kernel(bt),
        out_shape=jax.ShapeDtypeStruct((bp, 1), jnp.float32),
        grid_spec=pltpu.PrefetchScalarGridSpec(
            num_scalar_prefetch=0,
            grid=(g,),
            in_specs=[
                pl.BlockSpec((1, 8, 5 * bt, 32), lambda i: (i, 0, 0, 0)),  # x
                pl.BlockSpec((3, 32, 256), lambda i: (0, 0, 0)),           # k1
                pl.BlockSpec((1, 256), lambda i: (0, 0)),                  # b1
                pl.BlockSpec((3, 256, 256), lambda i: (0, 0, 0)),          # k2
                pl.BlockSpec((1, 256), lambda i: (0, 0)),                  # b2
                pl.BlockSpec((3, 256, 256), lambda i: (0, 0, 0)),          # k3
                pl.BlockSpec((1, 256), lambda i: (0, 0)),                  # b3
                pl.BlockSpec((4, 256), lambda i: (0, 0)),                  # w4
                pl.BlockSpec((1, 1), lambda i: (0, 0)),                    # b4
            ],
            out_specs=pl.BlockSpec((bt, 1), lambda i: (i, 0)),
            scratch_shapes=[
                pltpu.VMEM((4, 5 * bt, 256), jnp.bfloat16),  # conv1 out, rows mod 4
                pltpu.VMEM((2, 5 * bt, 256), jnp.bfloat16),  # conv2 out, rows mod 2
            ],
        ),
        compiler_params=pltpu.CompilerParams(
            dimension_semantics=("parallel",),
        ),
        cost_estimate=pl.CostEstimate(
            flops=flops, transcendentals=bp, bytes_accessed=bytes_accessed),
    )(xprep, k1, b1r, k2, b2r, k3, b3r, w4f, b4r)

    return out[:b_total].reshape(b_total, 1, 1, 1)


# ----------------------------------------------------------------------------
# Parameters + pure-JAX reference (lax.conv) for the correctness check
# ----------------------------------------------------------------------------
def init_params(key):
    """Deterministic synthetic parameters (PyTorch Conv2d weight shapes)."""
    shapes = [
        ((16, 1, 3, 3), (16,)),
        ((32, 16, 3, 3), (32,)),
        ((64, 32, 3, 3), (64,)),
        ((1, 64, 4, 4), (1,)),
    ]
    params = []
    for i, (ws, bs) in enumerate(shapes):
        kw_, kb = jax.random.split(jax.random.fold_in(key, i))
        w = 0.05 * jax.random.normal(kw_, ws, dtype=jnp.float32)
        b = 0.05 * jax.random.normal(kb, bs, dtype=jnp.float32)
        params.append((w, b))
    return params


def discriminator_reference(x_nchw, params):
    def conv(x, w, b, stride, padding):
        y = lax.conv_general_dilated(
            x, w, window_strides=(stride, stride),
            padding=[(padding, padding), (padding, padding)],
            dimension_numbers=("NCHW", "OIHW", "NCHW"))
        return y + b.reshape(1, -1, 1, 1)

    (w1, b1), (w2, b2), (w3, b3), (w4, b4) = params
    x = jax.nn.relu(conv(x_nchw, w1, b1, 2, 1))
    x = jax.nn.relu(conv(x, w2, b2, 2, 1))
    x = jax.nn.relu(conv(x, w3, b3, 2, 1))
    x = jax.nn.sigmoid(conv(x, w4, b4, 1, 0))
    return x


if __name__ == "__main__":
    key = jax.random.PRNGKey(0)
    k_x, k_p = jax.random.split(key)
    params = init_params(k_p)
    folded = fold_params(params)

    fwd = jax.jit(discriminator_forward)

    # B=128 -> grid of 2 steps (both v7x TensorCores get work);
    # B=2 exercises the batch-padding path (padded up to one 64-sample tile).
    for batch in (128, 2):
        x = jax.random.normal(jax.random.fold_in(k_x, batch),
                              (batch, 1, 32, 32), dtype=jnp.float32)
        out = jax.block_until_ready(fwd(x, folded))
        ref = jax.block_until_ready(discriminator_reference(x, params))
        assert out.shape == (batch, 1, 1, 1), out.shape
        # bf16 weights/activations with f32 accumulation: loosened tolerance.
        assert jnp.allclose(out, ref, atol=2e-2, rtol=2e-2), (
            batch, float(jnp.max(jnp.abs(out - ref))))

    print("KERNEL_OK")
</pallas_src>

<mosaic_0001>
module attributes {stable_mosaic.version = 11 : i64} {
  func.func @kernel(%arg0: i32, %arg1: memref<1x8x320x32xbf16, #tpu.memory_space<vmem>>, %arg2: memref<3x32x256xbf16, #tpu.memory_space<vmem>>, %arg3: memref<1x256xf32, #tpu.memory_space<vmem>>, %arg4: memref<3x256x256xbf16, #tpu.memory_space<vmem>>, %arg5: memref<1x256xf32, #tpu.memory_space<vmem>>, %arg6: memref<3x256x256xbf16, #tpu.memory_space<vmem>>, %arg7: memref<1x256xf32, #tpu.memory_space<vmem>>, %arg8: memref<4x256xf32, #tpu.memory_space<vmem>>, %arg9: memref<1x1xf32, #tpu.memory_space<vmem>>, %arg10: memref<64x1xf32, #tpu.memory_space<vmem>>, %arg11: memref<4x320x256xbf16, #tpu.memory_space<vmem>>, %arg12: memref<2x320x256xbf16, #tpu.memory_space<vmem>>) attributes {dimension_semantics = [#tpu.dimension_semantics<parallel>], iteration_bounds = array<i64: 2>, scalar_prefetch = 0 : i64, scratch_operands = 2 : i64, tpu.core_type = #tpu.core_type<tc>, window_params = [{transform_indices = @transform_0, window_bounds = array<i64: 1, 8, 320, 32>}, {pipeline_mode = #tpu.pipeline_mode<synchronous>, transform_indices = @transform_1, window_bounds = array<i64: 3, 32, 256>}, {pipeline_mode = #tpu.pipeline_mode<synchronous>, transform_indices = @transform_2, window_bounds = array<i64: 1, 256>}, {pipeline_mode = #tpu.pipeline_mode<synchronous>, transform_indices = @transform_3, window_bounds = array<i64: 3, 256, 256>}, {pipeline_mode = #tpu.pipeline_mode<synchronous>, transform_indices = @transform_4, window_bounds = array<i64: 1, 256>}, {pipeline_mode = #tpu.pipeline_mode<synchronous>, transform_indices = @transform_5, window_bounds = array<i64: 3, 256, 256>}, {pipeline_mode = #tpu.pipeline_mode<synchronous>, transform_indices = @transform_6, window_bounds = array<i64: 1, 256>}, {pipeline_mode = #tpu.pipeline_mode<synchronous>, transform_indices = @transform_7, window_bounds = array<i64: 4, 256>}, {pipeline_mode = #tpu.pipeline_mode<synchronous>, transform_indices = @transform_8, window_bounds = array<i64: 1, 1>}, {transform_indices = @transform_9, window_bounds = array<i64: 64, 1>}]} {
    %cst = arith.constant 0.000000e+00 : bf16
    %0 = vector.broadcast %cst : bf16 to vector<64x256xbf16>
    %c0 = arith.constant 0 : index
    %c0_0 = arith.constant 0 : index
    %c0_1 = arith.constant 0 : index
    %1 = vector.load %arg11[%c0, %c0_0, %c0_1] : memref<4x320x256xbf16, #tpu.memory_space<vmem>>, vector<1x64x256xbf16>
    %2 = vector.shape_cast %1 : vector<1x64x256xbf16> to vector<64x256xbf16>
    %3 = vector.shape_cast %0 : vector<64x256xbf16> to vector<1x64x256xbf16>
    tpu.vector_store %arg11[%c0, %c0_0, %c0_1], %3 {strides = array<i32>} : memref<4x320x256xbf16, #tpu.memory_space<vmem>>, vector<1x64x256xbf16>,
    %c0_2 = arith.constant 0 : index
    %c0_3 = arith.constant 0 : index
    %c0_4 = arith.constant 0 : index
    %4 = vector.load %arg12[%c0_2, %c0_3, %c0_4] : memref<2x320x256xbf16, #tpu.memory_space<vmem>>, vector<1x64x256xbf16>
    %5 = vector.shape_cast %4 : vector<1x64x256xbf16> to vector<64x256xbf16>
    %6 = vector.shape_cast %0 : vector<64x256xbf16> to vector<1x64x256xbf16>
    tpu.vector_store %arg12[%c0_2, %c0_3, %c0_4], %6 {strides = array<i32>} : memref<2x320x256xbf16, #tpu.memory_space<vmem>>, vector<1x64x256xbf16>,
    %c0_5 = arith.constant 0 : index
    %c0_6 = arith.constant 0 : index
    %c0_7 = arith.constant 0 : index
    %c0_8 = arith.constant 0 : index
    %7 = vector.load %arg1[%c0_5, %c0_6, %c0_7, %c0_8] : memref<1x8x320x32xbf16, #tpu.memory_space<vmem>>, vector<1x1x256x32xbf16>
    %8 = vector.shape_cast %7 : vector<1x1x256x32xbf16> to vector<256x32xbf16>
    %c0_9 = arith.constant 0 : index
    %c1 = arith.constant 1 : index
    %c0_10 = arith.constant 0 : index
    %c0_11 = arith.constant 0 : index
    %9 = vector.load %arg1[%c0_9, %c1, %c0_10, %c0_11] : memref<1x8x320x32xbf16, #tpu.memory_space<vmem>>, vector<1x1x256x32xbf16>
    %10 = vector.shape_cast %9 : vector<1x1x256x32xbf16> to vector<256x32xbf16>
    %c0_12 = arith.constant 0 : index
    %c2 = arith.constant 2 : index
    %c0_13 = arith.constant 0 : index
    %c0_14 = arith.constant 0 : index
    %11 = vector.load %arg1[%c0_12, %c2, %c0_13, %c0_14] : memref<1x8x320x32xbf16, #tpu.memory_space<vmem>>, vector<1x1x256x32xbf16>
    %12 = vector.shape_cast %11 : vector<1x1x256x32xbf16> to vector<256x32xbf16>
    %c0_15 = arith.constant 0 : index
    %c0_16 = arith.constant 0 : index
    %c0_17 = arith.constant 0 : index
    %13 = vector.load %arg2[%c0_15, %c0_16, %c0_17] : memref<3x32x256xbf16, #tpu.memory_space<vmem>>, vector<1x32x256xbf16>
    %14 = vector.shape_cast %13 : vector<1x32x256xbf16> to vector<32x256xbf16>
    %cst_18 = arith.constant dense<0.000000e+00> : vector<256x256xf32>
    %15 = tpu.matmul %8, %14, %cst_18 {dimension_numbers = #tpu.dot_dimension_numbers<[1], [0], [0], [1], [0, 0, 1, 1], [], []>} : vector<256x32xbf16>, vector<32x256xbf16>, vector<256x256xf32> -> vector<256x256xf32>
    %c1_19 = arith.constant 1 : index
    %c0_20 = arith.constant 0 : index
    %c0_21 = arith.constant 0 : index
    %16 = vector.load %arg2[%c1_19, %c0_20, %c0_21] : memref<3x32x256xbf16, #tpu.memory_space<vmem>>, vector<1x32x256xbf16>
    %17 = vector.shape_cast %16 : vector<1x32x256xbf16> to vector<32x256xbf16>
    %cst_22 = arith.constant dense<0.000000e+00> : vector<256x256xf32>
    %18 = tpu.matmul %10, %17, %cst_22 {dimension_numbers = #tpu.dot_dimension_numbers<[1], [0], [0], [1], [0, 0, 1, 1], [], []>} : vector<256x32xbf16>, vector<32x256xbf16>, vector<256x256xf32> -> vector<256x256xf32>
    %19 = arith.addf %15, %18 : vector<256x256xf32>
    %c2_23 = arith.constant 2 : index
    %c0_24 = arith.constant 0 : index
    %c0_25 = arith.constant 0 : index
    %20 = vector.load %arg2[%c2_23, %c0_24, %c0_25] : memref<3x32x256xbf16, #tpu.memory_space<vmem>>, vector<1x32x256xbf16>
    %21 = vector.shape_cast %20 : vector<1x32x256xbf16> to vector<32x256xbf16>
    %cst_26 = arith.constant dense<0.000000e+00> : vector<256x256xf32>
    %22 = tpu.matmul %12, %21, %cst_26 {dimension_numbers = #tpu.dot_dimension_numbers<[1], [0], [0], [1], [0, 0, 1, 1], [], []>} : vector<256x32xbf16>, vector<32x256xbf16>, vector<256x256xf32> -> vector<256x256xf32>
    %23 = arith.addf %19, %22 : vector<256x256xf32>
    %c0_27 = arith.constant 0 : index
    %c0_28 = arith.constant 0 : index
    %24 = vector.load %arg3[%c0_27, %c0_28] : memref<1x256xf32, #tpu.memory_space<vmem>>, vector<1x256xf32>
    %25 = vector.broadcast %24 : vector<1x256xf32> to vector<256x256xf32>
    %26 = arith.addf %23, %25 : vector<256x256xf32>
    %cst_29 = arith.constant 0.000000e+00 : f32
    %27 = vector.broadcast %cst_29 : f32 to vector<256x256xf32>
    %28 = arith.maximumf %26, %27 : vector<256x256xf32>
    %29 = arith.truncf %28 : vector<256x256xf32> to vector<256x256xbf16>
    %c1_30 = arith.constant 1 : index
    %c0_31 = arith.constant 0 : index
    %c0_32 = arith.constant 0 : index
    %30 = vector.load %arg11[%c1_30, %c0_31, %c0_32] : memref<4x320x256xbf16, #tpu.memory_space<vmem>>, vector<1x256x256xbf16>
    %31 = vector.shape_cast %30 : vector<1x256x256xbf16> to vector<256x256xbf16>
    %32 = vector.shape_cast %29 : vector<256x256xbf16> to vector<1x256x256xbf16>
    tpu.vector_store %arg11[%c1_30, %c0_31, %c0_32], %32 {strides = array<i32>} : memref<4x320x256xbf16, #tpu.memory_space<vmem>>, vector<1x256x256xbf16>,
    %c0_33 = arith.constant 0 : index
    %c2_34 = arith.constant 2 : index
    %c0_35 = arith.constant 0 : index
    %c0_36 = arith.constant 0 : index
    %33 = vector.load %arg1[%c0_33, %c2_34, %c0_35, %c0_36] : memref<1x8x320x32xbf16, #tpu.memory_space<vmem>>, vector<1x1x256x32xbf16>
    %34 = vector.shape_cast %33 : vector<1x1x256x32xbf16> to vector<256x32xbf16>
    %c0_37 = arith.constant 0 : index
    %c3 = arith.constant 3 : index
    %c0_38 = arith.constant 0 : index
    %c0_39 = arith.constant 0 : index
    %35 = vector.load %arg1[%c0_37, %c3, %c0_38, %c0_39] : memref<1x8x320x32xbf16, #tpu.memory_space<vmem>>, vector<1x1x256x32xbf16>
    %36 = vector.shape_cast %35 : vector<1x1x256x32xbf16> to vector<256x32xbf16>
    %c0_40 = arith.constant 0 : index
    %c4 = arith.constant 4 : index
    %c0_41 = arith.constant 0 : index
    %c0_42 = arith.constant 0 : index
    %37 = vector.load %arg1[%c0_40, %c4, %c0_41, %c0_42] : memref<1x8x320x32xbf16, #tpu.memory_space<vmem>>, vector<1x1x256x32xbf16>
    %38 = vector.shape_cast %37 : vector<1x1x256x32xbf16> to vector<256x32xbf16>
    %c0_43 = arith.constant 0 : index
    %c0_44 = arith.constant 0 : index
    %c0_45 = arith.constant 0 : index
    %39 = vector.load %arg2[%c0_43, %c0_44, %c0_45] : memref<3x32x256xbf16, #tpu.memory_space<vmem>>, vector<1x32x256xbf16>
    %40 = vector.shape_cast %39 : vector<1x32x256xbf16> to vector<32x256xbf16>
    %cst_46 = arith.constant dense<0.000000e+00> : vector<256x256xf32>
    %41 = tpu.matmul %34, %40, %cst_46 {dimension_numbers = #tpu.dot_dimension_numbers<[1], [0], [0], [1], [0, 0, 1, 1], [], []>} : vector<256x32xbf16>, vector<32x256xbf16>, vector<256x256xf32> -> vector<256x256xf32>
    %c1_47 = arith.constant 1 : index
    %c0_48 = arith.constant 0 : index
    %c0_49 = arith.constant 0 : index
    %42 = vector.load %arg2[%c1_47, %c0_48, %c0_49] : memref<3x32x256xbf16, #tpu.memory_space<vmem>>, vector<1x32x256xbf16>
    %43 = vector.shape_cast %42 : vector<1x32x256xbf16> to vector<32x256xbf16>
    %cst_50 = arith.constant dense<0.000000e+00> : vector<256x256xf32>
    %44 = tpu.matmul %36, %43, %cst_50 {dimension_numbers = #tpu.dot_dimension_numbers<[1], [0], [0], [1], [0, 0, 1, 1], [], []>} : vector<256x32xbf16>, vector<32x256xbf16>, vector<256x256xf32> -> vector<256x256xf32>
    %45 = arith.addf %41, %44 : vector<256x256xf32>
    %c2_51 = arith.constant 2 : index
    %c0_52 = arith.constant 0 : index
    %c0_53 = arith.constant 0 : index
    %46 = vector.load %arg2[%c2_51, %c0_52, %c0_53] : memref<3x32x256xbf16, #tpu.memory_space<vmem>>, vector<1x32x256xbf16>
    %47 = vector.shape_cast %46 : vector<1x32x256xbf16> to vector<32x256xbf16>
    %cst_54 = arith.constant dense<0.000000e+00> : vector<256x256xf32>
    %48 = tpu.matmul %38, %47, %cst_54 {dimension_numbers = #tpu.dot_dimension_numbers<[1], [0], [0], [1], [0, 0, 1, 1], [], []>} : vector<256x32xbf16>, vector<32x256xbf16>, vector<256x256xf32> -> vector<256x256xf32>
    %49 = arith.addf %45, %48 : vector<256x256xf32>
    %c0_55 = arith.constant 0 : index
    %c0_56 = arith.constant 0 : index
    %50 = vector.load %arg3[%c0_55, %c0_56] : memref<1x256xf32, #tpu.memory_space<vmem>>, vector<1x256xf32>
    %51 = vector.broadcast %50 : vector<1x256xf32> to vector<256x256xf32>
    %52 = arith.addf %49, %51 : vector<256x256xf32>
    %cst_57 = arith.constant 0.000000e+00 : f32
    %53 = vector.broadcast %cst_57 : f32 to vector<256x256xf32>
    %54 = arith.maximumf %52, %53 : vector<256x256xf32>
    %55 = arith.truncf %54 : vector<256x256xf32> to vector<256x256xbf16>
    %c2_58 = arith.constant 2 : index
    %c0_59 = arith.constant 0 : index
    %c0_60 = arith.constant 0 : index
    %56 = vector.load %arg11[%c2_58, %c0_59, %c0_60] : memref<4x320x256xbf16, #tpu.memory_space<vmem>>, vector<1x256x256xbf16>
    %57 = vector.shape_cast %56 : vector<1x256x256xbf16> to vector<256x256xbf16>
    %58 = vector.shape_cast %55 : vector<256x256xbf16> to vector<1x256x256xbf16>
    tpu.vector_store %arg11[%c2_58, %c0_59, %c0_60], %58 {strides = array<i32>} : memref<4x320x256xbf16, #tpu.memory_space<vmem>>, vector<1x256x256xbf16>,
    %c0_61 = arith.constant 0 : index
    %c4_62 = arith.constant 4 : index
    %c0_63 = arith.constant 0 : index
    %c0_64 = arith.constant 0 : index
    %59 = vector.load %arg1[%c0_61, %c4_62, %c0_63, %c0_64] : memref<1x8x320x32xbf16, #tpu.memory_space<vmem>>, vector<1x1x256x32xbf16>
    %60 = vector.shape_cast %59 : vector<1x1x256x32xbf16> to vector<256x32xbf16>
    %c0_65 = arith.constant 0 : index
    %c5 = arith.constant 5 : index
    %c0_66 = arith.constant 0 : index
    %c0_67 = arith.constant 0 : index
    %61 = vector.load %arg1[%c0_65, %c5, %c0_66, %c0_67] : memref<1x8x320x32xbf16, #tpu.memory_space<vmem>>, vector<1x1x256x32xbf16>
    %62 = vector.shape_cast %61 : vector<1x1x256x32xbf16> to vector<256x32xbf16>
    %c0_68 = arith.constant 0 : index
    %c6 = arith.constant 6 : index
    %c0_69 = arith.constant 0 : index
    %c0_70 = arith.constant 0 : index
    %63 = vector.load %arg1[%c0_68, %c6, %c0_69, %c0_70] : memref<1x8x320x32xbf16, #tpu.memory_space<vmem>>, vector<1x1x256x32xbf16>
    %64 = vector.shape_cast %63 : vector<1x1x256x32xbf16> to vector<256x32xbf16>
    %c0_71 = arith.constant 0 : index
    %c0_72 = arith.constant 0 : index
    %c0_73 = arith.constant 0 : index
    %65 = vector.load %arg2[%c0_71, %c0_72, %c0_73] : memref<3x32x256xbf16, #tpu.memory_space<vmem>>, vector<1x32x256xbf16>
    %66 = vector.shape_cast %65 : vector<1x32x256xbf16> to vector<32x256xbf16>
    %cst_74 = arith.constant dense<0.000000e+00> : vector<256x256xf32>
    %67 = tpu.matmul %60, %66, %cst_74 {dimension_numbers = #tpu.dot_dimension_numbers<[1], [0], [0], [1], [0, 0, 1, 1], [], []>} : vector<256x32xbf16>, vector<32x256xbf16>, vector<256x256xf32> -> vector<256x256xf32>
    %c1_75 = arith.constant 1 : index
    %c0_76 = arith.constant 0 : index
    %c0_77 = arith.constant 0 : index
    %68 = vector.load %arg2[%c1_75, %c0_76, %c0_77] : memref<3x32x256xbf16, #tpu.memory_space<vmem>>, vector<1x32x256xbf16>
    %69 = vector.shape_cast %68 : vector<1x32x256xbf16> to vector<32x256xbf16>
    %cst_78 = arith.constant dense<0.000000e+00> : vector<256x256xf32>
    %70 = tpu.matmul %62, %69, %cst_78 {dimension_numbers = #tpu.dot_dimension_numbers<[1], [0], [0], [1], [0, 0, 1, 1], [], []>} : vector<256x32xbf16>, vector<32x256xbf16>, vector<256x256xf32> -> vector<256x256xf32>
    %71 = arith.addf %67, %70 : vector<256x256xf32>
    %c2_79 = arith.constant 2 : index
    %c0_80 = arith.constant 0 : index
    %c0_81 = arith.constant 0 : index
    %72 = vector.load %arg2[%c2_79, %c0_80, %c0_81] : memref<3x32x256xbf16, #tpu.memory_space<vmem>>, vector<1x32x256xbf16>
    %73 = vector.shape_cast %72 : vector<1x32x256xbf16> to vector<32x256xbf16>
    %cst_82 = arith.constant dense<0.000000e+00> : vector<256x256xf32>
    %74 = tpu.matmul %64, %73, %cst_82 {dimension_numbers = #tpu.dot_dimension_numbers<[1], [0], [0], [1], [0, 0, 1, 1], [], []>} : vector<256x32xbf16>, vector<32x256xbf16>, vector<256x256xf32> -> vector<256x256xf32>
    %75 = arith.addf %71, %74 : vector<256x256xf32>
    %c0_83 = arith.constant 0 : index
    %c0_84 = arith.constant 0 : index
    %76 = vector.load %arg3[%c0_83, %c0_84] : memref<1x256xf32, #tpu.memory_space<vmem>>, vector<1x256xf32>
    %77 = vector.broadcast %76 : vector<1x256xf32> to vector<256x256xf32>
    %78 = arith.addf %75, %77 : vector<256x256xf32>
    %cst_85 = arith.constant 0.000000e+00 : f32
    %79 = vector.broadcast %cst_85 : f32 to vector<256x256xf32>
    %80 = arith.maximumf %78, %79 : vector<256x256xf32>
    %81 = arith.truncf %80 : vector<256x256xf32> to vector<256x256xbf16>
    %c3_86 = arith.constant 3 : index
    %c0_87 = arith.constant 0 : index
    %c0_88 = arith.constant 0 : index
    %82 = vector.load %arg11[%c3_86, %c0_87, %c0_88] : memref<4x320x256xbf16, #tpu.memory_space<vmem>>, vector<1x256x256xbf16>
    %83 = vector.shape_cast %82 : vector<1x256x256xbf16> to vector<256x256xbf16>
    %84 = vector.shape_cast %81 : vector<256x256xbf16> to vector<1x256x256xbf16>
    tpu.vector_store %arg11[%c3_86, %c0_87, %c0_88], %84 {strides = array<i32>} : memref<4x320x256xbf16, #tpu.memory_space<vmem>>, vector<1x256x256xbf16>,
    %c0_89 = arith.constant 0 : index
    %c6_90 = arith.constant 6 : index
    %c0_91 = arith.constant 0 : index
    %c0_92 = arith.constant 0 : index
    %85 = vector.load %arg1[%c0_89, %c6_90, %c0_91, %c0_92] : memref<1x8x320x32xbf16, #tpu.memory_space<vmem>>, vector<1x1x256x32xbf16>
    %86 = vector.shape_cast %85 : vector<1x1x256x32xbf16> to vector<256x32xbf16>
    %c0_93 = arith.constant 0 : index
    %c7 = arith.constant 7 : index
    %c0_94 = arith.constant 0 : index
    %c0_95 = arith.constant 0 : index
    %87 = vector.load %arg1[%c0_93, %c7, %c0_94, %c0_95] : memref<1x8x320x32xbf16, #tpu.memory_space<vmem>>, vector<1x1x256x32xbf16>
    %88 = vector.shape_cast %87 : vector<1x1x256x32xbf16> to vector<256x32xbf16>
    %c0_96 = arith.constant 0 : index
    %c0_97 = arith.constant 0 : index
    %c64 = arith.constant 64 : index
    %c0_98 = arith.constant 0 : index
    %89 = vector.load %arg1[%c0_96, %c0_97, %c64, %c0_98] : memref<1x8x320x32xbf16, #tpu.memory_space<vmem>>, vector<1x1x256x32xbf16>
    %90 = vector.shape_cast %89 : vector<1x1x256x32xbf16> to vector<256x32xbf16>
    %c0_99 = arith.constant 0 : index
    %c0_100 = arith.constant 0 : index
    %c0_101 = arith.constant 0 : index
    %91 = vector.load %arg2[%c0_99, %c0_100, %c0_101] : memref<3x32x256xbf16, #tpu.memory_space<vmem>>, vector<1x32x256xbf16>
    %92 = vector.shape_cast %91 : vector<1x32x256xbf16> to vector<32x256xbf16>
    %cst_102 = arith.constant dense<0.000000e+00> : vector<256x256xf32>
    %93 = tpu.matmul %86, %92, %cst_102 {dimension_numbers = #tpu.dot_dimension_numbers<[1], [0], [0], [1], [0, 0, 1, 1], [], []>} : vector<256x32xbf16>, vector<32x256xbf16>, vector<256x256xf32> -> vector<256x256xf32>
    %c1_103 = arith.constant 1 : index
    %c0_104 = arith.constant 0 : index
    %c0_105 = arith.constant 0 : index
    %94 = vector.load %arg2[%c1_103, %c0_104, %c0_105] : memref<3x32x256xbf16, #tpu.memory_space<vmem>>, vector<1x32x256xbf16>
    %95 = vector.shape_cast %94 : vector<1x32x256xbf16> to vector<32x256xbf16>
    %cst_106 = arith.constant dense<0.000000e+00> : vector<256x256xf32>
    %96 = tpu.matmul %88, %95, %cst_106 {dimension_numbers = #tpu.dot_dimension_numbers<[1], [0], [0], [1], [0, 0, 1, 1], [], []>} : vector<256x32xbf16>, vector<32x256xbf16>, vector<256x256xf32> -> vector<256x256xf32>
    %97 = arith.addf %93, %96 : vector<256x256xf32>
    %c2_107 = arith.constant 2 : index
    %c0_108 = arith.constant 0 : index
    %c0_109 = arith.constant 0 : index
    %98 = vector.load %arg2[%c2_107, %c0_108, %c0_109] : memref<3x32x256xbf16, #tpu.memory_space<vmem>>, vector<1x32x256xbf16>
    %99 = vector.shape_cast %98 : vector<1x32x256xbf16> to vector<32x256xbf16>
    %cst_110 = arith.constant dense<0.000000e+00> : vector<256x256xf32>
    %100 = tpu.matmul %90, %99, %cst_110 {dimension_numbers = #tpu.dot_dimension_numbers<[1], [0], [0], [1], [0, 0, 1, 1], [], []>} : vector<256x32xbf16>, vector<32x256xbf16>, vector<256x256xf32> -> vector<256x256xf32>
    %101 = arith.addf %97, %100 : vector<256x256xf32>
    %c0_111 = arith.constant 0 : index
    %c0_112 = arith.constant 0 : index
    %102 = vector.load %arg3[%c0_111, %c0_112] : memref<1x256xf32, #tpu.memory_space<vmem>>, vector<1x256xf32>
    %103 = vector.broadcast %102 : vector<1x256xf32> to vector<256x256xf32>
    %104 = arith.addf %101, %103 : vector<256x256xf32>
    %cst_113 = arith.constant 0.000000e+00 : f32
    %105 = vector.broadcast %cst_113 : f32 to vector<256x256xf32>
    %106 = arith.maximumf %104, %105 : vector<256x256xf32>
    %107 = arith.truncf %106 : vector<256x256xf32> to vector<256x256xbf16>
    %c0_114 = arith.constant 0 : index
    %c64_115 = arith.constant 64 : index
    %c0_116 = arith.constant 0 : index
    %108 = vector.load %arg11[%c0_114, %c64_115, %c0_116] : memref<4x320x256xbf16, #tpu.memory_space<vmem>>, vector<1x256x256xbf16>
    %109 = vector.shape_cast %108 : vector<1x256x256xbf16> to vector<256x256xbf16>
    %110 = vector.shape_cast %107 : vector<256x256xbf16> to vector<1x256x256xbf16>
    tpu.vector_store %arg11[%c0_114, %c64_115, %c0_116], %110 {strides = array<i32>} : memref<4x320x256xbf16, #tpu.memory_space<vmem>>, vector<1x256x256xbf16>,
    %c0_117 = arith.constant 0 : index
    %c0_118 = arith.constant 0 : index
    %c0_119 = arith.constant 0 : index
    %111 = vector.load %arg11[%c0_117, %c0_118, %c0_119] : memref<4x320x256xbf16, #tpu.memory_space<vmem>>, vector<1x256x256xbf16>
    %112 = vector.shape_cast %111 : vector<1x256x256xbf16> to vector<256x256xbf16>
    %c1_120 = arith.constant 1 : index
    %c0_121 = arith.constant 0 : index
    %c0_122 = arith.constant 0 : index
    %113 = vector.load %arg11[%c1_120, %c0_121, %c0_122] : memref<4x320x256xbf16, #tpu.memory_space<vmem>>, vector<1x256x256xbf16>
    %114 = vector.shape_cast %113 : vector<1x256x256xbf16> to vector<256x256xbf16>
    %c2_123 = arith.constant 2 : index
    %c0_124 = arith.constant 0 : index
    %c0_125 = arith.constant 0 : index
    %115 = vector.load %arg11[%c2_123, %c0_124, %c0_125] : memref<4x320x256xbf16, #tpu.memory_space<vmem>>, vector<1x256x256xbf16>
    %116 = vector.shape_cast %115 : vector<1x256x256xbf16> to vector<256x256xbf16>
    %c0_126 = arith.constant 0 : index
    %c0_127 = arith.constant 0 : index
    %c0_128 = arith.constant 0 : index
    %117 = vector.load %arg4[%c0_126, %c0_127, %c0_128] : memref<3x256x256xbf16, #tpu.memory_space<vmem>>, vector<1x256x256xbf16>
    %118 = vector.shape_cast %117 : vector<1x256x256xbf16> to vector<256x256xbf16>
    %cst_129 = arith.constant dense<0.000000e+00> : vector<256x256xf32>
    %119 = tpu.matmul %112, %118, %cst_129 {dimension_numbers = #tpu.dot_dimension_numbers<[1], [0], [0], [1], [0, 0, 1, 1], [], []>} : vector<256x256xbf16>, vector<256x256xbf16>, vector<256x256xf32> -> vector<256x256xf32>
    %c1_130 = arith.constant 1 : index
    %c0_131 = arith.constant 0 : index
    %c0_132 = arith.constant 0 : index
    %120 = vector.load %arg4[%c1_130, %c0_131, %c0_132] : memref<3x256x256xbf16, #tpu.memory_space<vmem>>, vector<1x256x256xbf16>
    %121 = vector.shape_cast %120 : vector<1x256x256xbf16> to vector<256x256xbf16>
    %cst_133 = arith.constant dense<0.000000e+00> : vector<256x256xf32>
    %122 = tpu.matmul %114, %121, %cst_133 {dimension_numbers = #tpu.dot_dimension_numbers<[1], [0], [0], [1], [0, 0, 1, 1], [], []>} : vector<256x256xbf16>, vector<256x256xbf16>, vector<256x256xf32> -> vector<256x256xf32>
    %123 = arith.addf %119, %122 : vector<256x256xf32>
    %c2_134 = arith.constant 2 : index
    %c0_135 = arith.constant 0 : index
    %c0_136 = arith.constant 0 : index
    %124 = vector.load %arg4[%c2_134, %c0_135, %c0_136] : memref<3x256x256xbf16, #tpu.memory_space<vmem>>, vector<1x256x256xbf16>
    %125 = vector.shape_cast %124 : vector<1x256x256xbf16> to vector<256x256xbf16>
    %cst_137 = arith.constant dense<0.000000e+00> : vector<256x256xf32>
    %126 = tpu.matmul %116, %125, %cst_137 {dimension_numbers = #tpu.dot_dimension_numbers<[1], [0], [0], [1], [0, 0, 1, 1], [], []>} : vector<256x256xbf16>, vector<256x256xbf16>, vector<256x256xf32> -> vector<256x256xf32>
    %127 = arith.addf %123, %126 : vector<256x256xf32>
    %c0_138 = arith.constant 0 : index
    %c0_139 = arith.constant 0 : index
    %128 = vector.load %arg5[%c0_138, %c0_139] : memref<1x256xf32, #tpu.memory_space<vmem>>, vector<1x256xf32>
    %129 = vector.broadcast %128 : vector<1x256xf32> to vector<256x256xf32>
    %130 = arith.addf %127, %129 : vector<256x256xf32>
    %cst_140 = arith.constant 0.000000e+00 : f32
    %131 = vector.broadcast %cst_140 : f32 to vector<256x256xf32>
    %132 = arith.maximumf %130, %131 : vector<256x256xf32>
    %133 = arith.truncf %132 : vector<256x256xf32> to vector<256x256xbf16>
    %c1_141 = arith.constant 1 : index
    %c0_142 = arith.constant 0 : index
    %c0_143 = arith.constant 0 : index
    %134 = vector.load %arg12[%c1_141, %c0_142, %c0_143] : memref<2x320x256xbf16, #tpu.memory_space<vmem>>, vector<1x256x256xbf16>
    %135 = vector.shape_cast %134 : vector<1x256x256xbf16> to vector<256x256xbf16>
    %136 = vector.shape_cast %133 : vector<256x256xbf16> to vector<1x256x256xbf16>
    tpu.vector_store %arg12[%c1_141, %c0_142, %c0_143], %136 {strides = array<i32>} : memref<2x320x256xbf16, #tpu.memory_space<vmem>>, vector<1x256x256xbf16>,
    %c2_144 = arith.constant 2 : index
    %c0_145 = arith.constant 0 : index
    %c0_146 = arith.constant 0 : index
    %137 = vector.load %arg11[%c2_144, %c0_145, %c0_146] : memref<4x320x256xbf16, #tpu.memory_space<vmem>>, vector<1x256x256xbf16>
    %138 = vector.shape_cast %137 : vector<1x256x256xbf16> to vector<256x256xbf16>
    %c3_147 = arith.constant 3 : index
    %c0_148 = arith.constant 0 : index
    %c0_149 = arith.constant 0 : index
    %139 = vector.load %arg11[%c3_147, %c0_148, %c0_149] : memref<4x320x256xbf16, #tpu.memory_space<vmem>>, vector<1x256x256xbf16>
    %140 = vector.shape_cast %139 : vector<1x256x256xbf16> to vector<256x256xbf16>
    %c0_150 = arith.constant 0 : index
    %c64_151 = arith.constant 64 : index
    %c0_152 = arith.constant 0 : index
    %141 = vector.load %arg11[%c0_150, %c64_151, %c0_152] : memref<4x320x256xbf16, #tpu.memory_space<vmem>>, vector<1x256x256xbf16>
    %142 = vector.shape_cast %141 : vector<1x256x256xbf16> to vector<256x256xbf16>
    %c0_153 = arith.constant 0 : index
    %c0_154 = arith.constant 0 : index
    %c0_155 = arith.constant 0 : index
    %143 = vector.load %arg4[%c0_153, %c0_154, %c0_155] : memref<3x256x256xbf16, #tpu.memory_space<vmem>>, vector<1x256x256xbf16>
    %144 = vector.shape_cast %143 : vector<1x256x256xbf16> to vector<256x256xbf16>
    %cst_156 = arith.constant dense<0.000000e+00> : vector<256x256xf32>
    %145 = tpu.matmul %138, %144, %cst_156 {dimension_numbers = #tpu.dot_dimension_numbers<[1], [0], [0], [1], [0, 0, 1, 1], [], []>} : vector<256x256xbf16>, vector<256x256xbf16>, vector<256x256xf32> -> vector<256x256xf32>
    %c1_157 = arith.constant 1 : index
    %c0_158 = arith.constant 0 : index
    %c0_159 = arith.constant 0 : index
    %146 = vector.load %arg4[%c1_157, %c0_158, %c0_159] : memref<3x256x256xbf16, #tpu.memory_space<vmem>>, vector<1x256x256xbf16>
    %147 = vector.shape_cast %146 : vector<1x256x256xbf16> to vector<256x256xbf16>
    %cst_160 = arith.constant dense<0.000000e+00> : vector<256x256xf32>
    %148 = tpu.matmul %140, %147, %cst_160 {dimension_numbers = #tpu.dot_dimension_numbers<[1], [0], [0], [1], [0, 0, 1, 1], [], []>} : vector<256x256xbf16>, vector<256x256xbf16>, vector<256x256xf32> -> vector<256x256xf32>
    %149 = arith.addf %145, %148 : vector<256x256xf32>
    %c2_161 = arith.constant 2 : index
    %c0_162 = arith.constant 0 : index
    %c0_163 = arith.constant 0 : index
    %150 = vector.load %arg4[%c2_161, %c0_162, %c0_163] : memref<3x256x256xbf16, #tpu.memory_space<vmem>>, vector<1x256x256xbf16>
    %151 = vector.shape_cast %150 : vector<1x256x256xbf16> to vector<256x256xbf16>
    %cst_164 = arith.constant dense<0.000000e+00> : vector<256x256xf32>
    %152 = tpu.matmul %142, %151, %cst_164 {dimension_numbers = #tpu.dot_dimension_numbers<[1], [0], [0], [1], [0, 0, 1, 1], [], []>} : vector<256x256xbf16>, vector<256x256xbf16>, vector<256x256xf32> -> vector<256x256xf32>
    %153 = arith.addf %149, %152 : vector<256x256xf32>
    %c0_165 = arith.constant 0 : index
    %c0_166 = arith.constant 0 : index
    %154 = vector.load %arg5[%c0_165, %c0_166] : memref<1x256xf32, #tpu.memory_space<vmem>>, vector<1x256xf32>
    %155 = vector.broadcast %154 : vector<1x256xf32> to vector<256x256xf32>
    %156 = arith.addf %153, %155 : vector<256x256xf32>
    %cst_167 = arith.constant 0.000000e+00 : f32
    %157 = vector.broadcast %cst_167 : f32 to vector<256x256xf32>
    %158 = arith.maximumf %156, %157 : vector<256x256xf32>
    %159 = arith.truncf %158 : vector<256x256xf32> to vector<256x256xbf16>
    %c0_168 = arith.constant 0 : index
    %c64_169 = arith.constant 64 : index
    %c0_170 = arith.constant 0 : index
    %160 = vector.load %arg12[%c0_168, %c64_169, %c0_170] : memref<2x320x256xbf16, #tpu.memory_space<vmem>>, vector<1x256x256xbf16>
    %161 = vector.shape_cast %160 : vector<1x256x256xbf16> to vector<256x256xbf16>
    %162 = vector.shape_cast %159 : vector<256x256xbf16> to vector<1x256x256xbf16>
    tpu.vector_store %arg12[%c0_168, %c64_169, %c0_170], %162 {strides = array<i32>} : memref<2x320x256xbf16, #tpu.memory_space<vmem>>, vector<1x256x256xbf16>,
    %c0_171 = arith.constant 0 : index
    %c0_172 = arith.constant 0 : index
    %c0_173 = arith.constant 0 : index
    %163 = vector.load %arg12[%c0_171, %c0_172, %c0_173] : memref<2x320x256xbf16, #tpu.memory_space<vmem>>, vector<1x256x256xbf16>
    %164 = vector.shape_cast %163 : vector<1x256x256xbf16> to vector<256x256xbf16>
    %c1_174 = arith.constant 1 : index
    %c0_175 = arith.constant 0 : index
    %c0_176 = arith.constant 0 : index
    %165 = vector.load %arg12[%c1_174, %c0_175, %c0_176] : memref<2x320x256xbf16, #tpu.memory_space<vmem>>, vector<1x256x256xbf16>
    %166 = vector.shape_cast %165 : vector<1x256x256xbf16> to vector<256x256xbf16>
    %c0_177 = arith.constant 0 : index
    %c64_178 = arith.constant 64 : index
    %c0_179 = arith.constant 0 : index
    %167 = vector.load %arg12[%c0_177, %c64_178, %c0_179] : memref<2x320x256xbf16, #tpu.memory_space<vmem>>, vector<1x256x256xbf16>
    %168 = vector.shape_cast %167 : vector<1x256x256xbf16> to vector<256x256xbf16>
    %c0_180 = arith.constant 0 : index
    %c0_181 = arith.constant 0 : index
    %c0_182 = arith.constant 0 : index
    %169 = vector.load %arg6[%c0_180, %c0_181, %c0_182] : memref<3x256x256xbf16, #tpu.memory_space<vmem>>, vector<1x256x256xbf16>
    %170 = vector.shape_cast %169 : vector<1x256x256xbf16> to vector<256x256xbf16>
    %cst_183 = arith.constant dense<0.000000e+00> : vector<256x256xf32>
    %171 = tpu.matmul %164, %170, %cst_183 {dimension_numbers = #tpu.dot_dimension_numbers<[1], [0], [0], [1], [0, 0, 1, 1], [], []>} : vector<256x256xbf16>, vector<256x256xbf16>, vector<256x256xf32> -> vector<256x256xf32>
    %c1_184 = arith.constant 1 : index
    %c0_185 = arith.constant 0 : index
    %c0_186 = arith.constant 0 : index
    %172 = vector.load %arg6[%c1_184, %c0_185, %c0_186] : memref<3x256x256xbf16, #tpu.memory_space<vmem>>, vector<1x256x256xbf16>
    %173 = vector.shape_cast %172 : vector<1x256x256xbf16> to vector<256x256xbf16>
    %cst_187 = arith.constant dense<0.000000e+00> : vector<256x256xf32>
    %174 = tpu.matmul %166, %173, %cst_187 {dimension_numbers = #tpu.dot_dimension_numbers<[1], [0], [0], [1], [0, 0, 1, 1], [], []>} : vector<256x256xbf16>, vector<256x256xbf16>, vector<256x256xf32> -> vector<256x256xf32>
    %175 = arith.addf %171, %174 : vector<256x256xf32>
    %c2_188 = arith.constant 2 : index
    %c0_189 = arith.constant 0 : index
    %c0_190 = arith.constant 0 : index
    %176 = vector.load %arg6[%c2_188, %c0_189, %c0_190] : memref<3x256x256xbf16, #tpu.memory_space<vmem>>, vector<1x256x256xbf16>
    %177 = vector.shape_cast %176 : vector<1x256x256xbf16> to vector<256x256xbf16>
    %cst_191 = arith.constant dense<0.000000e+00> : vector<256x256xf32>
    %178 = tpu.matmul %168, %177, %cst_191 {dimension_numbers = #tpu.dot_dimension_numbers<[1], [0], [0], [1], [0, 0, 1, 1], [], []>} : vector<256x256xbf16>, vector<256x256xbf16>, vector<256x256xf32> -> vector<256x256xf32>
    %179 = arith.addf %175, %178 : vector<256x256xf32>
    %c0_192 = arith.constant 0 : index
    %c0_193 = arith.constant 0 : index
    %180 = vector.load %arg7[%c0_192, %c0_193] : memref<1x256xf32, #tpu.memory_space<vmem>>, vector<1x256xf32>
    %181 = vector.broadcast %180 : vector<1x256xf32> to vector<256x256xf32>
    %182 = arith.addf %179, %181 : vector<256x256xf32>
    %cst_194 = arith.constant 0.000000e+00 : f32
    %183 = vector.broadcast %cst_194 : f32 to vector<256x256xf32>
    %184 = arith.maximumf %182, %183 : vector<256x256xf32>
    %185 = vector.extract_strided_slice %184 {offsets = [0, 0], sizes = [64, 256], strides = [1, 1]} : vector<256x256xf32> to vector<64x256xf32>
    %c0_195 = arith.constant 0 : index
    %c0_196 = arith.constant 0 : index
    %186 = vector.load %arg8[%c0_195, %c0_196] : memref<4x256xf32, #tpu.memory_space<vmem>>, vector<1x256xf32>
    %187 = vector.broadcast %186 : vector<1x256xf32> to vector<64x256xf32>
    %188 = arith.mulf %185, %187 : vector<64x256xf32>
    %189 = vector.extract_strided_slice %184 {offsets = [64, 0], sizes = [64, 256], strides = [1, 1]} : vector<256x256xf32> to vector<64x256xf32>
    %c1_197 = arith.constant 1 : index
    %c0_198 = arith.constant 0 : index
    %190 = vector.load %arg8[%c1_197, %c0_198] : memref<4x256xf32, #tpu.memory_space<vmem>>, vector<1x256xf32>
    %191 = vector.broadcast %190 : vector<1x256xf32> to vector<64x256xf32>
    %192 = arith.mulf %189, %191 : vector<64x256xf32>
    %193 = arith.addf %188, %192 : vector<64x256xf32>
    %194 = vector.extract_strided_slice %184 {offsets = [128, 0], sizes = [64, 256], strides = [1, 1]} : vector<256x256xf32> to vector<64x256xf32>
    %c2_199 = arith.constant 2 : index
    %c0_200 = arith.constant 0 : index
    %195 = vector.load %arg8[%c2_199, %c0_200] : memref<4x256xf32, #tpu.memory_space<vmem>>, vector<1x256xf32>
    %196 = vector.broadcast %195 : vector<1x256xf32> to vector<64x256xf32>
    %197 = arith.mulf %194, %196 : vector<64x256xf32>
    %198 = arith.addf %193, %197 : vector<64x256xf32>
    %199 = vector.extract_strided_slice %184 {offsets = [192, 0], sizes = [64, 256], strides = [1, 1]} : vector<256x256xf32> to vector<64x256xf32>
    %c3_201 = arith.constant 3 : index
    %c0_202 = arith.constant 0 : index
    %200 = vector.load %arg8[%c3_201, %c0_202] : memref<4x256xf32, #tpu.memory_space<vmem>>, vector<1x256xf32>
    %201 = vector.broadcast %200 : vector<1x256xf32> to vector<64x256xf32>
    %202 = arith.mulf %199, %201 : vector<64x256xf32>
    %203 = arith.addf %198, %202 : vector<64x256xf32>
    %cst_203 = arith.constant dense<0.000000e+00> : vector<64xf32>
    %204 = vector.multi_reduction <add>, %203, %cst_203 [1] : vector<64x256xf32> to vector<64xf32>
    %205 = vector.shape_cast %204 : vector<64xf32> to vector<64x1xf32>
    %c0_204 = arith.constant 0 : index
    %c0_205 = arith.constant 0 : index
    %206 = vector.load %arg9[%c0_204, %c0_205] : memref<1x1xf32, #tpu.memory_space<vmem>>, vector<1x1xf32>
    %207 = vector.broadcast %206 : vector<1x1xf32> to vector<64x1xf32>
    %208 = arith.addf %205, %207 : vector<64x1xf32>
    %209 = arith.negf %208 : vector<64x1xf32>
    %210 = math.exp %209 : vector<64x1xf32>
    %cst_206 = arith.constant 1.000000e+00 : f32
    %211 = vector.broadcast %cst_206 : f32 to vector<64x1xf32>
    %212 = arith.addf %211, %210 : vector<64x1xf32>
    %213 = arith.divf %211, %212 : vector<64x1xf32>
    %c0_207 = arith.constant 0 : index
    %c0_208 = arith.constant 0 : index
    %214 = vector.load %arg10[%c0_207, %c0_208] : memref<64x1xf32, #tpu.memory_space<vmem>>, vector<64x1xf32>
    tpu.vector_store %arg10[%c0_207, %c0_208], %213 {strides = array<i32>} : memref<64x1xf32, #tpu.memory_space<vmem>>, vector<64x1xf32>,
    return
  }
  func.func @transform_0(%arg0: i32) -> (i32, i32, i32, i32) {
    %c0_i32 = arith.constant 0 : i32
    %c0_i32_0 = arith.constant 0 : i32
    %c0_i32_1 = arith.constant 0 : i32
    %c0_i32_2 = arith.constant 0 : i32
    return %arg0, %c0_i32, %c0_i32_0, %c0_i32_1 : i32, i32, i32, i32
  }
  func.func @transform_1(%arg0: i32) -> (i32, i32, i32) {
    %c0_i32 = arith.constant 0 : i32
    %c0_i32_0 = arith.constant 0 : i32
    %c0_i32_1 = arith.constant 0 : i32
    %c0_i32_2 = arith.constant 0 : i32
    return %c0_i32, %c0_i32_0, %c0_i32_1 : i32, i32, i32
  }
  func.func @transform_2(%arg0: i32) -> (i32, i32) {
    %c0_i32 = arith.constant 0 : i32
    %c0_i32_0 = arith.constant 0 : i32
    %c0_i32_1 = arith.constant 0 : i32
    return %c0_i32, %c0_i32_0 : i32, i32
  }
  func.func @transform_3(%arg0: i32) -> (i32, i32, i32) {
    %c0_i32 = arith.constant 0 : i32
    %c0_i32_0 = arith.constant 0 : i32
    %c0_i32_1 = arith.constant 0 : i32
    %c0_i32_2 = arith.constant 0 : i32
    return %c0_i32, %c0_i32_0, %c0_i32_1 : i32, i32, i32
  }
  func.func @transform_4(%arg0: i32) -> (i32, i32) {
    %c0_i32 = arith.constant 0 : i32
    %c0_i32_0 = arith.constant 0 : i32
    %c0_i32_1 = arith.constant 0 : i32
    return %c0_i32, %c0_i32_0 : i32, i32
  }
  func.func @transform_5(%arg0: i32) -> (i32, i32, i32) {
    %c0_i32 = arith.constant 0 : i32
    %c0_i32_0 = arith.constant 0 : i32
    %c0_i32_1 = arith.constant 0 : i32
    %c0_i32_2 = arith.constant 0 : i32
    return %c0_i32, %c0_i32_0, %c0_i32_1 : i32, i32, i32
  }
  func.func @transform_6(%arg0: i32) -> (i32, i32) {
    %c0_i32 = arith.constant 0 : i32
    %c0_i32_0 = arith.constant 0 : i32
    %c0_i32_1 = arith.constant 0 : i32
    return %c0_i32, %c0_i32_0 : i32, i32
  }
  func.func @transform_7(%arg0: i32) -> (i32, i32) {
    %c0_i32 = arith.constant 0 : i32
    %c0_i32_0 = arith.constant 0 : i32
    %c0_i32_1 = arith.constant 0 : i32
    return %c0_i32, %c0_i32_0 : i32, i32
  }
  func.func @transform_8(%arg0: i32) -> (i32, i32) {
    %c0_i32 = arith.constant 0 : i32
    %c0_i32_0 = arith.constant 0 : i32
    %c0_i32_1 = arith.constant 0 : i32
    return %c0_i32, %c0_i32_0 : i32, i32
  }
  func.func @transform_9(%arg0: i32) -> (i32, i32) {
    %c0_i32 = arith.constant 0 : i32
    %c0_i32_0 = arith.constant 0 : i32
    return %arg0, %c0_i32 : i32, i32
  }
}

</mosaic_0001>

<bundles_post_ra>
// kernel: discriminator_forward.1
= control target key start
LH: loop header
LB: loop body
LE: loop exit
PB: predicated region body
PF: predicated region fallthrough
CT: control target
= control target key end

     0   :  { %s15907_s11 = smov 0   ;;  %s20843_s0 = inlined_call_operand.vmem [shape: bf16[2,8,320,32], index: 0, kind: input, shape index: {}]   ;;  %s20844_s1 = inlined_call_operand.vmem [shape: bf16[3,32,256], index: 1, kind: input, shape index: {}]   ;;  %s20845_s2 = inlined_call_operand.vmem [shape: f32[1,256], index: 2, kind: input, shape index: {}]   ;;  %s20846_s3 = inlined_call_operand.vmem [shape: bf16[3,256,256], index: 3, kind: input, shape index: {}]   ;;  %s20847_s4 = inlined_call_operand.vmem [shape: f32[1,256], index: 4, kind: input, shape index: {}]   ;;  %s20848_s5 = inlined_call_operand.vmem [shape: bf16[3,256,256], index: 5, kind: input, shape index: {}]   ;;  %s20849_s6 = inlined_call_operand.vmem [shape: f32[1,256], index: 6, kind: input, shape index: {}]   ;;  %s20850_s7 = inlined_call_operand.vmem [shape: f32[4,256], index: 7, kind: input, shape index: {}]   ;;  %s20851_s8 = inlined_call_operand.<no memory space> [shape: f32[1,1], index: 8, kind: input, shape index: {}]   ;;  %s20852_s9 = inlined_call_operand.vmem [shape: f32[128,1], index: 9, kind: output, shape index: {}]  }
   0x1   :  { %v14_v0 = vstv %s20851_s8 }
   0x2   :  { %15 = vst [vmem:[#allocation4] sm:$0x1] %v14_v0 }
   0x3 LB: > { %s15913_s12 = sadd.s32 4294967295, %s15851_s11   ;;  %p13035_p0 = scmp.ge.s32.totalorder %s15851_s11, 1  ;;  %s15851_s11 = sphi %s15907_s11, %s21_s11  }
   0x4   : > { %p289_p1 = scmp.lt.s32.totalorder %s15851_s11, 3 }
   0x6   : > { %p290_p2 = pnand %p13035_p0, %p289_p1 }
   0x8   : > { %293 = sbr.rel (%p290_p2) target bundleno = 1871 (0x74f), region = 56 }
   0xd   : > { %v15171_v1 = vld [vmem:[%s20844_s1 + $0x34] ss:$8 sps:$4 sm:$0xff]   ;;  %p325_p3 = scmp.lt.s32.totalorder %s15913_s12, 1  ;;  %v15924_v2 = vld [vmem:[%s20844_s1 + $0x30] ss:$8 sps:$4 sm:$0xff]   ;;  %v20853_v3 = vmov 0  }
   0xe   : > { %641 = vmatprep.mubr.bf16.mxu0 %v20853_v3  ;;  %721 = vmatprep.mubr.bf16.mxu1 %v20853_v3  ;;  %v15931_v4 = vld [vmem:[%s20844_s1 + $0x24] ss:$8 sps:$4 sm:$0xff]   ;;  %v15939_v5 = vld [vmem:[%s20844_s1 + $0x20] ss:$8 sps:$4 sm:$0xff]   ;;  %v15181_v6 = vld [vmem:[%s20844_s1 + $0x14] ss:$8 sps:$4 sm:$0xff]  }
   0xf   : > { %621 = vmatprep.subr.bf16.mxu0 %v15171_v1  ;;  %15157 = vmatprep.subr.bf16.mxu1 %v15171_v1  ;;  %s326_s18 = scalar_select %p325_p3, %s15913_s12, 1  ;;  %v15949_v7 = vld [vmem:[%s20844_s1 + $0x10] ss:$8 sps:$4 sm:$0xff]   ;;  %v15959_v8 = vld [vmem:[%s20844_s1 + $0x4] ss:$8 sps:$4 sm:$0xff]   ;;  %vm560_vm0 = vcmask 261120  }
  0x10   : > { %622 = vmatpush1.bf16.msra.mxu0 %v15924_v2  ;;  %15159 = vmatpush1.bf16.msra.mxu1 %v15924_v2  ;;  %v15964_v9 = vld [vmem:[%s20844_s1 + $0x54] ss:$8 sps:$4 sm:$0xff]   ;;  %v15199_v12 = vld [vmem:[%s20844_s1 + $0x50] ss:$8 sps:$4 sm:$0xff]   ;;  %v15981_v13 = vld [vmem:[%s20844_s1] ss:$8 sps:$4 sm:$0xff]  }
  0x11   : > { %623 = vmatprep.subr.bf16.mxu0 %v15931_v4  ;;  %15158 = vmatprep.subr.bf16.mxu1 %v15931_v4  ;;  %s15161_s21 = smul.u32 1280, %s326_s18  ;;  %v15204_v18 = vld [vmem:[%s20844_s1 + $0x44] ss:$8 sps:$4 sm:$0xff]   ;;  %v15202_v19 = vld [vmem:[%s20844_s1 + $0x40] ss:$8 sps:$4 sm:$0xff]   ;;  %s13037_s16 = sshll.u32 %s15913_s12, 3 }
  0x12   : > { %v15271_v62 = vld [vmem:[%s20844_s1 + $0x34] ss:$8 sps:$4 sm:$0xff]   ;;  %p331_p4 = scmp.lt.s32.totalorder %s13037_s16, 15  ;;  %vm12966_vm1 = vcmask 7168  }
  0x13   : > { %s15954_s28 = scalar_lea.vmem %s20843_s0, %s15161_s21 }
  0x14   : > { %624 = vmatpush1.bf16.msra.mxu0 %v15939_v5  ;;  %15160 = vmatpush1.bf16.msra.mxu1 %v15939_v5  ;;  %v15177_v10 = vld [vmem:[%s15954_s28 + $0xa0] sm:$0xff]   ;;  %v15182_v14 = vld [vmem:[%s15954_s28 + $0xa8] sm:$0xff]   ;;  %v15184_v16 = vld [vmem:[%s15954_s28 + $0xb0] sm:$0xff]   ;;  %s21807_s16 = smov (!%p331_p4, %s13037_s16), 15 }
  0x15   : > { %v15178_v11 = vld [vmem:[%s15954_s28 + $0xe0] sm:$0xff]   ;;  %962 = vmatprep.subr.bf16.mxu1 %v15181_v6  ;;  %1308 = vmatprep.subr.bf16.mxu0 %v15964_v9  ;;  %v15183_v15 = vld [vmem:[%s15954_s28 + $0xe8] sm:$0xff]   ;;  %v15185_v17 = vld [vmem:[%s15954_s28 + $0xf0] sm:$0xff]   ;;  %s13038_s12 = sshll.u32 %s21807_s16, 3 }
  0x16   : > { %v15186_v20 = vld [vmem:[%s15954_s28 + $0xb8] sm:$0xff]   ;;  %v15188_v22 = vld [vmem:[%s15954_s28 + $0xc0] sm:$0xff]   ;;  %v15193_v24 = vld [vmem:[%s15954_s28 + $0xc8] sm:$0xff]   ;;  %s20822_s19 = scalar_lea.vmem %s20852_s9, %s13038_s12 }
  0x17   : > { %13127 = vmatmul.mubr.msk.bf16.vlgmr.msra.gmra.mxu0 %vm560_vm0, %v15177_v10  ;;  %13135 = vmatmul.mubr.msk.bf16.vlgmr.msra.gmra.mxu1 %vm560_vm0, %v15178_v11  ;;  %v15187_v21 = vld [vmem:[%s15954_s28 + $0xf8] sm:$0xff]   ;;  %v15189_v23 = vld [vmem:[%s15954_s28 + $0x100] sm:$0xff]   ;;  %v15194_v25 = vld [vmem:[%s15954_s28 + $0x108] sm:$0xff]  }
  0x18   : > { %963 = vmatpush1.bf16.msra.mxu1 %v15949_v7  ;;  %651 = vmatprep.mubr.bf16.mxu0 %v20853_v3  ;;  %v15195_v26 = vld [vmem:[%s15954_s28 + $0xd0] sm:$0xff]   ;;  %v15197_v28 = vld [vmem:[%s15954_s28 + $0xd8] sm:$0xff]   ;;  %v15205_v30 = vld [vmem:[%s15954_s28] sm:$0xff]  }
  0x19   : > { %731 = vmatprep.mubr.bf16.mxu1 %v20853_v3  ;;  %964 = vmatprep.subr.bf16.mxu1 %v15959_v8  ;;  %v15196_v27 = vld [vmem:[%s15954_s28 + $0x110] sm:$0xff]   ;;  %v15198_v29 = vld [vmem:[%s15954_s28 + $0x118] sm:$0xff]   ;;  %v15206_v31 = vld [vmem:[%s15954_s28 + $0x140] sm:$0xff]  }
  0x1a   : > { %1309 = vmatpush1.bf16.msra.mxu0 %v15199_v12  ;;  %v15207_v32 = vld [vmem:[%s15954_s28 + $0x8] sm:$0xff]   ;;  %v15209_v34 = vld [vmem:[%s15954_s28 + $0x10] sm:$0xff]   ;;  %v15211_v36 = vld [vmem:[%s15954_s28 + $0x18] sm:$0xff]  }
  0x1b   : > { %1310 = vmatprep.subr.bf16.mxu0 %v15204_v18  ;;  %v15208_v33 = vld [vmem:[%s15954_s28 + $0x148] sm:$0xff]   ;;  %v15210_v35 = vld [vmem:[%s15954_s28 + $0x150] sm:$0xff]   ;;  %v15212_v37 = vld [vmem:[%s15954_s28 + $0x158] sm:$0xff]  }
  0x1c   : > { %965 = vmatpush1.bf16.msra.mxu1 %v15981_v13  ;;  %v15213_v38 = vld [vmem:[%s15954_s28 + $0x20] sm:$0xff]   ;;  %v15215_v40 = vld [vmem:[%s15954_s28 + $0x28] sm:$0xff]   ;;  %v15217_v42 = vld [vmem:[%s15954_s28 + $0x30] sm:$0xff]  }
  0x1d   : > { %2184 = vmatprep.subr.bf16.mxu1 %v15171_v1  ;;  %v15214_v39 = vld [vmem:[%s15954_s28 + $0x160] sm:$0xff]   ;;  %v15216_v41 = vld [vmem:[%s15954_s28 + $0x168] sm:$0xff]   ;;  %v15218_v43 = vld [vmem:[%s15954_s28 + $0x170] sm:$0xff]  }
  0x1e   : > { %1311 = vmatpush1.bf16.msra.mxu0 %v15202_v19  ;;  %v15219_v44 = vld [vmem:[%s15954_s28 + $0x38] sm:$0xff]   ;;  %v15221_v46 = vld [vmem:[%s15954_s28 + $0x40] sm:$0xff]   ;;  %v15223_v48 = vld [vmem:[%s15954_s28 + $0x48] sm:$0xff]  }
  0x1f   : > { %13128 = vmatmul.mubr.msk.bf16.gmra.mxu0 %vm560_vm0, %v15182_v14  ;;  %13136 = vmatmul.mubr.msk.bf16.gmra.mxu1 %vm560_vm0, %v15183_v15  ;;  %v15220_v45 = vld [vmem:[%s15954_s28 + $0x178] sm:$0xff]   ;;  %v15222_v47 = vld [vmem:[%s15954_s28 + $0x180] sm:$0xff]   ;;  %v15224_v49 = vld [vmem:[%s15954_s28 + $0x188] sm:$0xff]  }
  0x20   : > { %661 = vmatprep.mubr.bf16.mxu0 %v20853_v3  ;;  %741 = vmatprep.mubr.bf16.mxu1 %v20853_v3  ;;  %v15225_v50 = vld [vmem:[%s15954_s28 + $0x50] sm:$0xff]   ;;  %v15227_v52 = vld [vmem:[%s15954_s28 + $0x58] sm:$0xff]   ;;  %v15229_v54 = vld [vmem:[%s15954_s28 + $0x60] sm:$0xff]  }
  0x21   : > { %2525 = vmatprep.subr.bf16.mxu0 %v15181_v6  ;;  %v15226_v51 = vld [vmem:[%s15954_s28 + $0x190] sm:$0xff]   ;;  %v15228_v53 = vld [vmem:[%s15954_s28 + $0x198] sm:$0xff]   ;;  %v15230_v55 = vld [vmem:[%s15954_s28 + $0x1a0] sm:$0xff]  }
  0x22   : > { %v15231_v56 = vld [vmem:[%s15954_s28 + $0x68] sm:$0xff]   ;;  %v15233_v58 = vld [vmem:[%s15954_s28 + $0x70] sm:$0xff]   ;;  %v15235_v60 = vld [vmem:[%s15954_s28 + $0x78] sm:$0xff]  }
  0x23   : > { %v15232_v57 = vld [vmem:[%s15954_s28 + $0x1a8] sm:$0xff]   ;;  %v15234_v59 = vld [vmem:[%s15954_s28 + $0x1b0] sm:$0xff]   ;;  %v15236_v61 = vld [vmem:[%s15954_s28 + $0x1b8] sm:$0xff]  }
  0x24   : > { %v15237_v63 = vld [vmem:[%s15954_s28 + $0x1e0] sm:$0xff]   ;;  %v15269_v1 = vld [vmem:[%s20844_s1 + $0x30] ss:$8 sps:$4 sm:$0xff]   ;;  %v15239_v10 = vld [vmem:[%s15954_s28 + $0x1e8] sm:$0xff]  }
  0x25   : > { %v15238_v0 = vld [vmem:[%s15954_s28 + $0x140] sm:$0xff]   ;;  %v15839_v6 = vld [vmem:[%s20844_s1 + $0x50] ss:$8 sps:$4 sm:$0xff]   ;;  %v15240_v11 = vld [vmem:[%s15954_s28 + $0x148] sm:$0xff]  }
  0x26   : > { %v15840_v12 = vld [vmem:[%s20844_s1 + $0x44] ss:$8 sps:$4 sm:$0xff]   ;;  %v15841_v15 = vld [vmem:[%s20844_s1 + $0x40] ss:$8 sps:$4 sm:$0xff]   ;;  %v15279_v18 = vld [vmem:[%s20844_s1 + $0x14] ss:$8 sps:$4 sm:$0xff]  }
  0x27   : > { %13129 = vmatmul.mubr.msk.bf16.gmra.mxu0 %vm560_vm0, %v15184_v16  ;;  %13137 = vmatmul.mubr.msk.bf16.gmra.mxu1 %vm560_vm0, %v15185_v17 }
  0x28   : > { %671 = vmatprep.mubr.bf16.mxu0 %v20853_v3  ;;  %751 = vmatprep.mubr.bf16.mxu1 %v20853_v3 }
  0x2f   : > { %13130 = vmatmul.mubr.msk.bf16.gmra.mxu0 %vm560_vm0, %v15186_v20  ;;  %13138 = vmatmul.mubr.msk.bf16.gmra.mxu1 %vm560_vm0, %v15187_v21 }
  0x30   : > { %681 = vmatprep.mubr.bf16.mxu0 %v20853_v3  ;;  %761 = vmatprep.mubr.bf16.mxu1 %v20853_v3 }
  0x37   : > { %13131 = vmatmul.mubr.msk.bf16.gmra.mxu0 %vm560_vm0, %v15188_v22  ;;  %13139 = vmatmul.mubr.msk.bf16.gmra.mxu1 %vm560_vm0, %v15189_v23  ;;  %v15241_v23 = vld [vmem:[%s15954_s28 + $0x1f0] sm:$0xff]  }
  0x38   : > { %691 = vmatprep.mubr.bf16.mxu0 %v20853_v3  ;;  %771 = vmatprep.mubr.bf16.mxu1 %v20853_v3 }
  0x3f   : > { %13132 = vmatmul.mubr.msk.bf16.gmra.mxu0 %vm560_vm0, %v15193_v24  ;;  %13140 = vmatmul.mubr.msk.bf16.gmra.mxu1 %vm560_vm0, %v15194_v25  ;;  %v15242_v24 = vld [vmem:[%s15954_s28 + $0x150] sm:$0xff]  }
  0x40   : > { %701 = vmatprep.mubr.bf16.mxu0 %v20853_v3  ;;  %781 = vmatprep.mubr.bf16.mxu1 %v20853_v3 }
  0x47   : > { %13133 = vmatmul.mubr.msk.bf16.gmra.mxu0 %vm560_vm0, %v15195_v26  ;;  %13141 = vmatmul.mubr.msk.bf16.gmra.mxu1 %vm560_vm0, %v15196_v27 }
  0x48   : > { %711 = vmatprep.mubr.bf16.mxu0 %v20853_v3  ;;  %791 = vmatprep.mubr.bf16.mxu1 %v20853_v3 }
  0x4f   : > { %13134 = vmatmul.mubr.msk.bf16.gmra.mxu0 %vm560_vm0, %v15197_v28  ;;  %13142 = vmatmul.mubr.msk.bf16.gmra.mxu1 %vm560_vm0, %v15198_v29 }
  0x50   : > { %982 = vmatprep.mubr.bf16.mxu1 %v20853_v3  ;;  %1328 = vmatprep.mubr.bf16.mxu0 %v20853_v3 }
  0x57   : > { %13163 = vmatmul.mubr.msk.bf16.vlgmr.msra.gmra.mxu1 %vm560_vm0, %v15205_v30  ;;  %13203 = vmatmul.mubr.msk.bf16.vlgmr.msra.gmra.mxu0 %vm560_vm0, %v15206_v31 }
  0x58   : > { %2185 = vmatpush1.bf16.msra.mxu1 %v15924_v2  ;;  %992 = vmatprep.mubr.bf16.mxu1 %v20853_v3  ;;  %v15274_v2 = vld [vmem:[%s20844_s1 + $0x24] ss:$8 sps:$4 sm:$0xff]  }
  0x59   : > { %1338 = vmatprep.mubr.bf16.mxu0 %v20853_v3  ;;  %2186 = vmatprep.subr.bf16.mxu1 %v15931_v4 }
  0x5a   : > { %2526 = vmatpush1.bf16.msra.mxu0 %v15949_v7  ;;  %v15272_v7 = vld [vmem:[%s20844_s1 + $0x20] ss:$8 sps:$4 sm:$0xff]  }
  0x5b   : > { %2527 = vmatprep.subr.bf16.mxu0 %v15959_v8 }
  0x5c   : > { %2187 = vmatpush1.bf16.msra.mxu1 %v15939_v5 }
  0x5d   : > { %2870 = vmatprep.subr.bf16.mxu1 %v15964_v9 }
  0x5e   : > { %2528 = vmatpush1.bf16.msra.mxu0 %v15981_v13 }
  0x5f   : > { %13164 = vmatmul.mubr.msk.bf16.gmra.mxu1 %vm560_vm0, %v15207_v32  ;;  %13204 = vmatmul.mubr.msk.bf16.gmra.mxu0 %vm560_vm0, %v15208_v33  ;;  %v15243_v33 = vld [vmem:[%s15954_s28 + $0x1f8] sm:$0xff]  }
  0x60   : > { %1002 = vmatprep.mubr.bf16.mxu1 %v20853_v3  ;;  %1348 = vmatprep.mubr.bf16.mxu0 %v20853_v3 }
  0x61   : > { %3746 = vmatprep.subr.bf16.mxu0 %v15271_v62 }
  0x67   : > { %13165 = vmatmul.mubr.msk.bf16.gmra.mxu1 %vm560_vm0, %v15209_v34  ;;  %13205 = vmatmul.mubr.msk.bf16.gmra.mxu0 %vm560_vm0, %v15210_v35  ;;  %v15244_v34 = vld [vmem:[%s15954_s28 + $0x158] sm:$0xff]  }
  0x68   : > { %1012 = vmatprep.mubr.bf16.mxu1 %v20853_v3  ;;  %1358 = vmatprep.mubr.bf16.mxu0 %v20853_v3 }
  0x6f   : > { %13166 = vmatmul.mubr.msk.bf16.gmra.mxu1 %vm560_vm0, %v15211_v36  ;;  %13206 = vmatmul.mubr.msk.bf16.gmra.mxu0 %vm560_vm0, %v15212_v37 }
  0x70   : > { %1022 = vmatprep.mubr.bf16.mxu1 %v20853_v3  ;;  %1368 = vmatprep.mubr.bf16.mxu0 %v20853_v3 }
  0x77   : > { %13167 = vmatmul.mubr.msk.bf16.gmra.mxu1 %vm560_vm0, %v15213_v38  ;;  %13207 = vmatmul.mubr.msk.bf16.gmra.mxu0 %vm560_vm0, %v15214_v39 }
  0x78   : > { %1032 = vmatprep.mubr.bf16.mxu1 %v20853_v3  ;;  %1378 = vmatprep.mubr.bf16.mxu0 %v20853_v3 }
  0x7f   : > { %13168 = vmatmul.mubr.msk.bf16.gmra.mxu1 %vm560_vm0, %v15215_v40  ;;  %13208 = vmatmul.mubr.msk.bf16.gmra.mxu0 %vm560_vm0, %v15216_v41 }
  0x80   : > { %1042 = vmatprep.mubr.bf16.mxu1 %v20853_v3  ;;  %1388 = vmatprep.mubr.bf16.mxu0 %v20853_v3 }
  0x87   : > { %13169 = vmatmul.mubr.msk.bf16.gmra.mxu1 %vm560_vm0, %v15217_v42  ;;  %13209 = vmatmul.mubr.msk.bf16.gmra.mxu0 %vm560_vm0, %v15218_v43  ;;  %v15245_v43 = vld [vmem:[%s15954_s28 + $0x200] sm:$0xff]  }
  0x88   : > { %1052 = vmatprep.mubr.bf16.mxu1 %v20853_v3  ;;  %1398 = vmatprep.mubr.bf16.mxu0 %v20853_v3 }
  0x8f   : > { %13170 = vmatmul.mubr.msk.bf16.gmra.mxu1 %vm560_vm0, %v15219_v44  ;;  %13210 = vmatmul.mubr.msk.bf16.gmra.mxu0 %vm560_vm0, %v15220_v45  ;;  %v15246_v44 = vld [vmem:[%s15954_s28 + $0x160] sm:$0xff]  }
  0x90   : > { %1062 = vmatprep.mubr.bf16.mxu1 %v20853_v3  ;;  %1408 = vmatprep.mubr.bf16.mxu0 %v20853_v3 }
  0x97   : > { %13171 = vmatmul.mubr.msk.bf16.gmra.mxu1 %vm560_vm0, %v15221_v46  ;;  %13211 = vmatmul.mubr.msk.bf16.gmra.mxu0 %vm560_vm0, %v15222_v47 }
  0x98   : > { %1072 = vmatprep.mubr.bf16.mxu1 %v20853_v3  ;;  %1418 = vmatprep.mubr.bf16.mxu0 %v20853_v3 }
  0x9f   : > { %13172 = vmatmul.mubr.msk.bf16.gmra.mxu1 %vm560_vm0, %v15223_v48  ;;  %13212 = vmatmul.mubr.msk.bf16.gmra.mxu0 %vm560_vm0, %v15224_v49 }
  0xa0   : > { %1082 = vmatprep.mubr.bf16.mxu1 %v20853_v3  ;;  %1428 = vmatprep.mubr.bf16.mxu0 %v20853_v3 }
  0xa7   : > { %13173 = vmatmul.mubr.msk.bf16.gmra.mxu1 %vm560_vm0, %v15225_v50  ;;  %13213 = vmatmul.mubr.msk.bf16.gmra.mxu0 %vm560_vm0, %v15226_v51 }
  0xa8   : > { %1092 = vmatprep.mubr.bf16.mxu1 %v20853_v3  ;;  %1438 = vmatprep.mubr.bf16.mxu0 %v20853_v3 }
  0xaf   : > { %13174 = vmatmul.mubr.msk.bf16.gmra.mxu1 %vm560_vm0, %v15227_v52  ;;  %13214 = vmatmul.mubr.msk.bf16.gmra.mxu0 %vm560_vm0, %v15228_v53  ;;  %v15247_v53 = vld [vmem:[%s15954_s28 + $0x208] sm:$0xff]  }
  0xb0   : > { %1102 = vmatprep.mubr.bf16.mxu1 %v20853_v3  ;;  %1448 = vmatprep.mubr.bf16.mxu0 %v20853_v3 }
  0xb7   : > { %13175 = vmatmul.mubr.msk.bf16.gmra.mxu1 %vm560_vm0, %v15229_v54  ;;  %13215 = vmatmul.mubr.msk.bf16.gmra.mxu0 %vm560_vm0, %v15230_v55  ;;  %v15248_v54 = vld [vmem:[%s15954_s28 + $0x168] sm:$0xff]  }
  0xb8   : > { %1112 = vmatprep.mubr.bf16.mxu1 %v20853_v3  ;;  %1458 = vmatprep.mubr.bf16.mxu0 %v20853_v3 }
  0xbf   : > { %13176 = vmatmul.mubr.msk.bf16.gmra.mxu1 %vm560_vm0, %v15231_v56  ;;  %13216 = vmatmul.mubr.msk.bf16.gmra.mxu0 %vm560_vm0, %v15232_v57 }
  0xc0   : > { %1122 = vmatprep.mubr.bf16.mxu1 %v20853_v3  ;;  %1468 = vmatprep.mubr.bf16.mxu0 %v20853_v3 }
  0xc7   : > { %13177 = vmatmul.mubr.msk.bf16.gmra.mxu1 %vm560_vm0, %v15233_v58  ;;  %13217 = vmatmul.mubr.msk.bf16.gmra.mxu0 %vm560_vm0, %v15234_v59 }
  0xc8   : > { %1132 = vmatprep.mubr.bf16.mxu1 %v20853_v3  ;;  %1478 = vmatprep.mubr.bf16.mxu0 %v20853_v3 }
  0xcf   : > { %13178 = vmatmul.mubr.msk.bf16.gmra.mxu1 %vm560_vm0, %v15235_v60  ;;  %13218 = vmatmul.mubr.msk.bf16.gmra.mxu0 %vm560_vm0, %v15236_v61 }
  0xd0   : > { %2204 = vmatprep.mubr.bf16.mxu1 %v20853_v3  ;;  %2545 = vmatprep.mubr.bf16.mxu0 %v20853_v3 }
  0xd7   : > { %v16148_v4 = vpop.f32.mrf.mxu0  ;;  %v16150_v5 = vpop.f32.mrf.mxu1  ;;  %13371 = vmatmul.mubr.msk.bf16.vlgmr.msra.gmra.mxu1 %vm560_vm0, %v15237_v63  ;;  %13407 = vmatmul.mubr.msk.bf16.vlgmr.msra.gmra.mxu0 %vm560_vm0, %v15238_v0  ;;  %v15249_v63 = vld [vmem:[%s15954_s28 + $0x210] sm:$0xff]  }
  0xd8   : > { %2871 = vmatpush1.bf16.msra.mxu1 %v15839_v6  ;;  %2214 = vmatprep.mubr.bf16.mxu1 %v20853_v3  ;;  %v15250_v0 = vld [vmem:[%s15954_s28 + $0x170] sm:$0xff]  }
  0xd9   : > { %v16161_v8 = vpop.f32.mrf.mxu0  ;;  %v16163_v9 = vpop.f32.mrf.mxu1  ;;  %2555 = vmatprep.mubr.bf16.mxu0 %v20853_v3  ;;  %2872 = vmatprep.subr.bf16.mxu1 %v15840_v12 }
  0xda   : > { %3747 = vmatpush1.bf16.msra.mxu0 %v15269_v1 }
  0xdb   : > { %v16171_v13 = vpop.f32.mrf.mxu0  ;;  %v16173_v14 = vpop.f32.mrf.mxu1  ;;  %3748 = vmatprep.subr.bf16.mxu0 %v15274_v2 }
  0xdc   : > { %2873 = vmatpush1.bf16.msra.mxu1 %v15841_v15 }
  0xdd   : > { %v16178_v16 = vpop.f32.mrf.mxu0  ;;  %v16180_v17 = vpop.f32.mrf.mxu1  ;;  %4087 = vmatprep.subr.bf16.mxu1 %v15279_v18  ;;  %v15251_v18 = vld [vmem:[%s15954_s28 + $0x218] sm:$0xff]  }
  0xde   : > { %3749 = vmatpush1.bf16.msra.mxu0 %v15272_v7 }
  0xdf   : > { %v16185_v19 = vpop.f32.mrf.mxu0  ;;  %v16187_v20 = vpop.f32.mrf.mxu1  ;;  %13372 = vmatmul.mubr.msk.bf16.gmra.mxu1 %vm560_vm0, %v15239_v10  ;;  %13408 = vmatmul.mubr.msk.bf16.gmra.mxu0 %vm560_vm0, %v15240_v11 }
  0xe0   : > { %2224 = vmatprep.mubr.bf16.mxu1 %v20853_v3  ;;  %2565 = vmatprep.mubr.bf16.mxu0 %v20853_v3 }
  0xe1   : > { %v16193_v21 = vpop.f32.mrf.mxu0  ;;  %v16195_v22 = vpop.f32.mrf.mxu1 }
  0xe3   : > { %v16199_v25 = vpop.f32.mrf.mxu0  ;;  %v16201_v26 = vpop.f32.mrf.mxu1 }
  0xe5   : > { %v16203_v27 = vpop.f32.mrf.mxu0  ;;  %v16205_v28 = vpop.f32.mrf.mxu1 }
  0xe7   : > { %v16207_v29 = vpop.f32.mrf.mxu0  ;;  %v16209_v30 = vpop.f32.mrf.mxu1  ;;  %13373 = vmatmul.mubr.msk.bf16.gmra.mxu1 %vm560_vm0, %v15241_v23  ;;  %13409 = vmatmul.mubr.msk.bf16.gmra.mxu0 %vm560_vm0, %v15242_v24  ;;  %v15252_v23 = vld [vmem:[%s15954_s28 + $0x178] sm:$0xff]  }
  0xe8   : > { %2234 = vmatprep.mubr.bf16.mxu1 %v20853_v3  ;;  %2575 = vmatprep.mubr.bf16.mxu0 %v20853_v3 }
  0xe9   : > { %v16215_v31 = vpop.f32.mrf.mxu0  ;;  %v16217_v32 = vpop.f32.mrf.mxu1 }
  0xeb   : > { %v16221_v35 = vpop.f32.mrf.mxu0  ;;  %v16223_v36 = vpop.f32.mrf.mxu1 }
  0xec   : > { %20925 = vst [vmem:[#allocation5_spill] sm:$0xff] %v16223_v36 }
  0xed   : > { %v16225_v37 = vpop.f32.mrf.mxu0  ;;  %v16227_v38 = vpop.f32.mrf.mxu1 }
  0xee   : > { %20926 = vst [vmem:[#allocation6_spill] sm:$0xff] %v16227_v38 }
  0xef   : > { %v16229_v39 = vpop.f32.mrf.mxu0  ;;  %v16231_v40 = vpop.f32.mrf.mxu1  ;;  %13374 = vmatmul.mubr.msk.bf16.gmra.mxu1 %vm560_vm0, %v15243_v33  ;;  %13410 = vmatmul.mubr.msk.bf16.gmra.mxu0 %vm560_vm0, %v15244_v34 }
  0xf0   : > { %20927 = vst [vmem:[#allocation7_spill] sm:$0xff] %v16231_v40  ;;  %2244 = vmatprep.mubr.bf16.mxu1 %v20853_v3  ;;  %2585 = vmatprep.mubr.bf16.mxu0 %v20853_v3 }
  0xf1   : > { %v16237_v41 = vpop.f32.mrf.mxu0  ;;  %v16239_v42 = vpop.f32.mrf.mxu1 }
  0xf2   : > { %20928 = vst [vmem:[#allocation8_spill] sm:$0xff] %v16239_v42 }
  0xf3   : > { %v16243_v45 = vpop.f32.mrf.mxu0  ;;  %v16245_v46 = vpop.f32.mrf.mxu1 }
  0xf4   : > { %20929 = vst [vmem:[#allocation9_spill] sm:$0xff] %v16245_v46 }
  0xf5   : > { %v16247_v47 = vpop.f32.mrf.mxu0  ;;  %v16249_v48 = vpop.f32.mrf.mxu1 }
  0xf6   : > { %20930 = vst [vmem:[#allocation10_spill] sm:$0xff] %v16249_v48  ;;  %v15256_v48 = vld [vmem:[%s15954_s28 + $0x188] sm:$0xff]  }
  0xf7   : > { %v16251_v49 = vpop.f32.mrf.mxu0  ;;  %v16253_v50 = vpop.f32.mrf.mxu1  ;;  %13375 = vmatmul.mubr.msk.bf16.gmra.mxu1 %vm560_vm0, %v15245_v43  ;;  %13411 = vmatmul.mubr.msk.bf16.gmra.mxu0 %vm560_vm0, %v15246_v44  ;;  %v1555_v44 = vlaneseq }
  0xf8   : > { %20931 = vst [vmem:[#allocation11_spill] sm:$0xff] %v16253_v50  ;;  %2254 = vmatprep.mubr.bf16.mxu1 %v20853_v3  ;;  %2595 = vmatprep.mubr.bf16.mxu0 %v20853_v3  ;;  %v15255_v50 = vld [vmem:[%s15954_s28 + $0x228] sm:$0xff]  }
  0xf9   : > { %v16259_v51 = vpop.f32.mrf.mxu0  ;;  %v16261_v52 = vpop.f32.mrf.mxu1 }
  0xfa   : > { %20932 = vst [vmem:[#allocation12_spill] sm:$0xff] %v16261_v52 }
  0xfb   : > { %v16265_v55 = vpop.f32.mrf.mxu0  ;;  %v16267_v56 = vpop.f32.mrf.mxu1 }
  0xfc   : > { %20933 = vst [vmem:[#allocation13_spill] sm:$0xff] %v16267_v56 }
  0xfd   : > { %v16269_v57 = vpop.f32.mrf.mxu0  ;;  %v16271_v58 = vpop.f32.mrf.mxu1 }
  0xfe   : > { %20934 = vst [vmem:[#allocation14_spill] sm:$0xff] %v16271_v58 }
  0xff   : > { %v16273_v59 = vpop.f32.mrf.mxu0  ;;  %v16275_v60 = vpop.f32.mrf.mxu1  ;;  %13376 = vmatmul.mubr.msk.bf16.gmra.mxu1 %vm560_vm0, %v15247_v53  ;;  %13412 = vmatmul.mubr.msk.bf16.gmra.mxu0 %vm560_vm0, %v15248_v54 }
 0x100   : > { %20935 = vst [vmem:[#allocation15_spill] sm:$0xff] %v16275_v60  ;;  %2264 = vmatprep.mubr.bf16.mxu1 %v20853_v3  ;;  %2605 = vmatprep.mubr.bf16.mxu0 %v20853_v3 }
 0x101   : > { %v16281_v61 = vpop.f32.mrf.mxu0  ;;  %v16283_v62 = vpop.f32.mrf.mxu1 }
 0x102   : > { %20936 = vst [vmem:[#allocation16_spill] sm:$0xff] %v16283_v62  ;;  %v20949_v62 = vmov 0  }
 0x103   : > { %v16287_v1 = vpop.f32.mrf.mxu0  ;;  %v16289_v2 = vpop.f32.mrf.mxu1 }
 0x104   : > { %20937 = vst [vmem:[#allocation17_spill] sm:$0xff] %v16289_v2 }
 0x105   : > { %v16291_v6 = vpop.f32.mrf.mxu0  ;;  %v16293_v7 = vpop.f32.mrf.mxu1 }
 0x106   : > { %20938 = vst [vmem:[#allocation18_spill] sm:$0xff] %v16293_v7 }
 0x107   : > { %v16295_v10 = vpop.f32.mrf.mxu0  ;;  %v16297_v11 = vpop.f32.mrf.mxu1  ;;  %13377 = vmatmul.mubr.msk.bf16.gmra.mxu1 %vm560_vm0, %v15249_v63  ;;  %13413 = vmatmul.mubr.msk.bf16.gmra.mxu0 %vm560_vm0, %v15250_v0 }
 0x108   : > { %20939 = vst [vmem:[#allocation19_spill] sm:$0xff] %v16297_v11  ;;  %2274 = vmatprep.mubr.bf16.mxu1 %v20853_v3  ;;  %2615 = vmatprep.mubr.bf16.mxu0 %v20853_v3 }
 0x109   : > { %v16303_v12 = vpop.f32.mrf.mxu0  ;;  %v16305_v15 = vpop.f32.mrf.mxu1 }
 0x10a   : > { %20940 = vst [vmem:[#allocation20_spill] sm:$0xff] %v16305_v15  ;;  %v15253_v15 = vld [vmem:[%s15954_s28 + $0x220] sm:$0xff]  }
 0x10b   : > { %v16309_v24 = vpop.f32.mrf.mxu0  ;;  %v16311_v33 = vpop.f32.mrf.mxu1 }
 0x10c   : > { %20941 = vst [vmem:[#allocation21_spill] sm:$0xff] %v16311_v33  ;;  %v1556_v33 = vshrl.u32 %v1555_v44, 7 }
 0x10d   : > { %v16313_v34 = vpop.f32.mrf.mxu0  ;;  %v16315_v43 = vpop.f32.mrf.mxu1 }
 0x10e   : > { %20942 = vst [vmem:[#allocation22_spill] sm:$0xff] %v16315_v43  ;;  %v15254_v43 = vld [vmem:[%s15954_s28 + $0x180] sm:$0xff]   ;;  %v16346_v44 = vsub.s32 1, %v1556_v33 }
 0x10f   : > { %v16317_v53 = vpop.f32.mrf.mxu0  ;;  %v16319_v54 = vpop.f32.mrf.mxu1  ;;  %13378 = vmatmul.mubr.msk.bf16.gmra.mxu1 %vm560_vm0, %v15251_v18  ;;  %13414 = vmatmul.mubr.msk.bf16.gmra.mxu0 %vm560_vm0, %v15252_v23  ;;  %v16339_v23 = vsub.s32 0, %v1556_v33 }
 0x110   : > { %20943 = vst [vmem:[#allocation23_spill] sm:$0xff] %v16319_v54  ;;  %2284 = vmatprep.mubr.bf16.mxu1 %v20853_v3  ;;  %2625 = vmatprep.mubr.bf16.mxu0 %v20853_v3  ;;  %v1553_v3 = vld [vmem:[%s20845_s2] sm:$0x3]  ;;  %20948 = vst [vmem:[#allocation28_spill] sm:$0xff] %v16346_v44 }
 0x111   : > { %v16325_v63 = vpop.f32.mrf.mxu0  ;;  %v16327_v0 = vpop.f32.mrf.mxu1  ;;  %20947 = vst [vmem:[#allocation27_spill] sm:$0xff] %v16339_v23 }
 0x112   : > { %20944 = vst [vmem:[#allocation24_spill] sm:$0xff] %v16327_v0 }
 0x113   : > { %v16331_v11 = vpop.f32.mrf.mxu0  ;;  %v16333_v7 = vpop.f32.mrf.mxu1 }
 0x114   : > { %20945 = vst [vmem:[#allocation25_spill] sm:$0xff] %v16333_v7 }
 0x115   : > { %v16335_v54 = vpop.f32.mrf.mxu0  ;;  %v16337_v18 = vpop.f32.mrf.mxu1 }
 0x116   : > { %20946 = vst [vmem:[#allocation26_spill] sm:$0xff] %v16337_v18  ;;  %v16352_v18 = vrot.slane %v1553_v3, %v16339_v23 }
 0x117   : > { %v984_v2 = vpop.f32.mrf.mxu1  ;;  %v1330_v0 = vpop.f32.mrf.mxu0  ;;  %13379 = vmatmul.mubr.msk.bf16.gmra.mxu1 %vm560_vm0, %v15253_v15  ;;  %13415 = vmatmul.mubr.msk.bf16.gmra.mxu0 %vm560_vm0, %v15254_v43  ;;  %v16356_v15 = vrot.slane %v1553_v3, %v16346_v44 }
 0x118   : > { %v985_v7 = vadd.f32 %v984_v2, %v16148_v4  ;;  %2294 = vmatprep.mubr.bf16.mxu1 %v20949_v62  ;;  %2635 = vmatprep.mubr.bf16.mxu0 %v20949_v62 }
 0x119   : > { %v986_v60 = vpop.f32.mrf.mxu1  ;;  %v1332_v58 = vpop.f32.mrf.mxu0 }
 0x11a   : > { %v1489_v56 = vadd.f32 %v1330_v0, %v985_v7  ;;  %v987_v52 = vadd.f32 %v986_v60, %v16161_v8 }
 0x11b   : > { %v988_v43 = vpop.f32.mrf.mxu1  ;;  %v1334_v33 = vpop.f32.mrf.mxu0 }
 0x11c   : > { %v1490_v4 = vadd.f32 %v1332_v58, %v987_v52  ;;  %v989_v2 = vadd.f32 %v988_v43, %v16171_v13  ;;  %v1565_v46 = vadd.f32 %v16352_v18, %v1489_v56 }
 0x11d   : > { %v990_v42 = vpop.f32.mrf.mxu1  ;;  %v1336_v23 = vpop.f32.mrf.mxu0 }
 0x11e   : > { %v1491_v40 = vadd.f32 %v1334_v33, %v989_v2  ;;  %v991_v38 = vadd.f32 %v990_v42, %v16178_v16  ;;  %v1566_v7 = vadd.f32 %v16356_v15, %v1490_v4  ;;  %v1629_v16 = vmax.f32 %v1565_v46, 0.0  ;;  %v15257_v4 = vld [vmem:[%s15954_s28 + $0x230] sm:$0xff]  }
 0x11f   : > { %v994_v8 = vpop.f32.mrf.mxu1  ;;  %v1340_v60 = vpop.f32.mrf.mxu0  ;;  %13380 = vmatmul.mubr.msk.bf16.gmra.mxu1 %vm560_vm0, %v15255_v50  ;;  %13416 = vmatmul.mubr.msk.bf16.gmra.mxu0 %vm560_vm0, %v15256_v48 }
 0x120   : > { %v1567_v3 = vadd.f32 %v16352_v18, %v1491_v40  ;;  %v1492_v13 = vadd.f32 %v1336_v23, %v991_v38  ;;  %v995_v52 = vadd.f32 %v994_v8, %v16185_v19  ;;  %2304 = vmatprep.mubr.bf16.mxu1 %v20949_v62  ;;  %2645 = vmatprep.mubr.bf16.mxu0 %v20949_v62  ;;  %v15258_v40 = vld [vmem:[%s15954_s28 + $0x190] sm:$0xff]   ;;  %v1630_v38 = vmax.f32 %v1566_v7, 0.0 }
 0x121   : > { %v996_v42 = vpop.f32.mrf.mxu1  ;;  %v1342_v56 = vpop.f32.mrf.mxu0 }
 0x122   : > { %v1631_v58 = vmax.f32 %v1567_v3, 0.0  ;;  %v1568_v0 = vadd.f32 %v16356_v15, %v1492_v13  ;;  %v1493_v50 = vadd.f32 %v1340_v60, %v995_v52  ;;  %v997_v43 = vadd.f32 %v996_v42, %v16193_v21 }
 0x123   : > { %v998_v48 = vpop.f32.mrf.mxu1  ;;  %v1344_v33 = vpop.f32.mrf.mxu0 }
 0x124   : > { %v16374_v23 = vpack.c.bf16 %v1631_v58, %v1629_v16  ;;  %v1632_v19 = vmax.f32 %v1568_v0, 0.0  ;;  %v1494_v2 = vadd.f32 %v1342_v56, %v997_v43  ;;  %v999_v8 = vadd.f32 %v998_v48, %v16199_v25 }
 0x125   : > { %v1000_v46 = vpop.f32.mrf.mxu1  ;;  %v1346_v44 = vpop.f32.mrf.mxu0  ;;  %v1569_v60 = vadd.f32 %v16352_v18, %v1493_v50 }
 0x126   : > { %20950 = vst [vmem:[#allocation29_spill] sm:$0xff] %v16374_v23  ;;  %v1001_v3 = vadd.f32 %v1000_v46, %v16203_v27  ;;  %v16378_v36 = vpack.c.bf16 %v1632_v19, %v1630_v38  ;;  %v1495_v21 = vadd.f32 %v1344_v33, %v999_v8  ;;  %v1570_v27 = vadd.f32 %v16356_v15, %v1494_v2 }
 0x127   : > { %v1004_v13 = vpop.f32.mrf.mxu1  ;;  %v1350_v52 = vpop.f32.mrf.mxu0  ;;  %13381 = vmatmul.mubr.msk.bf16.gmra.mxu1 %vm560_vm0, %v15257_v4  ;;  %13417 = vmatmul.mubr.msk.bf16.gmra.mxu0 %vm560_vm0, %v15258_v40  ;;  %v1633_v43 = vmax.f32 %v1569_v60, 0.0  ;;  %v15260_v4 = vld [vmem:[%s15954_s28 + $0x198] sm:$0xff]  }
 0x128   : > { %20951 = vst [vmem:[#allocation30_spill] sm:$0xff] %v16378_v36  ;;  %v1496_v7 = vadd.f32 %v1346_v44, %v1001_v3  ;;  %v1005_v25 = vadd.f32 %v1004_v13, %v16207_v29  ;;  %2314 = vmatprep.mubr.bf16.mxu1 %v20949_v62  ;;  %2655 = vmatprep.mubr.bf16.mxu0 %v20949_v62  ;;  %v15259_v29 = vld [vmem:[%s15954_s28 + $0x238] sm:$0xff]   ;;  %v1634_v2 = vmax.f32 %v1570_v27, 0.0 }
 0x129   : > { %v1571_v16 = vadd.f32 %v16352_v18, %v1495_v21  ;;  %v1006_v42 = vpop.f32.mrf.mxu1  ;;  %v1352_v56 = vpop.f32.mrf.mxu0 }
 0x12a   : > { %v1572_v58 = vadd.f32 %v16356_v15, %v1496_v7  ;;  %v1497_v0 = vadd.f32 %v1350_v52, %v1005_v25  ;;  %v1007_v50 = vadd.f32 %v1006_v42, %v16215_v31 }
 0x12b   : > { %v1635_v44 = vmax.f32 %v1571_v16, 0.0  ;;  %v1008_v48 = vpop.f32.mrf.mxu1  ;;  %v1354_v33 = vpop.f32.mrf.mxu0 }
 0x12c   : > { %v1636_v40 = vmax.f32 %v1572_v58, 0.0  ;;  %v1498_v38 = vadd.f32 %v1352_v56, %v1007_v50  ;;  %v1009_v19 = vadd.f32 %v1008_v48, %v16221_v35  ;;  %v1573_v46 = vadd.f32 %v16352_v18, %v1497_v0 }
 0x12d   : > { %v16393_v8 = vpack.c.bf16 %v1635_v44, %v1633_v43  ;;  %v1010_v3 = vpop.f32.mrf.mxu1  ;;  %v1356_v21 = vpop.f32.mrf.mxu0 }
 0x12e   : > { %v1499_v13 = vadd.f32 %v1354_v33, %v1009_v19  ;;  %v1011_v31 = vadd.f32 %v1010_v3, %v16225_v37  ;;  %v1574_v60 = vadd.f32 %v16356_v15, %v1498_v38  ;;  %v16400_v35 = vpack.c.bf16 %v1636_v40, %v1634_v2  ;;  %v15261_v33 = vld [vmem:[%s15954_s28 + $0x240] sm:$0xff]  }
 0x12f   : > { %20952 = vst [vmem:[#allocation31_spill] sm:$0xff] %v16393_v8  ;;  %v1014_v52 = vpop.f32.mrf.mxu1  ;;  %v1360_v7 = vpop.f32.mrf.mxu0  ;;  %13382 = vmatmul.mubr.msk.bf16.gmra.mxu1 %vm560_vm0, %v15259_v29  ;;  %13418 = vmatmul.mubr.msk.bf16.gmra.mxu0 %vm560_vm0, %v15260_v4  ;;  %v1637_v37 = vmax.f32 %v1573_v46, 0.0  ;;  %v15262_v29 = vld [vmem:[%s15954_s28 + $0x1a0] sm:$0xff]  }
 0x130   : > { %20953 = vst [vmem:[#allocation32_spill] sm:$0xff] %v16400_v35  ;;  %v1575_v25 = vadd.f32 %v16352_v18, %v1499_v13  ;;  %v1500_v27 = vadd.f32 %v1356_v21, %v1011_v31  ;;  %v1015_v16 = vadd.f32 %v1014_v52, %v16229_v39  ;;  %2324 = vmatprep.mubr.bf16.mxu1 %v20949_v62  ;;  %v1638_v4 = vmax.f32 %v1574_v60, 0.0 }
 0x131   : > { %2665 = vmatprep.mubr.bf16.mxu0 %v20949_v62  ;;  %v1016_v42 = vpop.f32.mrf.mxu1  ;;  %v1362_v56 = vpop.f32.mrf.mxu0 }
 0x132   : > { %v1639_v58 = vmax.f32 %v1575_v25, 0.0  ;;  %v1576_v0 = vadd.f32 %v16356_v15, %v1500_v27  ;;  %v1501_v50 = vadd.f32 %v1360_v7, %v1015_v16  ;;  %v1017_v43 = vadd.f32 %v1016_v42, %v16237_v41 }
 0x133   : > { %v1018_v44 = vpop.f32.mrf.mxu1  ;;  %v1364_v48 = vpop.f32.mrf.mxu0 }
 0x134   : > { %v16410_v40 = vpack.c.bf16 %v1639_v58, %v1637_v37  ;;  %v1640_v39 = vmax.f32 %v1576_v0, 0.0  ;;  %v1502_v38 = vadd.f32 %v1362_v56, %v1017_v43  ;;  %v1019_v19 = vadd.f32 %v1018_v44, %v16243_v45  ;;  %v15264_v43 = vld [vmem:[%s15954_s28 + $0x1a8] sm:$0xff]  }
 0x135   : > { %v1020_v2 = vpop.f32.mrf.mxu1  ;;  %v1366_v46 = vpop.f32.mrf.mxu0  ;;  %v1577_v13 = vadd.f32 %v16352_v18, %v1501_v50 }
 0x136   : > { %20954 = vst [vmem:[#allocation33_spill] sm:$0xff] %v16410_v40  ;;  %v1021_v3 = vadd.f32 %v1020_v2, %v16247_v47  ;;  %v16414_v21 = vpack.c.bf16 %v1640_v39, %v1638_v4  ;;  %v1503_v41 = vadd.f32 %v1364_v48, %v1019_v19  ;;  %v1578_v47 = vadd.f32 %v16356_v15, %v1502_v38 }
 0x137   : > { %v1024_v31 = vpop.f32.mrf.mxu1  ;;  %v1370_v52 = vpop.f32.mrf.mxu0  ;;  %13383 = vmatmul.mubr.msk.bf16.gmra.mxu1 %vm560_vm0, %v15261_v33  ;;  %13419 = vmatmul.mubr.msk.bf16.gmra.mxu0 %vm560_vm0, %v15262_v29  ;;  %v1641_v56 = vmax.f32 %v1577_v13, 0.0 }
 0x138   : > { %20955 = vst [vmem:[#allocation34_spill] sm:$0xff] %v16414_v21  ;;  %v1504_v60 = vadd.f32 %v1366_v46, %v1021_v3  ;;  %v1025_v45 = vadd.f32 %v1024_v31, %v16251_v49  ;;  %2334 = vmatprep.mubr.bf16.mxu1 %v20949_v62  ;;  %2675 = vmatprep.mubr.bf16.mxu0 %v20949_v62  ;;  %v15263_v49 = vld [vmem:[%s15954_s28 + $0x248] sm:$0xff]   ;;  %v1642_v29 = vmax.f32 %v1578_v47, 0.0 }
 0x139   : > { %v1579_v7 = vadd.f32 %v16352_v18, %v1503_v41  ;;  %v1026_v25 = vpop.f32.mrf.mxu1  ;;  %v1372_v27 = vpop.f32.mrf.mxu0 }
 0x13a   : > { %v1580_v16 = vadd.f32 %v16356_v15, %v1504_v60  ;;  %v1505_v37 = vadd.f32 %v1370_v52, %v1025_v45  ;;  %v1027_v42 = vadd.f32 %v1026_v25, %v16259_v51 }
 0x13b   : > { %v1643_v58 = vmax.f32 %v1579_v7, 0.0  ;;  %v1028_v0 = vpop.f32.mrf.mxu1  ;;  %v1374_v50 = vpop.f32.mrf.mxu0 }
 0x13c   : > { %v1644_v44 = vmax.f32 %v1580_v16, 0.0  ;;  %v1506_v48 = vadd.f32 %v1372_v27, %v1027_v42  ;;  %v1029_v33 = vadd.f32 %v1028_v0, %v16265_v55  ;;  %v1581_v39 = vadd.f32 %v16352_v18, %v1505_v37  ;;  %v15265_v42 = vld [vmem:[%s15954_s28 + $0x250] sm:$0xff]  }
 0x13d   : > { %v16429_v4 = vpack.c.bf16 %v1643_v58, %v1641_v56  ;;  %v1030_v38 = vpop.f32.mrf.mxu1  ;;  %v1376_v19 = vpop.f32.mrf.mxu0  ;;  %v15266_v56 = vld [vmem:[%s15954_s28 + $0x1b0] sm:$0xff]  }
 0x13e   : > { %v1507_v2 = vadd.f32 %v1374_v50, %v1029_v33  ;;  %v1031_v51 = vadd.f32 %v1030_v38, %v16269_v57  ;;  %v1582_v46 = vadd.f32 %v16356_v15, %v1506_v48  ;;  %v16436_v55 = vpack.c.bf16 %v1644_v44, %v1642_v29 }
 0x13f   : > { %20956 = vst [vmem:[#allocation35_spill] sm:$0xff] %v16429_v4  ;;  %v1034_v3 = vpop.f32.mrf.mxu1  ;;  %v1380_v13 = vpop.f32.mrf.mxu0  ;;  %13384 = vmatmul.mubr.msk.bf16.gmra.mxu1 %vm560_vm0, %v15263_v49  ;;  %13420 = vmatmul.mubr.msk.bf16.gmra.mxu0 %vm560_vm0, %v15264_v43  ;;  %v1645_v57 = vmax.f32 %v1581_v39, 0.0 }
 0x140   : > { %20957 = vst [vmem:[#allocation36_spill] sm:$0xff] %v16436_v55  ;;  %v1583_v41 = vadd.f32 %v16352_v18, %v1507_v2  ;;  %v1508_v31 = vadd.f32 %v1376_v19, %v1031_v51  ;;  %v1035_v52 = vadd.f32 %v1034_v3, %v16273_v59  ;;  %2344 = vmatprep.mubr.bf16.mxu1 %v20949_v62  ;;  %v1646_v58 = vmax.f32 %v1582_v46, 0.0 }
 0x141   : > { %2685 = vmatprep.mubr.bf16.mxu0 %v20949_v62  ;;  %v1036_v60 = vpop.f32.mrf.mxu1  ;;  %v1382_v45 = vpop.f32.mrf.mxu0 }
 0x142   : > { %v1647_v47 = vmax.f32 %v1583_v41, 0.0  ;;  %v1584_v7 = vadd.f32 %v16356_v15, %v1508_v31  ;;  %v1509_v25 = vadd.f32 %v1380_v13, %v1035_v52  ;;  %v1037_v27 = vadd.f32 %v1036_v60, %v16281_v61 }
 0x143   : > { %v1038_v16 = vpop.f32.mrf.mxu1  ;;  %v1384_v37 = vpop.f32.mrf.mxu0 }
 0x144   : > { %v16446_v0 = vpack.c.bf16 %v1647_v47, %v1645_v57  ;;  %v1648_v59 = vmax.f32 %v1584_v7, 0.0  ;;  %v1510_v50 = vadd.f32 %v1382_v45, %v1037_v27  ;;  %v1039_v49 = vadd.f32 %v1038_v16, %v16287_v1  ;;  %v15268_v45 = vld [vmem:[%s15954_s28 + $0x1b8] sm:$0xff]  }
 0x145   : > { %v1040_v43 = vpop.f32.mrf.mxu1  ;;  %v1386_v44 = vpop.f32.mrf.mxu0  ;;  %v1585_v29 = vadd.f32 %v16352_v18, %v1509_v25 }
 0x146   : > { %20958 = vst [vmem:[#allocation37_spill] sm:$0xff] %v16446_v0  ;;  %v1041_v48 = vadd.f32 %v1040_v43, %v16291_v6  ;;  %v16450_v33 = vpack.c.bf16 %v1648_v59, %v1646_v58  ;;  %v1511_v61 = vadd.f32 %v1384_v37, %v1039_v49  ;;  %v1586_v6 = vadd.f32 %v16356_v15, %v1510_v50  ;;  %v16472_v59 = vld [vmem:[%s20844_s1 + $0x54] ss:$8 sps:$4 sm:$0xff]  }
 0x147   : > { %v1044_v39 = vpop.f32.mrf.mxu1  ;;  %v1390_v38 = vpop.f32.mrf.mxu0  ;;  %13385 = vmatmul.mubr.msk.bf16.gmra.mxu1 %vm560_vm0, %v15265_v42  ;;  %13421 = vmatmul.mubr.msk.bf16.gmra.mxu0 %vm560_vm0, %v15266_v56  ;;  %v1649_v31 = vmax.f32 %v1585_v29, 0.0 }
 0x148   : > { %20959 = vst [vmem:[#allocation38_spill] sm:$0xff] %v16450_v33  ;;  %v1512_v19 = vadd.f32 %v1386_v44, %v1041_v48  ;;  %v1045_v1 = vadd.f32 %v1044_v39, %v16295_v10  ;;  %2354 = vmatprep.mubr.bf16.mxu1 %v20949_v62  ;;  %2695 = vmatprep.mubr.bf16.mxu0 %v20949_v62  ;;  %v15267_v10 = vld [vmem:[%s15954_s28 + $0x258] sm:$0xff]   ;;  %v1650_v27 = vmax.f32 %v1586_v6, 0.0 }
 0x149   : > { %v1587_v2 = vadd.f32 %v16352_v18, %v1511_v61  ;;  %v1046_v51 = vpop.f32.mrf.mxu1  ;;  %v1392_v46 = vpop.f32.mrf.mxu0  ;;  %4432 = vmatprep.subr.bf16.mxu0 %v16472_v59 }
 0x14a   : > { %v1588_v3 = vadd.f32 %v16356_v15, %v1512_v19  ;;  %v1513_v13 = vadd.f32 %v1390_v38, %v1045_v1  ;;  %v1047_v41 = vadd.f32 %v1046_v51, %v16303_v12 }
 0x14b   : > { %v1651_v52 = vmax.f32 %v1587_v2, 0.0  ;;  %v1048_v57 = vpop.f32.mrf.mxu1  ;;  %v1394_v60 = vpop.f32.mrf.mxu0 }
 0x14c   : > { %v1652_v47 = vmax.f32 %v1588_v3, 0.0  ;;  %v1514_v7 = vadd.f32 %v1392_v46, %v1047_v41  ;;  %v1049_v25 = vadd.f32 %v1048_v57, %v16309_v24  ;;  %v1589_v37 = vadd.f32 %v16352_v18, %v1513_v13  ;;  %v15275_v46 = vld [vmem:[%s15954_s28 + $0x280] sm:$0xff]  }
 0x14d   : > { %v16465_v16 = vpack.c.bf16 %v1651_v52, %v1649_v31  ;;  %v1050_v42 = vpop.f32.mrf.mxu1  ;;  %v1396_v56 = vpop.f32.mrf.mxu0  ;;  %v15276_v3 = vld [vmem:[%s15954_s28 + $0x320] sm:$0xff]   ;;  %v15277_v52 = vld [vmem:[%s20844_s1 + $0x10] ss:$8 sps:$4 sm:$0xff]  }
 0x14e   : > { %v1515_v58 = vadd.f32 %v1394_v60, %v1049_v25  ;;  %v1051_v12 = vadd.f32 %v1050_v42, %v16313_v34  ;;  %v1590_v50 = vadd.f32 %v16356_v15, %v1514_v7  ;;  %v16477_v24 = vpack.c.bf16 %v1652_v47, %v1650_v27  ;;  %v15313_v47 = vld [vmem:[%s20844_s1 + $0x50] ss:$8 sps:$4 sm:$0xff]  }
 0x14f   : > { %20960 = vst [vmem:[#allocation39_spill] sm:$0xff] %v16465_v16  ;;  %v1054_v49 = vpop.f32.mrf.mxu1  ;;  %v1400_v43 = vpop.f32.mrf.mxu0  ;;  %13386 = vmatmul.mubr.msk.bf16.gmra.mxu1 %vm560_vm0, %v15267_v10  ;;  %13422 = vmatmul.mubr.msk.bf16.gmra.mxu0 %vm560_vm0, %v15268_v45  ;;  %v1653_v29 = vmax.f32 %v1589_v37, 0.0 }
 0x150   : > { %20961 = vst [vmem:[#allocation40_spill] sm:$0xff] %v16477_v24  ;;  %v1591_v44 = vadd.f32 %v16352_v18, %v1515_v58  ;;  %v1516_v34 = vadd.f32 %v1396_v56, %v1051_v12  ;;  %v1055_v48 = vadd.f32 %v1054_v49, %v16317_v53  ;;  %2890 = vmatprep.mubr.bf16.mxu1 %v20949_v62  ;;  %v1654_v53 = vmax.f32 %v1590_v50, 0.0  ;;  %v15296_v58 = vld [vmem:[%s20844_s1] ss:$8 sps:$4 sm:$0xff]  }
 0x151   : > { %3766 = vmatprep.mubr.bf16.mxu0 %v20949_v62  ;;  %v1056_v61 = vpop.f32.mrf.mxu1  ;;  %v1402_v39 = vpop.f32.mrf.mxu0 }
 0x152   : > { %v1655_v38 = vmax.f32 %v1591_v44, 0.0  ;;  %v1592_v19 = vadd.f32 %v16356_v15, %v1516_v34  ;;  %v1517_v1 = vadd.f32 %v1400_v43, %v1055_v48  ;;  %v1057_v6 = vadd.f32 %v1056_v61, %v16325_v63  ;;  %v15298_v63 = vld [vmem:[%s20844_s1 + $0x4] ss:$8 sps:$4 sm:$0xff]  }
 0x153   : > { %v1058_v2 = vpop.f32.mrf.mxu1  ;;  %v1404_v51 = vpop.f32.mrf.mxu0 }
 0x154   : > { %v16488_v13 = vpack.c.bf16 %v1655_v38, %v1653_v29  ;;  %v1656_v41 = vmax.f32 %v1592_v19, 0.0  ;;  %v1518_v31 = vadd.f32 %v1402_v39, %v1057_v6  ;;  %v1059_v57 = vadd.f32 %v1058_v2, %v16331_v11  ;;  %v15318_v11 = vld [vmem:[%s20844_s1 + $0x44] ss:$8 sps:$4 sm:$0xff]   ;;  %v15316_v29 = vld [vmem:[%s20844_s1 + $0x40] ss:$8 sps:$4 sm:$0xff]  }
 0x155   : > { %v1060_v60 = vpop.f32.mrf.mxu1  ;;  %v1406_v10 = vpop.f32.mrf.mxu0  ;;  %v1593_v25 = vadd.f32 %v16352_v18, %v1517_v1  ;;  %v15280_v1 = vld [vmem:[%s15954_s28 + $0x288] sm:$0xff]  }
 0x156   : > { %20962 = vst [vmem:[#allocation41_spill] sm:$0xff] %v16488_v13  ;;  %v1061_v45 = vadd.f32 %v1060_v60, %v16335_v54  ;;  %v16501_v7 = vpack.c.bf16 %v1656_v41, %v1654_v53  ;;  %v1519_v27 = vadd.f32 %v1404_v51, %v1059_v57  ;;  %v1594_v12 = vadd.f32 %v16356_v15, %v1518_v31  ;;  %v15281_v6 = vld [vmem:[%s15954_s28 + $0x328] sm:$0xff]  }
 0x157   : > { %v1064_v37 = vpop.f32.mrf.mxu1  ;;  %v1410_v42 = vpop.f32.mrf.mxu0  ;;  %13447 = vmatmul.mubr.msk.bf16.vlgmr.msra.gmra.mxu1 %vm560_vm0, %v15275_v46  ;;  %13615 = vmatmul.mubr.msk.bf16.vlgmr.msra.gmra.mxu0 %vm560_vm0, %v15276_v3  ;;  %v1657_v61 = vmax.f32 %v1593_v25, 0.0 }
 0x158   : > { %20963 = vst [vmem:[#allocation42_spill] sm:$0xff] %v16501_v7  ;;  %v1520_v54 = vadd.f32 %v1406_v10, %v1061_v45  ;;  %v1065_v56 = vadd.f32 %v1064_v37, %v16150_v5  ;;  %4088 = vmatpush1.bf16.msra.mxu1 %v15277_v52  ;;  %2900 = vmatprep.mubr.bf16.mxu1 %v20949_v62  ;;  %v15323_v5 = vld [vmem:[%s20844_s1 + $0x34] ss:$8 sps:$4 sm:$0xff]   ;;  %v1658_v3 = vmax.f32 %v1594_v12, 0.0 }
 0x159   : > { %v1595_v50 = vadd.f32 %v16352_v18, %v1519_v27  ;;  %v1066_v49 = vpop.f32.mrf.mxu1  ;;  %v1412_v43 = vpop.f32.mrf.mxu0  ;;  %3776 = vmatprep.mubr.bf16.mxu0 %v20949_v62  ;;  %4089 = vmatprep.subr.bf16.mxu1 %v15298_v63 }
 0x15a   : > { %v1596_v44 = vadd.f32 %v16356_v15, %v1520_v54  ;;  %v1521_v34 = vadd.f32 %v1410_v42, %v1065_v56  ;;  %v1067_v48 = vadd.f32 %v1066_v49, %v16163_v9  ;;  %4433 = vmatpush1.bf16.msra.mxu0 %v15313_v47  ;;  %v15283_v49 = vld [vmem:[%s15954_s28 + $0x330] sm:$0xff]  }
 0x15b   : > { %v1659_v39 = vmax.f32 %v1595_v50, 0.0  ;;  %v1068_v38 = vpop.f32.mrf.mxu1  ;;  %v1414_v19 = vpop.f32.mrf.mxu0  ;;  %4434 = vmatprep.subr.bf16.mxu0 %v15318_v11  ;;  %v15282_v50 = vld [vmem:[%s15954_s28 + $0x290] sm:$0xff]  }
 0x15c   : > { %v1660_v2 = vmax.f32 %v1596_v44, 0.0  ;;  %v1522_v51 = vadd.f32 %v1412_v43, %v1067_v48  ;;  %v1069_v46 = vadd.f32 %v1068_v38, %v16173_v14  ;;  %4090 = vmatpush1.bf16.msra.mxu1 %v15296_v58  ;;  %v1597_v9 = vadd.f32 %v16352_v18, %v1521_v34 }
 0x15d   : > { %v16528_v53 = vpack.c.bf16 %v1659_v39, %v1657_v61  ;;  %v1070_v41 = vpop.f32.mrf.mxu1  ;;  %v1416_v31 = vpop.f32.mrf.mxu0  ;;  %5307 = vmatprep.subr.bf16.mxu1 %v15323_v5 }
 0x15e   : > { %v1523_v52 = vadd.f32 %v1414_v19, %v1069_v46  ;;  %v1071_v57 = vadd.f32 %v1070_v41, %v16180_v17  ;;  %4435 = vmatpush1.bf16.msra.mxu0 %v15316_v29  ;;  %v1598_v60 = vadd.f32 %v16356_v15, %v1522_v51  ;;  %v16535_v14 = vpack.c.bf16 %v1660_v2, %v1658_v3 }
 0x15f   : > { %20964 = vst [vmem:[#allocation43_spill] sm:$0xff] %v16528_v53  ;;  %v1074_v10 = vpop.f32.mrf.mxu1  ;;  %v1420_v63 = vpop.f32.mrf.mxu0  ;;  %13448 = vmatmul.mubr.msk.bf16.gmra.mxu1 %vm560_vm0, %v15280_v1  ;;  %13616 = vmatmul.mubr.msk.bf16.gmra.mxu0 %vm560_vm0, %v15281_v6  ;;  %v1661_v17 = vmax.f32 %v1597_v9, 0.0 }
 0x160   : > { %20965 = vst [vmem:[#allocation44_spill] sm:$0xff] %v16535_v14  ;;  %v1599_v45 = vadd.f32 %v16352_v18, %v1523_v52  ;;  %v1524_v47 = vadd.f32 %v1416_v31, %v1071_v57  ;;  %v1075_v25 = vadd.f32 %v1074_v10, %v16187_v20  ;;  %2910 = vmatprep.mubr.bf16.mxu1 %v20949_v62  ;;  %v1662_v43 = vmax.f32 %v1598_v60, 0.0  ;;  %v15285_v10 = vld [vmem:[%s15954_s28 + $0x338] sm:$0xff]  }
 0x161   : > { %3786 = vmatprep.mubr.bf16.mxu0 %v20949_v62  ;;  %v1076_v27 = vpop.f32.mrf.mxu1  ;;  %v1422_v37 = vpop.f32.mrf.mxu0 }
 0x162   : > { %v1663_v42 = vmax.f32 %v1599_v45, 0.0  ;;  %v1600_v11 = vadd.f32 %v16356_v15, %v1524_v47  ;;  %v1525_v54 = vadd.f32 %v1420_v63, %v1075_v25  ;;  %v1077_v56 = vadd.f32 %v1076_v27, %v16195_v22  ;;  %v20968_v47 = vld [vmem:[#allocation5_spill] sm:$0xff] }
 0x163   : > { %v1078_v58 = vpop.f32.mrf.mxu1  ;;  %v1424_v12 = vpop.f32.mrf.mxu0 }
 0x164   : > { %v16545_v5 = vpack.c.bf16 %v1663_v42, %v1661_v17  ;;  %v1664_v20 = vmax.f32 %v1600_v11, 0.0  ;;  %v1526_v44 = vadd.f32 %v1422_v37, %v1077_v56  ;;  %v1079_v34 = vadd.f32 %v1078_v58, %v16201_v26  ;;  %v20970_v56 = vld [vmem:[#allocation6_spill] sm:$0xff] }
 0x165   : > { %v1080_v48 = vpop.f32.mrf.mxu1  ;;  %v1426_v29 = vpop.f32.mrf.mxu0  ;;  %v1601_v38 = vadd.f32 %v16352_v18, %v1525_v54 }
 0x166   : > { %20966 = vst [vmem:[#allocation45_spill] sm:$0xff] %v16545_v5  ;;  %v1081_v61 = vadd.f32 %v1080_v48, %v16205_v28  ;;  %v16549_v39 = vpack.c.bf16 %v1664_v20, %v1662_v43  ;;  %v1527_v22 = vadd.f32 %v1424_v12, %v1079_v34  ;;  %v1602_v28 = vadd.f32 %v16356_v15, %v1526_v44  ;;  %v20972_v44 = vld [vmem:[#allocation7_spill] sm:$0xff]  ;;  %v15325_v5 = vld [vmem:[%s15954_s28 + $0x3c8] sm:$0xff]  }
 0x167   : > { %v1084_v19 = vpop.f32.mrf.mxu1  ;;  %v1430_v1 = vpop.f32.mrf.mxu0  ;;  %13449 = vmatmul.mubr.msk.bf16.gmra.mxu1 %vm560_vm0, %v15282_v50  ;;  %13617 = vmatmul.mubr.msk.bf16.gmra.mxu0 %vm560_vm0, %v15283_v49  ;;  %v1665_v31 = vmax.f32 %v1601_v38, 0.0 }
 0x168   : > { %20967 = vst [vmem:[#allocation46_spill] sm:$0xff] %v16549_v39  ;;  %v1528_v6 = vadd.f32 %v1426_v29, %v1081_v61  ;;  %v1085_v26 = vadd.f32 %v1084_v19, %v16209_v30  ;;  %2920 = vmatprep.mubr.bf16.mxu1 %v20949_v62  ;;  %3796 = vmatprep.mubr.bf16.mxu0 %v20949_v62  ;;  %v15284_v30 = vld [vmem:[%s15954_s28 + $0x298] sm:$0xff]   ;;  %v1666_v17 = vmax.f32 %v1602_v28, 0.0 }
 0x169   : > { %v1603_v2 = vadd.f32 %v16352_v18, %v1527_v22  ;;  %v1086_v51 = vpop.f32.mrf.mxu1  ;;  %v1432_v46 = vpop.f32.mrf.mxu0 }
 0x16a   : > { %v1604_v3 = vadd.f32 %v16356_v15, %v1528_v6  ;;  %v1529_v9 = vadd.f32 %v1430_v1, %v1085_v26  ;;  %v1087_v41 = vadd.f32 %v1086_v51, %v16217_v32  ;;  %v20973_v1 = vld [vmem:[#allocation8_spill] sm:$0xff] }
 0x16b   : > { %v1667_v52 = vmax.f32 %v1603_v2, 0.0  ;;  %v1088_v57 = vpop.f32.mrf.mxu1  ;;  %v1434_v60 = vpop.f32.mrf.mxu0  ;;  %v15286_v2 = vld [vmem:[%s15954_s28 + $0x2a0] sm:$0xff]  }
 0x16c   : > { %v1668_v63 = vmax.f32 %v1604_v3, 0.0  ;;  %v1530_v45 = vadd.f32 %v1432_v46, %v1087_v41  ;;  %v1089_v25 = vadd.f32 %v1088_v57, %v20968_v47  ;;  %v1605_v37 = vadd.f32 %v16352_v18, %v1529_v9  ;;  %v15287_v51 = vld [vmem:[%s15954_s28 + $0x340] sm:$0xff]  }
 0x16d   : > { %v16564_v27 = vpack.c.bf16 %v1667_v52, %v1665_v31  ;;  %v1090_v42 = vpop.f32.mrf.mxu1  ;;  %v1436_v11 = vpop.f32.mrf.mxu0  ;;  %v20975_v31 = vld [vmem:[#allocation9_spill] sm:$0xff] }
 0x16e   : > { %v1531_v54 = vadd.f32 %v1434_v60, %v1089_v25  ;;  %v1091_v32 = vadd.f32 %v1090_v42, %v20970_v56  ;;  %v1606_v58 = vadd.f32 %v16356_v15, %v1530_v45  ;;  %v16571_v49 = vpack.c.bf16 %v1668_v63, %v1666_v17  ;;  %v20978_v42 = vld [vmem:[#allocation11_spill] sm:$0xff] }
 0x16f   : > { %20969 = vst [vmem:[#allocation5_spill] sm:$0xff] %v16564_v27  ;;  %v1094_v12 = vpop.f32.mrf.mxu1  ;;  %v1440_v50 = vpop.f32.mrf.mxu0  ;;  %13450 = vmatmul.mubr.msk.bf16.gmra.mxu1 %vm560_vm0, %v15284_v30  ;;  %13618 = vmatmul.mubr.msk.bf16.gmra.mxu0 %vm560_vm0, %v15285_v10  ;;  %v1669_v48 = vmax.f32 %v1605_v37, 0.0  ;;  %v20976_v30 = vld [vmem:[#allocation10_spill] sm:$0xff] }
 0x170   : > { %20971 = vst [vmem:[#allocation6_spill] sm:$0xff] %v16571_v49  ;;  %v1607_v43 = vadd.f32 %v16352_v18, %v1531_v54  ;;  %v1532_v20 = vadd.f32 %v1436_v11, %v1091_v32  ;;  %v1095_v34 = vadd.f32 %v1094_v12, %v20972_v44  ;;  %2930 = vmatprep.mubr.bf16.mxu1 %v20949_v62  ;;  %v1670_v46 = vmax.f32 %v1606_v58, 0.0 }
 0x171   : > { %3806 = vmatprep.mubr.bf16.mxu0 %v20949_v62  ;;  %v1096_v29 = vpop.f32.mrf.mxu1  ;;  %v1442_v61 = vpop.f32.mrf.mxu0 }
 0x172   : > { %v1671_v38 = vmax.f32 %v1607_v43, 0.0  ;;  %v1608_v22 = vadd.f32 %v16356_v15, %v1532_v20  ;;  %v1533_v19 = vadd.f32 %v1440_v50, %v1095_v34  ;;  %v1097_v6 = vadd.f32 %v1096_v29, %v20973_v1  ;;  %v20979_v43 = vld [vmem:[#allocation12_spill] sm:$0xff]  ;;  %v20980_v1 = vld [vmem:[#allocation13_spill] sm:$0xff] }
 0x173   : > { %v1098_v26 = vpop.f32.mrf.mxu1  ;;  %v1444_v28 = vpop.f32.mrf.mxu0 }
 0x174   : > { %v16581_v3 = vpack.c.bf16 %v1671_v38, %v1669_v48  ;;  %v1672_v9 = vmax.f32 %v1608_v22, 0.0  ;;  %v1534_v41 = vadd.f32 %v1442_v61, %v1097_v6  ;;  %v1099_v52 = vadd.f32 %v1098_v26, %v20975_v31  ;;  %v15288_v61 = vld [vmem:[%s15954_s28 + $0x2a8] sm:$0xff]  }
 0x175   : > { %v1100_v57 = vpop.f32.mrf.mxu1  ;;  %v1446_v60 = vpop.f32.mrf.mxu0  ;;  %v1609_v45 = vadd.f32 %v16352_v18, %v1533_v19  ;;  %v15289_v38 = vld [vmem:[%s15954_s28 + $0x348] sm:$0xff]  }
 0x176   : > { %20974 = vst [vmem:[#allocation7_spill] sm:$0xff] %v16581_v3  ;;  %v1101_v10 = vadd.f32 %v1100_v57, %v20976_v30  ;;  %v16585_v63 = vpack.c.bf16 %v1672_v9, %v1670_v46  ;;  %v1535_v47 = vadd.f32 %v1444_v28, %v1099_v52  ;;  %v1610_v54 = vadd.f32 %v16356_v15, %v1534_v41  ;;  %v20982_v41 = vld [vmem:[#allocation14_spill] sm:$0xff]  ;;  %v15320_v3 = vld [vmem:[%s15954_s28 + $0x3c0] sm:$0xff]  }
 0x177   : > { %v1104_v25 = vpop.f32.mrf.mxu1  ;;  %v1450_v17 = vpop.f32.mrf.mxu0  ;;  %13451 = vmatmul.mubr.msk.bf16.gmra.mxu1 %vm560_vm0, %v15286_v2  ;;  %13619 = vmatmul.mubr.msk.bf16.gmra.mxu0 %vm560_vm0, %v15287_v51  ;;  %v1673_v44 = vmax.f32 %v1609_v45, 0.0 }
 0x178   : > { %20977 = vst [vmem:[#allocation8_spill] sm:$0xff] %v16585_v63  ;;  %v1536_v37 = vadd.f32 %v1446_v60, %v1101_v10  ;;  %v1105_v11 = vadd.f32 %v1104_v25, %v20978_v42  ;;  %2940 = vmatprep.mubr.bf16.mxu1 %v20949_v62  ;;  %3816 = vmatprep.mubr.bf16.mxu0 %v20949_v62  ;;  %v1674_v26 = vmax.f32 %v1610_v54, 0.0 }
 0x179   : > { %v1611_v56 = vadd.f32 %v16352_v18, %v1535_v47  ;;  %v1106_v32 = vpop.f32.mrf.mxu1  ;;  %v1452_v58 = vpop.f32.mrf.mxu0  ;;  %v20984_v47 = vld [vmem:[#allocation15_spill] sm:$0xff] }
 0x17a   : > { %v1612_v12 = vadd.f32 %v16356_v15, %v1536_v37  ;;  %v1537_v50 = vadd.f32 %v1450_v17, %v1105_v11  ;;  %v1107_v20 = vadd.f32 %v1106_v32, %v20979_v43  ;;  %v20985_v32 = vld [vmem:[#allocation16_spill] sm:$0xff]  ;;  %v15290_v43 = vld [vmem:[%s15954_s28 + $0x2b0] sm:$0xff]  }
 0x17b   : > { %v1675_v34 = vmax.f32 %v1611_v56, 0.0  ;;  %v1108_v48 = vpop.f32.mrf.mxu1  ;;  %v1454_v29 = vpop.f32.mrf.mxu0 }
 0x17c   : > { %v1676_v22 = vmax.f32 %v1612_v12, 0.0  ;;  %v1538_v19 = vadd.f32 %v1452_v58, %v1107_v20  ;;  %v1109_v6 = vadd.f32 %v1108_v48, %v20980_v1  ;;  %v1613_v2 = vadd.f32 %v16352_v18, %v1537_v50  ;;  %v15291_v20 = vld [vmem:[%s15954_s28 + $0x350] sm:$0xff]  }
 0x17d   : > { %v16600_v28 = vpack.c.bf16 %v1675_v34, %v1673_v44  ;;  %v1110_v51 = vpop.f32.mrf.mxu1  ;;  %v1456_v46 = vpop.f32.mrf.mxu0  ;;  %v20988_v1 = vld [vmem:[#allocation18_spill] sm:$0xff] }
 0x17e   : > { %v1539_v9 = vadd.f32 %v1454_v29, %v1109_v6  ;;  %v1111_v31 = vadd.f32 %v1110_v51, %v20982_v41  ;;  %v1614_v52 = vadd.f32 %v16356_v15, %v1538_v19  ;;  %v16607_v30 = vpack.c.bf16 %v1676_v22, %v1674_v26 }
 0x17f   : > { %20981 = vst [vmem:[#allocation9_spill] sm:$0xff] %v16600_v28  ;;  %v1114_v57 = vpop.f32.mrf.mxu1  ;;  %v1460_v60 = vpop.f32.mrf.mxu0  ;;  %13452 = vmatmul.mubr.msk.bf16.gmra.mxu1 %vm560_vm0, %v15288_v61  ;;  %13620 = vmatmul.mubr.msk.bf16.gmra.mxu0 %vm560_vm0, %v15289_v38  ;;  %v1677_v17 = vmax.f32 %v1613_v2, 0.0  ;;  %v20987_v61 = vld [vmem:[#allocation17_spill] sm:$0xff] }
 0x180   : > { %20983 = vst [vmem:[#allocation10_spill] sm:$0xff] %v16607_v30  ;;  %v1615_v10 = vadd.f32 %v16352_v18, %v1539_v9  ;;  %v1540_v45 = vadd.f32 %v1456_v46, %v1111_v31  ;;  %v1115_v25 = vadd.f32 %v1114_v57, %v20984_v47  ;;  %2950 = vmatprep.mubr.bf16.mxu1 %v20949_v62  ;;  %v1678_v44 = vmax.f32 %v1614_v52, 0.0  ;;  %v20990_v31 = vld [vmem:[#allocation19_spill] sm:$0xff]  ;;  %v15319_v30 = vld [vmem:[%s15954_s28 + $0x280] sm:$0xff]  }
 0x181   : > { %3826 = vmatprep.mubr.bf16.mxu0 %v20949_v62  ;;  %v1116_v37 = vpop.f32.mrf.mxu1  ;;  %v1462_v42 = vpop.f32.mrf.mxu0 }
 0x182   : > { %v1679_v11 = vmax.f32 %v1615_v10, 0.0  ;;  %v1616_v54 = vadd.f32 %v16356_v15, %v1540_v45  ;;  %v1541_v56 = vadd.f32 %v1460_v60, %v1115_v25  ;;  %v1117_v58 = vadd.f32 %v1116_v37, %v20985_v32  ;;  %v15292_v32 = vld [vmem:[%s15954_s28 + $0x2b8] sm:$0xff]  }
 0x183   : > { %v1118_v12 = vpop.f32.mrf.mxu1  ;;  %v1464_v50 = vpop.f32.mrf.mxu0 }
 0x184   : > { %v16617_v34 = vpack.c.bf16 %v1679_v11, %v1677_v17  ;;  %v1680_v48 = vmax.f32 %v1616_v54, 0.0  ;;  %v1542_v29 = vadd.f32 %v1462_v42, %v1117_v58  ;;  %v1119_v38 = vadd.f32 %v1118_v12, %v20987_v61  ;;  %v20991_v17 = vld [vmem:[#allocation20_spill] sm:$0xff] }
 0x185   : > { %v1120_v22 = vpop.f32.mrf.mxu1  ;;  %v1466_v19 = vpop.f32.mrf.mxu0  ;;  %v1617_v2 = vadd.f32 %v16352_v18, %v1541_v56  ;;  %v15293_v58 = vld [vmem:[%s15954_s28 + $0x358] sm:$0xff]  }
 0x186   : > { %20986 = vst [vmem:[#allocation11_spill] sm:$0xff] %v16617_v34  ;;  %v1121_v6 = vadd.f32 %v1120_v22, %v20988_v1  ;;  %v16621_v26 = vpack.c.bf16 %v1680_v48, %v1678_v44  ;;  %v1543_v51 = vadd.f32 %v1464_v50, %v1119_v38  ;;  %v1618_v57 = vadd.f32 %v16356_v15, %v1542_v29 }
 0x187   : > { %v1124_v46 = vpop.f32.mrf.mxu1  ;;  %v1470_v9 = vpop.f32.mrf.mxu0  ;;  %13453 = vmatmul.mubr.msk.bf16.gmra.mxu1 %vm560_vm0, %v15290_v43  ;;  %13621 = vmatmul.mubr.msk.bf16.gmra.mxu0 %vm560_vm0, %v15291_v20  ;;  %v1681_v42 = vmax.f32 %v1617_v2, 0.0  ;;  %v20992_v43 = vld [vmem:[#allocation21_spill] sm:$0xff] }
 0x188   : > { %20989 = vst [vmem:[#allocation12_spill] sm:$0xff] %v16621_v26  ;;  %v1544_v41 = vadd.f32 %v1466_v19, %v1121_v6  ;;  %v1125_v52 = vadd.f32 %v1124_v46, %v20990_v31  ;;  %2960 = vmatprep.mubr.bf16.mxu1 %v20949_v62  ;;  %3836 = vmatprep.mubr.bf16.mxu0 %v20949_v62  ;;  %v1682_v44 = vmax.f32 %v1618_v57, 0.0  ;;  %v20994_v19 = vld [vmem:[#allocation22_spill] sm:$0xff]  ;;  %v20996_v31 = vld [vmem:[#allocation23_spill] sm:$0xff] }
 0x189   : > { %v1619_v60 = vadd.f32 %v16352_v18, %v1543_v51  ;;  %v1126_v10 = vpop.f32.mrf.mxu1  ;;  %v1472_v45 = vpop.f32.mrf.mxu0 }
 0x18a   : > { %v1620_v47 = vadd.f32 %v16356_v15, %v1544_v41  ;;  %v1545_v25 = vadd.f32 %v1470_v9, %v1125_v52  ;;  %v1127_v37 = vadd.f32 %v1126_v10, %v20991_v17  ;;  %v20997_v17 = vld [vmem:[#allocation24_spill] sm:$0xff] }
 0x18b   : > { %v1683_v11 = vmax.f32 %v1619_v60, 0.0  ;;  %v1128_v54 = vpop.f32.mrf.mxu1  ;;  %v1474_v56 = vpop.f32.mrf.mxu0 }
 0x18c   : > { %v1684_v12 = vmax.f32 %v1620_v47, 0.0  ;;  %v1546_v50 = vadd.f32 %v1472_v45, %v1127_v37  ;;  %v1129_v20 = vadd.f32 %v1128_v54, %v20992_v43  ;;  %v1621_v29 = vadd.f32 %v16352_v18, %v1545_v25  ;;  %v15294_v54 = vld [vmem:[%s15954_s28 + $0x2c0] sm:$0xff]  }
 0x18d   : > { %v16636_v48 = vpack.c.bf16 %v1683_v11, %v1681_v42  ;;  %v1130_v61 = vpop.f32.mrf.mxu1  ;;  %v1476_v38 = vpop.f32.mrf.mxu0  ;;  %v20999_v43 = vld [vmem:[#allocation25_spill] sm:$0xff] }
 0x18e   : > { %v1547_v22 = vadd.f32 %v1474_v56, %v1129_v20  ;;  %v1131_v1 = vadd.f32 %v1130_v61, %v20994_v19  ;;  %v1622_v6 = vadd.f32 %v16356_v15, %v1546_v50  ;;  %v16643_v46 = vpack.c.bf16 %v1684_v12, %v1682_v44  ;;  %v15295_v56 = vld [vmem:[%s15954_s28 + $0x360] sm:$0xff]   ;;  %v21000_v61 = vld [vmem:[#allocation26_spill] sm:$0xff] }
 0x18f   : > { %20993 = vst [vmem:[#allocation13_spill] sm:$0xff] %v16636_v48  ;;  %v1134_v2 = vpop.f32.mrf.mxu1  ;;  %v1480_v51 = vpop.f32.mrf.mxu0  ;;  %13454 = vmatmul.mubr.msk.bf16.gmra.mxu1 %vm560_vm0, %v15292_v32  ;;  %13622 = vmatmul.mubr.msk.bf16.gmra.mxu0 %vm560_vm0, %v15293_v58  ;;  %v1685_v57 = vmax.f32 %v1621_v29, 0.0 }
 0x190   : > { %20995 = vst [vmem:[#allocation14_spill] sm:$0xff] %v16643_v46  ;;  %v1623_v9 = vadd.f32 %v16352_v18, %v1547_v22  ;;  %v1548_v41 = vadd.f32 %v1476_v38, %v1131_v1  ;;  %v1135_v52 = vadd.f32 %v1134_v2, %v20996_v31  ;;  %2970 = vmatprep.mubr.bf16.mxu1 %v20949_v62  ;;  %v1686_v32 = vmax.f32 %v1622_v6, 0.0 }
 0x191   : > { %3846 = vmatprep.mubr.bf16.mxu0 %v20949_v62  ;;  %v1136_v60 = vpop.f32.mrf.mxu1  ;;  %v1482_v10 = vpop.f32.mrf.mxu0 }
 0x192   : > { %v1687_v45 = vmax.f32 %v1623_v9, 0.0  ;;  %v1624_v47 = vadd.f32 %v16356_v15, %v1548_v41  ;;  %v1549_v25 = vadd.f32 %v1480_v51, %v1135_v52  ;;  %v1137_v37 = vadd.f32 %v1136_v60, %v20997_v17 }
 0x193   : > { %v1138_v42 = vpop.f32.mrf.mxu1  ;;  %v1484_v11 = vpop.f32.mrf.mxu0 }
 0x194   : > { %v16653_v58 = vpack.c.bf16 %v1687_v45, %v1685_v57  ;;  %v1688_v12 = vmax.f32 %v1624_v47, 0.0  ;;  %v1550_v50 = vadd.f32 %v1482_v10, %v1137_v37  ;;  %v1139_v20 = vadd.f32 %v1138_v42, %v20999_v43  ;;  %v15299_v37 = vld [vmem:[%s15954_s28 + $0x2c8] sm:$0xff]  }
 0x195   : > { %v1140_v44 = vpop.f32.mrf.mxu1  ;;  %v1486_v29 = vpop.f32.mrf.mxu0  ;;  %v1625_v19 = vadd.f32 %v16352_v18, %v1549_v25  ;;  %v15300_v42 = vld [vmem:[%s15954_s28 + $0x368] sm:$0xff]  }
 0x196   : > { %20998 = vst [vmem:[#allocation15_spill] sm:$0xff] %v16653_v58  ;;  %v1141_v38 = vadd.f32 %v1140_v44, %v21000_v61  ;;  %v16657_v22 = vpack.c.bf16 %v1688_v12, %v1686_v32  ;;  %v1551_v1 = vadd.f32 %v1484_v11, %v1139_v20  ;;  %v1626_v6 = vadd.f32 %v16356_v15, %v1550_v50 }
 0x197   : > { %v2206_v2 = vpop.f32.mrf.mxu1  ;;  %v2547_v51 = vpop.f32.mrf.mxu0  ;;  %13455 = vmatmul.mubr.msk.bf16.gmra.mxu1 %vm560_vm0, %v15294_v54  ;;  %13623 = vmatmul.mubr.msk.bf16.gmra.mxu0 %vm560_vm0, %v15295_v56  ;;  %v1689_v45 = vmax.f32 %v1625_v19, 0.0 }
 0x198   : > { %21001 = vst [vmem:[#allocation16_spill] sm:$0xff] %v16657_v22  ;;  %v1552_v9 = vadd.f32 %v1486_v29, %v1141_v38  ;;  %v16663_v41 = vadd.f32 %v2547_v51, %v2206_v2  ;;  %2980 = vmatprep.mubr.bf16.mxu1 %v20949_v62  ;;  %3856 = vmatprep.mubr.bf16.mxu0 %v20949_v62  ;;  %v1690_v11 = vmax.f32 %v1626_v6, 0.0  ;;  %v15301_v2 = vld [vmem:[%s15954_s28 + $0x2d0] sm:$0xff]  }
 0x199   : > { %v1627_v31 = vadd.f32 %v16352_v18, %v1551_v1  ;;  %v2208_v52 = vpop.f32.mrf.mxu1  ;;  %v2549_v57 = vpop.f32.mrf.mxu0  ;;  %v15302_v51 = vld [vmem:[%s15954_s28 + $0x370] sm:$0xff]  }
 0x19a   : > { %v1628_v60 = vadd.f32 %v16356_v15, %v1552_v9  ;;  %v16669_v10 = vadd.f32 %v2549_v57, %v2208_v52 }
 0x19b   : > { %v1691_v47 = vmax.f32 %v1627_v31, 0.0  ;;  %v2210_v25 = vpop.f32.mrf.mxu1  ;;  %v2551_v17 = vpop.f32.mrf.mxu0 }
 0x19c   : > { %v1692_v54 = vmax.f32 %v1628_v60, 0.0  ;;  %v16673_v56 = vadd.f32 %v2551_v17, %v2210_v25 }
 0x19d   : > { %v16675_v32 = vpack.c.bf16 %v1691_v47, %v1689_v45  ;;  %v2212_v12 = vpop.f32.mrf.mxu1  ;;  %v2553_v18 = vpop.f32.mrf.mxu0 }
 0x19e   : > { %v16677_v50 = vadd.f32 %v2553_v18, %v2212_v12  ;;  %v16679_v15 = vpack.c.bf16 %v1692_v54, %v1690_v11  ;;  %v15303_v11 = vld [vmem:[%s15954_s28 + $0x2d8] sm:$0xff]  }
 0x19f   : > { %21002 = vst [vmem:[#allocation17_spill] sm:$0xff] %v16675_v32  ;;  %v2216_v43 = vpop.f32.mrf.mxu1  ;;  %v2557_v20 = vpop.f32.mrf.mxu0  ;;  %13456 = vmatmul.mubr.msk.bf16.gmra.mxu1 %vm560_vm0, %v15299_v37  ;;  %13624 = vmatmul.mubr.msk.bf16.gmra.mxu0 %vm560_vm0, %v15300_v42  ;;  %v15304_v54 = vld [vmem:[%s15954_s28 + $0x378] sm:$0xff]  }
 0x1a0   : > { %21003 = vst [vmem:[#allocation18_spill] sm:$0xff] %v16679_v15  ;;  %v16683_v44 = vadd.f32 %v2557_v20, %v2216_v43  ;;  %2990 = vmatprep.mubr.bf16.mxu1 %v20949_v62  ;;  %3866 = vmatprep.mubr.bf16.mxu0 %v20949_v62 }
 0x1a1   : > { %v2218_v29 = vpop.f32.mrf.mxu1  ;;  %v2559_v61 = vpop.f32.mrf.mxu0 }
 0x1a2   : > { %v16687_v38 = vadd.f32 %v2559_v61, %v2218_v29 }
 0x1a3   : > { %v2220_v19 = vpop.f32.mrf.mxu1  ;;  %v2561_v1 = vpop.f32.mrf.mxu0 }
 0x1a4   : > { %v16691_v6 = vadd.f32 %v2561_v1, %v2220_v19 }
 0x1a5   : > { %v2222_v9 = vpop.f32.mrf.mxu1  ;;  %v2563_v31 = vpop.f32.mrf.mxu0 }
 0x1a6   : > { %v16693_v52 = vadd.f32 %v2563_v31, %v2222_v9 }
 0x1a7   : > { %v2226_v57 = vpop.f32.mrf.mxu1  ;;  %v2567_v60 = vpop.f32.mrf.mxu0  ;;  %13457 = vmatmul.mubr.msk.bf16.gmra.mxu1 %vm560_vm0, %v15301_v2  ;;  %13625 = vmatmul.mubr.msk.bf16.gmra.mxu0 %vm560_vm0, %v15302_v51 }
 0x1a8   : > { %v16697_v45 = vadd.f32 %v2567_v60, %v2226_v57  ;;  %3000 = vmatprep.mubr.bf16.mxu1 %v20949_v62  ;;  %3876 = vmatprep.mubr.bf16.mxu0 %v20949_v62  ;;  %v15305_v57 = vld [vmem:[%s15954_s28 + $0x2e0] sm:$0xff]  }
 0x1a9   : > { %v2228_v47 = vpop.f32.mrf.mxu1  ;;  %v2569_v25 = vpop.f32.mrf.mxu0  ;;  %v15306_v60 = vld [vmem:[%s15954_s28 + $0x380] sm:$0xff]  }
 0x1aa   : > { %v16701_v17 = vadd.f32 %v2569_v25, %v2228_v47 }
 0x1ab   : > { %v2230_v37 = vpop.f32.mrf.mxu1  ;;  %v2571_v42 = vpop.f32.mrf.mxu0 }
 0x1ac   : > { %v16705_v12 = vadd.f32 %v2571_v42, %v2230_v37 }
 0x1ad   : > { %v2232_v18 = vpop.f32.mrf.mxu1  ;;  %v2573_v43 = vpop.f32.mrf.mxu0 }
 0x1ae   : > { %v16707_v20 = vadd.f32 %v2573_v43, %v2232_v18 }
 0x1af   : > { %v2236_v29 = vpop.f32.mrf.mxu1  ;;  %v2577_v61 = vpop.f32.mrf.mxu0  ;;  %13458 = vmatmul.mubr.msk.bf16.gmra.mxu1 %vm560_vm0, %v15303_v11  ;;  %13626 = vmatmul.mubr.msk.bf16.gmra.mxu0 %vm560_vm0, %v15304_v54 }
 0x1b0   : > { %v16711_v19 = vadd.f32 %v2577_v61, %v2236_v29  ;;  %3010 = vmatprep.mubr.bf16.mxu1 %v20949_v62  ;;  %3886 = vmatprep.mubr.bf16.mxu0 %v20949_v62 }
 0x1b1   : > { %v2238_v1 = vpop.f32.mrf.mxu1  ;;  %v2579_v2 = vpop.f32.mrf.mxu0 }
 0x1b2   : > { %v16715_v51 = vadd.f32 %v2579_v2, %v2238_v1 }
 0x1b3   : > { %v2240_v9 = vpop.f32.mrf.mxu1  ;;  %v2581_v31 = vpop.f32.mrf.mxu0 }
 0x1b4   : > { %v16719_v47 = vadd.f32 %v2581_v31, %v2240_v9  ;;  %v15307_v9 = vld [vmem:[%s15954_s28 + $0x2e8] sm:$0xff]  }
 0x1b5   : > { %v2242_v25 = vpop.f32.mrf.mxu1  ;;  %v2583_v37 = vpop.f32.mrf.mxu0  ;;  %v15308_v31 = vld [vmem:[%s15954_s28 + $0x388] sm:$0xff]  }
 0x1b6   : > { %v16721_v42 = vadd.f32 %v2583_v37, %v2242_v25 }
 0x1b7   : > { %v2246_v11 = vpop.f32.mrf.mxu1  ;;  %v2587_v54 = vpop.f32.mrf.mxu0  ;;  %13459 = vmatmul.mubr.msk.bf16.gmra.mxu1 %vm560_vm0, %v15305_v57  ;;  %13627 = vmatmul.mubr.msk.bf16.gmra.mxu0 %vm560_vm0, %v15306_v60 }
 0x1b8   : > { %v16725_v18 = vadd.f32 %v2587_v54, %v2246_v11  ;;  %3020 = vmatprep.mubr.bf16.mxu1 %v20949_v62  ;;  %3896 = vmatprep.mubr.bf16.mxu0 %v20949_v62 }
 0x1b9   : > { %v2248_v43 = vpop.f32.mrf.mxu1  ;;  %v2589_v29 = vpop.f32.mrf.mxu0 }
 0x1ba   : > { %v16729_v61 = vadd.f32 %v2589_v29, %v2248_v43 }
 0x1bb   : > { %v2250_v1 = vpop.f32.mrf.mxu1  ;;  %v2591_v2 = vpop.f32.mrf.mxu0 }
 0x1bc   : > { %v16733_v25 = vadd.f32 %v2591_v2, %v2250_v1 }
 0x1bd   : > { %v2252_v57 = vpop.f32.mrf.mxu1  ;;  %v2593_v60 = vpop.f32.mrf.mxu0 }
 0x1be   : > { %v16735_v37 = vadd.f32 %v2593_v60, %v2252_v57  ;;  %v15309_v57 = vld [vmem:[%s15954_s28 + $0x2f0] sm:$0xff]  }
 0x1bf   : > { %v2256_v11 = vpop.f32.mrf.mxu1  ;;  %v2597_v54 = vpop.f32.mrf.mxu0  ;;  %13460 = vmatmul.mubr.msk.bf16.gmra.mxu1 %vm560_vm0, %v15307_v9  ;;  %13628 = vmatmul.mubr.msk.bf16.gmra.mxu0 %vm560_vm0, %v15308_v31  ;;  %v15310_v60 = vld [vmem:[%s15954_s28 + $0x390] sm:$0xff]  }
 0x1c0   : > { %v16739_v43 = vadd.f32 %v2597_v54, %v2256_v11  ;;  %3030 = vmatprep.mubr.bf16.mxu1 %v20949_v62  ;;  %3906 = vmatprep.mubr.bf16.mxu0 %v20949_v62 }
 0x1c1   : > { %v2258_v29 = vpop.f32.mrf.mxu1  ;;  %v2599_v1 = vpop.f32.mrf.mxu0 }
 0x1c2   : > { %v16743_v2 = vadd.f32 %v2599_v1, %v2258_v29 }
 0x1c3   : > { %v2260_v32 = vpop.f32.mrf.mxu1  ;;  %v2601_v15 = vpop.f32.mrf.mxu0 }
 0x1c4   : > { %v16747_v58 = vadd.f32 %v2601_v15, %v2260_v32 }
 0x1c5   : > { %v2262_v9 = vpop.f32.mrf.mxu1  ;;  %v2603_v31 = vpop.f32.mrf.mxu0 }
 0x1c6   : > { %v16749_v11 = vadd.f32 %v2603_v31, %v2262_v9  ;;  %v15311_v9 = vld [vmem:[%s15954_s28 + $0x2f8] sm:$0xff]  }
 0x1c7   : > { %v2266_v54 = vpop.f32.mrf.mxu1  ;;  %v2607_v22 = vpop.f32.mrf.mxu0  ;;  %13461 = vmatmul.mubr.msk.bf16.gmra.mxu1 %vm560_vm0, %v15309_v57  ;;  %13629 = vmatmul.mubr.msk.bf16.gmra.mxu0 %vm560_vm0, %v15310_v60  ;;  %v15312_v31 = vld [vmem:[%s15954_s28 + $0x398] sm:$0xff]  }
 0x1c8   : > { %v16753_v29 = vadd.f32 %v2607_v22, %v2266_v54  ;;  %3040 = vmatprep.mubr.bf16.mxu1 %v20949_v62  ;;  %3916 = vmatprep.mubr.bf16.mxu0 %v20949_v62  ;;  %v15359_v22 = vld [vmem:[%s20844_s1 + $0x14] ss:$8 sps:$4 sm:$0xff]  }
 0x1c9   : > { %v2268_v32 = vpop.f32.mrf.mxu1  ;;  %v2609_v15 = vpop.f32.mrf.mxu0  ;;  %5648 = vmatprep.subr.bf16.mxu0 %v15359_v22  ;;  %v15357_v22 = vld [vmem:[%s20844_s1 + $0x10] ss:$8 sps:$4 sm:$0xff]  }
 0x1ca   : > { %v16757_v1 = vadd.f32 %v2609_v15, %v2268_v32 }
 0x1cb   : > { %v2270_v48 = vpop.f32.mrf.mxu1  ;;  %v2611_v46 = vpop.f32.mrf.mxu0 }
 0x1cc   : > { %v16761_v34 = vadd.f32 %v2611_v46, %v2270_v48 }
 0x1cd   : > { %v2272_v26 = vpop.f32.mrf.mxu1  ;;  %v2613_v57 = vpop.f32.mrf.mxu0 }
 0x1ce   : > { %v16763_v60 = vadd.f32 %v2613_v57, %v2272_v26 }
 0x1cf   : > { %v2276_v54 = vpop.f32.mrf.mxu1  ;;  %v2617_v28 = vpop.f32.mrf.mxu0  ;;  %13462 = vmatmul.mubr.msk.bf16.gmra.mxu1 %vm560_vm0, %v15311_v9  ;;  %13630 = vmatmul.mubr.msk.bf16.gmra.mxu0 %vm560_vm0, %v15312_v31 }
 0x1d0   : > { %v16770_v32 = vadd.f32 %v2617_v28, %v2276_v54  ;;  %4107 = vmatprep.mubr.bf16.mxu1 %v20949_v62  ;;  %4452 = vmatprep.mubr.bf16.mxu0 %v20949_v62  ;;  %v15321_v28 = vld [vmem:[%s20844_s1 + $0x30] ss:$8 sps:$4 sm:$0xff]   ;;  %v15342_v54 = vld [vmem:[%s20844_s1 + $0x24] ss:$8 sps:$4 sm:$0xff]  }
 0x1d1   : > { %v2278_v48 = vpop.f32.mrf.mxu1  ;;  %v2619_v26 = vpop.f32.mrf.mxu0 }
 0x1d2   : > { %v16774_v46 = vadd.f32 %v2619_v26, %v2278_v48 }
 0x1d3   : > { %v2280_v15 = vpop.f32.mrf.mxu1  ;;  %v2621_v57 = vpop.f32.mrf.mxu0 }
 0x1d4   : > { %v16778_v63 = vadd.f32 %v2621_v57, %v2280_v15  ;;  %v15362_v15 = vld [vmem:[%s20844_s1 + $0x4] ss:$8 sps:$4 sm:$0xff]  }
 0x1d5   : > { %v2282_v9 = vpop.f32.mrf.mxu1  ;;  %v2623_v31 = vpop.f32.mrf.mxu0 }
 0x1d6   : > { %v16786_v27 = vadd.f32 %v2623_v31, %v2282_v9  ;;  %v15340_v9 = vld [vmem:[%s20844_s1 + $0x20] ss:$8 sps:$4 sm:$0xff]  }
 0x1d7   : > { %v2286_v48 = vpop.f32.mrf.mxu1  ;;  %v2627_v26 = vpop.f32.mrf.mxu0  ;;  %13651 = vmatmul.mubr.msk.bf16.vlgmr.msra.gmra.mxu1 %vm560_vm0, %v15319_v30  ;;  %13691 = vmatmul.mubr.msk.bf16.vlgmr.msra.gmra.mxu0 %vm560_vm0, %v15320_v3  ;;  %v15360_v30 = vld [vmem:[%s20844_s1] ss:$8 sps:$4 sm:$0xff]  }
 0x1d8   : > { %v16796_v57 = vadd.f32 %v2627_v26, %v2286_v48  ;;  %5308 = vmatpush1.bf16.msra.mxu1 %v15321_v28  ;;  %4117 = vmatprep.mubr.bf16.mxu1 %v20949_v62  ;;  %v15324_v26 = vld [vmem:[%s15954_s28 + $0x288] sm:$0xff]  }
 0x1d9   : > { %v2288_v31 = vpop.f32.mrf.mxu1  ;;  %v2629_v49 = vpop.f32.mrf.mxu0  ;;  %4462 = vmatprep.mubr.bf16.mxu0 %v20949_v62  ;;  %5309 = vmatprep.subr.bf16.mxu1 %v15342_v54 }
 0x1da   : > { %v16803_v3 = vadd.f32 %v2629_v49, %v2288_v31  ;;  %5649 = vmatpush1.bf16.msra.mxu0 %v15357_v22 }
 0x1db   : > { %v2290_v48 = vpop.f32.mrf.mxu1  ;;  %v2631_v28 = vpop.f32.mrf.mxu0  ;;  %5650 = vmatprep.subr.bf16.mxu0 %v15362_v15 }
 0x1dc   : > { %v16810_v39 = vadd.f32 %v2631_v28, %v2290_v48  ;;  %5310 = vmatpush1.bf16.msra.mxu1 %v15340_v9 }
 0x1dd   : > { %v2292_v53 = vpop.f32.mrf.mxu1  ;;  %v2633_v14 = vpop.f32.mrf.mxu0  ;;  %5993 = vmatprep.subr.bf16.mxu1 %v16472_v59 }
 0x1de   : > { %v16813_v49 = vadd.f32 %v2633_v14, %v2292_v53  ;;  %5651 = vmatpush1.bf16.msra.mxu0 %v15360_v30  ;;  %v15326_v14 = vld [vmem:[%s15954_s28 + $0x290] sm:$0xff]  }
 0x1df   : > { %v2296_v54 = vpop.f32.mrf.mxu1  ;;  %v2637_v22 = vpop.f32.mrf.mxu0  ;;  %13652 = vmatmul.mubr.msk.bf16.gmra.mxu1 %vm560_vm0, %v15324_v26  ;;  %13692 = vmatmul.mubr.msk.bf16.gmra.mxu0 %vm560_vm0, %v15325_v5  ;;  %v15327_v30 = vld [vmem:[%s15954_s28 + $0x3d0] sm:$0xff]  }
 0x1e0   : > { %v16817_v31 = vadd.f32 %v2637_v22, %v2296_v54  ;;  %4127 = vmatprep.mubr.bf16.mxu1 %v20949_v62  ;;  %4472 = vmatprep.mubr.bf16.mxu0 %v20949_v62 }
 0x1e1   : > { %v2298_v15 = vpop.f32.mrf.mxu1  ;;  %v2639_v9 = vpop.f32.mrf.mxu0 }
 0x1e2   : > { %v16821_v48 = vadd.f32 %v2639_v9, %v2298_v15 }
 0x1e3   : > { %v2300_v59 = vpop.f32.mrf.mxu1  ;;  %v2641_v53 = vpop.f32.mrf.mxu0 }
 0x1e4   : > { %v16825_v28 = vadd.f32 %v2641_v53, %v2300_v59 }
 0x1e5   : > { %v2302_v26 = vpop.f32.mrf.mxu1  ;;  %v2643_v5 = vpop.f32.mrf.mxu0 }
 0x1e6   : > { %v16827_v54 = vadd.f32 %v2643_v5, %v2302_v26  ;;  %v15328_v26 = vld [vmem:[%s15954_s28 + $0x298] sm:$0xff]  }
 0x1e7   : > { %v2306_v22 = vpop.f32.mrf.mxu1  ;;  %v2647_v13 = vpop.f32.mrf.mxu0  ;;  %13653 = vmatmul.mubr.msk.bf16.gmra.mxu1 %vm560_vm0, %v15326_v14  ;;  %13693 = vmatmul.mubr.msk.bf16.gmra.mxu0 %vm560_vm0, %v15327_v30  ;;  %v15329_v5 = vld [vmem:[%s15954_s28 + $0x3d8] sm:$0xff]  }
 0x1e8   : > { %v16831_v15 = vadd.f32 %v2647_v13, %v2306_v22  ;;  %4137 = vmatprep.mubr.bf16.mxu1 %v20949_v62  ;;  %4482 = vmatprep.mubr.bf16.mxu0 %v20949_v62 }
 0x1e9   : > { %v2308_v9 = vpop.f32.mrf.mxu1  ;;  %v2649_v59 = vpop.f32.mrf.mxu0 }
 0x1ea   : > { %v16835_v53 = vadd.f32 %v2649_v59, %v2308_v9 }
 0x1eb   : > { %v2310_v7 = vpop.f32.mrf.mxu1  ;;  %v2651_v16 = vpop.f32.mrf.mxu0 }
 0x1ec   : > { %v16839_v24 = vadd.f32 %v2651_v16, %v2310_v7 }
 0x1ed   : > { %v2312_v14 = vpop.f32.mrf.mxu1  ;;  %v2653_v30 = vpop.f32.mrf.mxu0 }
 0x1ee   : > { %v16841_v13 = vadd.f32 %v2653_v30, %v2312_v14  ;;  %v15330_v14 = vld [vmem:[%s15954_s28 + $0x2a0] sm:$0xff]  }
 0x1ef   : > { %v2316_v22 = vpop.f32.mrf.mxu1  ;;  %v2657_v0 = vpop.f32.mrf.mxu0  ;;  %13654 = vmatmul.mubr.msk.bf16.gmra.mxu1 %vm560_vm0, %v15328_v26  ;;  %13694 = vmatmul.mubr.msk.bf16.gmra.mxu0 %vm560_vm0, %v15329_v5  ;;  %v15331_v30 = vld [vmem:[%s15954_s28 + $0x3e0] sm:$0xff]  }
 0x1f0   : > { %v16845_v9 = vadd.f32 %v2657_v0, %v2316_v22  ;;  %4147 = vmatprep.mubr.bf16.mxu1 %v20949_v62  ;;  %4492 = vmatprep.mubr.bf16.mxu0 %v20949_v62 }
 0x1f1   : > { %v2318_v16 = vpop.f32.mrf.mxu1  ;;  %v2659_v7 = vpop.f32.mrf.mxu0 }
 0x1f2   : > { %v16849_v59 = vadd.f32 %v2659_v7, %v2318_v16 }
 0x1f3   : > { %v2320_v33 = vpop.f32.mrf.mxu1  ;;  %v2661_v4 = vpop.f32.mrf.mxu0 }
 0x1f4   : > { %v16853_v55 = vadd.f32 %v2661_v4, %v2320_v33 }
 0x1f5   : > { %v2322_v26 = vpop.f32.mrf.mxu1  ;;  %v2663_v5 = vpop.f32.mrf.mxu0 }
 0x1f6   : > { %21004 = vst [vmem:[#allocation19_spill] sm:$0xff] %v16853_v55  ;;  %v16855_v0 = vadd.f32 %v2663_v5, %v2322_v26  ;;  %v15332_v26 = vld [vmem:[%s15954_s28 + $0x2a8] sm:$0xff]  }
 0x1f7   : > { %v2326_v22 = vpop.f32.mrf.mxu1  ;;  %v2667_v40 = vpop.f32.mrf.mxu0  ;;  %13655 = vmatmul.mubr.msk.bf16.gmra.mxu1 %vm560_vm0, %v15330_v14  ;;  %13695 = vmatmul.mubr.msk.bf16.gmra.mxu0 %vm560_vm0, %v15331_v30  ;;  %v15333_v5 = vld [vmem:[%s15954_s28 + $0x3e8] sm:$0xff]  }
 0x1f8   : > { %21005 = vst [vmem:[#allocation20_spill] sm:$0xff] %v16855_v0  ;;  %v16859_v16 = vadd.f32 %v2667_v40, %v2326_v22  ;;  %4157 = vmatprep.mubr.bf16.mxu1 %v20949_v62  ;;  %4502 = vmatprep.mubr.bf16.mxu0 %v20949_v62 }
 0x1f9   : > { %v2328_v4 = vpop.f32.mrf.mxu1  ;;  %v2669_v33 = vpop.f32.mrf.mxu0 }
 0x1fa   : > { %21006 = vst [vmem:[#allocation21_spill] sm:$0xff] %v16859_v16  ;;  %v16863_v7 = vadd.f32 %v2669_v33, %v2328_v4 }
 0x1fb   : > { %v2330_v21 = vpop.f32.mrf.mxu1  ;;  %v2671_v8 = vpop.f32.mrf.mxu0 }
 0x1fc   : > { %21007 = vst [vmem:[#allocation22_spill] sm:$0xff] %v16863_v7  ;;  %v16867_v35 = vadd.f32 %v2671_v8, %v2330_v21 }
 0x1fd   : > { %v2332_v14 = vpop.f32.mrf.mxu1  ;;  %v2673_v30 = vpop.f32.mrf.mxu0 }
 0x1fe   : > { %21008 = vst [vmem:[#allocation23_spill] sm:$0xff] %v16867_v35  ;;  %v16869_v40 = vadd.f32 %v2673_v30, %v2332_v14  ;;  %v15334_v14 = vld [vmem:[%s15954_s28 + $0x2b0] sm:$0xff]  }
 0x1ff   : > { %v2336_v22 = vpop.f32.mrf.mxu1  ;;  %v2677_v23 = vpop.f32.mrf.mxu0  ;;  %13656 = vmatmul.mubr.msk.bf16.gmra.mxu1 %vm560_vm0, %v15332_v26  ;;  %13696 = vmatmul.mubr.msk.bf16.gmra.mxu0 %vm560_vm0, %v15333_v5  ;;  %v15335_v30 = vld [vmem:[%s15954_s28 + $0x3f0] sm:$0xff]  }
 0x200   : > { %21009 = vst [vmem:[#allocation24_spill] sm:$0xff] %v16869_v40  ;;  %v16873_v4 = vadd.f32 %v2677_v23, %v2336_v22  ;;  %4167 = vmatprep.mubr.bf16.mxu1 %v20949_v62  ;;  %4512 = vmatprep.mubr.bf16.mxu0 %v20949_v62 }
 0x201   : > { %v2338_v8 = vpop.f32.mrf.mxu1  ;;  %v2679_v21 = vpop.f32.mrf.mxu0 }
 0x202   : > { %21010 = vst [vmem:[#allocation25_spill] sm:$0xff] %v16873_v4  ;;  %v16877_v33 = vadd.f32 %v2679_v21, %v2338_v8 }
 0x203   : > { %v2340_v36 = vpop.f32.mrf.mxu1  ;;  %v2681_v35 = vpop.f32.mrf.mxu0 }
 0x204   : > { %21011 = vst [vmem:[#allocation26_spill] sm:$0xff] %v16877_v33  ;;  %v16881_v40 = vadd.f32 %v2681_v35, %v2340_v36 }
 0x205   : > { %v2342_v26 = vpop.f32.mrf.mxu1  ;;  %v2683_v5 = vpop.f32.mrf.mxu0 }
 0x206   : > { %21012 = vst [vmem:[#allocation47_spill] sm:$0xff] %v16881_v40  ;;  %v16883_v23 = vadd.f32 %v2683_v5, %v2342_v26  ;;  %v15336_v26 = vld [vmem:[%s15954_s28 + $0x2b8] sm:$0xff]  }
 0x207   : > { %v2346_v22 = vpop.f32.mrf.mxu1  ;;  %v2687_v4 = vpop.f32.mrf.mxu0  ;;  %13657 = vmatmul.mubr.msk.bf16.gmra.mxu1 %vm560_vm0, %v15334_v14  ;;  %13697 = vmatmul.mubr.msk.bf16.gmra.mxu0 %vm560_vm0, %v15335_v30  ;;  %v15337_v5 = vld [vmem:[%s15954_s28 + $0x3f8] sm:$0xff]  }
 0x208   : > { %21013 = vst [vmem:[#allocation48_spill] sm:$0xff] %v16883_v23  ;;  %v16887_v8 = vadd.f32 %v2687_v4, %v2346_v22  ;;  %4177 = vmatprep.mubr.bf16.mxu1 %v20949_v62  ;;  %4522 = vmatprep.mubr.bf16.mxu0 %v20949_v62 }
 0x209   : > { %v2348_v36 = vpop.f32.mrf.mxu1  ;;  %v2689_v35 = vpop.f32.mrf.mxu0 }
 0x20a   : > { %21014 = vst [vmem:[#allocation49_spill] sm:$0xff] %v16887_v8  ;;  %v16891_v21 = vadd.f32 %v2689_v35, %v2348_v36 }
 0x20b   : > { %v2350_v40 = vpop.f32.mrf.mxu1  ;;  %v2691_v33 = vpop.f32.mrf.mxu0 }
 0x20c   : > { %21015 = vst [vmem:[#allocation50_spill] sm:$0xff] %v16891_v21  ;;  %v16895_v23 = vadd.f32 %v2691_v33, %v2350_v40 }
 0x20d   : > { %v2352_v14 = vpop.f32.mrf.mxu1  ;;  %v2693_v30 = vpop.f32.mrf.mxu0 }
 0x20e   : > { %21016 = vst [vmem:[#allocation51_spill] sm:$0xff] %v16895_v23  ;;  %v16897_v4 = vadd.f32 %v2693_v30, %v2352_v14  ;;  %v15338_v14 = vld [vmem:[%s15954_s28 + $0x2c0] sm:$0xff]  }
 0x20f   : > { %v2356_v22 = vpop.f32.mrf.mxu1  ;;  %v2697_v8 = vpop.f32.mrf.mxu0  ;;  %13658 = vmatmul.mubr.msk.bf16.gmra.mxu1 %vm560_vm0, %v15336_v26  ;;  %13698 = vmatmul.mubr.msk.bf16.gmra.mxu0 %vm560_vm0, %v15337_v5  ;;  %v15339_v30 = vld [vmem:[%s15954_s28 + $0x400] sm:$0xff]  }
 0x210   : > { %21017 = vst [vmem:[#allocation52_spill] sm:$0xff] %v16897_v4  ;;  %v16901_v36 = vadd.f32 %v2697_v8, %v2356_v22  ;;  %4187 = vmatprep.mubr.bf16.mxu1 %v20949_v62  ;;  %4532 = vmatprep.mubr.bf16.mxu0 %v20949_v62  ;;  %v3115_v8 = vld [vmem:[%s20845_s2] sm:$0x3]  ;;  %v15386_v22 = vld [vmem:[%s20846_s3 + $0x174] ss:$8 sps:$4 sm:$0xff]  }
 0x211   : > { %v2358_v40 = vpop.f32.mrf.mxu1  ;;  %v2699_v33 = vpop.f32.mrf.mxu0  ;;  %7083 = vmatprep.subr.bf16.mxu0 %v15386_v22 }
 0x212   : > { %21018 = vst [vmem:[#allocation53_spill] sm:$0xff] %v16901_v36  ;;  %v16905_v35 = vadd.f32 %v2699_v33, %v2358_v40 }
 0x213   : > { %v2360_v23 = vpop.f32.mrf.mxu1  ;;  %v2701_v21 = vpop.f32.mrf.mxu0 }
 0x214   : > { %21019 = vst [vmem:[#allocation54_spill] sm:$0xff] %v16905_v35  ;;  %v16909_v4 = vadd.f32 %v2701_v21, %v2360_v23  ;;  %v21023_v21 = vld [vmem:[#allocation27_spill] sm:$0xff] }
 0x215   : > { %v2362_v7 = vpop.f32.mrf.mxu1  ;;  %v2703_v26 = vpop.f32.mrf.mxu0 }
 0x216   : > { %21020 = vst [vmem:[#allocation55_spill] sm:$0xff] %v16909_v4  ;;  %v16914_v5 = vadd.f32 %v2703_v26, %v2362_v7  ;;  %v16925_v4 = vrot.slane %v3115_v8, %v21023_v21 }
 0x217   : > { %v2892_v40 = vpop.f32.mrf.mxu1  ;;  %v16919_v33 = vpop.f32.mrf.mxu0  ;;  %13659 = vmatmul.mubr.msk.bf16.gmra.mxu1 %vm560_vm0, %v15338_v14  ;;  %13699 = vmatmul.mubr.msk.bf16.gmra.mxu0 %vm560_vm0, %v15339_v30 }
 0x218   : > { %21021 = vst [vmem:[#allocation56_spill] sm:$0xff] %v16914_v5  ;;  %21022 = vst [vmem:[#allocation57_spill] sm:$0xff] %v16919_v33  ;;  %v3051_v23 = vadd.f32 %v2892_v40, %v16663_v41  ;;  %4197 = vmatprep.mubr.bf16.mxu1 %v20949_v62  ;;  %4542 = vmatprep.mubr.bf16.mxu0 %v20949_v62  ;;  %v21025_v33 = vld [vmem:[#allocation28_spill] sm:$0xff]  ;;  %v15343_v41 = vld [vmem:[%s15954_s28 + $0x2c8] sm:$0xff]  }
 0x219   : > { %v2894_v7 = vpop.f32.mrf.mxu1  ;;  %v16929_v26 = vpop.f32.mrf.mxu0  ;;  %v16933_v35 = vrot.slane %v3115_v8, %v21025_v33  ;;  %v15344_v40 = vld [vmem:[%s15954_s28 + $0x408] sm:$0xff]  }
 0x21a   : > { %21024 = vst [vmem:[#allocation58_spill] sm:$0xff] %v16929_v26  ;;  %v3052_v5 = vadd.f32 %v2894_v7, %v16669_v10  ;;  %v3127_v21 = vadd.f32 %v16925_v4, %v3051_v23 }
 0x21b   : > { %v2896_v14 = vpop.f32.mrf.mxu1  ;;  %v16935_v30 = vpop.f32.mrf.mxu0 }
 0x21c   : > { %21026 = vst [vmem:[#allocation59_spill] sm:$0xff] %v16935_v30  ;;  %v3053_v36 = vadd.f32 %v2896_v14, %v16673_v56  ;;  %v3128_v26 = vadd.f32 %v16933_v35, %v3052_v5  ;;  %v3191_v23 = vmax.f32 %v3127_v21, 0.0 }
 0x21d   : > { %v2898_v16 = vpop.f32.mrf.mxu1  ;;  %v16941_v0 = vpop.f32.mrf.mxu0 }
 0x21e   : > { %21027 = vst [vmem:[#allocation60_spill] sm:$0xff] %v16941_v0  ;;  %v3129_v22 = vadd.f32 %v16925_v4, %v3053_v36  ;;  %v3054_v10 = vadd.f32 %v2898_v16, %v16677_v50  ;;  %v3192_v36 = vmax.f32 %v3128_v26, 0.0 }
 0x21f   : > { %v2902_v8 = vpop.f32.mrf.mxu1  ;;  %v16946_v7 = vpop.f32.mrf.mxu0  ;;  %13660 = vmatmul.mubr.msk.bf16.gmra.mxu1 %vm560_vm0, %v15343_v41  ;;  %13700 = vmatmul.mubr.msk.bf16.gmra.mxu0 %vm560_vm0, %v15344_v40 }
 0x220   : > { %21028 = vst [vmem:[#allocation61_spill] sm:$0xff] %v16946_v7  ;;  %v3193_v56 = vmax.f32 %v3129_v22, 0.0  ;;  %v3130_v14 = vadd.f32 %v16933_v35, %v3054_v10  ;;  %v3055_v0 = vadd.f32 %v2902_v8, %v16683_v44  ;;  %4207 = vmatprep.mubr.bf16.mxu1 %v20949_v62  ;;  %4552 = vmatprep.mubr.bf16.mxu0 %v20949_v62  ;;  %v15345_v22 = vld [vmem:[%s15954_s28 + $0x2d0] sm:$0xff]  }
 0x221   : > { %v2904_v50 = vpop.f32.mrf.mxu1  ;;  %v16954_v16 = vpop.f32.mrf.mxu0  ;;  %v15346_v10 = vld [vmem:[%s15954_s28 + $0x410] sm:$0xff]  }
 0x222   : > { %v16956_v5 = vpack.c.bf16 %v3193_v56, %v3191_v23  ;;  %v3194_v41 = vmax.f32 %v3130_v14, 0.0  ;;  %v3056_v40 = vadd.f32 %v2904_v50, %v16687_v38  ;;  %v3131_v44 = vadd.f32 %v16925_v4, %v3055_v0 }
 0x223   : > { %v2906_v7 = vpop.f32.mrf.mxu1  ;;  %v16959_v21 = vpop.f32.mrf.mxu0 }
 0x224   : > { %21029 = vst [vmem:[#allocation62_spill] sm:$0xff] %v16956_v5  ;;  %v3057_v8 = vadd.f32 %v2906_v7, %v16691_v6  ;;  %v16965_v30 = vpack.c.bf16 %v3194_v41, %v3192_v36  ;;  %v3132_v26 = vadd.f32 %v16933_v35, %v3056_v40  ;;  %v3195_v6 = vmax.f32 %v3131_v44, 0.0 }
 0x225   : > { %v2908_v33 = vpop.f32.mrf.mxu1  ;;  %v16967_v55 = vpop.f32.mrf.mxu0 }
 0x226   : > { %21030 = vst [vmem:[#allocation63_spill] sm:$0xff] %v16965_v30  ;;  %v3133_v23 = vadd.f32 %v16925_v4, %v3057_v8  ;;  %v3058_v38 = vadd.f32 %v2908_v33, %v16693_v52  ;;  %v3196_v36 = vmax.f32 %v3132_v26, 0.0  ;;  %v15347_v8 = vld [vmem:[%s15954_s28 + $0x2d8] sm:$0xff]  }
 0x227   : > { %v2912_v56 = vpop.f32.mrf.mxu1  ;;  %v16972_v14 = vpop.f32.mrf.mxu0  ;;  %13661 = vmatmul.mubr.msk.bf16.gmra.mxu1 %vm560_vm0, %v15345_v22  ;;  %13701 = vmatmul.mubr.msk.bf16.gmra.mxu0 %vm560_vm0, %v15346_v10 }
 0x228   : > { %v3197_v0 = vmax.f32 %v3133_v23, 0.0  ;;  %v3134_v7 = vadd.f32 %v16933_v35, %v3058_v38  ;;  %v3059_v50 = vadd.f32 %v2912_v56, %v16697_v45  ;;  %4217 = vmatprep.mubr.bf16.mxu1 %v20949_v62  ;;  %4562 = vmatprep.mubr.bf16.mxu0 %v20949_v62  ;;  %v15348_v23 = vld [vmem:[%s15954_s28 + $0x418] sm:$0xff]  }
 0x229   : > { %v2914_v52 = vpop.f32.mrf.mxu1  ;;  %v16980_v33 = vpop.f32.mrf.mxu0 }
 0x22a   : > { %v16982_v41 = vpack.c.bf16 %v3197_v0, %v3195_v6  ;;  %v3198_v40 = vmax.f32 %v3134_v7, 0.0  ;;  %v3060_v22 = vadd.f32 %v2914_v52, %v16701_v17  ;;  %v3135_v45 = vadd.f32 %v16925_v4, %v3059_v50 }
 0x22b   : > { %v2916_v10 = vpop.f32.mrf.mxu1  ;;  %v16985_v44 = vpop.f32.mrf.mxu0 }
 0x22c   : > { %21031 = vst [vmem:[#allocation64_spill] sm:$0xff] %v16982_v41  ;;  %v3061_v38 = vadd.f32 %v2916_v10, %v16705_v12  ;;  %v16991_v56 = vpack.c.bf16 %v3198_v40, %v3196_v36  ;;  %v3136_v26 = vadd.f32 %v16933_v35, %v3060_v22  ;;  %v3199_v12 = vmax.f32 %v3135_v45, 0.0 }
 0x22d   : > { %v2918_v5 = vpop.f32.mrf.mxu1  ;;  %v16993_v30 = vpop.f32.mrf.mxu0 }
 0x22e   : > { %21032 = vst [vmem:[#allocation65_spill] sm:$0xff] %v16991_v56  ;;  %v3137_v6 = vadd.f32 %v16925_v4, %v3061_v38  ;;  %v3062_v17 = vadd.f32 %v2918_v5, %v16707_v20  ;;  %v3200_v40 = vmax.f32 %v3136_v26, 0.0  ;;  %v15349_v38 = vld [vmem:[%s15954_s28 + $0x2e0] sm:$0xff]  }
 0x22f   : > { %v2922_v0 = vpop.f32.mrf.mxu1  ;;  %v16998_v7 = vpop.f32.mrf.mxu0  ;;  %13662 = vmatmul.mubr.msk.bf16.gmra.mxu1 %vm560_vm0, %v15347_v8  ;;  %13702 = vmatmul.mubr.msk.bf16.gmra.mxu0 %vm560_vm0, %v15348_v23 }
 0x230   : > { %v3201_v50 = vmax.f32 %v3137_v6, 0.0  ;;  %v3138_v52 = vadd.f32 %v16933_v35, %v3062_v17  ;;  %v3063_v36 = vadd.f32 %v2922_v0, %v16711_v19  ;;  %4227 = vmatprep.mubr.bf16.mxu1 %v20949_v62  ;;  %4572 = vmatprep.mubr.bf16.mxu0 %v20949_v62  ;;  %v15350_v6 = vld [vmem:[%s15954_s28 + $0x420] sm:$0xff]  }
 0x231   : > { %v2924_v20 = vpop.f32.mrf.mxu1  ;;  %v17006_v5 = vpop.f32.mrf.mxu0 }
 0x232   : > { %v17008_v22 = vpack.c.bf16 %v3201_v50, %v3199_v12  ;;  %v3202_v10 = vmax.f32 %v3138_v52, 0.0  ;;  %v3064_v8 = vadd.f32 %v2924_v20, %v16715_v51  ;;  %v3139_v19 = vadd.f32 %v16925_v4, %v3063_v36 }
 0x233   : > { %v2926_v23 = vpop.f32.mrf.mxu1  ;;  %v17011_v45 = vpop.f32.mrf.mxu0 }
 0x234   : > { %21033 = vst [vmem:[#allocation66_spill] sm:$0xff] %v17008_v22  ;;  %v3065_v17 = vadd.f32 %v2926_v23, %v16719_v47  ;;  %v17017_v0 = vpack.c.bf16 %v3202_v10, %v3200_v40  ;;  %v3140_v26 = vadd.f32 %v16933_v35, %v3064_v8  ;;  %v3203_v47 = vmax.f32 %v3139_v19, 0.0 }
 0x235   : > { %v2928_v41 = vpop.f32.mrf.mxu1  ;;  %v17019_v56 = vpop.f32.mrf.mxu0 }
 0x236   : > { %21034 = vst [vmem:[#allocation67_spill] sm:$0xff] %v17017_v0  ;;  %v3141_v12 = vadd.f32 %v16925_v4, %v3065_v17  ;;  %v3066_v51 = vadd.f32 %v2928_v41, %v16721_v42  ;;  %v3204_v10 = vmax.f32 %v3140_v26, 0.0  ;;  %v15351_v17 = vld [vmem:[%s15954_s28 + $0x2e8] sm:$0xff]  }
 0x237   : > { %v2932_v50 = vpop.f32.mrf.mxu1  ;;  %v17024_v52 = vpop.f32.mrf.mxu0  ;;  %13663 = vmatmul.mubr.msk.bf16.gmra.mxu1 %vm560_vm0, %v15349_v38  ;;  %13703 = vmatmul.mubr.msk.bf16.gmra.mxu0 %vm560_vm0, %v15350_v6 }
 0x238   : > { %v3205_v36 = vmax.f32 %v3141_v12, 0.0  ;;  %v3142_v20 = vadd.f32 %v16933_v35, %v3066_v51  ;;  %v3067_v40 = vadd.f32 %v2932_v50, %v16725_v18  ;;  %4237 = vmatprep.mubr.bf16.mxu1 %v20949_v62  ;;  %4582 = vmatprep.mubr.bf16.mxu0 %v20949_v62  ;;  %v15352_v12 = vld [vmem:[%s15954_s28 + $0x428] sm:$0xff]  }
 0x239   : > { %v2934_v42 = vpop.f32.mrf.mxu1  ;;  %v17032_v41 = vpop.f32.mrf.mxu0 }
 0x23a   : > { %v17034_v8 = vpack.c.bf16 %v3205_v36, %v3203_v47  ;;  %v3206_v23 = vmax.f32 %v3142_v20, 0.0  ;;  %v3068_v38 = vadd.f32 %v2934_v42, %v16729_v61  ;;  %v3143_v18 = vadd.f32 %v16925_v4, %v3067_v40 }
 0x23b   : > { %v2936_v6 = vpop.f32.mrf.mxu1  ;;  %v17037_v19 = vpop.f32.mrf.mxu0 }
 0x23c   : > { %21035 = vst [vmem:[#allocation68_spill] sm:$0xff] %v17034_v8  ;;  %v3069_v51 = vadd.f32 %v2936_v6, %v16733_v25  ;;  %v17043_v50 = vpack.c.bf16 %v3206_v23, %v3204_v10  ;;  %v3144_v26 = vadd.f32 %v16933_v35, %v3068_v38  ;;  %v3207_v25 = vmax.f32 %v3143_v18, 0.0 }
 0x23d   : > { %v2938_v22 = vpop.f32.mrf.mxu1  ;;  %v17045_v0 = vpop.f32.mrf.mxu0 }
 0x23e   : > { %21036 = vst [vmem:[#allocation69_spill] sm:$0xff] %v17043_v50  ;;  %v3145_v47 = vadd.f32 %v16925_v4, %v3069_v51  ;;  %v3070_v61 = vadd.f32 %v2938_v22, %v16735_v37  ;;  %v3208_v23 = vmax.f32 %v3144_v26, 0.0  ;;  %v15353_v51 = vld [vmem:[%s15954_s28 + $0x2f0] sm:$0xff]  }
 0x23f   : > { %v2942_v36 = vpop.f32.mrf.mxu1  ;;  %v17050_v20 = vpop.f32.mrf.mxu0  ;;  %13664 = vmatmul.mubr.msk.bf16.gmra.mxu1 %vm560_vm0, %v15351_v17  ;;  %13704 = vmatmul.mubr.msk.bf16.gmra.mxu0 %vm560_vm0, %v15352_v12 }
 0x240   : > { %v3209_v40 = vmax.f32 %v3145_v47, 0.0  ;;  %v3146_v42 = vadd.f32 %v16933_v35, %v3070_v61  ;;  %v3071_v10 = vadd.f32 %v2942_v36, %v16739_v43  ;;  %4247 = vmatprep.mubr.bf16.mxu1 %v20949_v62  ;;  %4592 = vmatprep.mubr.bf16.mxu0 %v20949_v62  ;;  %v15354_v47 = vld [vmem:[%s15954_s28 + $0x430] sm:$0xff]  }
 0x241   : > { %v2944_v37 = vpop.f32.mrf.mxu1  ;;  %v17058_v22 = vpop.f32.mrf.mxu0 }
 0x242   : > { %v17060_v38 = vpack.c.bf16 %v3209_v40, %v3207_v25  ;;  %v3210_v6 = vmax.f32 %v3146_v42, 0.0  ;;  %v3072_v17 = vadd.f32 %v2944_v37, %v16743_v2  ;;  %v3147_v43 = vadd.f32 %v16925_v4, %v3071_v10 }
 0x243   : > { %v2946_v12 = vpop.f32.mrf.mxu1  ;;  %v17063_v18 = vpop.f32.mrf.mxu0 }
 0x244   : > { %21037 = vst [vmem:[#allocation70_spill] sm:$0xff] %v17060_v38  ;;  %v3073_v61 = vadd.f32 %v2946_v12, %v16747_v58  ;;  %v17069_v36 = vpack.c.bf16 %v3210_v6, %v3208_v23  ;;  %v3148_v26 = vadd.f32 %v16933_v35, %v3072_v17  ;;  %v3211_v58 = vmax.f32 %v3147_v43, 0.0 }
 0x245   : > { %v2948_v8 = vpop.f32.mrf.mxu1  ;;  %v17071_v50 = vpop.f32.mrf.mxu0 }
 0x246   : > { %21038 = vst [vmem:[#allocation71_spill] sm:$0xff] %v17069_v36  ;;  %v3149_v25 = vadd.f32 %v16925_v4, %v3073_v61  ;;  %v3074_v2 = vadd.f32 %v2948_v8, %v16749_v11  ;;  %v3212_v6 = vmax.f32 %v3148_v26, 0.0  ;;  %v15355_v61 = vld [vmem:[%s15954_s28 + $0x2f8] sm:$0xff]  }
 0x247   : > { %v2952_v40 = vpop.f32.mrf.mxu1  ;;  %v17076_v42 = vpop.f32.mrf.mxu0  ;;  %13665 = vmatmul.mubr.msk.bf16.gmra.mxu1 %vm560_vm0, %v15353_v51  ;;  %13705 = vmatmul.mubr.msk.bf16.gmra.mxu0 %vm560_vm0, %v15354_v47 }
 0x248   : > { %v3213_v10 = vmax.f32 %v3149_v25, 0.0  ;;  %v3150_v37 = vadd.f32 %v16933_v35, %v3074_v2  ;;  %v3075_v23 = vadd.f32 %v2952_v40, %v16753_v29  ;;  %4257 = vmatprep.mubr.bf16.mxu1 %v20949_v62  ;;  %4602 = vmatprep.mubr.bf16.mxu0 %v20949_v62  ;;  %v15356_v25 = vld [vmem:[%s15954_s28 + $0x438] sm:$0xff]  }
 0x249   : > { %v2954_v11 = vpop.f32.mrf.mxu1  ;;  %v17084_v8 = vpop.f32.mrf.mxu0 }
 0x24a   : > { %v17086_v17 = vpack.c.bf16 %v3213_v10, %v3211_v58  ;;  %v3214_v12 = vmax.f32 %v3150_v37, 0.0  ;;  %v3076_v51 = vadd.f32 %v2954_v11, %v16757_v1  ;;  %v3151_v29 = vadd.f32 %v16925_v4, %v3075_v23 }
 0x24b   : > { %v2956_v47 = vpop.f32.mrf.mxu1  ;;  %v17089_v43 = vpop.f32.mrf.mxu0 }
 0x24c   : > { %21039 = vst [vmem:[#allocation72_spill] sm:$0xff] %v17086_v17  ;;  %v3077_v2 = vadd.f32 %v2956_v47, %v16761_v34  ;;  %v17095_v40 = vpack.c.bf16 %v3214_v12, %v3212_v6  ;;  %v3152_v26 = vadd.f32 %v16933_v35, %v3076_v51  ;;  %v3215_v34 = vmax.f32 %v3151_v29, 0.0 }
 0x24d   : > { %v2958_v38 = vpop.f32.mrf.mxu1  ;;  %v17097_v36 = vpop.f32.mrf.mxu0 }
 0x24e   : > { %21040 = vst [vmem:[#allocation73_spill] sm:$0xff] %v17095_v40  ;;  %v3153_v58 = vadd.f32 %v16925_v4, %v3077_v2  ;;  %v3078_v1 = vadd.f32 %v2958_v38, %v16763_v60  ;;  %v3216_v12 = vmax.f32 %v3152_v26, 0.0  ;;  %v15363_v2 = vld [vmem:[%s15954_s28 + $0x460] sm:$0xff]  }
 0x24f   : > { %v2962_v10 = vpop.f32.mrf.mxu1  ;;  %v17102_v37 = vpop.f32.mrf.mxu0  ;;  %13666 = vmatmul.mubr.msk.bf16.gmra.mxu1 %vm560_vm0, %v15355_v61  ;;  %13706 = vmatmul.mubr.msk.bf16.gmra.mxu0 %vm560_vm0, %v15356_v25  ;;  %v15383_v26 = vld [vmem:[%s20844_s1 + $0x44] ss:$8 sps:$4 sm:$0xff]  }
 0x250   : > { %v3217_v23 = vmax.f32 %v3153_v58, 0.0  ;;  %v3154_v11 = vadd.f32 %v16933_v35, %v3078_v1  ;;  %v3079_v6 = vadd.f32 %v2962_v10, %v16770_v32  ;;  %5327 = vmatprep.mubr.bf16.mxu1 %v20949_v62  ;;  %5668 = vmatprep.mubr.bf16.mxu0 %v20949_v62  ;;  %v15364_v58 = vld [vmem:[%s15954_s28 + $0x3c0] sm:$0xff]  }
 0x251   : > { %v2964_v60 = vpop.f32.mrf.mxu1  ;;  %v17110_v38 = vpop.f32.mrf.mxu0 }
 0x252   : > { %v17112_v51 = vpack.c.bf16 %v3217_v23, %v3215_v34  ;;  %v3218_v47 = vmax.f32 %v3154_v11, 0.0  ;;  %v3080_v61 = vadd.f32 %v2964_v60, %v16774_v46  ;;  %v3155_v32 = vadd.f32 %v16925_v4, %v3079_v6  ;;  %v15384_v11 = vld [vmem:[%s20846_s3 + $0x170] ss:$8 sps:$4 sm:$0xff]   ;;  %v15389_v60 = vld [vmem:[%s20846_s3 + $0x164] ss:$8 sps:$4 sm:$0xff]  }
 0x253   : > { %v2966_v25 = vpop.f32.mrf.mxu1  ;;  %v17115_v29 = vpop.f32.mrf.mxu0 }
 0x254   : > { %21041 = vst [vmem:[#allocation74_spill] sm:$0xff] %v17112_v51  ;;  %v3081_v1 = vadd.f32 %v2966_v25, %v16778_v63  ;;  %v17121_v10 = vpack.c.bf16 %v3218_v47, %v3216_v12  ;;  %v3156_v46 = vadd.f32 %v16933_v35, %v3080_v61  ;;  %v3219_v12 = vmax.f32 %v3155_v32, 0.0  ;;  %v15381_v25 = vld [vmem:[%s20844_s1 + $0x40] ss:$8 sps:$4 sm:$0xff]  }
 0x255   : > { %v2968_v17 = vpop.f32.mrf.mxu1  ;;  %v17123_v40 = vpop.f32.mrf.mxu0  ;;  %v15365_v51 = vld [vmem:[%s15954_s28 + $0x468] sm:$0xff]  }
 0x256   : > { %21042 = vst [vmem:[#allocation75_spill] sm:$0xff] %v17121_v10  ;;  %v3157_v34 = vadd.f32 %v16925_v4, %v3081_v1  ;;  %v3082_v23 = vadd.f32 %v2968_v17, %v16786_v27  ;;  %v15842_v17 = vld [vmem:[%s20844_s1 + $0x50] ss:$8 sps:$4 sm:$0xff]   ;;  %v15366_v10 = vld [vmem:[%s15954_s28 + $0x3c8] sm:$0xff]  }
 0x257   : > { %v2972_v63 = vpop.f32.mrf.mxu1  ;;  %v17134_v6 = vpop.f32.mrf.mxu0  ;;  %13827 = vmatmul.mubr.msk.bf16.vlgmr.msra.gmra.mxu1 %vm560_vm0, %v15363_v2  ;;  %13863 = vmatmul.mubr.msk.bf16.vlgmr.msra.gmra.mxu0 %vm560_vm0, %v15364_v58 }
 0x258   : > { %v3221_v47 = vmax.f32 %v3157_v34, 0.0  ;;  %v3158_v61 = vadd.f32 %v16933_v35, %v3082_v23  ;;  %v3083_v27 = vadd.f32 %v2972_v63, %v16796_v57  ;;  %5994 = vmatpush1.bf16.msra.mxu1 %v15842_v17  ;;  %5337 = vmatprep.mubr.bf16.mxu1 %v20949_v62  ;;  %v3220_v57 = vmax.f32 %v3156_v46, 0.0  ;;  %v15387_v23 = vld [vmem:[%s20846_s3 + $0x160] ss:$8 sps:$4 sm:$0xff]  }
 0x259   : > { %v2974_v2 = vpop.f32.mrf.mxu1  ;;  %v17150_v58 = vpop.f32.mrf.mxu0  ;;  %5678 = vmatprep.mubr.bf16.mxu0 %v20949_v62  ;;  %5995 = vmatprep.subr.bf16.mxu1 %v15383_v26 }
 0x25a   : > { %21043 = vst [vmem:[#allocation76_spill] sm:$0xff] %v17150_v58  ;;  %v17153_v32 = vpack.c.bf16 %v3221_v47, %v3219_v12  ;;  %v3222_v1 = vmax.f32 %v3158_v61, 0.0  ;;  %v3084_v34 = vadd.f32 %v2974_v2, %v16803_v3  ;;  %7084 = vmatpush1.bf16.msra.mxu0 %v15384_v11  ;;  %v3159_v58 = vadd.f32 %v16925_v4, %v3083_v27  ;;  %v15394_v11 = vld [vmem:[%s20846_s3 + $0x154] ss:$8 sps:$4 sm:$0xff]   ;;  %v15397_v2 = vld [vmem:[%s20846_s3 + $0x144] ss:$8 sps:$4 sm:$0xff]  }
 0x25b   : > { %v2976_v63 = vpop.f32.mrf.mxu1  ;;  %v17159_v17 = vpop.f32.mrf.mxu0  ;;  %7085 = vmatprep.subr.bf16.mxu0 %v15389_v60 }
 0x25c   : > { %21044 = vst [vmem:[#allocation77_spill] sm:$0xff] %v17153_v32  ;;  %v3085_v26 = vadd.f32 %v2976_v63, %v16810_v39  ;;  %5996 = vmatpush1.bf16.msra.mxu1 %v15381_v25  ;;  %v17165_v46 = vpack.c.bf16 %v3222_v1, %v3220_v57  ;;  %v3160_v47 = vadd.f32 %v16933_v35, %v3084_v34  ;;  %v15392_v39 = vld [vmem:[%s20846_s3 + $0x150] ss:$8 sps:$4 sm:$0xff]   ;;  %v3223_v57 = vmax.f32 %v3159_v58, 0.0 }
 0x25d   : > { %v2978_v12 = vpop.f32.mrf.mxu1  ;;  %v17167_v3 = vpop.f32.mrf.mxu0 }
 0x25e   : > { %21045 = vst [vmem:[#allocation78_spill] sm:$0xff] %v17165_v46  ;;  %v3161_v61 = vadd.f32 %v16925_v4, %v3085_v26  ;;  %v3086_v60 = vadd.f32 %v2978_v12, %v16813_v49  ;;  %7086 = vmatpush1.bf16.msra.mxu0 %v15387_v23  ;;  %v15395_v12 = vld [vmem:[%s20846_s3 + $0x140] ss:$8 sps:$4 sm:$0xff]  }
 0x25f   : > { %v2982_v27 = vpop.f32.mrf.mxu1  ;;  %v17178_v25 = vpop.f32.mrf.mxu0  ;;  %13828 = vmatmul.mubr.msk.bf16.gmra.mxu1 %vm560_vm0, %v15365_v51  ;;  %13864 = vmatmul.mubr.msk.bf16.gmra.mxu0 %vm560_vm0, %v15366_v10  ;;  %v3224_v10 = vmax.f32 %v3160_v47, 0.0 }
 0x260   : > { %v3225_v1 = vmax.f32 %v3161_v61, 0.0  ;;  %v3162_v49 = vadd.f32 %v16933_v35, %v3086_v60  ;;  %v3087_v34 = vadd.f32 %v2982_v27, %v16817_v31  ;;  %5347 = vmatprep.mubr.bf16.mxu1 %v20949_v62  ;;  %5688 = vmatprep.mubr.bf16.mxu0 %v20949_v62  ;;  %v15367_v60 = vld [vmem:[%s15954_s28 + $0x470] sm:$0xff]  }
 0x261   : > { %v2984_v23 = vpop.f32.mrf.mxu1  ;;  %v17189_v51 = vpop.f32.mrf.mxu0  ;;  %7087 = vmatprep.subr.bf16.mxu0 %v15394_v11  ;;  %v15368_v27 = vld [vmem:[%s15954_s28 + $0x3d0] sm:$0xff]  }
 0x262   : > { %v17191_v63 = vpack.c.bf16 %v3225_v1, %v3223_v57  ;;  %v3226_v26 = vmax.f32 %v3162_v49, 0.0  ;;  %v3088_v58 = vadd.f32 %v2984_v23, %v16821_v48  ;;  %7088 = vmatpush1.bf16.msra.mxu0 %v15392_v39  ;;  %v3163_v32 = vadd.f32 %v16925_v4, %v3087_v34  ;;  %v15402_v48 = vld [vmem:[%s20846_s3 + $0x134] ss:$8 sps:$4 sm:$0xff]  }
 0x263   : > { %v2986_v31 = vpop.f32.mrf.mxu1  ;;  %v17197_v61 = vpop.f32.mrf.mxu0  ;;  %7089 = vmatprep.subr.bf16.mxu0 %v15397_v2 }
 0x264   : > { %21046 = vst [vmem:[#allocation79_spill] sm:$0xff] %v17191_v63  ;;  %v3089_v11 = vadd.f32 %v2986_v31, %v16825_v28  ;;  %v17203_v47 = vpack.c.bf16 %v3226_v26, %v3224_v10  ;;  %v3164_v39 = vadd.f32 %v16933_v35, %v3088_v58  ;;  %v15400_v28 = vld [vmem:[%s20846_s3 + $0x130] ss:$8 sps:$4 sm:$0xff]   ;;  %v15405_v10 = vld [vmem:[%s20846_s3 + $0x124] ss:$8 sps:$4 sm:$0xff]   ;;  %v3227_v26 = vmax.f32 %v3163_v32, 0.0 }
 0x265   : > { %v2988_v57 = vpop.f32.mrf.mxu1  ;;  %v17205_v1 = vpop.f32.mrf.mxu0  ;;  %v15370_v63 = vld [vmem:[%s15954_s28 + $0x3d8] sm:$0xff]  }
 0x266   : > { %21047 = vst [vmem:[#allocation80_spill] sm:$0xff] %v17203_v47  ;;  %v3165_v49 = vadd.f32 %v16925_v4, %v3089_v11  ;;  %v3090_v23 = vadd.f32 %v2988_v57, %v16827_v54  ;;  %7090 = vmatpush1.bf16.msra.mxu0 %v15395_v12 }
 0x267   : > { %v2992_v2 = vpop.f32.mrf.mxu1  ;;  %v17216_v34 = vpop.f32.mrf.mxu0  ;;  %13829 = vmatmul.mubr.msk.bf16.gmra.mxu1 %vm560_vm0, %v15367_v60  ;;  %13865 = vmatmul.mubr.msk.bf16.gmra.mxu0 %vm560_vm0, %v15368_v27  ;;  %v3228_v27 = vmax.f32 %v3164_v39, 0.0 }
 0x268   : > { %v3229_v58 = vmax.f32 %v3165_v49, 0.0  ;;  %v3166_v54 = vadd.f32 %v16933_v35, %v3090_v23  ;;  %v3091_v12 = vadd.f32 %v2992_v2, %v16831_v15  ;;  %5357 = vmatprep.mubr.bf16.mxu1 %v20949_v62  ;;  %5698 = vmatprep.mubr.bf16.mxu0 %v20949_v62  ;;  %v15403_v49 = vld [vmem:[%s20846_s3 + $0x120] ss:$8 sps:$4 sm:$0xff]   ;;  %v15369_v2 = vld [vmem:[%s15954_s28 + $0x478] sm:$0xff]  }
 0x269   : > { %v2994_v31 = vpop.f32.mrf.mxu1  ;;  %v17227_v60 = vpop.f32.mrf.mxu0  ;;  %7091 = vmatprep.subr.bf16.mxu0 %v15402_v48 }
 0x26a   : > { %v17229_v11 = vpack.c.bf16 %v3229_v58, %v3227_v26  ;;  %v3230_v57 = vmax.f32 %v3166_v54, 0.0  ;;  %v3092_v32 = vadd.f32 %v2994_v31, %v16835_v53  ;;  %7092 = vmatpush1.bf16.msra.mxu0 %v15400_v28  ;;  %v3167_v47 = vadd.f32 %v16925_v4, %v3091_v12  ;;  %v15410_v53 = vld [vmem:[%s20846_s3 + $0x114] ss:$8 sps:$4 sm:$0xff]  }
 0x26b   : > { %v2996_v15 = vpop.f32.mrf.mxu1  ;;  %v17235_v23 = vpop.f32.mrf.mxu0  ;;  %7093 = vmatprep.subr.bf16.mxu0 %v15405_v10 }
 0x26c   : > { %21048 = vst [vmem:[#allocation81_spill] sm:$0xff] %v17229_v11  ;;  %v3093_v48 = vadd.f32 %v2996_v15, %v16839_v24  ;;  %v17241_v39 = vpack.c.bf16 %v3230_v57, %v3228_v27  ;;  %v3168_v28 = vadd.f32 %v16933_v35, %v3092_v32  ;;  %v15408_v24 = vld [vmem:[%s20846_s3 + $0x110] ss:$8 sps:$4 sm:$0xff]   ;;  %v15413_v27 = vld [vmem:[%s20846_s3 + $0x104] ss:$8 sps:$4 sm:$0xff]   ;;  %v3231_v57 = vmax.f32 %v3167_v47, 0.0 }
 0x26d   : > { %v2998_v26 = vpop.f32.mrf.mxu1  ;;  %v17243_v58 = vpop.f32.mrf.mxu0  ;;  %v15372_v11 = vld [vmem:[%s15954_s28 + $0x3e0] sm:$0xff]  }
 0x26e   : > { %21049 = vst [vmem:[#allocation82_spill] sm:$0xff] %v17241_v39  ;;  %21050 = vst [vmem:[#allocation83_spill] sm:$0xff] %v17243_v58  ;;  %v3169_v54 = vadd.f32 %v16925_v4, %v3093_v48  ;;  %v3094_v31 = vadd.f32 %v2998_v26, %v16841_v13  ;;  %7094 = vmatpush1.bf16.msra.mxu0 %v15403_v49 }
 0x26f   : > { %v3002_v10 = vpop.f32.mrf.mxu1  ;;  %v17254_v12 = vpop.f32.mrf.mxu0  ;;  %13830 = vmatmul.mubr.msk.bf16.gmra.mxu1 %vm560_vm0, %v15369_v2  ;;  %13866 = vmatmul.mubr.msk.bf16.gmra.mxu0 %vm560_vm0, %v15370_v63  ;;  %v3232_v63 = vmax.f32 %v3168_v28, 0.0 }
 0x270   : > { %21051 = vst [vmem:[#allocation84_spill] sm:$0xff] %v17254_v12  ;;  %v3233_v32 = vmax.f32 %v3169_v54, 0.0  ;;  %v3170_v13 = vadd.f32 %v16933_v35, %v3094_v31  ;;  %v3095_v49 = vadd.f32 %v3002_v10, %v16845_v9  ;;  %5367 = vmatprep.mubr.bf16.mxu1 %v20949_v62  ;;  %5708 = vmatprep.mubr.bf16.mxu0 %v20949_v62  ;;  %v15411_v54 = vld [vmem:[%s20846_s3 + $0x100] ss:$8 sps:$4 sm:$0xff]   ;;  %v21104_v12 = vld [vmem:[#allocation59_spill] sm:$0xff] }
 0x271   : > { %v3004_v15 = vpop.f32.mrf.mxu1  ;;  %v17265_v2 = vpop.f32.mrf.mxu0  ;;  %7095 = vmatprep.subr.bf16.mxu0 %v15410_v53  ;;  %v15371_v10 = vld [vmem:[%s15954_s28 + $0x480] sm:$0xff]   ;;  %v21055_v53 = vld [vmem:[#allocation19_spill] sm:$0xff] }
 0x272   : > { %21052 = vst [vmem:[#allocation85_spill] sm:$0xff] %v17265_v2  ;;  %v17267_v48 = vpack.c.bf16 %v3233_v32, %v3231_v57  ;;  %v3234_v26 = vmax.f32 %v3170_v13, 0.0  ;;  %v3096_v47 = vadd.f32 %v3004_v15, %v16849_v59  ;;  %7096 = vmatpush1.bf16.msra.mxu0 %v15408_v24  ;;  %v3171_v39 = vadd.f32 %v16925_v4, %v3095_v49  ;;  %v15418_v59 = vld [vmem:[%s20846_s3 + $0x1f4] ss:$8 sps:$4 sm:$0xff]   ;;  %v15391_v2 = vld [vmem:[%s15954_s28 + $0x408] sm:$0xff]  }
 0x273   : > { %v3006_v9 = vpop.f32.mrf.mxu1  ;;  %v17273_v31 = vpop.f32.mrf.mxu0  ;;  %7097 = vmatprep.subr.bf16.mxu0 %v15413_v27  ;;  %v15416_v27 = vld [vmem:[%s20846_s3 + $0x1f0] ss:$8 sps:$4 sm:$0xff]  }
 0x274   : > { %21053 = vst [vmem:[#allocation86_spill] sm:$0xff] %v17267_v48  ;;  %21054 = vst [vmem:[#allocation87_spill] sm:$0xff] %v17273_v31  ;;  %v3097_v28 = vadd.f32 %v3006_v9, %v21055_v53  ;;  %v17279_v57 = vpack.c.bf16 %v3234_v26, %v3232_v63  ;;  %v3172_v24 = vadd.f32 %v16933_v35, %v3096_v47  ;;  %v21058_v48 = vld [vmem:[#allocation20_spill] sm:$0xff]  ;;  %v15421_v26 = vld [vmem:[%s20846_s3 + $0x1e4] ss:$8 sps:$4 sm:$0xff]   ;;  %v3235_v47 = vmax.f32 %v3171_v39, 0.0 }
 0x275   : > { %v3008_v32 = vpop.f32.mrf.mxu1  ;;  %v17281_v13 = vpop.f32.mrf.mxu0  ;;  %v21063_v39 = vld [vmem:[#allocation22_spill] sm:$0xff]  ;;  %v15380_v31 = vld [vmem:[%s15954_s28 + $0x400] sm:$0xff]  }
 0x276   : > { %21056 = vst [vmem:[#allocation19_spill] sm:$0xff] %v17279_v57  ;;  %21057 = vst [vmem:[#allocation88_spill] sm:$0xff] %v17281_v13  ;;  %v3173_v15 = vadd.f32 %v16925_v4, %v3097_v28  ;;  %v3098_v46 = vadd.f32 %v3008_v32, %v21058_v48  ;;  %7098 = vmatpush1.bf16.msra.mxu0 %v15411_v54  ;;  %v21060_v54 = vld [vmem:[#allocation21_spill] sm:$0xff] }
 0x277   : > { %v3012_v49 = vpop.f32.mrf.mxu1  ;;  %v17292_v63 = vpop.f32.mrf.mxu0  ;;  %13831 = vmatmul.mubr.msk.bf16.gmra.mxu1 %vm560_vm0, %v15371_v10  ;;  %13867 = vmatmul.mubr.msk.bf16.gmra.mxu0 %vm560_vm0, %v15372_v11  ;;  %v3236_v11 = vmax.f32 %v3172_v24, 0.0  ;;  %v15374_v13 = vld [vmem:[%s15954_s28 + $0x3e8] sm:$0xff]  }
 0x278   : > { %21059 = vst [vmem:[#allocation20_spill] sm:$0xff] %v17292_v63  ;;  %v3237_v9 = vmax.f32 %v3173_v15, 0.0  ;;  %v3174_v48 = vadd.f32 %v16933_v35, %v3098_v46  ;;  %v3099_v53 = vadd.f32 %v3012_v49, %v21060_v54  ;;  %5377 = vmatprep.mubr.bf16.mxu1 %v20949_v62  ;;  %5718 = vmatprep.mubr.bf16.mxu0 %v20949_v62  ;;  %v15419_v46 = vld [vmem:[%s20846_s3 + $0x1e0] ss:$8 sps:$4 sm:$0xff]  }
 0x279   : > { %v3014_v28 = vpop.f32.mrf.mxu1  ;;  %v17303_v10 = vpop.f32.mrf.mxu0  ;;  %7099 = vmatprep.subr.bf16.mxu0 %v15418_v59  ;;  %v15373_v63 = vld [vmem:[%s15954_s28 + $0x488] sm:$0xff]   ;;  %v21065_v59 = vld [vmem:[#allocation23_spill] sm:$0xff] }
 0x27a   : > { %21061 = vst [vmem:[#allocation21_spill] sm:$0xff] %v17303_v10  ;;  %v17305_v32 = vpack.c.bf16 %v3237_v9, %v3235_v47  ;;  %v3238_v57 = vmax.f32 %v3174_v48, 0.0  ;;  %v3100_v15 = vadd.f32 %v3014_v28, %v21063_v39  ;;  %7100 = vmatpush2.bf16.msra.mxu0 %v15416_v27  ;;  %v3175_v10 = vadd.f32 %v16925_v4, %v3099_v53  ;;  %v15426_v27 = vld [vmem:[%s20846_s3 + $0x1d4] ss:$8 sps:$4 sm:$0xff]  }
 0x27b   : > { %v3016_v49 = vpop.f32.mrf.mxu1  ;;  %v17311_v54 = vpop.f32.mrf.mxu0  ;;  %7101 = vmatprep.subr.bf16.mxu0 %v15421_v26  ;;  %v15424_v26 = vld [vmem:[%s20846_s3 + $0x1d0] ss:$8 sps:$4 sm:$0xff]  }
 0x27c   : > { %21062 = vst [vmem:[#allocation89_spill] sm:$0xff] %v17305_v32  ;;  %21064 = vst [vmem:[#allocation22_spill] sm:$0xff] %v17311_v54  ;;  %v3101_v24 = vadd.f32 %v3016_v49, %v21065_v59  ;;  %v17317_v47 = vpack.c.bf16 %v3238_v57, %v3236_v11  ;;  %v3176_v28 = vadd.f32 %v16933_v35, %v3100_v15  ;;  %v21068_v32 = vld [vmem:[#allocation24_spill] sm:$0xff]  ;;  %v15429_v11 = vld [vmem:[%s20846_s3 + $0x1c4] ss:$8 sps:$4 sm:$0xff]   ;;  %v3239_v15 = vmax.f32 %v3175_v10, 0.0 }
 0x27d   : > { %v3018_v9 = vpop.f32.mrf.mxu1  ;;  %v17319_v48 = vpop.f32.mrf.mxu0  ;;  %v21073_v10 = vld [vmem:[#allocation26_spill] sm:$0xff] }
 0x27e   : > { %21066 = vst [vmem:[#allocation23_spill] sm:$0xff] %v17317_v47  ;;  %21067 = vst [vmem:[#allocation90_spill] sm:$0xff] %v17319_v48  ;;  %v3177_v39 = vadd.f32 %v16925_v4, %v3101_v24  ;;  %v3102_v54 = vadd.f32 %v3018_v9, %v21068_v32  ;;  %7102 = vmatpush2.bf16.msra.mxu0 %v15419_v46  ;;  %v21070_v46 = vld [vmem:[#allocation25_spill] sm:$0xff]  ;;  %v15376_v48 = vld [vmem:[%s15954_s28 + $0x3f0] sm:$0xff]  }
 0x27f   : > { %v3022_v57 = vpop.f32.mrf.mxu1  ;;  %v17330_v53 = vpop.f32.mrf.mxu0  ;;  %13832 = vmatmul.mubr.msk.bf16.gmra.mxu1 %vm560_vm0, %v15373_v63  ;;  %13868 = vmatmul.mubr.msk.bf16.gmra.mxu0 %vm560_vm0, %v15374_v13  ;;  %v3240_v13 = vmax.f32 %v3176_v28, 0.0 }
 0x280   : > { %21069 = vst [vmem:[#allocation24_spill] sm:$0xff] %v17330_v53  ;;  %v3241_v49 = vmax.f32 %v3177_v39, 0.0  ;;  %v3178_v32 = vadd.f32 %v16933_v35, %v3102_v54  ;;  %v3103_v59 = vadd.f32 %v3022_v57, %v21070_v46  ;;  %5387 = vmatprep.mubr.bf16.mxu1 %v20949_v62  ;;  %5728 = vmatprep.mubr.bf16.mxu0 %v20949_v62  ;;  %v15427_v54 = vld [vmem:[%s20846_s3 + $0x1c0] ss:$8 sps:$4 sm:$0xff]   ;;  %v15375_v53 = vld [vmem:[%s15954_s28 + $0x490] sm:$0xff]  }
 0x281   : > { %v3024_v24 = vpop.f32.mrf.mxu1  ;;  %v17341_v63 = vpop.f32.mrf.mxu0  ;;  %7103 = vmatprep.subr.bf16.mxu0 %v15426_v27  ;;  %v21075_v27 = vld [vmem:[#allocation47_spill] sm:$0xff] }
 0x282   : > { %21071 = vst [vmem:[#allocation25_spill] sm:$0xff] %v17341_v63  ;;  %v17343_v9 = vpack.c.bf16 %v3241_v49, %v3239_v15  ;;  %v3242_v47 = vmax.f32 %v3178_v32, 0.0  ;;  %v3104_v39 = vadd.f32 %v3024_v24, %v21073_v10  ;;  %7104 = vmatpush2.bf16.msra.mxu0 %v15424_v26  ;;  %v3179_v63 = vadd.f32 %v16925_v4, %v3103_v59  ;;  %v15434_v26 = vld [vmem:[%s20846_s3 + $0x1b4] ss:$8 sps:$4 sm:$0xff]  }
 0x283   : > { %v3026_v57 = vpop.f32.mrf.mxu1  ;;  %v17349_v46 = vpop.f32.mrf.mxu0  ;;  %7105 = vmatprep.subr.bf16.mxu0 %v15429_v11  ;;  %v15432_v11 = vld [vmem:[%s20846_s3 + $0x1b0] ss:$8 sps:$4 sm:$0xff]  }
 0x284   : > { %21072 = vst [vmem:[#allocation91_spill] sm:$0xff] %v17343_v9  ;;  %21074 = vst [vmem:[#allocation26_spill] sm:$0xff] %v17349_v46  ;;  %v3105_v28 = vadd.f32 %v3026_v57, %v21075_v27  ;;  %v17355_v15 = vpack.c.bf16 %v3242_v47, %v3240_v13  ;;  %v3180_v24 = vadd.f32 %v16933_v35, %v3104_v39  ;;  %v21078_v9 = vld [vmem:[#allocation48_spill] sm:$0xff]  ;;  %v15437_v13 = vld [vmem:[%s20846_s3 + $0x1a4] ss:$8 sps:$4 sm:$0xff]   ;;  %v3243_v39 = vmax.f32 %v3179_v63, 0.0 }
 0x285   : > { %v3028_v49 = vpop.f32.mrf.mxu1  ;;  %v17357_v32 = vpop.f32.mrf.mxu0  ;;  %v21083_v63 = vld [vmem:[#allocation50_spill] sm:$0xff] }
 0x286   : > { %21076 = vst [vmem:[#allocation47_spill] sm:$0xff] %v17355_v15  ;;  %21077 = vst [vmem:[#allocation92_spill] sm:$0xff] %v17357_v32  ;;  %v3181_v10 = vadd.f32 %v16925_v4, %v3105_v28  ;;  %v3106_v46 = vadd.f32 %v3028_v49, %v21078_v9  ;;  %7106 = vmatpush2.bf16.msra.mxu0 %v15427_v54  ;;  %v21080_v54 = vld [vmem:[#allocation49_spill] sm:$0xff]  ;;  %v15378_v32 = vld [vmem:[%s15954_s28 + $0x3f8] sm:$0xff]  }
 0x287   : > { %v3032_v47 = vpop.f32.mrf.mxu1  ;;  %v17368_v59 = vpop.f32.mrf.mxu0  ;;  %13833 = vmatmul.mubr.msk.bf16.gmra.mxu1 %vm560_vm0, %v15375_v53  ;;  %13869 = vmatmul.mubr.msk.bf16.gmra.mxu0 %vm560_vm0, %v15376_v48  ;;  %v3244_v48 = vmax.f32 %v3180_v24, 0.0 }
 0x288   : > { %21079 = vst [vmem:[#allocation48_spill] sm:$0xff] %v17368_v59  ;;  %v3245_v57 = vmax.f32 %v3181_v10, 0.0  ;;  %v3182_v9 = vadd.f32 %v16933_v35, %v3106_v46  ;;  %v3107_v27 = vadd.f32 %v3032_v47, %v21080_v54  ;;  %5397 = vmatprep.mubr.bf16.mxu1 %v20949_v62  ;;  %5738 = vmatprep.mubr.bf16.mxu0 %v20949_v62  ;;  %v15435_v46 = vld [vmem:[%s20846_s3 + $0x1a0] ss:$8 sps:$4 sm:$0xff]   ;;  %v15377_v59 = vld [vmem:[%s15954_s28 + $0x498] sm:$0xff]  }
 0x289   : > { %v3034_v28 = vpop.f32.mrf.mxu1  ;;  %v17379_v53 = vpop.f32.mrf.mxu0  ;;  %7107 = vmatprep.subr.bf16.mxu0 %v15434_v26  ;;  %v21085_v26 = vld [vmem:[#allocation51_spill] sm:$0xff] }
 0x28a   : > { %21081 = vst [vmem:[#allocation49_spill] sm:$0xff] %v17379_v53  ;;  %v17381_v49 = vpack.c.bf16 %v3245_v57, %v3243_v39  ;;  %v3246_v15 = vmax.f32 %v3182_v9, 0.0  ;;  %v3108_v10 = vadd.f32 %v3034_v28, %v21083_v63  ;;  %7108 = vmatpush2.bf16.msra.mxu0 %v15432_v11  ;;  %v3183_v53 = vadd.f32 %v16925_v4, %v3107_v27  ;;  %v15442_v11 = vld [vmem:[%s20846_s3 + $0x194] ss:$8 sps:$4 sm:$0xff]  }
 0x28b   : > { %v3036_v47 = vpop.f32.mrf.mxu1  ;;  %v17387_v54 = vpop.f32.mrf.mxu0  ;;  %7109 = vmatprep.subr.bf16.mxu0 %v15437_v13  ;;  %v15440_v13 = vld [vmem:[%s20846_s3 + $0x190] ss:$8 sps:$4 sm:$0xff]  }
 0x28c   : > { %21082 = vst [vmem:[#allocation93_spill] sm:$0xff] %v17381_v49  ;;  %21084 = vst [vmem:[#allocation50_spill] sm:$0xff] %v17387_v54  ;;  %v3109_v24 = vadd.f32 %v3036_v47, %v21085_v26  ;;  %v17393_v39 = vpack.c.bf16 %v3246_v15, %v3244_v48  ;;  %v3184_v28 = vadd.f32 %v16933_v35, %v3108_v10  ;;  %v21088_v49 = vld [vmem:[#allocation52_spill] sm:$0xff]  ;;  %v3247_v10 = vmax.f32 %v3183_v53, 0.0  ;;  %v21090_v26 = vld [vmem:[#allocation53_spill] sm:$0xff] }
 0x28d   : > { %v3038_v57 = vpop.f32.mrf.mxu1  ;;  %v17395_v9 = vpop.f32.mrf.mxu0  ;;  %v15455_v15 = vld [vmem:[%s20846_s3 + $0x74] ss:$8 sps:$4 sm:$0xff]  }
 0x28e   : > { %21086 = vst [vmem:[#allocation51_spill] sm:$0xff] %v17393_v39  ;;  %21087 = vst [vmem:[#allocation94_spill] sm:$0xff] %v17395_v9  ;;  %v3185_v63 = vadd.f32 %v16925_v4, %v3109_v24  ;;  %v3110_v54 = vadd.f32 %v3038_v57, %v21088_v49  ;;  %7110 = vmatpush2.bf16.msra.mxu0 %v15435_v46  ;;  %v15445_v49 = vld [vmem:[%s20846_s3 + $0x184] ss:$8 sps:$4 sm:$0xff]   ;;  %7596 = vmatprep.subr.bf16.mxu1 %v15455_v15  ;;  %v21095_v15 = vld [vmem:[#allocation55_spill] sm:$0xff] }
 0x28f   : > { %v3042_v27 = vpop.f32.mrf.mxu1  ;;  %v17409_v48 = vpop.f32.mrf.mxu0  ;;  %13834 = vmatmul.mubr.msk.bf16.gmra.mxu1 %vm560_vm0, %v15377_v59  ;;  %13870 = vmatmul.mubr.msk.bf16.gmra.mxu0 %vm560_vm0, %v15378_v32  ;;  %v3248_v32 = vmax.f32 %v3184_v28, 0.0  ;;  %v15379_v9 = vld [vmem:[%s15954_s28 + $0x4a0] sm:$0xff]  }
 0x290   : > { %21089 = vst [vmem:[#allocation52_spill] sm:$0xff] %v17409_v48  ;;  %v3249_v46 = vmax.f32 %v3185_v63, 0.0  ;;  %v3186_v47 = vadd.f32 %v16933_v35, %v3110_v54  ;;  %v3111_v24 = vadd.f32 %v3042_v27, %v21090_v26  ;;  %5407 = vmatprep.mubr.bf16.mxu1 %v20949_v62  ;;  %5748 = vmatprep.mubr.bf16.mxu0 %v20949_v62  ;;  %v21093_v63 = vld [vmem:[#allocation54_spill] sm:$0xff] }
 0x291   : > { %v3044_v57 = vpop.f32.mrf.mxu1  ;;  %v17420_v59 = vpop.f32.mrf.mxu0  ;;  %7111 = vmatprep.subr.bf16.mxu0 %v15442_v11  ;;  %v15443_v54 = vld [vmem:[%s20846_s3 + $0x180] ss:$8 sps:$4 sm:$0xff]  }
 0x292   : > { %21091 = vst [vmem:[#allocation53_spill] sm:$0xff] %v17420_v59  ;;  %v17422_v39 = vpack.c.bf16 %v3249_v46, %v3247_v10  ;;  %v3250_v53 = vmax.f32 %v3186_v47, 0.0  ;;  %v3112_v48 = vadd.f32 %v3044_v57, %v21093_v63  ;;  %7112 = vmatpush2.bf16.msra.mxu0 %v15440_v13  ;;  %v3187_v11 = vadd.f32 %v16925_v4, %v3111_v24  ;;  %v21098_v63 = vld [vmem:[#allocation56_spill] sm:$0xff]  ;;  %v15390_v59 = vld [vmem:[%s15954_s28 + $0x4a8] sm:$0xff]  }
 0x293   : > { %v3046_v27 = vpop.f32.mrf.mxu1  ;;  %v17428_v26 = vpop.f32.mrf.mxu0  ;;  %7113 = vmatprep.subr.bf16.mxu0 %v15445_v49 }
 0x294   : > { %21092 = vst [vmem:[#allocation95_spill] sm:$0xff] %v17422_v39  ;;  %21094 = vst [vmem:[#allocation54_spill] sm:$0xff] %v17428_v26  ;;  %v3113_v28 = vadd.f32 %v3046_v27, %v21095_v15  ;;  %v17434_v10 = vpack.c.bf16 %v3250_v53, %v3248_v32  ;;  %v3188_v46 = vadd.f32 %v16933_v35, %v3112_v48  ;;  %v4677_v26 = vld [vmem:[%s20845_s2] sm:$0x3]  ;;  %v15466_v48 = vld [vmem:[%s20846_s3 + $0x274] ss:$8 sps:$4 sm:$0xff]  }
 0x295   : > { %v3048_v47 = vpop.f32.mrf.mxu1  ;;  %v17437_v13 = vpop.f32.mrf.mxu0  ;;  %v3251_v32 = vmax.f32 %v3187_v11, 0.0  ;;  %v21099_v27 = vld [vmem:[#allocation57_spill] sm:$0xff] }
 0x296   : > { %21096 = vst [vmem:[#allocation55_spill] sm:$0xff] %v17434_v10  ;;  %21097 = vst [vmem:[#allocation96_spill] sm:$0xff] %v17437_v13  ;;  %v3189_v57 = vadd.f32 %v16925_v4, %v3113_v28  ;;  %v3114_v39 = vadd.f32 %v3048_v47, %v21098_v63  ;;  %7114 = vmatpush2.bf16.msra.mxu0 %v15443_v54  ;;  %v3252_v54 = vmax.f32 %v3188_v46, 0.0  ;;  %v21103_v10 = vld [vmem:[#allocation28_spill] sm:$0xff] }
 0x297   : > { %v4109_v49 = vpop.f32.mrf.mxu1  ;;  %v4454_v24 = vpop.f32.mrf.mxu0  ;;  %13835 = vmatmul.mubr.msk.bf16.gmra.mxu1 %vm560_vm0, %v15379_v9  ;;  %13871 = vmatmul.mubr.msk.bf16.gmra.mxu0 %vm560_vm0, %v15380_v31  ;;  %v21100_v9 = vld [vmem:[#allocation27_spill] sm:$0xff] }
 0x298   : > { %v3253_v53 = vmax.f32 %v3189_v57, 0.0  ;;  %v3190_v4 = vadd.f32 %v16933_v35, %v3114_v39  ;;  %v4110_v15 = vadd.f32 %v4109_v49, %v21099_v27  ;;  %5417 = vmatprep.mubr.bf16.mxu1 %v20949_v62  ;;  %5758 = vmatprep.mubr.bf16.mxu0 %v20949_v62  ;;  %v17454_v28 = vrot.slane %v4677_v26, %v21100_v9  ;;  %v21102_v35 = vld [vmem:[#allocation58_spill] sm:$0xff] }
 0x299   : > { %v4111_v31 = vpop.f32.mrf.mxu1  ;;  %v4456_v47 = vpop.f32.mrf.mxu0  ;;  %8142 = vmatprep.subr.bf16.mxu0 %v15466_v48  ;;  %v17460_v49 = vrot.slane %v4677_v26, %v21103_v10 }
 0x29a   : > { %v17456_v63 = vpack.c.bf16 %v3253_v53, %v3251_v32  ;;  %v3254_v11 = vmax.f32 %v3190_v4, 0.0  ;;  %v4613_v57 = vadd.f32 %v4454_v24, %v4110_v15  ;;  %v4112_v39 = vadd.f32 %v4111_v31, %v21102_v35  ;;  %v21106_v24 = vld [vmem:[#allocation60_spill] sm:$0xff] }
 0x29b   : > { %v4113_v27 = vpop.f32.mrf.mxu1  ;;  %v4458_v13 = vpop.f32.mrf.mxu0 }
 0x29c   : > { %21101 = vst [vmem:[#allocation56_spill] sm:$0xff] %v17456_v63  ;;  %v4614_v46 = vadd.f32 %v4456_v47, %v4112_v39  ;;  %v4114_v9 = vadd.f32 %v4113_v27, %v21104_v12  ;;  %v17465_v58 = vpack.c.bf16 %v3254_v11, %v3252_v54  ;;  %v4689_v48 = vadd.f32 %v17454_v28, %v4613_v57  ;;  %v21107_v47 = vld [vmem:[#allocation61_spill] sm:$0xff] }
 0x29d   : > { %v4115_v32 = vpop.f32.mrf.mxu1  ;;  %v4460_v53 = vpop.f32.mrf.mxu0 }
 0x29e   : > { %21105 = vst [vmem:[#allocation57_spill] sm:$0xff] %v17465_v58  ;;  %v4615_v4 = vadd.f32 %v4458_v13, %v4114_v9  ;;  %v4116_v15 = vadd.f32 %v4115_v32, %v21106_v24  ;;  %v4690_v31 = vadd.f32 %v17460_v49, %v4614_v46  ;;  %v4753_v13 = vmax.f32 %v4689_v48, 0.0  ;;  %v15398_v24 = vld [vmem:[%s15954_s28 + $0x4b0] sm:$0xff]  }
 0x29f   : > { %v4119_v26 = vpop.f32.mrf.mxu1  ;;  %v4464_v35 = vpop.f32.mrf.mxu0  ;;  %13836 = vmatmul.mubr.msk.bf16.gmra.mxu1 %vm560_vm0, %v15390_v59  ;;  %13872 = vmatmul.mubr.msk.bf16.gmra.mxu0 %vm560_vm0, %v15391_v2 }
 0x2a0   : > { %v4691_v12 = vadd.f32 %v17454_v28, %v4615_v4  ;;  %v4616_v54 = vadd.f32 %v4460_v53, %v4116_v15  ;;  %v4120_v11 = vadd.f32 %v4119_v26, %v21107_v47  ;;  %5427 = vmatprep.mubr.bf16.mxu1 %v20949_v62  ;;  %5768 = vmatprep.mubr.bf16.mxu0 %v20949_v62  ;;  %v15399_v4 = vld [vmem:[%s15954_s28 + $0x410] sm:$0xff]   ;;  %v4754_v53 = vmax.f32 %v4690_v31, 0.0 }
 0x2a1   : > { %v4121_v9 = vpop.f32.mrf.mxu1  ;;  %v4466_v57 = vpop.f32.mrf.mxu0 }
 0x2a2   : > { %v4755_v39 = vmax.f32 %v4691_v12, 0.0  ;;  %v4692_v27 = vadd.f32 %v17460_v49, %v4616_v54  ;;  %v4617_v59 = vadd.f32 %v4464_v35, %v4120_v11  ;;  %v4122_v46 = vadd.f32 %v4121_v9, %v16954_v16 }
 0x2a3   : > { %v4123_v2 = vpop.f32.mrf.mxu1  ;;  %v4468_v32 = vpop.f32.mrf.mxu0 }
 0x2a4   : > { %v17480_v15 = vpack.c.bf16 %v4755_v39, %v4753_v13  ;;  %v4756_v26 = vmax.f32 %v4692_v27, 0.0  ;;  %v4618_v47 = vadd.f32 %v4466_v57, %v4122_v46  ;;  %v4124_v63 = vadd.f32 %v4123_v2, %v16959_v21 }
 0x2a5   : > { %v4125_v48 = vpop.f32.mrf.mxu1  ;;  %v4470_v58 = vpop.f32.mrf.mxu0  ;;  %v4693_v35 = vadd.f32 %v17454_v28, %v4617_v59 }
 0x2a6   : > { %21108 = vst [vmem:[#allocation58_spill] sm:$0xff] %v17480_v15  ;;  %v4126_v12 = vadd.f32 %v4125_v48, %v16967_v55  ;;  %v17484_v10 = vpack.c.bf16 %v4756_v26, %v4754_v53  ;;  %v4619_v16 = vadd.f32 %v4468_v32, %v4124_v63  ;;  %v4694_v55 = vadd.f32 %v17460_v49, %v4618_v47  ;;  %v15407_v32 = vld [vmem:[%s15954_s28 + $0x418] sm:$0xff]  }
 0x2a7   : > { %v4129_v54 = vpop.f32.mrf.mxu1  ;;  %v4474_v11 = vpop.f32.mrf.mxu0  ;;  %13837 = vmatmul.mubr.msk.bf16.gmra.mxu1 %vm560_vm0, %v15398_v24  ;;  %13873 = vmatmul.mubr.msk.bf16.gmra.mxu0 %vm560_vm0, %v15399_v4  ;;  %v4757_v59 = vmax.f32 %v4693_v35, 0.0 }
 0x2a8   : > { %21109 = vst [vmem:[#allocation59_spill] sm:$0xff] %v17484_v10  ;;  %v4620_v31 = vadd.f32 %v4470_v58, %v4126_v12  ;;  %v4130_v21 = vadd.f32 %v4129_v54, %v16972_v14  ;;  %5437 = vmatprep.mubr.bf16.mxu1 %v20949_v62  ;;  %5778 = vmatprep.mubr.bf16.mxu0 %v20949_v62  ;;  %v15406_v14 = vld [vmem:[%s15954_s28 + $0x4b8] sm:$0xff]   ;;  %v4758_v26 = vmax.f32 %v4694_v55, 0.0  ;;  %v21198_v10 = vld [vmem:[#allocation17_spill] sm:$0xff] }
 0x2a9   : > { %v4695_v13 = vadd.f32 %v17454_v28, %v4619_v16  ;;  %v4131_v63 = vpop.f32.mrf.mxu1  ;;  %v4476_v9 = vpop.f32.mrf.mxu0 }
 0x2aa   : > { %v4696_v57 = vadd.f32 %v17460_v49, %v4620_v31  ;;  %v4621_v39 = vadd.f32 %v4474_v11, %v4130_v21  ;;  %v4132_v27 = vadd.f32 %v4131_v63, %v16980_v33 }
 0x2ab   : > { %v4759_v58 = vmax.f32 %v4695_v13, 0.0  ;;  %v4133_v46 = vpop.f32.mrf.mxu1  ;;  %v4478_v2 = vpop.f32.mrf.mxu0 }
 0x2ac   : > { %v4760_v24 = vmax.f32 %v4696_v57, 0.0  ;;  %v4622_v4 = vadd.f32 %v4476_v9, %v4132_v27  ;;  %v4134_v53 = vadd.f32 %v4133_v46, %v16985_v44  ;;  %v4697_v48 = vadd.f32 %v17454_v28, %v4621_v39 }
 0x2ad   : > { %v17499_v47 = vpack.c.bf16 %v4759_v58, %v4757_v59  ;;  %v4135_v12 = vpop.f32.mrf.mxu1  ;;  %v4480_v16 = vpop.f32.mrf.mxu0 }
 0x2ae   : > { %v4623_v54 = vadd.f32 %v4478_v2, %v4134_v53  ;;  %v4136_v33 = vadd.f32 %v4135_v12, %v16993_v30  ;;  %v4698_v35 = vadd.f32 %v17460_v49, %v4622_v4  ;;  %v17506_v44 = vpack.c.bf16 %v4760_v24, %v4758_v26  ;;  %v15414_v2 = vld [vmem:[%s15954_s28 + $0x4c0] sm:$0xff]  }
 0x2af   : > { %21110 = vst [vmem:[#allocation60_spill] sm:$0xff] %v17499_v47  ;;  %v4139_v11 = vpop.f32.mrf.mxu1  ;;  %v4484_v31 = vpop.f32.mrf.mxu0  ;;  %13838 = vmatmul.mubr.msk.bf16.gmra.mxu1 %vm560_vm0, %v15406_v14  ;;  %13874 = vmatmul.mubr.msk.bf16.gmra.mxu0 %vm560_vm0, %v15407_v32  ;;  %v4761_v30 = vmax.f32 %v4697_v48, 0.0  ;;  %v15415_v14 = vld [vmem:[%s15954_s28 + $0x420] sm:$0xff]  }
 0x2b0   : > { %21111 = vst [vmem:[#allocation61_spill] sm:$0xff] %v17506_v44  ;;  %v4699_v21 = vadd.f32 %v17454_v28, %v4623_v54  ;;  %v4624_v55 = vadd.f32 %v4480_v16, %v4136_v33  ;;  %v4140_v13 = vadd.f32 %v4139_v11, %v16998_v7  ;;  %5447 = vmatprep.mubr.bf16.mxu1 %v20949_v62  ;;  %v4762_v32 = vmax.f32 %v4698_v35, 0.0 }
 0x2b1   : > { %5788 = vmatprep.mubr.bf16.mxu0 %v20949_v62  ;;  %v4141_v63 = vpop.f32.mrf.mxu1  ;;  %v4486_v9 = vpop.f32.mrf.mxu0 }
 0x2b2   : > { %v4763_v57 = vmax.f32 %v4699_v21, 0.0  ;;  %v4700_v39 = vadd.f32 %v17460_v49, %v4624_v55  ;;  %v4625_v27 = vadd.f32 %v4484_v31, %v4140_v13  ;;  %v4142_v59 = vadd.f32 %v4141_v63, %v17006_v5 }
 0x2b3   : > { %v4143_v58 = vpop.f32.mrf.mxu1  ;;  %v4488_v46 = vpop.f32.mrf.mxu0 }
 0x2b4   : > { %v17516_v24 = vpack.c.bf16 %v4763_v57, %v4761_v30  ;;  %v4764_v7 = vmax.f32 %v4700_v39, 0.0  ;;  %v4626_v4 = vadd.f32 %v4486_v9, %v4142_v59  ;;  %v4144_v53 = vadd.f32 %v4143_v58, %v17011_v45  ;;  %v15423_v59 = vld [vmem:[%s15954_s28 + $0x428] sm:$0xff]  }
 0x2b5   : > { %v4145_v26 = vpop.f32.mrf.mxu1  ;;  %v4490_v48 = vpop.f32.mrf.mxu0  ;;  %v4701_v54 = vadd.f32 %v17454_v28, %v4625_v27 }
 0x2b6   : > { %21112 = vst [vmem:[#allocation97_spill] sm:$0xff] %v17516_v24  ;;  %v4146_v12 = vadd.f32 %v4145_v26, %v17019_v56  ;;  %v17520_v16 = vpack.c.bf16 %v4764_v7, %v4762_v32  ;;  %v4627_v5 = vadd.f32 %v4488_v46, %v4144_v53  ;;  %v4702_v56 = vadd.f32 %v17460_v49, %v4626_v4 }
 0x2b7   : > { %v4149_v33 = vpop.f32.mrf.mxu1  ;;  %v4494_v11 = vpop.f32.mrf.mxu0  ;;  %13839 = vmatmul.mubr.msk.bf16.gmra.mxu1 %vm560_vm0, %v15414_v2  ;;  %13875 = vmatmul.mubr.msk.bf16.gmra.mxu0 %vm560_vm0, %v15415_v14  ;;  %v4765_v9 = vmax.f32 %v4701_v54, 0.0 }
 0x2b8   : > { %21113 = vst [vmem:[#allocation98_spill] sm:$0xff] %v17520_v16  ;;  %v4628_v35 = vadd.f32 %v4490_v48, %v4146_v12  ;;  %v4150_v45 = vadd.f32 %v4149_v33, %v17024_v52  ;;  %5457 = vmatprep.mubr.bf16.mxu1 %v20949_v62  ;;  %5798 = vmatprep.mubr.bf16.mxu0 %v20949_v62  ;;  %v15422_v52 = vld [vmem:[%s15954_s28 + $0x4c8] sm:$0xff]   ;;  %v4766_v14 = vmax.f32 %v4702_v56, 0.0 }
 0x2b9   : > { %v4703_v31 = vadd.f32 %v17454_v28, %v4627_v5  ;;  %v4151_v21 = vpop.f32.mrf.mxu1  ;;  %v4496_v55 = vpop.f32.mrf.mxu0 }
 0x2ba   : > { %v4704_v13 = vadd.f32 %v17460_v49, %v4628_v35  ;;  %v4629_v30 = vadd.f32 %v4494_v11, %v4150_v45  ;;  %v4152_v63 = vadd.f32 %v4151_v21, %v17032_v41 }
 0x2bb   : > { %v4767_v57 = vmax.f32 %v4703_v31, 0.0  ;;  %v4153_v39 = vpop.f32.mrf.mxu1  ;;  %v4498_v27 = vpop.f32.mrf.mxu0 }
 0x2bc   : > { %v4768_v58 = vmax.f32 %v4704_v13, 0.0  ;;  %v4630_v46 = vadd.f32 %v4496_v55, %v4152_v63  ;;  %v4154_v2 = vadd.f32 %v4153_v39, %v17037_v19  ;;  %v4705_v7 = vadd.f32 %v17454_v28, %v4629_v30  ;;  %v15430_v63 = vld [vmem:[%s15954_s28 + $0x4d0] sm:$0xff]  }
 0x2bd   : > { %v17535_v32 = vpack.c.bf16 %v4767_v57, %v4765_v9  ;;  %v4155_v4 = vpop.f32.mrf.mxu1  ;;  %v4500_v53 = vpop.f32.mrf.mxu0  ;;  %v15431_v9 = vld [vmem:[%s15954_s28 + $0x430] sm:$0xff]  }
 0x2be   : > { %v4631_v26 = vadd.f32 %v4498_v27, %v4154_v2  ;;  %v4156_v41 = vadd.f32 %v4155_v4, %v17045_v0  ;;  %v4706_v48 = vadd.f32 %v17460_v49, %v4630_v46  ;;  %v17542_v19 = vpack.c.bf16 %v4768_v58, %v4766_v14 }
 0x2bf   : > { %21114 = vst [vmem:[#allocation99_spill] sm:$0xff] %v17535_v32  ;;  %v4159_v12 = vpop.f32.mrf.mxu1  ;;  %v4504_v54 = vpop.f32.mrf.mxu0  ;;  %13840 = vmatmul.mubr.msk.bf16.gmra.mxu1 %vm560_vm0, %v15422_v52  ;;  %13876 = vmatmul.mubr.msk.bf16.gmra.mxu0 %vm560_vm0, %v15423_v59  ;;  %v4769_v0 = vmax.f32 %v4705_v7, 0.0 }
 0x2c0   : > { %21115 = vst [vmem:[#allocation100_spill] sm:$0xff] %v17542_v19  ;;  %v4707_v5 = vadd.f32 %v17454_v28, %v4631_v26  ;;  %v4632_v33 = vadd.f32 %v4500_v53, %v4156_v41  ;;  %v4160_v11 = vadd.f32 %v4159_v12, %v17050_v20  ;;  %5467 = vmatprep.mubr.bf16.mxu1 %v20949_v62  ;;  %v4770_v57 = vmax.f32 %v4706_v48, 0.0 }
 0x2c1   : > { %5808 = vmatprep.mubr.bf16.mxu0 %v20949_v62  ;;  %v4161_v35 = vpop.f32.mrf.mxu1  ;;  %v4506_v45 = vpop.f32.mrf.mxu0 }
 0x2c2   : > { %v4771_v56 = vmax.f32 %v4707_v5, 0.0  ;;  %v4708_v31 = vadd.f32 %v17460_v49, %v4632_v33  ;;  %v4633_v21 = vadd.f32 %v4504_v54, %v4160_v11  ;;  %v4162_v55 = vadd.f32 %v4161_v35, %v17058_v22 }
 0x2c3   : > { %v4163_v13 = vpop.f32.mrf.mxu1  ;;  %v4508_v30 = vpop.f32.mrf.mxu0 }
 0x2c4   : > { %v17552_v39 = vpack.c.bf16 %v4771_v56, %v4769_v0  ;;  %v4772_v20 = vmax.f32 %v4708_v31, 0.0  ;;  %v4634_v27 = vadd.f32 %v4506_v45, %v4162_v55  ;;  %v4164_v52 = vadd.f32 %v4163_v13, %v17063_v18  ;;  %v15439_v45 = vld [vmem:[%s15954_s28 + $0x438] sm:$0xff]  }
 0x2c5   : > { %v4165_v59 = vpop.f32.mrf.mxu1  ;;  %v4510_v58 = vpop.f32.mrf.mxu0  ;;  %v4709_v14 = vadd.f32 %v17454_v28, %v4633_v21 }
 0x2c6   : > { %21116 = vst [vmem:[#allocation101_spill] sm:$0xff] %v17552_v39  ;;  %v4166_v46 = vadd.f32 %v4165_v59, %v17071_v50  ;;  %v17556_v2 = vpack.c.bf16 %v4772_v20, %v4770_v57  ;;  %v4635_v22 = vadd.f32 %v4508_v30, %v4164_v52  ;;  %v4710_v50 = vadd.f32 %v17460_v49, %v4634_v27 }
 0x2c7   : > { %v4169_v7 = vpop.f32.mrf.mxu1  ;;  %v4514_v4 = vpop.f32.mrf.mxu0  ;;  %13841 = vmatmul.mubr.msk.bf16.gmra.mxu1 %vm560_vm0, %v15430_v63  ;;  %13877 = vmatmul.mubr.msk.bf16.gmra.mxu0 %vm560_vm0, %v15431_v9  ;;  %v4773_v33 = vmax.f32 %v4709_v14, 0.0 }
 0x2c8   : > { %21117 = vst [vmem:[#allocation102_spill] sm:$0xff] %v17556_v2  ;;  %v4636_v53 = vadd.f32 %v4510_v58, %v4166_v46  ;;  %v4170_v18 = vadd.f32 %v4169_v7, %v17076_v42  ;;  %5477 = vmatprep.mubr.bf16.mxu1 %v20949_v62  ;;  %5818 = vmatprep.mubr.bf16.mxu0 %v20949_v62  ;;  %v15438_v42 = vld [vmem:[%s15954_s28 + $0x4d8] sm:$0xff]   ;;  %v4774_v55 = vmax.f32 %v4710_v50, 0.0  ;;  %v21120_v46 = vld [vmem:[#allocation30_spill] sm:$0xff] }
 0x2c9   : > { %v4711_v26 = vadd.f32 %v17454_v28, %v4635_v22  ;;  %v4171_v41 = vpop.f32.mrf.mxu1  ;;  %v4516_v48 = vpop.f32.mrf.mxu0 }
 0x2ca   : > { %v4712_v12 = vadd.f32 %v17460_v49, %v4636_v53  ;;  %v4637_v54 = vadd.f32 %v4514_v4, %v4170_v18  ;;  %v4172_v5 = vadd.f32 %v4171_v41, %v17084_v8 }
 0x2cb   : > { %v4775_v11 = vmax.f32 %v4711_v26, 0.0  ;;  %v4173_v0 = vpop.f32.mrf.mxu1  ;;  %v4518_v35 = vpop.f32.mrf.mxu0 }
 0x2cc   : > { %v4776_v56 = vmax.f32 %v4712_v12, 0.0  ;;  %v4638_v31 = vadd.f32 %v4516_v48, %v4172_v5  ;;  %v4174_v21 = vadd.f32 %v4173_v0, %v17089_v43  ;;  %v4713_v30 = vadd.f32 %v17454_v28, %v4637_v54  ;;  %v15446_v48 = vld [vmem:[%s15954_s28 + $0x20] sm:$0xff]  }
 0x2cd   : > { %v17571_v13 = vpack.c.bf16 %v4775_v11, %v4773_v33  ;;  %v4175_v63 = vpop.f32.mrf.mxu1  ;;  %v4520_v9 = vpop.f32.mrf.mxu0 }
 0x2ce   : > { %v4639_v57 = vadd.f32 %v4518_v35, %v4174_v21  ;;  %v4176_v8 = vadd.f32 %v4175_v63, %v17097_v36  ;;  %v17577_v52 = vpack.c.bf16 %v4776_v56, %v4774_v55  ;;  %v4777_v14 = vmax.f32 %v4713_v30, 0.0  ;;  %v15453_v35 = vld [vmem:[%s20846_s3 + $0x70] ss:$8 sps:$4 sm:$0xff]   ;;  %v21122_v30 = vld [vmem:[#allocation29_spill] sm:$0xff] }
 0x2cf   : > { %21118 = vst [vmem:[#allocation103_spill] sm:$0xff] %v17571_v13  ;;  %v4179_v20 = vpop.f32.mrf.mxu1  ;;  %v4524_v27 = vpop.f32.mrf.mxu0  ;;  %13842 = vmatmul.mubr.msk.bf16.gmra.mxu1 %vm560_vm0, %v15438_v42  ;;  %13878 = vmatmul.mubr.msk.bf16.gmra.mxu0 %vm560_vm0, %v15439_v45  ;;  %v4714_v36 = vadd.f32 %v17460_v49, %v4638_v31  ;;  %v15459_v45 = vld [vmem:[%s20846_s3 + $0x64] ss:$8 sps:$4 sm:$0xff]  }
 0x2d0   : > { %21119 = vst [vmem:[#allocation104_spill] sm:$0xff] %v17577_v52  ;;  %v4715_v43 = vadd.f32 %v17454_v28, %v4639_v57  ;;  %v4640_v59 = vadd.f32 %v4520_v9, %v4176_v8  ;;  %v4180_v58 = vadd.f32 %v4179_v20, %v17102_v37  ;;  %7115 = vmatprep.mubr.bf16.mxu0 %v21120_v46  ;;  %v21124_v57 = vld [vmem:[#allocation32_spill] sm:$0xff] }
 0x2d1   : > { %6013 = vmatprep.mubr.bf16.mxu1 %v20949_v62  ;;  %v4181_v22 = vpop.f32.mrf.mxu1  ;;  %v4526_v7 = vpop.f32.mrf.mxu0  ;;  %v4778_v5 = vmax.f32 %v4714_v36, 0.0 }
 0x2d2   : > { %v4779_v4 = vmax.f32 %v4715_v43, 0.0  ;;  %v4716_v53 = vadd.f32 %v17460_v49, %v4640_v59  ;;  %v4641_v18 = vadd.f32 %v4524_v27, %v4180_v58  ;;  %v4182_v50 = vadd.f32 %v4181_v22, %v17110_v38  ;;  %v15464_v38 = vld [vmem:[%s20846_s3 + $0x270] ss:$8 sps:$4 sm:$0xff]   ;;  %v15457_v59 = vld [vmem:[%s20846_s3 + $0x60] ss:$8 sps:$4 sm:$0xff]  }
 0x2d3   : > { %v4183_v26 = vpop.f32.mrf.mxu1  ;;  %v4528_v41 = vpop.f32.mrf.mxu0  ;;  %v15463_v22 = vld [vmem:[%s20846_s3 + $0x54] ss:$8 sps:$4 sm:$0xff]  }
 0x2d4   : > { %v17587_v12 = vpack.c.bf16 %v4779_v4, %v4777_v14  ;;  %v4780_v37 = vmax.f32 %v4716_v53, 0.0  ;;  %v4642_v54 = vadd.f32 %v4526_v7, %v4182_v50  ;;  %v4184_v33 = vadd.f32 %v4183_v26, %v17115_v29  ;;  %v15469_v29 = vld [vmem:[%s20846_s3 + $0x264] ss:$8 sps:$4 sm:$0xff]   ;;  %v21125_v14 = vld [vmem:[#allocation76_spill] sm:$0xff] }
 0x2d5   : > { %v4185_v11 = vpop.f32.mrf.mxu1  ;;  %v4530_v0 = vpop.f32.mrf.mxu0  ;;  %v4717_v56 = vadd.f32 %v17454_v28, %v4641_v18  ;;  %v15476_v7 = vld [vmem:[%s20846_s3 + $0x254] ss:$8 sps:$4 sm:$0xff]   ;;  %v15447_v26 = vld [vmem:[%s15954_s28 + $0x28] sm:$0xff]  }
 0x2d6   : > { %21121 = vst [vmem:[#allocation30_spill] sm:$0xff] %v17587_v12  ;;  %v4186_v42 = vadd.f32 %v4185_v11, %v17123_v40  ;;  %v4643_v31 = vadd.f32 %v4528_v41, %v4184_v33  ;;  %v17606_v63 = vpack.c.bf16 %v4780_v37, %v4778_v5  ;;  %v4718_v8 = vadd.f32 %v17460_v49, %v4642_v54 }
 0x2d7   : > { %v4189_v21 = vpop.f32.mrf.mxu1  ;;  %v4534_v55 = vpop.f32.mrf.mxu0  ;;  %13903 = vmatmul.mubr.msk.bf16.vlgmr.msra.gmra.mxu1 %vm560_vm0, %v15446_v48  ;;  %7116 = vmatmul.mubr.bf16.vlgmr.msra.gmra.mxu0 %v21122_v30  ;;  %v4781_v4 = vmax.f32 %v4717_v56, 0.0 }
 0x2d8   : > { %21123 = vst [vmem:[#allocation29_spill] sm:$0xff] %v17606_v63  ;;  %v4644_v40 = vadd.f32 %v4530_v0, %v4186_v42  ;;  %v4190_v9 = vadd.f32 %v4189_v21, %v17134_v6  ;;  %7125 = vmatprep.mubr.bf16.mxu0 %v21124_v57  ;;  %6023 = vmatprep.mubr.bf16.mxu1 %v20949_v62  ;;  %v15467_v6 = vld [vmem:[%s20846_s3 + $0x260] ss:$8 sps:$4 sm:$0xff]   ;;  %v4782_v54 = vmax.f32 %v4718_v8, 0.0 }
 0x2d9   : > { %v4719_v20 = vadd.f32 %v17454_v28, %v4643_v31  ;;  %v4191_v27 = vpop.f32.mrf.mxu1  ;;  %v4536_v43 = vpop.f32.mrf.mxu0  ;;  %7597 = vmatpush1.bf16.msra.mxu1 %v15453_v35  ;;  %8143 = vmatpush1.bf16.msra.mxu0 %v15464_v38  ;;  %v15461_v35 = vld [vmem:[%s20846_s3 + $0x50] ss:$8 sps:$4 sm:$0xff]  }
 0x2da   : > { %v4720_v58 = vadd.f32 %v17460_v49, %v4644_v40  ;;  %v4645_v46 = vadd.f32 %v4534_v55, %v4190_v9  ;;  %v4192_v36 = vadd.f32 %v4191_v27, %v21125_v14  ;;  %7598 = vmatprep.subr.bf16.mxu1 %v15459_v45  ;;  %8144 = vmatprep.subr.bf16.mxu0 %v15469_v29  ;;  %v15474_v38 = vld [vmem:[%s20846_s3 + $0x250] ss:$8 sps:$4 sm:$0xff]   ;;  %v15473_v45 = vld [vmem:[%s20846_s3 + $0x44] ss:$8 sps:$4 sm:$0xff]   ;;  %v17665_v14 = vld [vmem:[%s20846_s3 + $0x34] ss:$8 sps:$4 sm:$0xff]  }
 0x2db   : > { %v4783_v53 = vmax.f32 %v4719_v20, 0.0  ;;  %v4193_v18 = vpop.f32.mrf.mxu1  ;;  %v4538_v50 = vpop.f32.mrf.mxu0  ;;  %v15479_v29 = vld [vmem:[%s20846_s3 + $0x244] ss:$8 sps:$4 sm:$0xff]   ;;  %v21127_v55 = vld [vmem:[#allocation31_spill] sm:$0xff] }
 0x2dc   : > { %v4784_v41 = vmax.f32 %v4720_v58, 0.0  ;;  %v4646_v48 = vadd.f32 %v4536_v43, %v4192_v36  ;;  %v4194_v37 = vadd.f32 %v4193_v18, %v17159_v17  ;;  %v4721_v33 = vadd.f32 %v17454_v28, %v4645_v46  ;;  %v21129_v57 = vld [vmem:[#allocation34_spill] sm:$0xff]  ;;  %v15486_v36 = vld [vmem:[%s20846_s3 + $0x234] ss:$8 sps:$4 sm:$0xff]  }
 0x2dd   : > { %v17629_v5 = vpack.c.bf16 %v4783_v53, %v4781_v4  ;;  %v4195_v11 = vpop.f32.mrf.mxu1  ;;  %v4540_v0 = vpop.f32.mrf.mxu0  ;;  %7599 = vmatpush1.bf16.msra.mxu1 %v15457_v59  ;;  %8145 = vmatpush1.bf16.msra.mxu0 %v15467_v6  ;;  %v15471_v43 = vld [vmem:[%s20846_s3 + $0x40] ss:$8 sps:$4 sm:$0xff]   ;;  %v15448_v4 = vld [vmem:[%s15954_s28 + $0x30] sm:$0xff]  }
 0x2de   : > { %v4647_v42 = vadd.f32 %v4538_v50, %v4194_v37  ;;  %v4196_v17 = vadd.f32 %v4195_v11, %v17167_v3  ;;  %7600 = vmatprep.subr.bf16.mxu1 %v15463_v22  ;;  %8146 = vmatprep.subr.bf16.mxu0 %v15476_v7  ;;  %v4722_v56 = vadd.f32 %v17460_v49, %v4646_v48  ;;  %v4785_v8 = vmax.f32 %v4721_v33, 0.0  ;;  %v15477_v59 = vld [vmem:[%s20846_s3 + $0x240] ss:$8 sps:$4 sm:$0xff]   ;;  %v17677_v37 = vld [vmem:[%s20846_s3 + $0x30] ss:$8 sps:$4 sm:$0xff]  }
 0x2df   : > { %21126 = vst [vmem:[#allocation32_spill] sm:$0xff] %v17629_v5  ;;  %v4199_v31 = vpop.f32.mrf.mxu1  ;;  %v4544_v21 = vpop.f32.mrf.mxu0  ;;  %13904 = vmatmul.mubr.msk.bf16.gmra.mxu1 %vm560_vm0, %v15447_v26  ;;  %7126 = vmatmul.mubr.bf16.gmra.mxu0 %v21127_v55  ;;  %v17648_v30 = vpack.c.bf16 %v4784_v41, %v4782_v54  ;;  %v15484_v54 = vld [vmem:[%s20846_s3 + $0x230] ss:$8 sps:$4 sm:$0xff]   ;;  %v15492_v11 = vld [vmem:[%s20846_s3 + $0x224] ss:$8 sps:$4 sm:$0xff]  }
 0x2e0   : > { %v4723_v3 = vadd.f32 %v17454_v28, %v4647_v42  ;;  %v4648_v40 = vadd.f32 %v4540_v0, %v4196_v17  ;;  %v4200_v9 = vadd.f32 %v4199_v31, %v17178_v25  ;;  %7135 = vmatprep.mubr.bf16.mxu0 %v21129_v57  ;;  %6033 = vmatprep.mubr.bf16.mxu1 %v20949_v62  ;;  %v4786_v53 = vmax.f32 %v4722_v56, 0.0  ;;  %v21133_v56 = vld [vmem:[#allocation36_spill] sm:$0xff] }
 0x2e1   : > { %21128 = vst [vmem:[#allocation76_spill] sm:$0xff] %v17648_v30  ;;  %v4201_v20 = vpop.f32.mrf.mxu1  ;;  %v4546_v27 = vpop.f32.mrf.mxu0  ;;  %7601 = vmatpush1.bf16.msra.mxu1 %v15461_v35  ;;  %8147 = vmatpush1.bf16.msra.mxu0 %v15474_v38  ;;  %v21174_v30 = vld [vmem:[#allocation54_spill] sm:$0xff] }
 0x2e2   : > { %v4787_v6 = vmax.f32 %v4723_v3, 0.0  ;;  %v4724_v25 = vadd.f32 %v17460_v49, %v4648_v40  ;;  %v4649_v58 = vadd.f32 %v4544_v21, %v4200_v9  ;;  %v4202_v46 = vadd.f32 %v4201_v20, %v17189_v51  ;;  %7602 = vmatprep.subr.bf16.mxu1 %v15473_v45  ;;  %8148 = vmatprep.subr.bf16.mxu0 %v15479_v29  ;;  %v17706_v40 = vld [vmem:[%s20846_s3 + $0x20] ss:$8 sps:$4 sm:$0xff]   ;;  %v17717_v20 = vld [vmem:[%s20846_s3 + $0x14] ss:$8 sps:$4 sm:$0xff]  }
 0x2e3   : > { %v4203_v22 = vpop.f32.mrf.mxu1  ;;  %v4548_v7 = vpop.f32.mrf.mxu0 }
 0x2e4   : > { %v17671_v18 = vpack.c.bf16 %v4787_v6, %v4785_v8  ;;  %v4788_v50 = vmax.f32 %v4724_v25, 0.0  ;;  %v4650_v26 = vadd.f32 %v4546_v27, %v4202_v46  ;;  %v4204_v51 = vadd.f32 %v4203_v22, %v17197_v61  ;;  %v17687_v61 = vld [vmem:[%s20846_s3 + $0x24] ss:$8 sps:$4 sm:$0xff]   ;;  %v15499_v27 = vld [vmem:[%s20846_s3 + $0x214] ss:$8 sps:$4 sm:$0xff]  }
 0x2e5   : > { %v4205_v41 = vpop.f32.mrf.mxu1  ;;  %v4550_v48 = vpop.f32.mrf.mxu0  ;;  %7603 = vmatpush1.bf16.msra.mxu1 %v15471_v43  ;;  %8149 = vmatpush1.bf16.msra.mxu0 %v15477_v59  ;;  %v4725_v35 = vadd.f32 %v17454_v28, %v4649_v58  ;;  %v15449_v58 = vld [vmem:[%s15954_s28 + $0x38] sm:$0xff]  }
 0x2e6   : > { %21130 = vst [vmem:[#allocation31_spill] sm:$0xff] %v17671_v18  ;;  %v4206_v33 = vadd.f32 %v4205_v41, %v17205_v1  ;;  %7604 = vmatprep.subr.bf16.mxu1 %v17665_v14  ;;  %8150 = vmatprep.subr.bf16.mxu0 %v15486_v36  ;;  %v17692_v0 = vpack.c.bf16 %v4788_v50, %v4786_v53  ;;  %v21132_v1 = vld [vmem:[#allocation33_spill] sm:$0xff]  ;;  %v21135_v41 = vld [vmem:[#allocation83_spill] sm:$0xff] }
 0x2e7   : > { %v4651_v38 = vadd.f32 %v4548_v7, %v4204_v51  ;;  %v4209_v42 = vpop.f32.mrf.mxu1  ;;  %v4554_v17 = vpop.f32.mrf.mxu0  ;;  %13905 = vmatmul.mubr.msk.bf16.gmra.mxu1 %vm560_vm0, %v15448_v4  ;;  %7136 = vmatmul.mubr.bf16.gmra.mxu0 %v21132_v1  ;;  %v4726_v31 = vadd.f32 %v17460_v49, %v4650_v26  ;;  %v4789_v43 = vmax.f32 %v4725_v35, 0.0  ;;  %v17731_v26 = vld [vmem:[%s20846_s3 + $0x10] ss:$8 sps:$4 sm:$0xff]  }
 0x2e8   : > { %21131 = vst [vmem:[#allocation34_spill] sm:$0xff] %v17692_v0  ;;  %v4652_v45 = vadd.f32 %v4550_v48, %v4206_v33  ;;  %v4210_v29 = vadd.f32 %v4209_v42, %v17216_v34  ;;  %7145 = vmatprep.mubr.bf16.mxu0 %v21133_v56  ;;  %6043 = vmatprep.mubr.bf16.mxu1 %v20949_v62  ;;  %v15490_v34 = vld [vmem:[%s20846_s3 + $0x220] ss:$8 sps:$4 sm:$0xff]   ;;  %v15497_v51 = vld [vmem:[%s20846_s3 + $0x210] ss:$8 sps:$4 sm:$0xff]  }
 0x2e9   : > { %v4727_v21 = vadd.f32 %v17454_v28, %v4651_v38  ;;  %v4211_v55 = vpop.f32.mrf.mxu1  ;;  %v4556_v3 = vpop.f32.mrf.mxu0  ;;  %7605 = vmatpush1.bf16.msra.mxu1 %v17677_v37  ;;  %8151 = vmatpush1.bf16.msra.mxu0 %v15484_v54  ;;  %v4790_v22 = vmax.f32 %v4726_v31, 0.0  ;;  %v17741_v54 = vld [vmem:[%s20846_s3 + $0x4] ss:$8 sps:$4 sm:$0xff]   ;;  %v21136_v42 = vld [vmem:[#allocation35_spill] sm:$0xff] }
 0x2ea   : > { %v4728_v9 = vadd.f32 %v17460_v49, %v4652_v45  ;;  %v4653_v57 = vadd.f32 %v4554_v17, %v4210_v29  ;;  %v4212_v8 = vadd.f32 %v4211_v55, %v17227_v60  ;;  %7606 = vmatprep.subr.bf16.mxu1 %v17687_v61  ;;  %8152 = vmatprep.subr.bf16.mxu0 %v15492_v11  ;;  %v15505_v33 = vld [vmem:[%s20846_s3 + $0x204] ss:$8 sps:$4 sm:$0xff]   ;;  %v21138_v29 = vld [vmem:[#allocation84_spill] sm:$0xff] }
 0x2eb   : > { %v4791_v59 = vmax.f32 %v4727_v21, 0.0  ;;  %v4213_v6 = vpop.f32.mrf.mxu1  ;;  %v4558_v25 = vpop.f32.mrf.mxu0  ;;  %v21139_v31 = vld [vmem:[#allocation38_spill] sm:$0xff] }
 0x2ec   : > { %v4792_v46 = vmax.f32 %v4728_v9, 0.0  ;;  %v4654_v36 = vadd.f32 %v4556_v3, %v4212_v8  ;;  %v4214_v60 = vadd.f32 %v4213_v6, %v17235_v23  ;;  %v4729_v4 = vadd.f32 %v17454_v28, %v4653_v57  ;;  %v15503_v9 = vld [vmem:[%s20846_s3 + $0x200] ss:$8 sps:$4 sm:$0xff]   ;;  %v17770_v6 = vld [vmem:[%s20846_s3 + $0xf4] ss:$8 sps:$4 sm:$0xff]  }
 0x2ed   : > { %v17724_v7 = vpack.c.bf16 %v4791_v59, %v4789_v43  ;;  %v4215_v53 = vpop.f32.mrf.mxu1  ;;  %v4560_v50 = vpop.f32.mrf.mxu0  ;;  %7607 = vmatpush1.bf16.msra.mxu1 %v17706_v40  ;;  %8153 = vmatpush1.bf16.msra.mxu0 %v15490_v34  ;;  %v17759_v34 = vld [vmem:[%s20846_s3] ss:$8 sps:$4 sm:$0xff]  }
 0x2ee   : > { %v4655_v23 = vadd.f32 %v4558_v25, %v4214_v60  ;;  %v4216_v48 = vadd.f32 %v4215_v53, %v21135_v41  ;;  %7608 = vmatprep.subr.bf16.mxu1 %v17717_v20  ;;  %8154 = vmatprep.subr.bf16.mxu0 %v15499_v27  ;;  %v4730_v11 = vadd.f32 %v17460_v49, %v4654_v36  ;;  %v4793_v21 = vmax.f32 %v4729_v4, 0.0  ;;  %v21140_v43 = vld [vmem:[#allocation85_spill] sm:$0xff]  ;;  %v15512_v25 = vld [vmem:[%s20846_s3 + $0x2f4] ss:$8 sps:$4 sm:$0xff]  }
 0x2ef   : > { %21134 = vst [vmem:[#allocation33_spill] sm:$0xff] %v17724_v7  ;;  %v4219_v35 = vpop.f32.mrf.mxu1  ;;  %v4564_v38 = vpop.f32.mrf.mxu0  ;;  %13906 = vmatmul.mubr.msk.bf16.gmra.mxu1 %vm560_vm0, %v15449_v58  ;;  %7146 = vmatmul.mubr.bf16.gmra.mxu0 %v21136_v42  ;;  %v17749_v17 = vpack.c.bf16 %v4792_v46, %v4790_v22  ;;  %v15450_v36 = vld [vmem:[%s15954_s28 + $0x40] sm:$0xff]  }
 0x2f0   : > { %v4731_v1 = vadd.f32 %v17454_v28, %v4655_v23  ;;  %v4656_v45 = vadd.f32 %v4560_v50, %v4216_v48  ;;  %v4220_v56 = vadd.f32 %v4219_v35, %v21138_v29  ;;  %7155 = vmatprep.mubr.bf16.mxu0 %v21139_v31  ;;  %6053 = vmatprep.mubr.bf16.mxu1 %v20949_v62  ;;  %v4794_v60 = vmax.f32 %v4730_v11, 0.0  ;;  %v21142_v50 = vld [vmem:[#allocation87_spill] sm:$0xff]  ;;  %v21143_v11 = vld [vmem:[#allocation88_spill] sm:$0xff]  ;;  %v15518_v42 = vld [vmem:[%s20846_s3 + $0x2e4] ss:$8 sps:$4 sm:$0xff]  }
 0x2f1   : > { %21137 = vst [vmem:[#allocation36_spill] sm:$0xff] %v17749_v17  ;;  %v4221_v55 = vpop.f32.mrf.mxu1  ;;  %v4566_v3 = vpop.f32.mrf.mxu0  ;;  %7609 = vmatpush1.bf16.msra.mxu1 %v17731_v26  ;;  %8155 = vmatpush1.bf16.msra.mxu0 %v15497_v51  ;;  %v17783_v48 = vld [vmem:[%s20846_s3 + $0xf0] ss:$8 sps:$4 sm:$0xff]  }
 0x2f2   : > { %v4795_v57 = vmax.f32 %v4731_v1, 0.0  ;;  %v4732_v8 = vadd.f32 %v17460_v49, %v4656_v45  ;;  %v4657_v27 = vadd.f32 %v4564_v38, %v4220_v56  ;;  %v4222_v59 = vadd.f32 %v4221_v55, %v21140_v43  ;;  %7610 = vmatprep.subr.bf16.mxu1 %v17741_v54  ;;  %8156 = vmatprep.subr.bf16.mxu0 %v15505_v33  ;;  %v15510_v33 = vld [vmem:[%s20846_s3 + $0x2f0] ss:$8 sps:$4 sm:$0xff]   ;;  %v17793_v38 = vld [vmem:[%s20846_s3 + $0xe4] ss:$8 sps:$4 sm:$0xff]  }
 0x2f3   : > { %v4223_v58 = vpop.f32.mrf.mxu1  ;;  %v4568_v46 = vpop.f32.mrf.mxu0 }
 0x2f4   : > { %v17776_v22 = vpack.c.bf16 %v4795_v57, %v4793_v21  ;;  %v4796_v4 = vmax.f32 %v4732_v8, 0.0  ;;  %v4658_v53 = vadd.f32 %v4566_v3, %v4222_v59  ;;  %v4224_v51 = vadd.f32 %v4223_v58, %v21142_v50  ;;  %v21145_v21 = vld [vmem:[#allocation37_spill] sm:$0xff]  ;;  %v21146_v3 = vld [vmem:[#allocation20_spill] sm:$0xff] }
 0x2f5   : > { %v4225_v23 = vpop.f32.mrf.mxu1  ;;  %v4570_v41 = vpop.f32.mrf.mxu0  ;;  %7611 = vmatpush1.bf16.msra.mxu1 %v17759_v34  ;;  %8157 = vmatpush1.bf16.msra.mxu0 %v15503_v9  ;;  %v4733_v45 = vadd.f32 %v17454_v28, %v4657_v27  ;;  %v21147_v57 = vld [vmem:[#allocation40_spill] sm:$0xff] }
 0x2f6   : > { %21141 = vst [vmem:[#allocation83_spill] sm:$0xff] %v17776_v22  ;;  %v4226_v35 = vadd.f32 %v4225_v23, %v21143_v11  ;;  %7612 = vmatprep.subr.bf16.mxu1 %v17770_v6  ;;  %8158 = vmatprep.subr.bf16.mxu0 %v15512_v25  ;;  %v17798_v1 = vpack.c.bf16 %v4796_v4, %v4794_v60  ;;  %v17812_v25 = vld [vmem:[%s20846_s3 + $0xe0] ss:$8 sps:$4 sm:$0xff]   ;;  %v15525_v50 = vld [vmem:[%s20846_s3 + $0x2d4] ss:$8 sps:$4 sm:$0xff]  }
 0x2f7   : > { %v4659_v29 = vadd.f32 %v4568_v46, %v4224_v51  ;;  %v4229_v56 = vpop.f32.mrf.mxu1  ;;  %v4574_v31 = vpop.f32.mrf.mxu0  ;;  %13907 = vmatmul.mubr.msk.bf16.gmra.mxu1 %vm560_vm0, %v15450_v36  ;;  %7156 = vmatmul.mubr.bf16.gmra.mxu0 %v21145_v21  ;;  %v4734_v8 = vadd.f32 %v17460_v49, %v4658_v53  ;;  %v15516_v58 = vld [vmem:[%s20846_s3 + $0x2e0] ss:$8 sps:$4 sm:$0xff]   ;;  %v17823_v53 = vld [vmem:[%s20846_s3 + $0xd4] ss:$8 sps:$4 sm:$0xff]   ;;  %v4797_v51 = vmax.f32 %v4733_v45, 0.0 }
 0x2f8   : > { %21144 = vst [vmem:[#allocation35_spill] sm:$0xff] %v17798_v1  ;;  %v4660_v55 = vadd.f32 %v4570_v41, %v4226_v35  ;;  %v4230_v9 = vadd.f32 %v4229_v56, %v21146_v3  ;;  %7165 = vmatprep.mubr.bf16.mxu0 %v21147_v57  ;;  %6063 = vmatprep.mubr.bf16.mxu1 %v20949_v62  ;;  %v21148_v60 = vld [vmem:[#allocation21_spill] sm:$0xff]  ;;  %v21149_v56 = vld [vmem:[#allocation22_spill] sm:$0xff]  ;;  %v21163_v22 = vld [vmem:[#allocation44_spill] sm:$0xff] }
 0x2f9   : > { %v4735_v43 = vadd.f32 %v17454_v28, %v4659_v29  ;;  %v4231_v59 = vpop.f32.mrf.mxu1  ;;  %v4576_v27 = vpop.f32.mrf.mxu0  ;;  %7613 = vmatpush2.bf16.msra.mxu1 %v17783_v48  ;;  %8159 = vmatpush2.bf16.msra.mxu0 %v15510_v33  ;;  %v15451_v11 = vld [vmem:[%s15954_s28 + $0x48] sm:$0xff]   ;;  %v4798_v21 = vmax.f32 %v4734_v8, 0.0  ;;  %v17837_v45 = vld [vmem:[%s20846_s3 + $0xd0] ss:$8 sps:$4 sm:$0xff]  }
 0x2fa   : > { %v4736_v46 = vadd.f32 %v17460_v49, %v4660_v55  ;;  %v4661_v36 = vadd.f32 %v4574_v31, %v4230_v9  ;;  %v4232_v4 = vadd.f32 %v4231_v59, %v21148_v60  ;;  %7614 = vmatprep.subr.bf16.mxu1 %v17793_v38  ;;  %8160 = vmatprep.subr.bf16.mxu0 %v15518_v42  ;;  %v15523_v57 = vld [vmem:[%s20846_s3 + $0x2d0] ss:$8 sps:$4 sm:$0xff]  }
 0x2fb   : > { %v4799_v23 = vmax.f32 %v4735_v43, 0.0  ;;  %v4233_v41 = vpop.f32.mrf.mxu1  ;;  %v4578_v33 = vpop.f32.mrf.mxu0  ;;  %v21151_v8 = vld [vmem:[#allocation90_spill] sm:$0xff] }
 0x2fc   : > { %v4800_v35 = vmax.f32 %v4736_v46, 0.0  ;;  %v4662_v29 = vadd.f32 %v4576_v27, %v4232_v4  ;;  %v4234_v31 = vadd.f32 %v4233_v41, %v21149_v56  ;;  %v4737_v55 = vadd.f32 %v17454_v28, %v4661_v36  ;;  %v17847_v27 = vld [vmem:[%s20846_s3 + $0xc4] ss:$8 sps:$4 sm:$0xff]   ;;  %v21152_v4 = vld [vmem:[#allocation39_spill] sm:$0xff]  ;;  %v21154_v41 = vld [vmem:[#allocation24_spill] sm:$0xff] }
 0x2fd   : > { %v17830_v42 = vpack.c.bf16 %v4799_v23, %v4797_v51  ;;  %v4235_v3 = vpop.f32.mrf.mxu1  ;;  %v4580_v9 = vpop.f32.mrf.mxu0  ;;  %7615 = vmatpush2.bf16.msra.mxu1 %v17812_v25  ;;  %8161 = vmatpush2.bf16.msra.mxu0 %v15516_v58  ;;  %v15531_v58 = vld [vmem:[%s20846_s3 + $0x2c4] ss:$8 sps:$4 sm:$0xff]  }
 0x2fe   : > { %v4663_v43 = vadd.f32 %v4578_v33, %v4234_v31  ;;  %v4236_v59 = vadd.f32 %v4235_v3, %v21151_v8  ;;  %7616 = vmatprep.subr.bf16.mxu1 %v17823_v53  ;;  %8162 = vmatprep.subr.bf16.mxu0 %v15525_v50  ;;  %v4738_v46 = vadd.f32 %v17460_v49, %v4662_v29  ;;  %v21155_v56 = vld [vmem:[#allocation42_spill] sm:$0xff]  ;;  %v4801_v31 = vmax.f32 %v4737_v55, 0.0  ;;  %v21156_v55 = vld [vmem:[#allocation25_spill] sm:$0xff] }
 0x2ff   : > { %21150 = vst [vmem:[#allocation84_spill] sm:$0xff] %v17830_v42  ;;  %v4239_v36 = vpop.f32.mrf.mxu1  ;;  %v4584_v60 = vpop.f32.mrf.mxu0  ;;  %13908 = vmatmul.mubr.msk.bf16.gmra.mxu1 %vm560_vm0, %v15451_v11  ;;  %7166 = vmatmul.mubr.bf16.gmra.mxu0 %v21152_v4  ;;  %v17855_v51 = vpack.c.bf16 %v4800_v35, %v4798_v21  ;;  %v17865_v11 = vld [vmem:[%s20846_s3 + $0xc0] ss:$8 sps:$4 sm:$0xff]   ;;  %v17889_v42 = vld [vmem:[%s20846_s3 + $0xb0] ss:$8 sps:$4 sm:$0xff]  }
 0x300   : > { %v4739_v50 = vadd.f32 %v17454_v28, %v4663_v43  ;;  %v4664_v23 = vadd.f32 %v4580_v9, %v4236_v59  ;;  %v4240_v33 = vadd.f32 %v4239_v36, %v21154_v41  ;;  %7175 = vmatprep.mubr.bf16.mxu0 %v21155_v56  ;;  %6073 = vmatprep.mubr.bf16.mxu1 %v20949_v62  ;;  %v15529_v35 = vld [vmem:[%s20846_s3 + $0x2c0] ss:$8 sps:$4 sm:$0xff]   ;;  %v15538_v59 = vld [vmem:[%s20846_s3 + $0x2b4] ss:$8 sps:$4 sm:$0xff]   ;;  %v4802_v41 = vmax.f32 %v4738_v46, 0.0 }
 0x301   : > { %21153 = vst [vmem:[#allocation38_spill] sm:$0xff] %v17855_v51  ;;  %v4241_v3 = vpop.f32.mrf.mxu1  ;;  %v4586_v29 = vpop.f32.mrf.mxu0  ;;  %7617 = vmatpush2.bf16.msra.mxu1 %v17837_v45  ;;  %8163 = vmatpush2.bf16.msra.mxu0 %v15523_v57  ;;  %v17876_v57 = vld [vmem:[%s20846_s3 + $0xb4] ss:$8 sps:$4 sm:$0xff]   ;;  %v21158_v56 = vld [vmem:[#allocation26_spill] sm:$0xff] }
 0x302   : > { %v4803_v21 = vmax.f32 %v4739_v50, 0.0  ;;  %v4740_v9 = vadd.f32 %v17460_v49, %v4664_v23  ;;  %v4665_v43 = vadd.f32 %v4584_v60, %v4240_v33  ;;  %v4242_v8 = vadd.f32 %v4241_v3, %v21156_v55  ;;  %7618 = vmatprep.subr.bf16.mxu1 %v17847_v27  ;;  %8164 = vmatprep.subr.bf16.mxu0 %v15531_v58  ;;  %v15452_v50 = vld [vmem:[%s15954_s28 + $0x50] sm:$0xff]  }
 0x303   : > { %v4243_v36 = vpop.f32.mrf.mxu1  ;;  %v4588_v4 = vpop.f32.mrf.mxu0  ;;  %v15536_v46 = vld [vmem:[%s20846_s3 + $0x2b0] ss:$8 sps:$4 sm:$0xff]  }
 0x304   : > { %v17882_v23 = vpack.c.bf16 %v4803_v21, %v4801_v31  ;;  %v4804_v60 = vmax.f32 %v4740_v9, 0.0  ;;  %v4666_v33 = vadd.f32 %v4586_v29, %v4242_v8  ;;  %v4244_v3 = vadd.f32 %v4243_v36, %v21158_v56  ;;  %v21159_v31 = vld [vmem:[#allocation92_spill] sm:$0xff]  ;;  %v17899_v29 = vld [vmem:[%s20846_s3 + $0xa4] ss:$8 sps:$4 sm:$0xff]  }
 0x305   : > { %v4245_v58 = vpop.f32.mrf.mxu1  ;;  %v4590_v55 = vpop.f32.mrf.mxu0  ;;  %7619 = vmatpush2.bf16.msra.mxu1 %v17865_v11  ;;  %8165 = vmatpush2.bf16.msra.mxu0 %v15529_v35  ;;  %v15544_v35 = vld [vmem:[%s20846_s3 + $0x2a4] ss:$8 sps:$4 sm:$0xff]   ;;  %v4741_v8 = vadd.f32 %v17454_v28, %v4665_v43 }
 0x306   : > { %21157 = vst [vmem:[#allocation85_spill] sm:$0xff] %v17882_v23  ;;  %v4246_v21 = vadd.f32 %v4245_v58, %v21159_v31  ;;  %7620 = vmatprep.subr.bf16.mxu1 %v17876_v57  ;;  %8166 = vmatprep.subr.bf16.mxu0 %v15538_v59  ;;  %v17904_v9 = vpack.c.bf16 %v4804_v60, %v4802_v41  ;;  %v21161_v58 = vld [vmem:[#allocation41_spill] sm:$0xff]  ;;  %v21162_v31 = vld [vmem:[#allocation48_spill] sm:$0xff] }
 0x307   : > { %v4667_v36 = vadd.f32 %v4588_v4, %v4244_v3  ;;  %v4249_v56 = vpop.f32.mrf.mxu1  ;;  %v4594_v23 = vpop.f32.mrf.mxu0  ;;  %13909 = vmatmul.mubr.msk.bf16.gmra.mxu1 %vm560_vm0, %v15452_v50  ;;  %7176 = vmatmul.mubr.bf16.gmra.mxu0 %v21161_v58  ;;  %v4742_v1 = vadd.f32 %v17460_v49, %v4666_v33  ;;  %v17918_v4 = vld [vmem:[%s20846_s3 + $0xa0] ss:$8 sps:$4 sm:$0xff]  }
 0x308   : > { %21160 = vst [vmem:[#allocation87_spill] sm:$0xff] %v17904_v9  ;;  %v4668_v59 = vadd.f32 %v4590_v55, %v4246_v21  ;;  %v4250_v51 = vadd.f32 %v4249_v56, %v21162_v31  ;;  %7185 = vmatprep.mubr.bf16.mxu0 %v21163_v22  ;;  %6083 = vmatprep.mubr.bf16.mxu1 %v20949_v62  ;;  %v15542_v22 = vld [vmem:[%s20846_s3 + $0x2a0] ss:$8 sps:$4 sm:$0xff]   ;;  %v15551_v21 = vld [vmem:[%s20846_s3 + $0x294] ss:$8 sps:$4 sm:$0xff]  }
 0x309   : > { %v4743_v41 = vadd.f32 %v17454_v28, %v4667_v36  ;;  %v4251_v60 = vpop.f32.mrf.mxu1  ;;  %v4596_v43 = vpop.f32.mrf.mxu0  ;;  %7621 = vmatpush2.bf16.msra.mxu1 %v17889_v42  ;;  %8167 = vmatpush2.bf16.msra.mxu0 %v15536_v46  ;;  %v21164_v3 = vld [vmem:[#allocation49_spill] sm:$0xff]  ;;  %v17929_v46 = vld [vmem:[%s20846_s3 + $0x94] ss:$8 sps:$4 sm:$0xff]   ;;  %v4805_v36 = vmax.f32 %v4741_v8, 0.0  ;;  %v4806_v9 = vmax.f32 %v4742_v1, 0.0  ;;  %v21167_v1 = vld [vmem:[#allocation94_spill] sm:$0xff] }
 0x30a   : > { %v4744_v50 = vadd.f32 %v17460_v49, %v4668_v59  ;;  %v4669_v33 = vadd.f32 %v4594_v23, %v4250_v51  ;;  %v4252_v55 = vadd.f32 %v4251_v60, %v21164_v3  ;;  %7622 = vmatprep.subr.bf16.mxu1 %v17899_v29  ;;  %8168 = vmatprep.subr.bf16.mxu0 %v15544_v35  ;;  %v15456_v59 = vld [vmem:[%s15954_s28 + $0x58] sm:$0xff]   ;;  %v21165_v60 = vld [vmem:[#allocation50_spill] sm:$0xff] }
 0x30b   : > { %v4807_v56 = vmax.f32 %v4743_v41, 0.0  ;;  %v4253_v58 = vpop.f32.mrf.mxu1  ;;  %v4598_v31 = vpop.f32.mrf.mxu0  ;;  %v17943_v8 = vld [vmem:[%s20846_s3 + $0x90] ss:$8 sps:$4 sm:$0xff]  }
 0x30c   : > { %v4808_v51 = vmax.f32 %v4744_v50, 0.0  ;;  %v4670_v23 = vadd.f32 %v4596_v43, %v4252_v55  ;;  %v4254_v3 = vadd.f32 %v4253_v58, %v21165_v60  ;;  %v4745_v7 = vadd.f32 %v17454_v28, %v4669_v33  ;;  %v15549_v41 = vld [vmem:[%s20846_s3 + $0x290] ss:$8 sps:$4 sm:$0xff]   ;;  %v17953_v33 = vld [vmem:[%s20846_s3 + $0x84] ss:$8 sps:$4 sm:$0xff]  }
 0x30d   : > { %v17936_v35 = vpack.c.bf16 %v4807_v56, %v4805_v36  ;;  %v4255_v17 = vpop.f32.mrf.mxu1  ;;  %v4600_v18 = vpop.f32.mrf.mxu0  ;;  %7623 = vmatpush2.bf16.msra.mxu1 %v17918_v4  ;;  %8169 = vmatpush2.bf16.msra.mxu0 %v15542_v22  ;;  %v15557_v22 = vld [vmem:[%s20846_s3 + $0x284] ss:$8 sps:$4 sm:$0xff]   ;;  %v21168_v58 = vld [vmem:[#allocation43_spill] sm:$0xff]  ;;  %v21170_v60 = vld [vmem:[#allocation52_spill] sm:$0xff] }
 0x30e   : > { %v4671_v43 = vadd.f32 %v4598_v31, %v4254_v3  ;;  %v4256_v50 = vadd.f32 %v4255_v17, %v21167_v1  ;;  %7624 = vmatprep.subr.bf16.mxu1 %v17929_v46  ;;  %8170 = vmatprep.subr.bf16.mxu0 %v15551_v21  ;;  %v4746_v55 = vadd.f32 %v17460_v49, %v4670_v23  ;;  %v21171_v1 = vld [vmem:[#allocation46_spill] sm:$0xff] }
 0x30f   : > { %21166 = vst [vmem:[#allocation88_spill] sm:$0xff] %v17936_v35  ;;  %v4259_v36 = vpop.f32.mrf.mxu1  ;;  %v4604_v56 = vpop.f32.mrf.mxu0  ;;  %13910 = vmatmul.mubr.msk.bf16.gmra.mxu1 %vm560_vm0, %v15456_v59  ;;  %7186 = vmatmul.mubr.bf16.gmra.mxu0 %v21168_v58  ;;  %v17961_v17 = vpack.c.bf16 %v4808_v51, %v4806_v9  ;;  %v4809_v35 = vmax.f32 %v4745_v7, 0.0  ;;  %v17971_v9 = vld [vmem:[%s20846_s3 + $0x80] ss:$8 sps:$4 sm:$0xff]  }
 0x310   : > { %v4747_v21 = vadd.f32 %v17454_v28, %v4671_v43  ;;  %v4672_v31 = vadd.f32 %v4600_v18, %v4256_v50  ;;  %v4260_v3 = vadd.f32 %v4259_v36, %v21170_v60  ;;  %7195 = vmatprep.mubr.bf16.mxu0 %v21171_v1  ;;  %6093 = vmatprep.mubr.bf16.mxu1 %v20949_v62  ;;  %v15555_v18 = vld [vmem:[%s20846_s3 + $0x280] ss:$8 sps:$4 sm:$0xff]   ;;  %v4810_v1 = vmax.f32 %v4746_v55, 0.0 }
 0x311   : > { %21169 = vst [vmem:[#allocation37_spill] sm:$0xff] %v17961_v17  ;;  %v4261_v23 = vpop.f32.mrf.mxu1  ;;  %v4606_v0 = vpop.f32.mrf.mxu0  ;;  %7625 = vmatpush2.bf16.msra.mxu1 %v17943_v8  ;;  %8171 = vmatpush2.bf16.msra.mxu0 %v15549_v41  ;;  %v21172_v7 = vld [vmem:[#allocation53_spill] sm:$0xff]  ;;  %v15560_v41 = vld [vmem:[%s20846_s3 + $0x174] ss:$8 sps:$4 sm:$0xff]  }
 0x312   : > { %v4811_v59 = vmax.f32 %v4747_v21, 0.0  ;;  %v4748_v51 = vadd.f32 %v17460_v49, %v4672_v31  ;;  %v4673_v43 = vadd.f32 %v4604_v56, %v4260_v3  ;;  %v4262_v50 = vadd.f32 %v4261_v23, %v21172_v7  ;;  %7626 = vmatprep.subr.bf16.mxu1 %v17953_v33  ;;  %8172 = vmatprep.subr.bf16.mxu0 %v15557_v22  ;;  %v15460_v60 = vld [vmem:[%s15954_s28 + $0x60] sm:$0xff]   ;;  %v15569_v7 = vld [vmem:[%s20846_s3 + $0x74] ss:$8 sps:$4 sm:$0xff]  }
 0x313   : > { %v4263_v36 = vpop.f32.mrf.mxu1  ;;  %v4608_v58 = vpop.f32.mrf.mxu0  ;;  %v21175_v22 = vld [vmem:[#allocation96_spill] sm:$0xff] }
 0x314   : > { %v17983_v17 = vpack.c.bf16 %v4811_v59, %v4809_v35  ;;  %v4812_v5 = vmax.f32 %v4748_v51, 0.0  ;;  %v4674_v21 = vadd.f32 %v4606_v0, %v4262_v50  ;;  %v4264_v31 = vadd.f32 %v4263_v36, %v21174_v30  ;;  %v21177_v30 = vld [vmem:[#allocation45_spill] sm:$0xff] }
 0x315   : > { %v4265_v56 = vpop.f32.mrf.mxu1  ;;  %v4610_v3 = vpop.f32.mrf.mxu0  ;;  %7627 = vmatpush2.bf16.msra.mxu1 %v17971_v9  ;;  %8173 = vmatpush2.bf16.msra.mxu0 %v15555_v18  ;;  %v4749_v35 = vadd.f32 %v17454_v28, %v4673_v43 }
 0x316   : > { %21173 = vst [vmem:[#allocation20_spill] sm:$0xff] %v17983_v17  ;;  %v4266_v23 = vadd.f32 %v4265_v56, %v21175_v22  ;;  %9244 = vmatprep.subr.bf16.mxu1 %v15560_v41  ;;  %v17991_v12 = vpack.c.bf16 %v4812_v5, %v4810_v1  ;;  %v4675_v55 = vadd.f32 %v4608_v58, %v4264_v31  ;;  %v21178_v41 = vld [vmem:[#allocation6_spill] sm:$0xff] }
 0x317   : > { %v5329_v0 = vpop.f32.mrf.mxu1  ;;  %v5670_v59 = vpop.f32.mrf.mxu0  ;;  %13911 = vmatmul.mubr.msk.bf16.gmra.mxu1 %vm560_vm0, %v15460_v60  ;;  %7196 = vmatmul.mubr.bf16.gmra.mxu0 %v21177_v30  ;;  %v4750_v18 = vadd.f32 %v17460_v49, %v4674_v21  ;;  %v4813_v1 = vmax.f32 %v4749_v35, 0.0  ;;  %v21181_v35 = vld [vmem:[#allocation5_spill] sm:$0xff] }
 0x318   : > { %21176 = vst [vmem:[#allocation40_spill] sm:$0xff] %v17991_v12  ;;  %v4676_v51 = vadd.f32 %v4610_v3, %v4266_v23  ;;  %v17997_v50 = vadd.f32 %v5670_v59, %v5329_v0  ;;  %7205 = vmatprep.mubr.bf16.mxu0 %v21178_v41  ;;  %6103 = vmatprep.mubr.bf16.mxu1 %v20949_v62  ;;  %v15470_v3 = vld [vmem:[%s15954_s28 + $0x68] sm:$0xff]  }
 0x319   : > { %v4751_v5 = vadd.f32 %v17454_v28, %v4675_v55  ;;  %v5331_v43 = vpop.f32.mrf.mxu1  ;;  %v5672_v36 = vpop.f32.mrf.mxu0  ;;  %9757 = vmatprep.subr.bf16.mxu0 %v15569_v7  ;;  %v4814_v22 = vmax.f32 %v4750_v18, 0.0  ;;  %v21182_v18 = vld [vmem:[#allocation8_spill] sm:$0xff] }
 0x31a   : > { %v4752_v58 = vadd.f32 %v17460_v49, %v4676_v51  ;;  %v18003_v60 = vadd.f32 %v5672_v36, %v5331_v43 }
 0x31b   : > { %v4815_v31 = vmax.f32 %v4751_v5, 0.0  ;;  %v5333_v56 = vpop.f32.mrf.mxu1  ;;  %v5674_v21 = vpop.f32.mrf.mxu0 }
 0x31c   : > { %v4816_v23 = vmax.f32 %v4752_v58, 0.0  ;;  %v18006_v0 = vadd.f32 %v5674_v21, %v5333_v56 }
 0x31d   : > { %v18008_v59 = vpack.c.bf16 %v4815_v31, %v4813_v1  ;;  %v5335_v30 = vpop.f32.mrf.mxu1  ;;  %v5676_v28 = vpop.f32.mrf.mxu0  ;;  %v15480_v31 = vld [vmem:[%s15954_s28 + $0x70] sm:$0xff]  }
 0x31e   : > { %v18010_v55 = vadd.f32 %v5676_v28, %v5335_v30  ;;  %v18012_v7 = vpack.c.bf16 %v4816_v23, %v4814_v22  ;;  %v21183_v28 = vld [vmem:[#allocation7_spill] sm:$0xff] }
 0x31f   : > { %21179 = vst [vmem:[#allocation21_spill] sm:$0xff] %v18008_v59  ;;  %v5339_v49 = vpop.f32.mrf.mxu1  ;;  %v5680_v51 = vpop.f32.mrf.mxu0  ;;  %13912 = vmatmul.mubr.msk.bf16.gmra.mxu1 %vm560_vm0, %v15470_v3  ;;  %7206 = vmatmul.mubr.bf16.gmra.mxu0 %v21181_v35 }
 0x320   : > { %21180 = vst [vmem:[#allocation22_spill] sm:$0xff] %v18012_v7  ;;  %v18016_v41 = vadd.f32 %v5680_v51, %v5339_v49  ;;  %7215 = vmatprep.mubr.bf16.mxu0 %v21182_v18  ;;  %6113 = vmatprep.mubr.bf16.mxu1 %v20949_v62  ;;  %v21184_v51 = vld [vmem:[#allocation10_spill] sm:$0xff] }
 0x321   : > { %v5341_v5 = vpop.f32.mrf.mxu1  ;;  %v5682_v43 = vpop.f32.mrf.mxu0 }
 0x322   : > { %v18020_v36 = vadd.f32 %v5682_v43, %v5341_v5 }
 0x323   : > { %v5343_v58 = vpop.f32.mrf.mxu1  ;;  %v5684_v1 = vpop.f32.mrf.mxu0 }
 0x324   : > { %v18023_v56 = vadd.f32 %v5684_v1, %v5343_v58  ;;  %v15493_v1 = vld [vmem:[%s15954_s28 + $0x78] sm:$0xff]  }
 0x325   : > { %v5345_v21 = vpop.f32.mrf.mxu1  ;;  %v5686_v3 = vpop.f32.mrf.mxu0 }
 0x326   : > { %v18025_v22 = vadd.f32 %v5686_v3, %v5345_v21 }
 0x327   : > { %v5349_v23 = vpop.f32.mrf.mxu1  ;;  %v5690_v30 = vpop.f32.mrf.mxu0  ;;  %13913 = vmatmul.mubr.msk.bf16.gmra.mxu1 %vm560_vm0, %v15480_v31  ;;  %7216 = vmatmul.mubr.bf16.gmra.mxu0 %v21183_v28  ;;  %v21185_v28 = vld [vmem:[#allocation9_spill] sm:$0xff] }
 0x328   : > { %v18029_v49 = vadd.f32 %v5690_v30, %v5349_v23  ;;  %7225 = vmatprep.mubr.bf16.mxu0 %v21184_v51  ;;  %6123 = vmatprep.mubr.bf16.mxu1 %v20949_v62 }
 0x329   : > { %v5351_v35 = vpop.f32.mrf.mxu1  ;;  %v5692_v18 = vpop.f32.mrf.mxu0 }
 0x32a   : > { %v18033_v5 = vadd.f32 %v5692_v18, %v5351_v35  ;;  %v21186_v35 = vld [vmem:[#allocation12_spill] sm:$0xff] }
 0x32b   : > { %v5353_v43 = vpop.f32.mrf.mxu1  ;;  %v5694_v58 = vpop.f32.mrf.mxu0 }
 0x32c   : > { %v18036_v21 = vadd.f32 %v5694_v58, %v5353_v43 }
 0x32d   : > { %v5355_v3 = vpop.f32.mrf.mxu1  ;;  %v5696_v31 = vpop.f32.mrf.mxu0 }
 0x32e   : > { %v18038_v59 = vadd.f32 %v5696_v31, %v5355_v3  ;;  %v15506_v3 = vld [vmem:[%s15954_s28 + $0x80] sm:$0xff]  }
 0x32f   : > { %v5359_v23 = vpop.f32.mrf.mxu1  ;;  %v5700_v30 = vpop.f32.mrf.mxu0  ;;  %13914 = vmatmul.mubr.msk.bf16.gmra.mxu1 %vm560_vm0, %v15493_v1  ;;  %7226 = vmatmul.mubr.bf16.gmra.mxu0 %v21185_v28  ;;  %v21187_v28 = vld [vmem:[#allocation11_spill] sm:$0xff] }
 0x330   : > { %v18042_v51 = vadd.f32 %v5700_v30, %v5359_v23  ;;  %7235 = vmatprep.mubr.bf16.mxu0 %v21186_v35  ;;  %6133 = vmatprep.mubr.bf16.mxu1 %v20949_v62 }
 0x331   : > { %v5361_v18 = vpop.f32.mrf.mxu1  ;;  %v5702_v43 = vpop.f32.mrf.mxu0 }
 0x332   : > { %v18046_v58 = vadd.f32 %v5702_v43, %v5361_v18  ;;  %v21188_v18 = vld [vmem:[#allocation14_spill] sm:$0xff] }
 0x333   : > { %v5363_v7 = vpop.f32.mrf.mxu1  ;;  %v5704_v17 = vpop.f32.mrf.mxu0 }
 0x334   : > { %v18049_v31 = vadd.f32 %v5704_v17, %v5363_v7 }
 0x335   : > { %v5365_v12 = vpop.f32.mrf.mxu1  ;;  %v5706_v1 = vpop.f32.mrf.mxu0 }
 0x336   : > { %v18051_v63 = vadd.f32 %v5706_v1, %v5365_v12  ;;  %v15519_v12 = vld [vmem:[%s15954_s28 + $0x88] sm:$0xff]  }
 0x337   : > { %v5369_v23 = vpop.f32.mrf.mxu1  ;;  %v5710_v30 = vpop.f32.mrf.mxu0  ;;  %13915 = vmatmul.mubr.msk.bf16.gmra.mxu1 %vm560_vm0, %v15506_v3  ;;  %7236 = vmatmul.mubr.bf16.gmra.mxu0 %v21187_v28  ;;  %v21189_v28 = vld [vmem:[#allocation13_spill] sm:$0xff] }
 0x338   : > { %v18055_v35 = vadd.f32 %v5710_v30, %v5369_v23  ;;  %7245 = vmatprep.mubr.bf16.mxu0 %v21188_v18  ;;  %6143 = vmatprep.mubr.bf16.mxu1 %v20949_v62 }
 0x339   : > { %v5371_v43 = vpop.f32.mrf.mxu1  ;;  %v5712_v17 = vpop.f32.mrf.mxu0 }
 0x33a   : > { %v18059_v7 = vadd.f32 %v5712_v17, %v5371_v43  ;;  %v21190_v43 = vld [vmem:[#allocation16_spill] sm:$0xff] }
 0x33b   : > { %v5373_v13 = vpop.f32.mrf.mxu1  ;;  %v5714_v52 = vpop.f32.mrf.mxu0 }
 0x33c   : > { %v18062_v1 = vadd.f32 %v5714_v52, %v5373_v13 }
 0x33d   : > { %v5375_v39 = vpop.f32.mrf.mxu1  ;;  %v5716_v3 = vpop.f32.mrf.mxu0 }
 0x33e   : > { %v18064_v2 = vadd.f32 %v5716_v3, %v5375_v39  ;;  %v15532_v39 = vld [vmem:[%s15954_s28 + $0x90] sm:$0xff]  }
 0x33f   : > { %v5379_v23 = vpop.f32.mrf.mxu1  ;;  %v5720_v30 = vpop.f32.mrf.mxu0  ;;  %13916 = vmatmul.mubr.msk.bf16.gmra.mxu1 %vm560_vm0, %v15519_v12  ;;  %7246 = vmatmul.mubr.bf16.gmra.mxu0 %v21189_v28  ;;  %v21191_v28 = vld [vmem:[#allocation15_spill] sm:$0xff] }
 0x340   : > { %v18068_v18 = vadd.f32 %v5720_v30, %v5379_v23  ;;  %7255 = vmatprep.mubr.bf16.mxu0 %v21190_v43  ;;  %6153 = vmatprep.mubr.bf16.mxu1 %v20949_v62 }
 0x341   : > { %v5381_v17 = vpop.f32.mrf.mxu1  ;;  %v5722_v13 = vpop.f32.mrf.mxu0 }
 0x342   : > { %v18072_v52 = vadd.f32 %v5722_v13, %v5381_v17  ;;  %v21193_v17 = vld [vmem:[#allocation18_spill] sm:$0xff] }
 0x343   : > { %v5383_v32 = vpop.f32.mrf.mxu1  ;;  %v5724_v19 = vpop.f32.mrf.mxu0 }
 0x344   : > { %v18075_v3 = vadd.f32 %v5724_v19, %v5383_v32 }
 0x345   : > { %v5385_v24 = vpop.f32.mrf.mxu1  ;;  %v5726_v12 = vpop.f32.mrf.mxu0 }
 0x346   : > { %v18077_v16 = vadd.f32 %v5726_v12, %v5385_v24  ;;  %v15545_v24 = vld [vmem:[%s15954_s28 + $0x98] sm:$0xff]  }
 0x347   : > { %v5389_v23 = vpop.f32.mrf.mxu1  ;;  %v5730_v30 = vpop.f32.mrf.mxu0  ;;  %13917 = vmatmul.mubr.msk.bf16.gmra.mxu1 %vm560_vm0, %v15532_v39  ;;  %7256 = vmatmul.mubr.bf16.gmra.mxu0 %v21191_v28  ;;  %v18092_v39 = vcombine.high %v20949_v62, %v20949_v62 }
 0x348   : > { %v18081_v43 = vadd.f32 %v5730_v30, %v5389_v23  ;;  %7265 = vmatprep.mubr.bf16.mxu0 %v21193_v17  ;;  %6163 = vmatprep.mubr.bf16.mxu1 %v20949_v62 }
 0x349   : > { %v5391_v13 = vpop.f32.mrf.mxu1  ;;  %v5732_v32 = vpop.f32.mrf.mxu0  ;;  %21196 = vst [vmem:[#allocation42_spill] sm:$0xff] %v18092_v39 }
 0x34a   : > { %21192 = vst [vmem:[#allocation90_spill] sm:$0xff] %v18081_v43  ;;  %v18085_v19 = vadd.f32 %v5732_v32, %v5391_v13  ;;  %v21200_v32 = vld [vmem:[#allocation63_spill] sm:$0xff] }
 0x34b   : > { %v5393_v47 = vpop.f32.mrf.mxu1  ;;  %v5734_v44 = vpop.f32.mrf.mxu0 }
 0x34c   : > { %21194 = vst [vmem:[#allocation39_spill] sm:$0xff] %v18085_v19  ;;  %v18088_v12 = vadd.f32 %v5734_v44, %v5393_v47 }
 0x34d   : > { %v5395_v28 = vpop.f32.mrf.mxu1  ;;  %v5736_v23 = vpop.f32.mrf.mxu0 }
 0x34e   : > { %21195 = vst [vmem:[#allocation24_spill] sm:$0xff] %v18088_v12  ;;  %v18094_v30 = vadd.f32 %v5736_v23, %v5395_v28  ;;  %v18106_v28 = vcombine.low %v20949_v62, %v20949_v62  ;;  %v15572_v62 = vld [vmem:[%s20846_s3 + $0x64] ss:$8 sps:$4 sm:$0xff]  }
 0x34f   : > { %v5399_v17 = vpop.f32.mrf.mxu1  ;;  %v5740_v15 = vpop.f32.mrf.mxu0  ;;  %13918 = vmatmul.mubr.msk.bf16.gmra.mxu1 %vm560_vm0, %v15545_v24  ;;  %7266 = vmatmul.mubr.bf16.gmra.mxu0 %v21198_v10 }
 0x350   : > { %21197 = vst [vmem:[#allocation25_spill] sm:$0xff] %v18094_v30  ;;  %v18098_v13 = vadd.f32 %v5740_v15, %v5399_v17  ;;  %8174 = vmatprep.mubr.bf16.mxu0 %v21200_v32  ;;  %7628 = vmatprep.mubr.bf16.mxu1 %v18092_v39  ;;  %21202 = vst [vmem:[#allocation41_spill] sm:$0xff] %v18106_v28  ;;  %v15558_v15 = vld [vmem:[%s20846_s3 + $0x170] ss:$8 sps:$4 sm:$0xff]   ;;  %v21207_v32 = vld [vmem:[#allocation65_spill] sm:$0xff] }
 0x351   : > { %v5401_v47 = vpop.f32.mrf.mxu1  ;;  %v5742_v44 = vpop.f32.mrf.mxu0  ;;  %v15567_v17 = vld [vmem:[%s20846_s3 + $0x70] ss:$8 sps:$4 sm:$0xff]  }
 0x352   : > { %21199 = vst [vmem:[#allocation26_spill] sm:$0xff] %v18098_v13  ;;  %v18102_v12 = vadd.f32 %v5742_v44, %v5401_v47  ;;  %v15563_v44 = vld [vmem:[%s20846_s3 + $0x164] ss:$8 sps:$4 sm:$0xff]   ;;  %v15570_v13 = vld [vmem:[%s20846_s3 + $0x60] ss:$8 sps:$4 sm:$0xff]  }
 0x353   : > { %v5403_v19 = vpop.f32.mrf.mxu1  ;;  %v5744_v43 = vpop.f32.mrf.mxu0 }
 0x354   : > { %21201 = vst [vmem:[#allocation92_spill] sm:$0xff] %v18102_v12  ;;  %v18108_v23 = vadd.f32 %v5744_v43, %v5403_v19 }
 0x355   : > { %v5405_v24 = vpop.f32.mrf.mxu1  ;;  %v5746_v10 = vpop.f32.mrf.mxu0 }
 0x356   : > { %21203 = vst [vmem:[#allocation48_spill] sm:$0xff] %v18108_v23  ;;  %v18116_v47 = vadd.f32 %v5746_v10, %v5405_v24  ;;  %v21205_v23 = vld [vmem:[#allocation62_spill] sm:$0xff] }
 0x357   : > { %v5409_v43 = vpop.f32.mrf.mxu1  ;;  %v5750_v19 = vpop.f32.mrf.mxu0  ;;  %7629 = vmatmul.mubr.bf16.vlgmr.msra.gmra.mxu1 %v18106_v28  ;;  %8175 = vmatmul.mubr.bf16.vlgmr.msra.gmra.mxu0 %v21205_v23 }
 0x358   : > { %21204 = vst [vmem:[#allocation44_spill] sm:$0xff] %v18116_v47  ;;  %v18126_v12 = vadd.f32 %v5750_v19, %v5409_v43  ;;  %8184 = vmatprep.mubr.bf16.mxu0 %v21207_v32  ;;  %7638 = vmatprep.mubr.bf16.mxu1 %v18092_v39  ;;  %v15561_v47 = vld [vmem:[%s20846_s3 + $0x160] ss:$8 sps:$4 sm:$0xff]   ;;  %v15566_v43 = vld [vmem:[%s20846_s3 + $0x154] ss:$8 sps:$4 sm:$0xff]  }
 0x359   : > { %v5411_v24 = vpop.f32.mrf.mxu1  ;;  %v5752_v10 = vpop.f32.mrf.mxu0  ;;  %9245 = vmatpush1.bf16.msra.mxu1 %v15558_v15  ;;  %9758 = vmatpush1.bf16.msra.mxu0 %v15567_v17  ;;  %v15578_v15 = vld [vmem:[%s20846_s3 + $0x54] ss:$8 sps:$4 sm:$0xff]  }
 0x35a   : > { %21206 = vst [vmem:[#allocation49_spill] sm:$0xff] %v18126_v12  ;;  %v18136_v30 = vadd.f32 %v5752_v10, %v5411_v24  ;;  %9246 = vmatprep.subr.bf16.mxu1 %v15563_v44  ;;  %9759 = vmatprep.subr.bf16.mxu0 %v15572_v62  ;;  %v15564_v44 = vld [vmem:[%s20846_s3 + $0x150] ss:$8 sps:$4 sm:$0xff]  }
 0x35b   : > { %v5413_v19 = vpop.f32.mrf.mxu1  ;;  %v5754_v32 = vpop.f32.mrf.mxu0  ;;  %v15576_v62 = vld [vmem:[%s20846_s3 + $0x50] ss:$8 sps:$4 sm:$0xff]  }
 0x35c   : > { %v18144_v12 = vadd.f32 %v5754_v32, %v5413_v19  ;;  %v15575_v32 = vld [vmem:[%s20846_s3 + $0x144] ss:$8 sps:$4 sm:$0xff]  }
 0x35d   : > { %v18146_v17 = vpop.f32.mrf.mxu1  ;;  %v18148_v23 = vpop.f32.mrf.mxu0  ;;  %9247 = vmatpush1.bf16.msra.mxu1 %v15561_v47  ;;  %9760 = vmatpush1.bf16.msra.mxu0 %v15570_v13  ;;  %v21211_v47 = vld [vmem:[#allocation64_spill] sm:$0xff] }
 0x35e   : > { %21208 = vst [vmem:[#allocation50_spill] sm:$0xff] %v18144_v12  ;;  %21209 = vst [vmem:[#allocation94_spill] sm:$0xff] %v18146_v17  ;;  %9248 = vmatprep.subr.bf16.mxu1 %v15566_v43  ;;  %9761 = vmatprep.subr.bf16.mxu0 %v15578_v15  ;;  %v21213_v12 = vld [vmem:[#allocation67_spill] sm:$0xff]  ;;  %v15573_v43 = vld [vmem:[%s20846_s3 + $0x140] ss:$8 sps:$4 sm:$0xff]  }
 0x35f   : > { %21210 = vst [vmem:[#allocation43_spill] sm:$0xff] %v18148_v23  ;;  %v5419_v24 = vpop.f32.mrf.mxu1  ;;  %v5760_v10 = vpop.f32.mrf.mxu0  ;;  %7639 = vmatmul.mubr.bf16.gmra.mxu1 %v18106_v28  ;;  %8185 = vmatmul.mubr.bf16.gmra.mxu0 %v21211_v47 }
 0x360   : > { %v18161_v19 = vadd.f32 %v5760_v10, %v5419_v24  ;;  %8194 = vmatprep.mubr.bf16.mxu0 %v21213_v12  ;;  %7648 = vmatprep.mubr.bf16.mxu1 %v18092_v39  ;;  %v15843_v24 = vld [vmem:[%s20846_s3 + $0x44] ss:$8 sps:$4 sm:$0xff]   ;;  %v15581_v10 = vld [vmem:[%s20846_s3 + $0x134] ss:$8 sps:$4 sm:$0xff]  }
 0x361   : > { %v5421_v13 = vpop.f32.mrf.mxu1  ;;  %v5762_v23 = vpop.f32.mrf.mxu0  ;;  %9249 = vmatpush1.bf16.msra.mxu1 %v15564_v44  ;;  %9762 = vmatpush1.bf16.msra.mxu0 %v15576_v62  ;;  %v15579_v62 = vld [vmem:[%s20846_s3 + $0x130] ss:$8 sps:$4 sm:$0xff]  }
 0x362   : > { %21212 = vst [vmem:[#allocation52_spill] sm:$0xff] %v18161_v19  ;;  %v18168_v15 = vadd.f32 %v5762_v23, %v5421_v13  ;;  %9250 = vmatprep.subr.bf16.mxu1 %v15575_v32  ;;  %9763 = vmatprep.subr.bf16.mxu0 %v15843_v24  ;;  %v15844_v23 = vld [vmem:[%s20846_s3 + $0x40] ss:$8 sps:$4 sm:$0xff]  }
 0x363   : > { %v5423_v12 = vpop.f32.mrf.mxu1  ;;  %v5764_v19 = vpop.f32.mrf.mxu0  ;;  %v21215_v13 = vld [vmem:[#allocation66_spill] sm:$0xff]  ;;  %v21216_v24 = vld [vmem:[#allocation69_spill] sm:$0xff] }
 0x364   : > { %v18176_v44 = vadd.f32 %v5764_v19, %v5423_v12  ;;  %v15584_v12 = vld [vmem:[%s20846_s3 + $0x124] ss:$8 sps:$4 sm:$0xff]  }
 0x365   : > { %v18178_v47 = vpop.f32.mrf.mxu1  ;;  %v18180_v17 = vpop.f32.mrf.mxu0  ;;  %9251 = vmatpush1.bf16.msra.mxu1 %v15573_v43  ;;  %9764 = vmatpush1.bf16.msra.mxu0 %v15844_v23 }
 0x366   : > { %21214 = vst [vmem:[#allocation46_spill] sm:$0xff] %v18176_v44  ;;  %9252 = vmatprep.subr.bf16.mxu1 %v15581_v10  ;;  %9765 = vmatprep.subr.bf16.mxu0 %v17665_v14  ;;  %v15582_v14 = vld [vmem:[%s20846_s3 + $0x120] ss:$8 sps:$4 sm:$0xff]  }
 0x367   : > { %v5429_v32 = vpop.f32.mrf.mxu1  ;;  %v5770_v19 = vpop.f32.mrf.mxu0  ;;  %7649 = vmatmul.mubr.bf16.gmra.mxu1 %v18106_v28  ;;  %8195 = vmatmul.mubr.bf16.gmra.mxu0 %v21215_v13 }
 0x368   : > { %v18194_v43 = vadd.f32 %v5770_v19, %v5429_v32  ;;  %8204 = vmatprep.mubr.bf16.mxu0 %v21216_v24  ;;  %7658 = vmatprep.mubr.bf16.mxu1 %v18092_v39  ;;  %v15587_v32 = vld [vmem:[%s20846_s3 + $0x114] ss:$8 sps:$4 sm:$0xff]  }
 0x369   : > { %v5431_v23 = vpop.f32.mrf.mxu1  ;;  %v5772_v10 = vpop.f32.mrf.mxu0  ;;  %9253 = vmatpush1.bf16.msra.mxu1 %v15579_v62  ;;  %9766 = vmatpush1.bf16.msra.mxu0 %v17677_v37 }
 0x36a   : > { %v18202_v44 = vadd.f32 %v5772_v10, %v5431_v23  ;;  %9767 = vmatprep.subr.bf16.mxu0 %v17687_v61  ;;  %9254 = vmatprep.subr.bf16.mxu1 %v15584_v12  ;;  %v15585_v61 = vld [vmem:[%s20846_s3 + $0x110] ss:$8 sps:$4 sm:$0xff]   ;;  %v15590_v12 = vld [vmem:[%s20846_s3 + $0x104] ss:$8 sps:$4 sm:$0xff]  }
 0x36b   : > { %v5433_v19 = vpop.f32.mrf.mxu1  ;;  %v5774_v39 = vpop.f32.mrf.mxu0  ;;  %v21218_v10 = vld [vmem:[#allocation68_spill] sm:$0xff] }
 0x36c   : > { %v18208_v24 = vadd.f32 %v5774_v39, %v5433_v19 }
 0x36d   : > { %v18210_v62 = vpop.f32.mrf.mxu1  ;;  %v18212_v37 = vpop.f32.mrf.mxu0  ;;  %9768 = vmatpush1.bf16.msra.mxu0 %v17706_v40  ;;  %9255 = vmatpush1.bf16.msra.mxu1 %v15582_v14  ;;  %v21220_v40 = vld [vmem:[#allocation71_spill] sm:$0xff] }
 0x36e   : > { %21217 = vst [vmem:[#allocation53_spill] sm:$0xff] %v18208_v24  ;;  %9769 = vmatprep.subr.bf16.mxu0 %v17717_v20  ;;  %9256 = vmatprep.subr.bf16.mxu1 %v15587_v32  ;;  %v15588_v20 = vld [vmem:[%s20846_s3 + $0x100] ss:$8 sps:$4 sm:$0xff]  }
 0x36f   : > { %v5439_v39 = vpop.f32.mrf.mxu1  ;;  %v5780_v23 = vpop.f32.mrf.mxu0  ;;  %7659 = vmatmul.mubr.bf16.gmra.mxu1 %v18106_v28  ;;  %8205 = vmatmul.mubr.bf16.gmra.mxu0 %v21218_v10 }
 0x370   : > { %v18224_v19 = vadd.f32 %v5780_v23, %v5439_v39  ;;  %8214 = vmatprep.mubr.bf16.mxu0 %v21220_v40  ;;  %v15593_v39 = vld [vmem:[%s20846_s3 + $0x1f4] ss:$8 sps:$4 sm:$0xff]  }
 0x371   : > { %v5441_v14 = vpop.f32.mrf.mxu1  ;;  %v5782_v24 = vpop.f32.mrf.mxu0  ;;  %9770 = vmatpush1.bf16.msra.mxu0 %v17731_v26  ;;  %9257 = vmatpush1.bf16.msra.mxu1 %v15585_v61 }
 0x372   : > { %21219 = vst [vmem:[#allocation54_spill] sm:$0xff] %v18224_v19  ;;  %v18231_v32 = vadd.f32 %v5782_v24, %v5441_v14  ;;  %9771 = vmatprep.subr.bf16.mxu0 %v17741_v54  ;;  %9258 = vmatprep.subr.bf16.mxu1 %v15590_v12  ;;  %v15591_v54 = vld [vmem:[%s20846_s3 + $0x1f0] ss:$8 sps:$4 sm:$0xff]   ;;  %v15596_v24 = vld [vmem:[%s20846_s3 + $0x1e4] ss:$8 sps:$4 sm:$0xff]  }
 0x373   : > { %v5443_v23 = vpop.f32.mrf.mxu1  ;;  %v5784_v28 = vpop.f32.mrf.mxu0  ;;  %v21221_v12 = vld [vmem:[#allocation70_spill] sm:$0xff] }
 0x374   : > { %v18237_v40 = vadd.f32 %v5784_v28, %v5443_v23  ;;  %v21223_v23 = vld [vmem:[#allocation73_spill] sm:$0xff] }
 0x375   : > { %v18239_v19 = vpop.f32.mrf.mxu1  ;;  %v18241_v26 = vpop.f32.mrf.mxu0  ;;  %9772 = vmatpush1.bf16.msra.mxu0 %v17759_v34  ;;  %9259 = vmatpush1.bf16.msra.mxu1 %v15588_v20 }
 0x376   : > { %9773 = vmatprep.subr.bf16.mxu0 %v17770_v6  ;;  %9260 = vmatprep.subr.bf16.mxu1 %v15593_v39  ;;  %v15594_v6 = vld [vmem:[%s20846_s3 + $0x1e0] ss:$8 sps:$4 sm:$0xff]  }
 0x377   : > { %v5449_v28 = vpop.f32.mrf.mxu1  ;;  %v5790_v61 = vpop.f32.mrf.mxu0  ;;  %8215 = vmatmul.mubr.bf16.gmra.mxu0 %v21221_v12 }
 0x378   : > { %v18252_v14 = vadd.f32 %v5790_v61, %v5449_v28  ;;  %8224 = vmatprep.mubr.bf16.mxu0 %v21223_v23  ;;  %v15599_v28 = vld [vmem:[%s20846_s3 + $0x1d4] ss:$8 sps:$4 sm:$0xff]  }
 0x379   : > { %v5451_v34 = vpop.f32.mrf.mxu1  ;;  %v5792_v20 = vpop.f32.mrf.mxu0  ;;  %9774 = vmatpush2.bf16.msra.mxu0 %v17783_v48  ;;  %9261 = vmatpush2.bf16.msra.mxu1 %v15591_v54  ;;  %v15602_v54 = vld [vmem:[%s20846_s3 + $0x1c4] ss:$8 sps:$4 sm:$0xff]  }
 0x37a   : > { %21222 = vst [vmem:[#allocation96_spill] sm:$0xff] %v18252_v14  ;;  %v18259_v39 = vadd.f32 %v5792_v20, %v5451_v34  ;;  %9775 = vmatprep.subr.bf16.mxu0 %v17793_v38  ;;  %9262 = vmatprep.subr.bf16.mxu1 %v15596_v24  ;;  %v15597_v38 = vld [vmem:[%s20846_s3 + $0x1d0] ss:$8 sps:$4 sm:$0xff]  }
 0x37b   : > { %v5453_v61 = vpop.f32.mrf.mxu1  ;;  %v5794_v23 = vpop.f32.mrf.mxu0  ;;  %v21224_v34 = vld [vmem:[#allocation72_spill] sm:$0xff] }
 0x37c   : > { %v18265_v14 = vadd.f32 %v5794_v23, %v5453_v61  ;;  %v21226_v61 = vld [vmem:[#allocation75_spill] sm:$0xff] }
 0x37d   : > { %v18267_v12 = vpop.f32.mrf.mxu1  ;;  %v18269_v48 = vpop.f32.mrf.mxu0  ;;  %9776 = vmatpush2.bf16.msra.mxu0 %v17812_v25  ;;  %9263 = vmatpush2.bf16.msra.mxu1 %v15594_v6 }
 0x37e   : > { %9777 = vmatprep.subr.bf16.mxu0 %v17823_v53  ;;  %9264 = vmatprep.subr.bf16.mxu1 %v15599_v28  ;;  %v15600_v53 = vld [vmem:[%s20846_s3 + $0x1c0] ss:$8 sps:$4 sm:$0xff]  }
 0x37f   : > { %v5459_v24 = vpop.f32.mrf.mxu1  ;;  %v5800_v23 = vpop.f32.mrf.mxu0  ;;  %8225 = vmatmul.mubr.bf16.gmra.mxu0 %v21224_v34 }
 0x380   : > { %v18280_v20 = vadd.f32 %v5800_v23, %v5459_v24  ;;  %8234 = vmatprep.mubr.bf16.mxu0 %v21226_v61  ;;  %v15605_v24 = vld [vmem:[%s20846_s3 + $0x1b4] ss:$8 sps:$4 sm:$0xff]  }
 0x381   : > { %v5461_v25 = vpop.f32.mrf.mxu1  ;;  %v5802_v6 = vpop.f32.mrf.mxu0  ;;  %9778 = vmatpush2.bf16.msra.mxu0 %v17837_v45  ;;  %9265 = vmatpush2.bf16.msra.mxu1 %v15597_v38  ;;  %v15608_v38 = vld [vmem:[%s20846_s3 + $0x1a4] ss:$8 sps:$4 sm:$0xff]  }
 0x382   : > { %21225 = vst [vmem:[#allocation45_spill] sm:$0xff] %v18280_v20  ;;  %v18287_v28 = vadd.f32 %v5802_v6, %v5461_v25  ;;  %9779 = vmatprep.subr.bf16.mxu0 %v17847_v27  ;;  %9266 = vmatprep.subr.bf16.mxu1 %v15602_v54  ;;  %v15603_v27 = vld [vmem:[%s20846_s3 + $0x1b0] ss:$8 sps:$4 sm:$0xff]  }
 0x383   : > { %v5463_v23 = vpop.f32.mrf.mxu1  ;;  %v5804_v61 = vpop.f32.mrf.mxu0  ;;  %v21227_v25 = vld [vmem:[#allocation74_spill] sm:$0xff] }
 0x384   : > { %v18293_v20 = vadd.f32 %v5804_v61, %v5463_v23  ;;  %v21229_v23 = vld [vmem:[#allocation78_spill] sm:$0xff] }
 0x385   : > { %v18295_v34 = vpop.f32.mrf.mxu1  ;;  %v18297_v45 = vpop.f32.mrf.mxu0  ;;  %9780 = vmatpush2.bf16.msra.mxu0 %v17865_v11  ;;  %9267 = vmatpush2.bf16.msra.mxu1 %v15600_v53 }
 0x386   : > { %9781 = vmatprep.subr.bf16.mxu0 %v17876_v57  ;;  %9268 = vmatprep.subr.bf16.mxu1 %v15605_v24  ;;  %v15606_v57 = vld [vmem:[%s20846_s3 + $0x1a0] ss:$8 sps:$4 sm:$0xff]  }
 0x387   : > { %v5469_v54 = vpop.f32.mrf.mxu1  ;;  %v5810_v61 = vpop.f32.mrf.mxu0  ;;  %8235 = vmatmul.mubr.bf16.gmra.mxu0 %v21227_v25 }
 0x388   : > { %v18308_v6 = vadd.f32 %v5810_v61, %v5469_v54  ;;  %8244 = vmatprep.mubr.bf16.mxu0 %v21229_v23  ;;  %v15611_v54 = vld [vmem:[%s20846_s3 + $0x194] ss:$8 sps:$4 sm:$0xff]  }
 0x389   : > { %v5471_v11 = vpop.f32.mrf.mxu1  ;;  %v5812_v53 = vpop.f32.mrf.mxu0  ;;  %9782 = vmatpush2.bf16.msra.mxu0 %v17889_v42  ;;  %9269 = vmatpush2.bf16.msra.mxu1 %v15603_v27  ;;  %v15614_v27 = vld [vmem:[%s20846_s3 + $0x184] ss:$8 sps:$4 sm:$0xff]  }
 0x38a   : > { %21228 = vst [vmem:[#allocation6_spill] sm:$0xff] %v18308_v6  ;;  %v18315_v24 = vadd.f32 %v5812_v53, %v5471_v11  ;;  %9783 = vmatprep.subr.bf16.mxu0 %v17899_v29  ;;  %9270 = vmatprep.subr.bf16.mxu1 %v15608_v38  ;;  %v15609_v29 = vld [vmem:[%s20846_s3 + $0x190] ss:$8 sps:$4 sm:$0xff]   ;;  %v21233_v11 = vld [vmem:[#allocation77_spill] sm:$0xff] }
 0x38b   : > { %v5473_v61 = vpop.f32.mrf.mxu1  ;;  %v5814_v23 = vpop.f32.mrf.mxu0 }
 0x38c   : > { %v18321_v6 = vadd.f32 %v5814_v23, %v5473_v61  ;;  %v21235_v61 = vld [vmem:[#allocation80_spill] sm:$0xff] }
 0x38d   : > { %v18323_v25 = vpop.f32.mrf.mxu1  ;;  %v18325_v42 = vpop.f32.mrf.mxu0  ;;  %9784 = vmatpush2.bf16.msra.mxu0 %v17918_v4  ;;  %9271 = vmatpush2.bf16.msra.mxu1 %v15606_v57 }
 0x38e   : > { %21230 = vst [vmem:[#allocation5_spill] sm:$0xff] %v18321_v6  ;;  %21231 = vst [vmem:[#allocation8_spill] sm:$0xff] %v18323_v25  ;;  %9785 = vmatprep.subr.bf16.mxu0 %v17929_v46  ;;  %9272 = vmatprep.subr.bf16.mxu1 %v15611_v54  ;;  %v15612_v46 = vld [vmem:[%s20846_s3 + $0x180] ss:$8 sps:$4 sm:$0xff]  }
 0x38f   : > { %21232 = vst [vmem:[#allocation7_spill] sm:$0xff] %v18325_v42  ;;  %v5479_v38 = vpop.f32.mrf.mxu1  ;;  %v5820_v23 = vpop.f32.mrf.mxu0  ;;  %8245 = vmatmul.mubr.bf16.gmra.mxu0 %v21233_v11 }
 0x390   : > { %v18336_v53 = vadd.f32 %v5820_v23, %v5479_v38  ;;  %8254 = vmatprep.mubr.bf16.mxu0 %v21235_v61  ;;  %v15617_v38 = vld [vmem:[%s20846_s3 + $0x274] ss:$8 sps:$4 sm:$0xff]  }
 0x391   : > { %v5481_v4 = vpop.f32.mrf.mxu1  ;;  %v5822_v57 = vpop.f32.mrf.mxu0  ;;  %9786 = vmatpush2.bf16.msra.mxu0 %v17943_v8  ;;  %9273 = vmatpush2.bf16.msra.mxu1 %v15609_v29  ;;  %v6238_v29 = vld [vmem:[%s20845_s2] sm:$0x3] }
 0x392   : > { %21234 = vst [vmem:[#allocation10_spill] sm:$0xff] %v18336_v53  ;;  %v18343_v54 = vadd.f32 %v5822_v57, %v5481_v4  ;;  %9787 = vmatprep.subr.bf16.mxu0 %v17953_v33  ;;  %9274 = vmatprep.subr.bf16.mxu1 %v15614_v27  ;;  %v15626_v33 = vld [vmem:[%s20848_s5 + $0x174] ss:$8 sps:$4 sm:$0xff]  }
 0x393   : > { %v5483_v23 = vpop.f32.mrf.mxu1  ;;  %v5824_v61 = vpop.f32.mrf.mxu0 }
 0x394   : > { %21236 = vst [vmem:[#allocation9_spill] sm:$0xff] %v18343_v54  ;;  %v18349_v53 = vadd.f32 %v5824_v61, %v5483_v23  ;;  %v21241_v61 = vld [vmem:[#allocation79_spill] sm:$0xff] }
 0x395   : > { %v18351_v11 = vpop.f32.mrf.mxu1  ;;  %v18353_v8 = vpop.f32.mrf.mxu0  ;;  %9788 = vmatpush2.bf16.msra.mxu0 %v17971_v9  ;;  %9275 = vmatpush2.bf16.msra.mxu1 %v15612_v46  ;;  %v21242_v23 = vld [vmem:[#allocation27_spill] sm:$0xff] }
 0x396   : > { %21237 = vst [vmem:[#allocation12_spill] sm:$0xff] %v18349_v53  ;;  %21238 = vst [vmem:[#allocation11_spill] sm:$0xff] %v18351_v11  ;;  %10302 = vmatprep.subr.bf16.mxu1 %v15617_v38  ;;  %v18367_v53 = vrot.slane %v6238_v29, %v21242_v23  ;;  %11380 = vmatprep.subr.bf16.mxu0 %v15626_v33  ;;  %v21245_v11 = vld [vmem:[#allocation28_spill] sm:$0xff] }
 0x397   : > { %21239 = vst [vmem:[#allocation14_spill] sm:$0xff] %v18353_v8  ;;  %v6015_v27 = vpop.f32.mrf.mxu1  ;;  %v18362_v4 = vpop.f32.mrf.mxu0  ;;  %8255 = vmatmul.mubr.bf16.gmra.mxu0 %v21241_v61  ;;  %v21243_v8 = vld [vmem:[#allocation82_spill] sm:$0xff]  ;;  %v18374_v54 = vrot.slane %v6238_v29, %v21245_v11  ;;  %v21249_v29 = vld [vmem:[#allocation81_spill] sm:$0xff] }
 0x398   : > { %21240 = vst [vmem:[#allocation13_spill] sm:$0xff] %v18362_v4  ;;  %v6174_v57 = vadd.f32 %v6015_v27, %v17997_v50  ;;  %8264 = vmatprep.mubr.bf16.mxu0 %v21243_v8 }
 0x399   : > { %v6017_v9 = vpop.f32.mrf.mxu1  ;;  %v18370_v46 = vpop.f32.mrf.mxu0 }
 0x39a   : > { %21244 = vst [vmem:[#allocation16_spill] sm:$0xff] %v18370_v46  ;;  %v6175_v38 = vadd.f32 %v6017_v9, %v18003_v60  ;;  %v6250_v61 = vadd.f32 %v18367_v53, %v6174_v57 }
 0x39b   : > { %v6019_v6 = vpop.f32.mrf.mxu1  ;;  %v18376_v4 = vpop.f32.mrf.mxu0 }
 0x39c   : > { %21246 = vst [vmem:[#allocation15_spill] sm:$0xff] %v18376_v4  ;;  %v6176_v50 = vadd.f32 %v6019_v6, %v18006_v0  ;;  %v6251_v33 = vadd.f32 %v18374_v54, %v6175_v38  ;;  %v6314_v11 = vmax.f32 %v6250_v61, 0.0  ;;  %v21250_v6 = vld [vmem:[#allocation19_spill] sm:$0xff] }
 0x39d   : > { %v6021_v27 = vpop.f32.mrf.mxu1  ;;  %v18380_v23 = vpop.f32.mrf.mxu0 }
 0x39e   : > { %21247 = vst [vmem:[#allocation18_spill] sm:$0xff] %v18380_v23  ;;  %v6252_v8 = vadd.f32 %v18367_v53, %v6176_v50  ;;  %v6177_v46 = vadd.f32 %v6021_v27, %v18010_v55  ;;  %v6315_v38 = vmax.f32 %v6251_v33, 0.0  ;;  %v21255_v33 = vld [vmem:[#allocation86_spill] sm:$0xff] }
 0x39f   : > { %v6025_v60 = vpop.f32.mrf.mxu1  ;;  %v18385_v9 = vpop.f32.mrf.mxu0  ;;  %8265 = vmatmul.mubr.bf16.gmra.mxu0 %v21249_v29 }
 0x3a0   : > { %21248 = vst [vmem:[#allocation17_spill] sm:$0xff] %v18385_v9  ;;  %v6316_v4 = vmax.f32 %v6252_v8, 0.0  ;;  %v6253_v57 = vadd.f32 %v18374_v54, %v6177_v46  ;;  %v6178_v0 = vadd.f32 %v6025_v60, %v18016_v41  ;;  %8274 = vmatprep.mubr.bf16.mxu0 %v21250_v6 }
 0x3a1   : > { %v6027_v23 = vpop.f32.mrf.mxu1  ;;  %v18391_v42 = vpop.f32.mrf.mxu0 }
 0x3a2   : > { %21251 = vst [vmem:[#allocation66_spill] sm:$0xff] %v18391_v42  ;;  %v18393_v50 = vpack.c.bf16 %v6316_v4, %v6314_v11  ;;  %v6317_v55 = vmax.f32 %v6253_v57, 0.0  ;;  %v6179_v27 = vadd.f32 %v6027_v23, %v18020_v36  ;;  %v6254_v8 = vadd.f32 %v18367_v53, %v6178_v0 }
 0x3a3   : > { %v6029_v9 = vpop.f32.mrf.mxu1  ;;  %v18396_v25 = vpop.f32.mrf.mxu0 }
 0x3a4   : > { %21252 = vst [vmem:[#allocation68_spill] sm:$0xff] %v18393_v50  ;;  %v6180_v61 = vadd.f32 %v6029_v9, %v18023_v56  ;;  %v18400_v46 = vpack.c.bf16 %v6317_v55, %v6315_v38  ;;  %v6255_v42 = vadd.f32 %v18374_v54, %v6179_v27  ;;  %v6318_v56 = vmax.f32 %v6254_v8, 0.0  ;;  %v21256_v38 = vld [vmem:[#allocation23_spill] sm:$0xff] }
 0x3a5   : > { %v6031_v41 = vpop.f32.mrf.mxu1  ;;  %v18402_v60 = vpop.f32.mrf.mxu0 }
 0x3a6   : > { %21253 = vst [vmem:[#allocation81_spill] sm:$0xff] %v18400_v46  ;;  %v6256_v11 = vadd.f32 %v18367_v53, %v6180_v61  ;;  %v6181_v4 = vadd.f32 %v6031_v41, %v18025_v22  ;;  %7668 = vmatprep.mubr.bf16.mxu1 %v18400_v46  ;;  %v6319_v22 = vmax.f32 %v6255_v42, 0.0 }
 0x3a7   : > { %v6035_v36 = vpop.f32.mrf.mxu1  ;;  %v18408_v23 = vpop.f32.mrf.mxu0  ;;  %7669 = vmatmul.mubr.bf16.gmra.mxu1 %v18393_v50  ;;  %8275 = vmatmul.mubr.bf16.gmra.mxu0 %v21255_v33 }
 0x3a8   : > { %21254 = vst [vmem:[#allocation19_spill] sm:$0xff] %v18408_v23  ;;  %v6320_v9 = vmax.f32 %v6256_v11, 0.0  ;;  %v6257_v57 = vadd.f32 %v18374_v54, %v6181_v4  ;;  %v6182_v0 = vadd.f32 %v6035_v36, %v18029_v49  ;;  %8284 = vmatprep.mubr.bf16.mxu0 %v21256_v38 }
 0x3a9   : > { %v6037_v55 = vpop.f32.mrf.mxu1  ;;  %v18415_v27 = vpop.f32.mrf.mxu0 }
 0x3aa   : > { %21257 = vst [vmem:[#allocation86_spill] sm:$0xff] %v18415_v27  ;;  %v18417_v61 = vpack.c.bf16 %v6320_v9, %v6318_v56  ;;  %v6321_v41 = vmax.f32 %v6257_v57, 0.0  ;;  %v6183_v46 = vadd.f32 %v6037_v55, %v18033_v5  ;;  %v6258_v8 = vadd.f32 %v18367_v53, %v6182_v0  ;;  %v21261_v57 = vld [vmem:[#allocation89_spill] sm:$0xff] }
 0x3ab   : > { %v6039_v50 = vpop.f32.mrf.mxu1  ;;  %v18420_v23 = vpop.f32.mrf.mxu0 }
 0x3ac   : > { %21258 = vst [vmem:[#allocation23_spill] sm:$0xff] %v18417_v61  ;;  %v6184_v11 = vadd.f32 %v6039_v50, %v18036_v21  ;;  %v18424_v4 = vpack.c.bf16 %v6321_v41, %v6319_v22  ;;  %v6259_v27 = vadd.f32 %v18374_v54, %v6183_v46  ;;  %v6322_v21 = vmax.f32 %v6258_v8, 0.0  ;;  %v21262_v46 = vld [vmem:[#allocation47_spill] sm:$0xff] }
 0x3ad   : > { %v6041_v49 = vpop.f32.mrf.mxu1  ;;  %v18426_v36 = vpop.f32.mrf.mxu0 }
 0x3ae   : > { %21259 = vst [vmem:[#allocation105_spill] sm:$0xff] %v18424_v4  ;;  %v6260_v42 = vadd.f32 %v18367_v53, %v6184_v11  ;;  %v6185_v56 = vadd.f32 %v6041_v49, %v18038_v59  ;;  %7678 = vmatprep.mubr.bf16.mxu1 %v18424_v4  ;;  %v6323_v59 = vmax.f32 %v6259_v27, 0.0 }
 0x3af   : > { %v6045_v5 = vpop.f32.mrf.mxu1  ;;  %v18432_v9 = vpop.f32.mrf.mxu0  ;;  %7679 = vmatmul.mubr.bf16.gmra.mxu1 %v18417_v61  ;;  %8285 = vmatmul.mubr.bf16.gmra.mxu0 %v21261_v57 }
 0x3b0   : > { %21260 = vst [vmem:[#allocation106_spill] sm:$0xff] %v18432_v9  ;;  %v6324_v50 = vmax.f32 %v6260_v42, 0.0  ;;  %v6261_v0 = vadd.f32 %v18374_v54, %v6185_v56  ;;  %v6186_v55 = vadd.f32 %v6045_v5, %v18042_v51  ;;  %8294 = vmatprep.mubr.bf16.mxu0 %v21262_v46 }
 0x3b1   : > { %v6047_v22 = vpop.f32.mrf.mxu1  ;;  %v18439_v41 = vpop.f32.mrf.mxu0 }
 0x3b2   : > { %21263 = vst [vmem:[#allocation89_spill] sm:$0xff] %v18439_v41  ;;  %v18441_v11 = vpack.c.bf16 %v6324_v50, %v6322_v21  ;;  %v6325_v49 = vmax.f32 %v6261_v0, 0.0  ;;  %v6187_v4 = vadd.f32 %v6047_v22, %v18046_v58  ;;  %v6262_v8 = vadd.f32 %v18367_v53, %v6186_v55  ;;  %v21268_v0 = vld [vmem:[#allocation91_spill] sm:$0xff] }
 0x3b3   : > { %v6049_v61 = vpop.f32.mrf.mxu1  ;;  %v18444_v9 = vpop.f32.mrf.mxu0 }
 0x3b4   : > { %21264 = vst [vmem:[#allocation47_spill] sm:$0xff] %v18441_v11  ;;  %21265 = vst [vmem:[#allocation107_spill] sm:$0xff] %v18444_v9  ;;  %v6188_v42 = vadd.f32 %v6049_v61, %v18049_v31  ;;  %v18448_v56 = vpack.c.bf16 %v6325_v49, %v6323_v59  ;;  %v6263_v41 = vadd.f32 %v18374_v54, %v6187_v4  ;;  %v6326_v31 = vmax.f32 %v6262_v8, 0.0  ;;  %v21269_v4 = vld [vmem:[#allocation51_spill] sm:$0xff] }
 0x3b5   : > { %v6051_v51 = vpop.f32.mrf.mxu1  ;;  %v18450_v5 = vpop.f32.mrf.mxu0 }
 0x3b6   : > { %21266 = vst [vmem:[#allocation108_spill] sm:$0xff] %v18448_v56  ;;  %v6264_v27 = vadd.f32 %v18367_v53, %v6188_v42  ;;  %v6189_v21 = vadd.f32 %v6051_v51, %v18051_v63  ;;  %7688 = vmatprep.mubr.bf16.mxu1 %v18448_v56  ;;  %v6327_v63 = vmax.f32 %v6263_v41, 0.0 }
 0x3b7   : > { %v6055_v58 = vpop.f32.mrf.mxu1  ;;  %v18456_v50 = vpop.f32.mrf.mxu0  ;;  %7689 = vmatmul.mubr.bf16.gmra.mxu1 %v18441_v11  ;;  %8295 = vmatmul.mubr.bf16.gmra.mxu0 %v21268_v0 }
 0x3b8   : > { %21267 = vst [vmem:[#allocation109_spill] sm:$0xff] %v18456_v50  ;;  %v6328_v61 = vmax.f32 %v6264_v27, 0.0  ;;  %v6265_v55 = vadd.f32 %v18374_v54, %v6189_v21  ;;  %v6190_v22 = vadd.f32 %v6055_v58, %v18055_v35  ;;  %8304 = vmatprep.mubr.bf16.mxu0 %v21269_v4 }
 0x3b9   : > { %v6057_v59 = vpop.f32.mrf.mxu1  ;;  %v18463_v49 = vpop.f32.mrf.mxu0 }
 0x3ba   : > { %21270 = vst [vmem:[#allocation91_spill] sm:$0xff] %v18463_v49  ;;  %v18465_v42 = vpack.c.bf16 %v6328_v61, %v6326_v31  ;;  %v6329_v51 = vmax.f32 %v6265_v55, 0.0  ;;  %v6191_v56 = vadd.f32 %v6057_v59, %v18059_v7  ;;  %v6266_v8 = vadd.f32 %v18367_v53, %v6190_v22  ;;  %v21276_v55 = vld [vmem:[#allocation93_spill] sm:$0xff] }
 0x3bb   : > { %v6059_v11 = vpop.f32.mrf.mxu1  ;;  %v18468_v50 = vpop.f32.mrf.mxu0 }
 0x3bc   : > { %21271 = vst [vmem:[#allocation51_spill] sm:$0xff] %v18465_v42  ;;  %21272 = vst [vmem:[#allocation110_spill] sm:$0xff] %v18468_v50  ;;  %v6192_v27 = vadd.f32 %v6059_v11, %v18062_v1  ;;  %v18472_v21 = vpack.c.bf16 %v6329_v51, %v6327_v63  ;;  %v6267_v49 = vadd.f32 %v18374_v54, %v6191_v56  ;;  %v6330_v1 = vmax.f32 %v6266_v8, 0.0  ;;  %v21277_v56 = vld [vmem:[#allocation55_spill] sm:$0xff] }
 0x3bd   : > { %v6061_v35 = vpop.f32.mrf.mxu1  ;;  %v18474_v58 = vpop.f32.mrf.mxu0 }
 0x3be   : > { %21273 = vst [vmem:[#allocation111_spill] sm:$0xff] %v18472_v21  ;;  %21274 = vst [vmem:[#allocation112_spill] sm:$0xff] %v18474_v58  ;;  %v6268_v41 = vadd.f32 %v18367_v53, %v6192_v27  ;;  %v6193_v31 = vadd.f32 %v6061_v35, %v18064_v2  ;;  %7698 = vmatprep.mubr.bf16.mxu1 %v18472_v21  ;;  %v6331_v2 = vmax.f32 %v6267_v49, 0.0 }
 0x3bf   : > { %v6065_v7 = vpop.f32.mrf.mxu1  ;;  %v18480_v61 = vpop.f32.mrf.mxu0  ;;  %7699 = vmatmul.mubr.bf16.gmra.mxu1 %v18465_v42  ;;  %8305 = vmatmul.mubr.bf16.gmra.mxu0 %v21276_v55 }
 0x3c0   : > { %21275 = vst [vmem:[#allocation113_spill] sm:$0xff] %v18480_v61  ;;  %v6332_v11 = vmax.f32 %v6268_v41, 0.0  ;;  %v6269_v22 = vadd.f32 %v18374_v54, %v6193_v31  ;;  %v6194_v59 = vadd.f32 %v6065_v7, %v18068_v18  ;;  %8314 = vmatprep.mubr.bf16.mxu0 %v21277_v56 }
 0x3c1   : > { %v6067_v63 = vpop.f32.mrf.mxu1  ;;  %v18487_v51 = vpop.f32.mrf.mxu0 }
 0x3c2   : > { %21278 = vst [vmem:[#allocation93_spill] sm:$0xff] %v18487_v51  ;;  %v18489_v27 = vpack.c.bf16 %v6332_v11, %v6330_v1  ;;  %v6333_v35 = vmax.f32 %v6269_v22, 0.0  ;;  %v6195_v21 = vadd.f32 %v6067_v63, %v18072_v52  ;;  %v6270_v8 = vadd.f32 %v18367_v53, %v6194_v59  ;;  %v21284_v22 = vld [vmem:[#allocation95_spill] sm:$0xff]  ;;  %v21285_v63 = vld [vmem:[#allocation90_spill] sm:$0xff] }
 0x3c3   : > { %v6069_v42 = vpop.f32.mrf.mxu1  ;;  %v18492_v61 = vpop.f32.mrf.mxu0 }
 0x3c4   : > { %21279 = vst [vmem:[#allocation55_spill] sm:$0xff] %v18489_v27  ;;  %21280 = vst [vmem:[#allocation114_spill] sm:$0xff] %v18492_v61  ;;  %v6196_v41 = vadd.f32 %v6069_v42, %v18075_v3  ;;  %v18496_v31 = vpack.c.bf16 %v6333_v35, %v6331_v2  ;;  %v6271_v51 = vadd.f32 %v18374_v54, %v6195_v21  ;;  %v6334_v3 = vmax.f32 %v6270_v8, 0.0  ;;  %v21286_v21 = vld [vmem:[#allocation57_spill] sm:$0xff] }
 0x3c5   : > { %v6071_v18 = vpop.f32.mrf.mxu1  ;;  %v18498_v7 = vpop.f32.mrf.mxu0 }
 0x3c6   : > { %21281 = vst [vmem:[#allocation115_spill] sm:$0xff] %v18496_v31  ;;  %21282 = vst [vmem:[#allocation116_spill] sm:$0xff] %v18498_v7  ;;  %v6272_v49 = vadd.f32 %v18367_v53, %v6196_v41  ;;  %v6197_v1 = vadd.f32 %v6071_v18, %v18077_v16  ;;  %7708 = vmatprep.mubr.bf16.mxu1 %v18496_v31  ;;  %v6335_v16 = vmax.f32 %v6271_v51, 0.0 }
 0x3c7   : > { %v6075_v52 = vpop.f32.mrf.mxu1  ;;  %v18504_v11 = vpop.f32.mrf.mxu0  ;;  %7709 = vmatmul.mubr.bf16.gmra.mxu1 %v18489_v27  ;;  %8315 = vmatmul.mubr.bf16.gmra.mxu0 %v21284_v22 }
 0x3c8   : > { %21283 = vst [vmem:[#allocation117_spill] sm:$0xff] %v18504_v11  ;;  %v6336_v42 = vmax.f32 %v6272_v49, 0.0  ;;  %v6273_v59 = vadd.f32 %v18374_v54, %v6197_v1  ;;  %v6198_v2 = vadd.f32 %v6075_v52, %v21285_v63  ;;  %8324 = vmatprep.mubr.bf16.mxu0 %v21286_v21  ;;  %v21289_v11 = vld [vmem:[#allocation39_spill] sm:$0xff]  ;;  %v21291_v49 = vld [vmem:[#allocation24_spill] sm:$0xff] }
 0x3c9   : > { %v6077_v35 = vpop.f32.mrf.mxu1  ;;  %v18511_v41 = vpop.f32.mrf.mxu0 }
 0x3ca   : > { %21287 = vst [vmem:[#allocation95_spill] sm:$0xff] %v18511_v41  ;;  %v18513_v18 = vpack.c.bf16 %v6336_v42, %v6334_v3  ;;  %v6337_v31 = vmax.f32 %v6273_v59, 0.0  ;;  %v6199_v7 = vadd.f32 %v6077_v35, %v21289_v11  ;;  %v6274_v8 = vadd.f32 %v18367_v53, %v6198_v2  ;;  %v21294_v3 = vld [vmem:[#allocation25_spill] sm:$0xff]  ;;  %v21296_v2 = vld [vmem:[#allocation56_spill] sm:$0xff] }
 0x3cb   : > { %v6079_v27 = vpop.f32.mrf.mxu1  ;;  %v18516_v61 = vpop.f32.mrf.mxu0 }
 0x3cc   : > { %21288 = vst [vmem:[#allocation90_spill] sm:$0xff] %v18513_v18  ;;  %21290 = vst [vmem:[#allocation57_spill] sm:$0xff] %v18516_v61  ;;  %v6200_v1 = vadd.f32 %v6079_v27, %v21291_v49  ;;  %v18520_v58 = vpack.c.bf16 %v6337_v31, %v6335_v16  ;;  %v6275_v41 = vadd.f32 %v18374_v54, %v6199_v7  ;;  %v6338_v27 = vmax.f32 %v6274_v8, 0.0  ;;  %v21297_v16 = vld [vmem:[#allocation26_spill] sm:$0xff]  ;;  %v21298_v7 = vld [vmem:[#allocation63_spill] sm:$0xff] }
 0x3cd   : > { %v6081_v52 = vpop.f32.mrf.mxu1  ;;  %v18522_v63 = vpop.f32.mrf.mxu0 }
 0x3ce   : > { %21292 = vst [vmem:[#allocation39_spill] sm:$0xff] %v18520_v58  ;;  %21293 = vst [vmem:[#allocation24_spill] sm:$0xff] %v18522_v63  ;;  %v6276_v51 = vadd.f32 %v18367_v53, %v6200_v1  ;;  %v6201_v42 = vadd.f32 %v6081_v52, %v21294_v3  ;;  %7718 = vmatprep.mubr.bf16.mxu1 %v18520_v58  ;;  %v6339_v52 = vmax.f32 %v6275_v41, 0.0 }
 0x3cf   : > { %v6085_v11 = vpop.f32.mrf.mxu1  ;;  %v18528_v59 = vpop.f32.mrf.mxu0  ;;  %7719 = vmatmul.mubr.bf16.gmra.mxu1 %v18513_v18  ;;  %8325 = vmatmul.mubr.bf16.gmra.mxu0 %v21296_v2 }
 0x3d0   : > { %21295 = vst [vmem:[#allocation25_spill] sm:$0xff] %v18528_v59  ;;  %v6340_v31 = vmax.f32 %v6276_v51, 0.0  ;;  %v6277_v35 = vadd.f32 %v18374_v54, %v6201_v42  ;;  %v6202_v49 = vadd.f32 %v6085_v11, %v21297_v16  ;;  %9789 = vmatprep.mubr.bf16.mxu0 %v21298_v7  ;;  %v21301_v59 = vld [vmem:[#allocation92_spill] sm:$0xff]  ;;  %v21308_v7 = vld [vmem:[#allocation62_spill] sm:$0xff] }
 0x3d1   : > { %v6087_v1 = vpop.f32.mrf.mxu1  ;;  %v18535_v63 = vpop.f32.mrf.mxu0  ;;  %v21303_v51 = vld [vmem:[#allocation48_spill] sm:$0xff] }
 0x3d2   : > { %21299 = vst [vmem:[#allocation56_spill] sm:$0xff] %v18535_v63  ;;  %v18537_v3 = vpack.c.bf16 %v6340_v31, %v6338_v27  ;;  %v6341_v58 = vmax.f32 %v6277_v35, 0.0  ;;  %v6203_v61 = vadd.f32 %v6087_v1, %v21301_v59  ;;  %v6278_v8 = vadd.f32 %v18367_v53, %v6202_v49  ;;  %v15624_v11 = vld [vmem:[%s20848_s5 + $0x170] ss:$8 sps:$4 sm:$0xff]   ;;  %v15629_v59 = vld [vmem:[%s20848_s5 + $0x164] ss:$8 sps:$4 sm:$0xff]  }
 0x3d3   : > { %v6089_v18 = vpop.f32.mrf.mxu1  ;;  %v18540_v50 = vpop.f32.mrf.mxu0  ;;  %v21306_v35 = vld [vmem:[#allocation44_spill] sm:$0xff] }
 0x3d4   : > { %21300 = vst [vmem:[#allocation26_spill] sm:$0xff] %v18537_v3  ;;  %21302 = vst [vmem:[#allocation63_spill] sm:$0xff] %v18540_v50  ;;  %v6204_v42 = vadd.f32 %v6089_v18, %v21303_v51  ;;  %v18544_v9 = vpack.c.bf16 %v6341_v58, %v6339_v52  ;;  %v6279_v27 = vadd.f32 %v18374_v54, %v6203_v61  ;;  %v6342_v1 = vmax.f32 %v6278_v8, 0.0  ;;  %v21310_v61 = vld [vmem:[#allocation65_spill] sm:$0xff]  ;;  %v15635_v8 = vld [vmem:[%s20848_s5 + $0x154] ss:$8 sps:$4 sm:$0xff]  }
 0x3d5   : > { %v6091_v16 = vpop.f32.mrf.mxu1  ;;  %v18549_v41 = vpop.f32.mrf.mxu0 }
 0x3d6   : > { %21304 = vst [vmem:[#allocation92_spill] sm:$0xff] %v18544_v9  ;;  %21305 = vst [vmem:[#allocation48_spill] sm:$0xff] %v18549_v41  ;;  %v6280_v31 = vadd.f32 %v18367_v53, %v6204_v42  ;;  %v6205_v49 = vadd.f32 %v6091_v16, %v21306_v35  ;;  %7728 = vmatprep.mubr.bf16.mxu1 %v18544_v9  ;;  %v21309_v41 = vld [vmem:[#allocation49_spill] sm:$0xff] }
 0x3d7   : > { %v6095_v58 = vpop.f32.mrf.mxu1  ;;  %v18558_v18 = vpop.f32.mrf.mxu0  ;;  %7729 = vmatmul.mubr.bf16.gmra.mxu1 %v18537_v3  ;;  %9790 = vmatmul.mubr.bf16.vlgmr.msra.gmra.mxu0 %v21308_v7  ;;  %v15627_v42 = vld [vmem:[%s20848_s5 + $0x160] ss:$8 sps:$4 sm:$0xff]   ;;  %v21314_v3 = vld [vmem:[#allocation43_spill] sm:$0xff] }
 0x3d8   : > { %21307 = vst [vmem:[#allocation44_spill] sm:$0xff] %v18558_v18  ;;  %v6344_v52 = vmax.f32 %v6280_v31, 0.0  ;;  %v6281_v51 = vadd.f32 %v18374_v54, %v6205_v49  ;;  %v6206_v50 = vadd.f32 %v6095_v58, %v21309_v41  ;;  %9799 = vmatprep.mubr.bf16.mxu0 %v21310_v61  ;;  %11381 = vmatpush1.bf16.msra.mxu0 %v15624_v11  ;;  %v6343_v31 = vmax.f32 %v6279_v27, 0.0  ;;  %v21313_v61 = vld [vmem:[#allocation94_spill] sm:$0xff] }
 0x3d9   : > { %v6097_v16 = vpop.f32.mrf.mxu1  ;;  %v18568_v35 = vpop.f32.mrf.mxu0  ;;  %11382 = vmatprep.subr.bf16.mxu0 %v15629_v59  ;;  %v5757_v9 = vadd.f32 %v21314_v3, %v21313_v61  ;;  %v15633_v27 = vld [vmem:[%s20848_s5 + $0x150] ss:$8 sps:$4 sm:$0xff]  }
 0x3da   : > { %21311 = vst [vmem:[#allocation62_spill] sm:$0xff] %v18568_v35  ;;  %v18573_v7 = vpack.c.bf16 %v6344_v52, %v6342_v1  ;;  %v6345_v49 = vmax.f32 %v6281_v51, 0.0  ;;  %v6207_v41 = vadd.f32 %v6097_v16, %v18136_v30  ;;  %v6282_v18 = vadd.f32 %v18367_v53, %v6206_v50  ;;  %v21315_v35 = vld [vmem:[#allocation50_spill] sm:$0xff] }
 0x3db   : > { %v6099_v58 = vpop.f32.mrf.mxu1  ;;  %v18576_v11 = vpop.f32.mrf.mxu0  ;;  %v15638_v30 = vld [vmem:[%s20848_s5 + $0x144] ss:$8 sps:$4 sm:$0xff]  }
 0x3dc   : > { %21312 = vst [vmem:[#allocation49_spill] sm:$0xff] %v18573_v7  ;;  %v6208_v59 = vadd.f32 %v6099_v58, %v21315_v35  ;;  %v18582_v63 = vpack.c.bf16 %v6345_v49, %v6343_v31  ;;  %11383 = vmatpush1.bf16.msra.mxu0 %v15627_v42  ;;  %v6283_v3 = vadd.f32 %v18374_v54, %v6207_v41  ;;  %v21318_v35 = vld [vmem:[#allocation64_spill] sm:$0xff]  ;;  %v6346_v31 = vmax.f32 %v6282_v18, 0.0 }
 0x3dd   : > { %v6101_v1 = vpop.f32.mrf.mxu1  ;;  %v18587_v52 = vpop.f32.mrf.mxu0  ;;  %11384 = vmatprep.subr.bf16.mxu0 %v15635_v8  ;;  %v21319_v58 = vld [vmem:[#allocation52_spill] sm:$0xff] }
 0x3de   : > { %21316 = vst [vmem:[#allocation65_spill] sm:$0xff] %v18582_v63  ;;  %21317 = vst [vmem:[#allocation94_spill] sm:$0xff] %v18587_v52  ;;  %v6284_v50 = vadd.f32 %v18367_v53, %v6208_v59  ;;  %v6209_v51 = vadd.f32 %v6101_v1, %v5757_v9  ;;  %7738 = vmatprep.mubr.bf16.mxu1 %v18582_v63  ;;  %v21320_v52 = vld [vmem:[#allocation67_spill] sm:$0xff]  ;;  %v15636_v9 = vld [vmem:[%s20848_s5 + $0x140] ss:$8 sps:$4 sm:$0xff]   ;;  %v6347_v1 = vmax.f32 %v6283_v3, 0.0 }
 0x3df   : > { %v6105_v42 = vpop.f32.mrf.mxu1  ;;  %v18595_v16 = vpop.f32.mrf.mxu0  ;;  %7739 = vmatmul.mubr.bf16.gmra.mxu1 %v18573_v7  ;;  %9800 = vmatmul.mubr.bf16.gmra.mxu0 %v21318_v35  ;;  %v15644_v18 = vld [vmem:[%s20848_s5 + $0x134] ss:$8 sps:$4 sm:$0xff]   ;;  %v5767_v35 = vadd.f32 %v18180_v17, %v18178_v47  ;;  %v21322_v7 = vld [vmem:[#allocation46_spill] sm:$0xff] }
 0x3e0   : > { %v6348_v8 = vmax.f32 %v6284_v50, 0.0  ;;  %v6285_v49 = vadd.f32 %v18374_v54, %v6209_v51  ;;  %v6210_v61 = vadd.f32 %v6105_v42, %v21319_v58  ;;  %9809 = vmatprep.mubr.bf16.mxu0 %v21320_v52  ;;  %11385 = vmatpush1.bf16.msra.mxu0 %v15633_v27  ;;  %v15642_v3 = vld [vmem:[%s20848_s5 + $0x130] ss:$8 sps:$4 sm:$0xff]  }
 0x3e1   : > { %v6107_v41 = vpop.f32.mrf.mxu1  ;;  %v18605_v59 = vpop.f32.mrf.mxu0  ;;  %11386 = vmatprep.subr.bf16.mxu0 %v15638_v30 }
 0x3e2   : > { %v18610_v50 = vpack.c.bf16 %v6348_v8, %v6346_v31  ;;  %v6349_v51 = vmax.f32 %v6285_v49, 0.0  ;;  %v6211_v42 = vadd.f32 %v6107_v41, %v18168_v15  ;;  %v6286_v58 = vadd.f32 %v18367_v53, %v6210_v61  ;;  %v15647_v15 = vld [vmem:[%s20848_s5 + $0x124] ss:$8 sps:$4 sm:$0xff]  }
 0x3e3   : > { %v6109_v52 = vpop.f32.mrf.mxu1  ;;  %v18613_v27 = vpop.f32.mrf.mxu0 }
 0x3e4   : > { %21321 = vst [vmem:[#allocation43_spill] sm:$0xff] %v18610_v50  ;;  %v6212_v30 = vadd.f32 %v6109_v52, %v21322_v7  ;;  %v18619_v63 = vpack.c.bf16 %v6349_v51, %v6347_v1  ;;  %11387 = vmatpush1.bf16.msra.mxu0 %v15636_v9  ;;  %v6287_v17 = vadd.f32 %v18374_v54, %v6211_v42  ;;  %v6350_v9 = vmax.f32 %v6286_v58, 0.0  ;;  %v21324_v51 = vld [vmem:[#allocation69_spill] sm:$0xff] }
 0x3e5   : > { %v6111_v31 = vpop.f32.mrf.mxu1  ;;  %v18624_v8 = vpop.f32.mrf.mxu0  ;;  %11388 = vmatprep.subr.bf16.mxu0 %v15644_v18  ;;  %v15645_v42 = vld [vmem:[%s20848_s5 + $0x120] ss:$8 sps:$4 sm:$0xff]  }
 0x3e6   : > { %21323 = vst [vmem:[#allocation50_spill] sm:$0xff] %v18619_v63  ;;  %v6288_v47 = vadd.f32 %v18367_v53, %v6212_v30  ;;  %v6213_v7 = vadd.f32 %v6111_v31, %v5767_v35  ;;  %7748 = vmatprep.mubr.bf16.mxu1 %v18619_v63  ;;  %v6351_v58 = vmax.f32 %v6287_v17, 0.0  ;;  %v15651_v17 = vld [vmem:[%s20848_s5 + $0x110] ss:$8 sps:$4 sm:$0xff]  }
 0x3e7   : > { %v6115_v49 = vpop.f32.mrf.mxu1  ;;  %v18632_v61 = vpop.f32.mrf.mxu0  ;;  %7749 = vmatmul.mubr.bf16.gmra.mxu1 %v18610_v50  ;;  %9810 = vmatmul.mubr.bf16.gmra.mxu0 %v21215_v13  ;;  %v15653_v13 = vld [vmem:[%s20848_s5 + $0x114] ss:$8 sps:$4 sm:$0xff]   ;;  %v15687_v63 = vld [vmem:[%s20848_s5 + $0x190] ss:$8 sps:$4 sm:$0xff]  }
 0x3e8   : > { %v6352_v41 = vmax.f32 %v6288_v47, 0.0  ;;  %v6289_v18 = vadd.f32 %v18374_v54, %v6213_v7  ;;  %v6214_v1 = vadd.f32 %v6115_v49, %v18194_v43  ;;  %9819 = vmatprep.mubr.bf16.mxu0 %v21324_v51  ;;  %11389 = vmatpush1.bf16.msra.mxu0 %v15642_v3  ;;  %v5777_v7 = vadd.f32 %v18212_v37, %v18210_v62  ;;  %v21327_v51 = vld [vmem:[#allocation53_spill] sm:$0xff] }
 0x3e9   : > { %v6117_v52 = vpop.f32.mrf.mxu1  ;;  %v18642_v35 = vpop.f32.mrf.mxu0  ;;  %11390 = vmatprep.subr.bf16.mxu0 %v15647_v15 }
 0x3ea   : > { %v18647_v30 = vpack.c.bf16 %v6352_v41, %v6350_v9  ;;  %v6353_v31 = vmax.f32 %v6289_v18, 0.0  ;;  %v6215_v43 = vadd.f32 %v6117_v52, %v18202_v44  ;;  %v6290_v49 = vadd.f32 %v18367_v53, %v6214_v1  ;;  %v15656_v44 = vld [vmem:[%s20848_s5 + $0x104] ss:$8 sps:$4 sm:$0xff]  }
 0x3eb   : > { %v6119_v47 = vpop.f32.mrf.mxu1  ;;  %v18650_v3 = vpop.f32.mrf.mxu0 }
 0x3ec   : > { %21325 = vst [vmem:[#allocation64_spill] sm:$0xff] %v18647_v30  ;;  %21326 = vst [vmem:[#allocation52_spill] sm:$0xff] %v18650_v3  ;;  %v6216_v15 = vadd.f32 %v6119_v47, %v21327_v51  ;;  %v18656_v50 = vpack.c.bf16 %v6353_v31, %v6351_v58  ;;  %11391 = vmatpush1.bf16.msra.mxu0 %v15645_v42  ;;  %v6291_v62 = vadd.f32 %v18374_v54, %v6215_v43  ;;  %v21331_v31 = vld [vmem:[#allocation54_spill] sm:$0xff]  ;;  %v21332_v51 = vld [vmem:[#allocation71_spill] sm:$0xff] }
 0x3ed   : > { %v6121_v9 = vpop.f32.mrf.mxu1  ;;  %v18661_v41 = vpop.f32.mrf.mxu0  ;;  %11392 = vmatprep.subr.bf16.mxu0 %v15653_v13  ;;  %v6354_v52 = vmax.f32 %v6290_v49, 0.0  ;;  %v15654_v43 = vld [vmem:[%s20848_s5 + $0x100] ss:$8 sps:$4 sm:$0xff]  }
 0x3ee   : > { %21328 = vst [vmem:[#allocation67_spill] sm:$0xff] %v18656_v50  ;;  %21329 = vst [vmem:[#allocation46_spill] sm:$0xff] %v18661_v41  ;;  %v6292_v37 = vadd.f32 %v18367_v53, %v6216_v15  ;;  %v6217_v18 = vadd.f32 %v6121_v9, %v5777_v7  ;;  %7758 = vmatprep.mubr.bf16.mxu1 %v18656_v50  ;;  %v6355_v49 = vmax.f32 %v6291_v62, 0.0  ;;  %v15660_v62 = vld [vmem:[%s20848_s5 + $0x1f0] ss:$8 sps:$4 sm:$0xff]   ;;  %v21341_v50 = vld [vmem:[#allocation73_spill] sm:$0xff] }
 0x3ef   : > { %v6125_v1 = vpop.f32.mrf.mxu1  ;;  %v18669_v42 = vpop.f32.mrf.mxu0  ;;  %7759 = vmatmul.mubr.bf16.gmra.mxu1 %v18647_v30  ;;  %9820 = vmatmul.mubr.bf16.gmra.mxu0 %v21218_v10  ;;  %v15662_v10 = vld [vmem:[%s20848_s5 + $0x1f4] ss:$8 sps:$4 sm:$0xff]  }
 0x3f0   : > { %21330 = vst [vmem:[#allocation69_spill] sm:$0xff] %v18669_v42  ;;  %v6356_v13 = vmax.f32 %v6292_v37, 0.0  ;;  %v6293_v58 = vadd.f32 %v18374_v54, %v6217_v18  ;;  %v6218_v47 = vadd.f32 %v6125_v1, %v21331_v31  ;;  %9829 = vmatprep.mubr.bf16.mxu0 %v21332_v51  ;;  %11393 = vmatpush1.bf16.msra.mxu0 %v15651_v17  ;;  %v21407_v42 = vld [vmem:[#allocation31_spill] sm:$0xff] }
 0x3f1   : > { %v6127_v7 = vpop.f32.mrf.mxu1  ;;  %v18679_v15 = vpop.f32.mrf.mxu0  ;;  %11394 = vmatprep.subr.bf16.mxu0 %v15656_v44  ;;  %v5787_v31 = vadd.f32 %v18241_v26, %v18239_v19 }
 0x3f2   : > { %21333 = vst [vmem:[#allocation53_spill] sm:$0xff] %v18679_v15  ;;  %v18684_v9 = vpack.c.bf16 %v6356_v13, %v6354_v52  ;;  %v6357_v37 = vmax.f32 %v6293_v58, 0.0  ;;  %v6219_v18 = vadd.f32 %v6127_v7, %v18231_v32  ;;  %v6294_v51 = vadd.f32 %v18367_v53, %v6218_v47  ;;  %v15665_v32 = vld [vmem:[%s20848_s5 + $0x1e4] ss:$8 sps:$4 sm:$0xff]  }
 0x3f3   : > { %v6129_v1 = vpop.f32.mrf.mxu1  ;;  %v18687_v17 = vpop.f32.mrf.mxu0  ;;  %v21406_v15 = vld [vmem:[#allocation13_spill] sm:$0xff] }
 0x3f4   : > { %21334 = vst [vmem:[#allocation54_spill] sm:$0xff] %v18684_v9  ;;  %21335 = vst [vmem:[#allocation71_spill] sm:$0xff] %v18687_v17  ;;  %v6220_v44 = vadd.f32 %v6129_v1, %v18237_v40  ;;  %v18693_v30 = vpack.c.bf16 %v6357_v37, %v6355_v49  ;;  %11395 = vmatpush1.bf16.msra.mxu0 %v15654_v43  ;;  %v6295_v19 = vadd.f32 %v18374_v54, %v6219_v18  ;;  %v21339_v43 = vld [vmem:[#allocation70_spill] sm:$0xff]  ;;  %v21340_v37 = vld [vmem:[#allocation96_spill] sm:$0xff] }
 0x3f5   : > { %v6131_v52 = vpop.f32.mrf.mxu1  ;;  %v18698_v13 = vpop.f32.mrf.mxu0  ;;  %11396 = vmatprep.subr.bf16.mxu0 %v15662_v10  ;;  %v6358_v7 = vmax.f32 %v6294_v51, 0.0  ;;  %v15663_v18 = vld [vmem:[%s20848_s5 + $0x1e0] ss:$8 sps:$4 sm:$0xff]   ;;  %v15671_v51 = vld [vmem:[%s20848_s5 + $0x1d4] ss:$8 sps:$4 sm:$0xff]  }
 0x3f6   : > { %21336 = vst [vmem:[#allocation118_spill] sm:$0xff] %v18693_v30  ;;  %21337 = vst [vmem:[#allocation119_spill] sm:$0xff] %v18698_v13  ;;  %v6296_v26 = vadd.f32 %v18367_v53, %v6220_v44  ;;  %v6221_v40 = vadd.f32 %v6131_v52, %v5787_v31  ;;  %7768 = vmatprep.mubr.bf16.mxu1 %v18693_v30  ;;  %v6359_v52 = vmax.f32 %v6295_v19, 0.0 }
 0x3f7   : > { %v6135_v58 = vpop.f32.mrf.mxu1  ;;  %v18706_v47 = vpop.f32.mrf.mxu0  ;;  %7769 = vmatmul.mubr.bf16.gmra.mxu1 %v18684_v9  ;;  %9830 = vmatmul.mubr.bf16.gmra.mxu0 %v21339_v43  ;;  %v5797_v43 = vadd.f32 %v18269_v48, %v18267_v12 }
 0x3f8   : > { %21338 = vst [vmem:[#allocation120_spill] sm:$0xff] %v18706_v47  ;;  %v6360_v10 = vmax.f32 %v6296_v26, 0.0  ;;  %v6297_v49 = vadd.f32 %v18374_v54, %v6221_v40  ;;  %v6222_v1 = vadd.f32 %v6135_v58, %v21340_v37  ;;  %9839 = vmatprep.mubr.bf16.mxu0 %v21341_v50  ;;  %11397 = vmatpush2.bf16.msra.mxu0 %v15660_v62  ;;  %v21403_v47 = vld [vmem:[#allocation34_spill] sm:$0xff] }
 0x3f9   : > { %v6137_v31 = vpop.f32.mrf.mxu1  ;;  %v18716_v44 = vpop.f32.mrf.mxu0  ;;  %11398 = vmatprep.subr.bf16.mxu0 %v15665_v32 }
 0x3fa   : > { %21342 = vst [vmem:[#allocation70_spill] sm:$0xff] %v18716_v44  ;;  %v18721_v26 = vpack.c.bf16 %v6360_v10, %v6358_v7  ;;  %v6361_v40 = vmax.f32 %v6297_v49, 0.0  ;;  %v6223_v58 = vadd.f32 %v6137_v31, %v18259_v39  ;;  %v6298_v37 = vadd.f32 %v18367_v53, %v6222_v1  ;;  %v15669_v39 = vld [vmem:[%s20848_s5 + $0x1d0] ss:$8 sps:$4 sm:$0xff]  }
 0x3fb   : > { %v6139_v50 = vpop.f32.mrf.mxu1  ;;  %v18724_v62 = vpop.f32.mrf.mxu0  ;;  %v21348_v1 = vld [vmem:[#allocation72_spill] sm:$0xff] }
 0x3fc   : > { %21343 = vst [vmem:[#allocation96_spill] sm:$0xff] %v18721_v26  ;;  %21344 = vst [vmem:[#allocation73_spill] sm:$0xff] %v18724_v62  ;;  %v6224_v32 = vadd.f32 %v6139_v50, %v18265_v14  ;;  %v18730_v9 = vpack.c.bf16 %v6361_v40, %v6359_v52  ;;  %11399 = vmatpush2.bf16.msra.mxu0 %v15663_v18  ;;  %v6299_v7 = vadd.f32 %v18374_v54, %v6223_v58  ;;  %v15674_v14 = vld [vmem:[%s20848_s5 + $0x1c4] ss:$8 sps:$4 sm:$0xff]   ;;  %v21351_v58 = vld [vmem:[#allocation75_spill] sm:$0xff] }
 0x3fd   : > { %v6141_v30 = vpop.f32.mrf.mxu1  ;;  %v18732_v19 = vpop.f32.mrf.mxu0  ;;  %11400 = vmatprep.subr.bf16.mxu0 %v15671_v51  ;;  %v6362_v18 = vmax.f32 %v6298_v37, 0.0  ;;  %v21349_v52 = vld [vmem:[#allocation45_spill] sm:$0xff]  ;;  %v21401_v62 = vld [vmem:[#allocation32_spill] sm:$0xff] }
 0x3fe   : > { %21345 = vst [vmem:[#allocation121_spill] sm:$0xff] %v18730_v9  ;;  %21346 = vst [vmem:[#allocation122_spill] sm:$0xff] %v18732_v19  ;;  %v6300_v10 = vadd.f32 %v18367_v53, %v6224_v32  ;;  %v6225_v12 = vadd.f32 %v6141_v30, %v5797_v43  ;;  %7778 = vmatprep.mubr.bf16.mxu1 %v18730_v9  ;;  %v21350_v30 = vld [vmem:[#allocation59_spill] sm:$0xff]  ;;  %v15672_v32 = vld [vmem:[%s20848_s5 + $0x1c0] ss:$8 sps:$4 sm:$0xff]  }
 0x3ff   : > { %v6145_v48 = vpop.f32.mrf.mxu1  ;;  %v18743_v49 = vpop.f32.mrf.mxu0  ;;  %7779 = vmatmul.mubr.bf16.gmra.mxu1 %v18721_v26  ;;  %9840 = vmatmul.mubr.bf16.gmra.mxu0 %v21348_v1  ;;  %v6363_v26 = vmax.f32 %v6299_v7, 0.0 }
 0x400   : > { %21347 = vst [vmem:[#allocation123_spill] sm:$0xff] %v18743_v49  ;;  %v6364_v31 = vmax.f32 %v6300_v10, 0.0  ;;  %v6301_v51 = vadd.f32 %v18374_v54, %v6225_v12  ;;  %v6226_v40 = vadd.f32 %v6145_v48, %v21349_v52  ;;  %9276 = vmatprep.mubr.bf16.mxu1 %v21350_v30  ;;  %9849 = vmatprep.mubr.bf16.mxu0 %v21351_v58  ;;  %v15680_v12 = vld [vmem:[%s20848_s5 + $0x1b4] ss:$8 sps:$4 sm:$0xff]  }
 0x401   : > { %v6147_v50 = vpop.f32.mrf.mxu1  ;;  %v18751_v43 = vpop.f32.mrf.mxu0  ;;  %11401 = vmatpush2.bf16.msra.mxu0 %v15669_v39  ;;  %v5807_v39 = vadd.f32 %v18297_v45, %v18295_v34 }
 0x402   : > { %21352 = vst [vmem:[#allocation72_spill] sm:$0xff] %v18751_v43  ;;  %v18756_v1 = vpack.c.bf16 %v6364_v31, %v6362_v18  ;;  %v6365_v37 = vmax.f32 %v6301_v51, 0.0  ;;  %v6227_v10 = vadd.f32 %v6147_v50, %v18287_v28  ;;  %11402 = vmatprep.subr.bf16.mxu0 %v15674_v14  ;;  %v6302_v30 = vadd.f32 %v18367_v53, %v6226_v40  ;;  %v15615_v28 = vld [vmem:[%s20846_s3 + $0x270] ss:$8 sps:$4 sm:$0xff]  }
 0x403   : > { %v6149_v48 = vpop.f32.mrf.mxu1  ;;  %v18762_v52 = vpop.f32.mrf.mxu0  ;;  %v15678_v14 = vld [vmem:[%s20848_s5 + $0x1b0] ss:$8 sps:$4 sm:$0xff]  }
 0x404   : > { %21353 = vst [vmem:[#allocation45_spill] sm:$0xff] %v18756_v1  ;;  %21354 = vst [vmem:[#allocation59_spill] sm:$0xff] %v18762_v52  ;;  %v6228_v7 = vadd.f32 %v6149_v48, %v18293_v20  ;;  %v18768_v18 = vpack.c.bf16 %v6365_v37, %v6363_v26  ;;  %v6303_v34 = vadd.f32 %v18374_v54, %v6227_v10  ;;  %v15620_v20 = vld [vmem:[%s20846_s3 + $0x264] ss:$8 sps:$4 sm:$0xff]   ;;  %v6366_v10 = vmax.f32 %v6302_v30, 0.0 }
 0x405   : > { %v6151_v31 = vpop.f32.mrf.mxu1  ;;  %v18770_v51 = vpop.f32.mrf.mxu0  ;;  %11403 = vmatpush2.bf16.msra.mxu0 %v15672_v32  ;;  %v15683_v26 = vld [vmem:[%s20848_s5 + $0x1a4] ss:$8 sps:$4 sm:$0xff]   ;;  %v15681_v30 = vld [vmem:[%s20848_s5 + $0x1a0] ss:$8 sps:$4 sm:$0xff]   ;;  %v15707_v52 = vld [vmem:[%s20846_s3 + $0x294] ss:$8 sps:$4 sm:$0xff]  }
 0x406   : > { %21355 = vst [vmem:[#allocation75_spill] sm:$0xff] %v18768_v18  ;;  %21356 = vst [vmem:[#allocation124_spill] sm:$0xff] %v18770_v51  ;;  %v6304_v45 = vadd.f32 %v18367_v53, %v6228_v7  ;;  %v6229_v40 = vadd.f32 %v6151_v31, %v5807_v39  ;;  %11404 = vmatprep.subr.bf16.mxu0 %v15680_v12  ;;  %v21358_v32 = vld [vmem:[#allocation58_spill] sm:$0xff]  ;;  %v21361_v1 = vld [vmem:[#allocation61_spill] sm:$0xff] }
 0x407   : > { %v6155_v58 = vpop.f32.mrf.mxu1  ;;  %v18786_v50 = vpop.f32.mrf.mxu0  ;;  %9277 = vmatmul.mubr.bf16.vlgmr.msra.gmra.mxu1 %v21358_v32  ;;  %v21359_v37 = vld [vmem:[#allocation74_spill] sm:$0xff]  ;;  %v21399_v51 = vld [vmem:[#allocation76_spill] sm:$0xff] }
 0x408   : > { %21357 = vst [vmem:[#allocation125_spill] sm:$0xff] %v18786_v50  ;;  %9850 = vmatmul.mubr.bf16.gmra.mxu0 %v21359_v37  ;;  %v6368_v48 = vmax.f32 %v6304_v45, 0.0  ;;  %v6305_v39 = vadd.f32 %v18374_v54, %v6229_v40  ;;  %v21360_v7 = vld [vmem:[#allocation6_spill] sm:$0xff]  ;;  %9286 = vmatprep.mubr.bf16.mxu1 %v21361_v1  ;;  %v6367_v45 = vmax.f32 %v6303_v34, 0.0  ;;  %v21367_v34 = vld [vmem:[#allocation7_spill] sm:$0xff] }
 0x409   : > { %v6230_v31 = vadd.f32 %v6155_v58, %v21360_v7  ;;  %v21362_v12 = vld [vmem:[#allocation78_spill] sm:$0xff]  ;;  %10303 = vmatpush1.bf16.msra.mxu1 %v15615_v28  ;;  %v6157_v18 = vpop.f32.mrf.mxu1  ;;  %v18794_v9 = vpop.f32.mrf.mxu0  ;;  %11405 = vmatpush2.bf16.msra.mxu0 %v15678_v14  ;;  %v15623_v28 = vld [vmem:[%s20846_s3 + $0x254] ss:$8 sps:$4 sm:$0xff]  }
 0x40a   : > { %9859 = vmatprep.mubr.bf16.mxu0 %v21362_v12  ;;  %21363 = vst [vmem:[#allocation58_spill] sm:$0xff] %v18794_v9  ;;  %v15618_v32 = vld [vmem:[%s20846_s3 + $0x260] ss:$8 sps:$4 sm:$0xff]   ;;  %v18802_v40 = vpack.c.bf16 %v6368_v48, %v6366_v10  ;;  %v6369_v58 = vmax.f32 %v6305_v39, 0.0  ;;  %v6231_v1 = vadd.f32 %v6157_v18, %v18315_v24  ;;  %10304 = vmatprep.subr.bf16.mxu1 %v15620_v20  ;;  %v15689_v14 = vld [vmem:[%s20848_s5 + $0x194] ss:$8 sps:$4 sm:$0xff]  }
 0x40b   : > { %11406 = vmatprep.subr.bf16.mxu0 %v15683_v26  ;;  %v6159_v37 = vpop.f32.mrf.mxu1  ;;  %v18811_v7 = vpop.f32.mrf.mxu0  ;;  %v21366_v12 = vld [vmem:[#allocation8_spill] sm:$0xff]  ;;  %v6306_v48 = vadd.f32 %v18367_v53, %v6230_v31  ;;  %v21368_v39 = vld [vmem:[#allocation5_spill] sm:$0xff]  ;;  %v21398_v50 = vld [vmem:[#allocation30_spill] sm:$0xff] }
 0x40c   : > { %21364 = vst [vmem:[#allocation74_spill] sm:$0xff] %v18802_v40  ;;  %21365 = vst [vmem:[#allocation6_spill] sm:$0xff] %v18811_v7  ;;  %v5817_v10 = vadd.f32 %v21367_v34, %v21366_v12  ;;  %v6232_v24 = vadd.f32 %v6159_v37, %v21368_v39  ;;  %v18817_v18 = vpack.c.bf16 %v6369_v58, %v6367_v45  ;;  %v15621_v26 = vld [vmem:[%s20846_s3 + $0x250] ss:$8 sps:$4 sm:$0xff]   ;;  %v15632_v45 = vld [vmem:[%s20846_s3 + $0x244] ss:$8 sps:$4 sm:$0xff]  }
 0x40d   : > { %v6161_v20 = vpop.f32.mrf.mxu1  ;;  %v18819_v40 = vpop.f32.mrf.mxu0  ;;  %10305 = vmatpush1.bf16.msra.mxu1 %v15618_v32  ;;  %11407 = vmatpush2.bf16.msra.mxu0 %v15681_v30  ;;  %v6307_v12 = vadd.f32 %v18374_v54, %v6231_v1  ;;  %v15692_v32 = vld [vmem:[%s20848_s5 + $0x184] ss:$8 sps:$4 sm:$0xff]   ;;  %v21372_v34 = vld [vmem:[#allocation60_spill] sm:$0xff]  ;;  %v6370_v1 = vmax.f32 %v6306_v48, 0.0 }
 0x40e   : > { %21369 = vst [vmem:[#allocation61_spill] sm:$0xff] %v18817_v18  ;;  %21370 = vst [vmem:[#allocation78_spill] sm:$0xff] %v18819_v40  ;;  %v6308_v31 = vadd.f32 %v18367_v53, %v6232_v24  ;;  %v6233_v37 = vadd.f32 %v6161_v20, %v5817_v10  ;;  %10306 = vmatprep.subr.bf16.mxu1 %v15623_v28  ;;  %11408 = vmatprep.subr.bf16.mxu0 %v15689_v14  ;;  %v21373_v39 = vld [vmem:[#allocation77_spill] sm:$0xff]  ;;  %v21374_v10 = vld [vmem:[#allocation10_spill] sm:$0xff] }
 0x40f   : > { %v6165_v30 = vpop.f32.mrf.mxu1  ;;  %v18835_v58 = vpop.f32.mrf.mxu0  ;;  %9287 = vmatmul.mubr.bf16.gmra.mxu1 %v21372_v34  ;;  %v21375_v18 = vld [vmem:[#allocation98_spill] sm:$0xff]  ;;  %v21376_v14 = vld [vmem:[#allocation80_spill] sm:$0xff] }
 0x410   : > { %21371 = vst [vmem:[#allocation8_spill] sm:$0xff] %v18835_v58  ;;  %9860 = vmatmul.mubr.bf16.gmra.mxu0 %v21373_v39  ;;  %v6372_v24 = vmax.f32 %v6308_v31, 0.0  ;;  %v6309_v28 = vadd.f32 %v18374_v54, %v6233_v37  ;;  %v6234_v20 = vadd.f32 %v6165_v30, %v21374_v10  ;;  %9296 = vmatprep.mubr.bf16.mxu1 %v21375_v18  ;;  %v15630_v34 = vld [vmem:[%s20846_s3 + $0x240] ss:$8 sps:$4 sm:$0xff]   ;;  %v6371_v31 = vmax.f32 %v6307_v12, 0.0 }
 0x411   : > { %9869 = vmatprep.mubr.bf16.mxu0 %v21376_v14  ;;  %v6167_v40 = vpop.f32.mrf.mxu1  ;;  %v18843_v7 = vpop.f32.mrf.mxu0  ;;  %10307 = vmatpush1.bf16.msra.mxu1 %v15621_v26  ;;  %v15690_v48 = vld [vmem:[%s20848_s5 + $0x180] ss:$8 sps:$4 sm:$0xff]   ;;  %v15641_v26 = vld [vmem:[%s20846_s3 + $0x234] ss:$8 sps:$4 sm:$0xff]  }
 0x412   : > { %21377 = vst [vmem:[#allocation7_spill] sm:$0xff] %v18843_v7  ;;  %11409 = vmatpush2.bf16.msra.mxu0 %v15687_v63  ;;  %v18851_v37 = vpack.c.bf16 %v6372_v24, %v6370_v1  ;;  %v6373_v30 = vmax.f32 %v6309_v28, 0.0  ;;  %v21379_v18 = vld [vmem:[#allocation9_spill] sm:$0xff]  ;;  %10308 = vmatprep.subr.bf16.mxu1 %v15632_v45  ;;  %v21381_v63 = vld [vmem:[#allocation11_spill] sm:$0xff]  ;;  %v21382_v7 = vld [vmem:[#allocation14_spill] sm:$0xff]  ;;  %v6310_v9 = vadd.f32 %v18367_v53, %v6234_v20 }
 0x413   : > { %v6235_v39 = vadd.f32 %v6167_v40, %v21379_v18  ;;  %11410 = vmatprep.subr.bf16.mxu0 %v15692_v32  ;;  %v6169_v10 = vpop.f32.mrf.mxu1  ;;  %v18857_v14 = vpop.f32.mrf.mxu0  ;;  %v5827_v58 = vadd.f32 %v21382_v7, %v21381_v63  ;;  %v21383_v12 = vld [vmem:[#allocation12_spill] sm:$0xff]  ;;  %v15650_v20 = vld [vmem:[%s20846_s3 + $0x224] ss:$8 sps:$4 sm:$0xff]  }
 0x414   : > { %21378 = vst [vmem:[#allocation5_spill] sm:$0xff] %v18851_v37  ;;  %21380 = vst [vmem:[#allocation60_spill] sm:$0xff] %v18857_v14  ;;  %v6236_v1 = vadd.f32 %v6169_v10, %v21383_v12  ;;  %v18863_v24 = vpack.c.bf16 %v6373_v30, %v6371_v31  ;;  %v15639_v45 = vld [vmem:[%s20846_s3 + $0x230] ss:$8 sps:$4 sm:$0xff]   ;;  %v6374_v63 = vmax.f32 %v6310_v9, 0.0 }
 0x415   : > { %v6171_v28 = vpop.f32.mrf.mxu1  ;;  %v18865_v40 = vpop.f32.mrf.mxu0  ;;  %10309 = vmatpush1.bf16.msra.mxu1 %v15630_v34  ;;  %v6311_v32 = vadd.f32 %v18374_v54, %v6235_v39  ;;  %v21386_v34 = vld [vmem:[#allocation97_spill] sm:$0xff]  ;;  %v21387_v10 = vld [vmem:[#allocation79_spill] sm:$0xff]  ;;  %v21388_v12 = vld [vmem:[#allocation100_spill] sm:$0xff] }
 0x416   : > { %21384 = vst [vmem:[#allocation77_spill] sm:$0xff] %v18863_v24  ;;  %21385 = vst [vmem:[#allocation10_spill] sm:$0xff] %v18865_v40  ;;  %11411 = vmatpush2.bf16.msra.mxu0 %v15690_v48  ;;  %v6312_v18 = vadd.f32 %v18367_v53, %v6236_v1  ;;  %v6237_v7 = vadd.f32 %v6171_v28, %v5827_v58  ;;  %10310 = vmatprep.subr.bf16.mxu1 %v15641_v26  ;;  %v21389_v53 = vld [vmem:[#allocation82_spill] sm:$0xff]  ;;  %v21396_v37 = vld [vmem:[#allocation103_spill] sm:$0xff] }
 0x417   : > { %v18875_v31 = vpop.f32.mrf.mxu1  ;;  %v18877_v30 = vpop.f32.mrf.mxu0  ;;  %9297 = vmatmul.mubr.bf16.gmra.mxu1 %v21386_v34  ;;  %v15648_v26 = vld [vmem:[%s20846_s3 + $0x220] ss:$8 sps:$4 sm:$0xff]   ;;  %v6375_v1 = vmax.f32 %v6311_v32, 0.0  ;;  %v15657_v32 = vld [vmem:[%s20846_s3 + $0x210] ss:$8 sps:$4 sm:$0xff]  }
 0x418   : > { %9870 = vmatmul.mubr.bf16.gmra.mxu0 %v21387_v10  ;;  %v6376_v48 = vmax.f32 %v6312_v18, 0.0  ;;  %v6313_v39 = vadd.f32 %v18374_v54, %v6237_v7  ;;  %9306 = vmatprep.mubr.bf16.mxu1 %v21388_v12  ;;  %v15659_v54 = vld [vmem:[%s20846_s3 + $0x214] ss:$8 sps:$4 sm:$0xff]   ;;  %v21397_v24 = vld [vmem:[#allocation29_spill] sm:$0xff] }
 0x419   : > { %9879 = vmatprep.mubr.bf16.mxu0 %v21389_v53  ;;  %v18884_v58 = vpop.f32.mrf.mxu0  ;;  %10311 = vmatpush1.bf16.msra.mxu1 %v15639_v45  ;;  %v18894_v9 = vpop.f32.mrf.mxu1  ;;  %v15666_v53 = vld [vmem:[%s20846_s3 + $0x200] ss:$8 sps:$4 sm:$0xff]   ;;  %v15701_v40 = vld [vmem:[%s20846_s3 + $0x2b4] ss:$8 sps:$4 sm:$0xff]  }
 0x41a   : > { %v18889_v28 = vpack.c.bf16 %v6376_v48, %v6374_v63  ;;  %v6377_v34 = vmax.f32 %v6313_v39, 0.0  ;;  %10312 = vmatprep.subr.bf16.mxu1 %v15650_v20  ;;  %v15668_v20 = vld [vmem:[%s20846_s3 + $0x204] ss:$8 sps:$4 sm:$0xff]   ;;  %v21392_v48 = vld [vmem:[#allocation99_spill] sm:$0xff] }
 0x41b   : > { %v18896_v18 = vpop.f32.mrf.mxu0  ;;  %v18908_v10 = vpop.f32.mrf.mxu1  ;;  %v21393_v39 = vld [vmem:[#allocation102_spill] sm:$0xff] }
 0x41c   : > { %21390 = vst [vmem:[#allocation98_spill] sm:$0xff] %v18889_v28  ;;  %v18898_v7 = vpack.c.bf16 %v6377_v34, %v6375_v1  ;;  %v15695_v28 = vld [vmem:[%s20846_s3 + $0x2d4] ss:$8 sps:$4 sm:$0xff]  }
 0x41d   : > { %v18900_v45 = vpop.f32.mrf.mxu0  ;;  %10313 = vmatpush1.bf16.msra.mxu1 %v15648_v26  ;;  %v15677_v26 = vld [vmem:[%s20846_s3 + $0x2f4] ss:$8 sps:$4 sm:$0xff]   ;;  %v7636_v1 = vpop.f32.mrf.mxu1 }
 0x41e   : > { %21391 = vst [vmem:[#allocation80_spill] sm:$0xff] %v18898_v7  ;;  %10314 = vmatprep.subr.bf16.mxu1 %v15659_v54  ;;  %v15686_v54 = vld [vmem:[%s20846_s3 + $0x2e4] ss:$8 sps:$4 sm:$0xff]  }
 0x41f   : > { %v18910_v63 = vpop.f32.mrf.mxu0  ;;  %9307 = vmatmul.mubr.bf16.gmra.mxu1 %v21392_v48  ;;  %v21394_v48 = vld [vmem:[#allocation101_spill] sm:$0xff] }
 0x420   : > { %9880 = vmatmul.mubr.bf16.gmra.mxu0 %v21249_v29  ;;  %9316 = vmatprep.mubr.bf16.mxu1 %v21393_v39  ;;  %v21395_v39 = vld [vmem:[#allocation104_spill] sm:$0xff] }
 0x421   : > { %9889 = vmatprep.mubr.bf16.mxu0 %v21250_v6  ;;  %v18916_v12 = vpop.f32.mrf.mxu0  ;;  %10315 = vmatpush1.bf16.msra.mxu1 %v15657_v32  ;;  %v15675_v6 = vld [vmem:[%s20846_s3 + $0x2f0] ss:$8 sps:$4 sm:$0xff]   ;;  %v18934_v32 = vpop.f32.mrf.mxu1 }
 0x422   : > { %10316 = vmatprep.subr.bf16.mxu1 %v15668_v20 }
 0x423   : > { %v18924_v34 = vpop.f32.mrf.mxu0  ;;  %v18950_v7 = vpop.f32.mrf.mxu1 }
 0x425   : > { %v18926_v29 = vpop.f32.mrf.mxu0  ;;  %10317 = vmatpush1.bf16.msra.mxu1 %v15666_v53 }
 0x426   : > { %10318 = vmatprep.subr.bf16.mxu1 %v15677_v26  ;;  %v15684_v26 = vld [vmem:[%s20846_s3 + $0x2e0] ss:$8 sps:$4 sm:$0xff]  }
 0x427   : > { %v18936_v20 = vpop.f32.mrf.mxu0  ;;  %9317 = vmatmul.mubr.bf16.gmra.mxu1 %v21394_v48 }
 0x428   : > { %9890 = vmatmul.mubr.bf16.gmra.mxu0 %v21255_v33  ;;  %9326 = vmatprep.mubr.bf16.mxu1 %v21395_v39 }
 0x429   : > { %9899 = vmatprep.mubr.bf16.mxu0 %v21256_v38  ;;  %v18942_v53 = vpop.f32.mrf.mxu0  ;;  %10319 = vmatpush2.bf16.msra.mxu1 %v15675_v6  ;;  %v15693_v38 = vld [vmem:[%s20846_s3 + $0x2d0] ss:$8 sps:$4 sm:$0xff]   ;;  %v15698_v6 = vld [vmem:[%s20846_s3 + $0x2c4] ss:$8 sps:$4 sm:$0xff]  }
 0x42a   : > { %10320 = vmatprep.subr.bf16.mxu1 %v15686_v54  ;;  %v18962_v54 = vpop.f32.mrf.mxu1 }
 0x42b   : > { %v18952_v48 = vpop.f32.mrf.mxu0 }
 0x42c   : > { %v7646_v14 = vpop.f32.mrf.mxu1 }
 0x42d   : > { %v18954_v33 = vpop.f32.mrf.mxu0  ;;  %10321 = vmatpush2.bf16.msra.mxu1 %v15684_v26 }
 0x42e   : > { %10322 = vmatprep.subr.bf16.mxu1 %v15695_v28  ;;  %v15696_v28 = vld [vmem:[%s20846_s3 + $0x2c0] ss:$8 sps:$4 sm:$0xff]  }
 0x42f   : > { %v18964_v39 = vpop.f32.mrf.mxu0  ;;  %9327 = vmatmul.mubr.bf16.gmra.mxu1 %v21396_v37 }
 0x430   : > { %9900 = vmatmul.mubr.bf16.gmra.mxu0 %v21261_v57  ;;  %9336 = vmatprep.mubr.bf16.mxu1 %v21397_v24  ;;  %v15704_v24 = vld [vmem:[%s20846_s3 + $0x2a4] ss:$8 sps:$4 sm:$0xff]  }
 0x431   : > { %9909 = vmatprep.mubr.bf16.mxu0 %v21262_v46  ;;  %v18970_v26 = vpop.f32.mrf.mxu0  ;;  %10323 = vmatpush2.bf16.msra.mxu1 %v15693_v38  ;;  %v15699_v46 = vld [vmem:[%s20846_s3 + $0x2b0] ss:$8 sps:$4 sm:$0xff]   ;;  %v18988_v38 = vpop.f32.mrf.mxu1 }
 0x432   : > { %10324 = vmatprep.subr.bf16.mxu1 %v15698_v6 }
 0x433   : > { %v18978_v37 = vpop.f32.mrf.mxu0  ;;  %v19004_v43 = vpop.f32.mrf.mxu1 }
 0x435   : > { %v18980_v57 = vpop.f32.mrf.mxu0  ;;  %10325 = vmatpush2.bf16.msra.mxu1 %v15696_v28  ;;  %v19017_v49 = vpop.f32.mrf.mxu1 }
 0x436   : > { %10326 = vmatprep.subr.bf16.mxu1 %v15701_v40  ;;  %v15702_v40 = vld [vmem:[%s20846_s3 + $0x2a0] ss:$8 sps:$4 sm:$0xff]  }
 0x437   : > { %v18990_v6 = vpop.f32.mrf.mxu0  ;;  %9337 = vmatmul.mubr.bf16.gmra.mxu1 %v21398_v50 }
 0x438   : > { %9910 = vmatmul.mubr.bf16.gmra.mxu0 %v21268_v0  ;;  %9346 = vmatprep.mubr.bf16.mxu1 %v21399_v51  ;;  %v21400_v51 = vld [vmem:[#allocation18_spill] sm:$0xff] }
 0x439   : > { %9919 = vmatprep.mubr.bf16.mxu0 %v21269_v4  ;;  %v18996_v28 = vpop.f32.mrf.mxu0  ;;  %10327 = vmatpush2.bf16.msra.mxu1 %v15699_v46  ;;  %v15705_v4 = vld [vmem:[%s20846_s3 + $0x290] ss:$8 sps:$4 sm:$0xff]   ;;  %v7637_v46 = vadd.f32 %v7636_v1, %v21400_v51  ;;  %v15708_v1 = vld [vmem:[%s20846_s3 + $0x280] ss:$8 sps:$4 sm:$0xff]  }
 0x43a   : > { %10328 = vmatprep.subr.bf16.mxu1 %v15704_v24  ;;  %v15710_v24 = vld [vmem:[%s20846_s3 + $0x284] ss:$8 sps:$4 sm:$0xff]  }
 0x43b   : > { %v19006_v50 = vpop.f32.mrf.mxu0  ;;  %v8338_v51 = vadd.f32 %v18900_v45, %v7637_v46  ;;  %v7647_v46 = vadd.f32 %v7646_v14, %v18402_v60  ;;  %v21409_v14 = vld [vmem:[#allocation36_spill] sm:$0xff] }
 0x43d   : > { %v19008_v0 = vpop.f32.mrf.mxu0  ;;  %10329 = vmatpush2.bf16.msra.mxu1 %v15702_v40  ;;  %v21402_v40 = vld [vmem:[#allocation16_spill] sm:$0xff] }
 0x43e   : > { %10330 = vmatprep.subr.bf16.mxu1 %v15707_v52  ;;  %v7633_v44 = vadd.f32 %v18894_v9, %v21402_v40 }
 0x43f   : > { %v19019_v19 = vpop.f32.mrf.mxu0  ;;  %9347 = vmatmul.mubr.bf16.gmra.mxu1 %v21401_v62  ;;  %v7656_v62 = vpop.f32.mrf.mxu1 }
 0x440   : > { %9920 = vmatmul.mubr.bf16.gmra.mxu0 %v21276_v55  ;;  %9356 = vmatprep.mubr.bf16.mxu1 %v21403_v47  ;;  %v8399_v55 = vld [vmem:[%s20847_s4] sm:$0x3]  ;;  %v8336_v47 = vadd.f32 %v18884_v58, %v7633_v44  ;;  %v7631_v44 = vadd.f32 %v18875_v31, %v21406_v15 }
 0x441   : > { %9929 = vmatprep.mubr.bf16.mxu0 %v21277_v56  ;;  %v19027_v52 = vpop.f32.mrf.mxu0  ;;  %10331 = vmatpush2.bf16.msra.mxu1 %v15705_v4  ;;  %v21404_v56 = vld [vmem:[#allocation28_spill] sm:$0xff]  ;;  %v21405_v4 = vld [vmem:[#allocation15_spill] sm:$0xff]  ;;  %v19053_v58 = vpop.f32.mrf.mxu1 }
 0x442   : > { %10332 = vmatprep.subr.bf16.mxu1 %v15710_v24  ;;  %v19040_v40 = vrot.slane %v8399_v55, %v21404_v56  ;;  %v7635_v13 = vadd.f32 %v18908_v10, %v21405_v4  ;;  %v15713_v24 = vld [vmem:[%s20848_s5 + $0x74] ss:$8 sps:$4 sm:$0xff]   ;;  %v8342_v4 = vadd.f32 %v18926_v29, %v7647_v46  ;;  %v21411_v46 = vld [vmem:[#allocation17_spill] sm:$0xff] }
 0x443   : > { %v19036_v9 = vpop.f32.mrf.mxu0 }
 0x444   : > { %v8414_v45 = vadd.f32 %v19040_v40, %v8338_v51  ;;  %v8412_v10 = vadd.f32 %v19040_v40, %v8336_v47  ;;  %v8337_v51 = vadd.f32 %v18896_v18, %v7635_v13  ;;  %v7662_v47 = vpop.f32.mrf.mxu1  ;;  %v7645_v13 = vadd.f32 %v18962_v54, %v18396_v25  ;;  %v21413_v54 = vld [vmem:[#allocation86_spill] sm:$0xff] }
 0x445   : > { %v19044_v17 = vpop.f32.mrf.mxu0  ;;  %10333 = vmatpush2.bf16.msra.mxu1 %v15708_v1  ;;  %v21408_v1 = vld [vmem:[#allocation66_spill] sm:$0xff]  ;;  %v8418_v29 = vadd.f32 %v19040_v40, %v8342_v4 }
 0x446   : > { %v7643_v60 = vadd.f32 %v18950_v7, %v21408_v1  ;;  %11893 = vmatprep.subr.bf16.mxu1 %v15713_v24  ;;  %v8478_v31 = vmax.f32 %v8414_v45, 0.0  ;;  %v8476_v7 = vmax.f32 %v8412_v10, 0.0  ;;  %v7641_v24 = vadd.f32 %v18934_v32, %v21411_v46 }
 0x447   : > { %v19055_v56 = vpop.f32.mrf.mxu0  ;;  %9357 = vmatmul.mubr.bf16.gmra.mxu1 %v21407_v42  ;;  %v8335_v42 = vadd.f32 %v18877_v30, %v7631_v44  ;;  %v7657_v30 = vadd.f32 %v7656_v62, %v18426_v36  ;;  %v7664_v44 = vpop.f32.mrf.mxu1  ;;  %v8341_v62 = vadd.f32 %v18924_v34, %v7645_v13  ;;  %v8482_v32 = vmax.f32 %v8418_v29, 0.0 }
 0x448   : > { %9930 = vmatmul.mubr.bf16.gmra.mxu0 %v21284_v22  ;;  %9366 = vmatprep.mubr.bf16.mxu1 %v21409_v14  ;;  %v21410_v22 = vld [vmem:[#allocation27_spill] sm:$0xff]  ;;  %v8340_v1 = vadd.f32 %v18916_v12, %v7643_v60  ;;  %v15094_v45 = vpack.c.bf16 %v8478_v31, %v8476_v7  ;;  %v21412_v12 = vld [vmem:[#allocation33_spill] sm:$0xff]  ;;  %v7653_v60 = vadd.f32 %v19004_v43, %v21413_v54 }
 0x449   : > { %9939 = vmatprep.mubr.bf16.mxu0 %v21286_v21  ;;  %v19065_v15 = vpop.f32.mrf.mxu0  ;;  %v19070_v41 = vrot.slane %v8399_v55, %v21410_v22  ;;  %v21414_v14 = vld [vmem:[#allocation35_spill] sm:$0xff]  ;;  %v8346_v31 = vadd.f32 %v18954_v33, %v7657_v30  ;;  %v7655_v34 = vadd.f32 %v19017_v49, %v18420_v23  ;;  %v21417_v23 = vld [vmem:[#allocation89_spill] sm:$0xff] }
 0x44a   : > { %v8416_v25 = vadd.f32 %v19040_v40, %v8340_v1  ;;  %v8344_v43 = vadd.f32 %v18942_v53, %v7653_v60  ;;  %v21415_v30 = vld [vmem:[#allocation19_spill] sm:$0xff]  ;;  %v7663_v49 = vadd.f32 %v7662_v47, %v21417_v23 }
 0x44b   : > { %v19072_v3 = vpop.f32.mrf.mxu0  ;;  %v8413_v21 = vadd.f32 %v19070_v41, %v8337_v51  ;;  %v8411_v55 = vadd.f32 %v19070_v41, %v8335_v42  ;;  %v8339_v42 = vadd.f32 %v18910_v63, %v7641_v24  ;;  %v8422_v13 = vadd.f32 %v19040_v40, %v8346_v31  ;;  %v21416_v53 = vld [vmem:[#allocation83_spill] sm:$0xff] }
 0x44c   : > { %v8480_v1 = vmax.f32 %v8416_v25, 0.0  ;;  %v21418_v25 = vld [vmem:[#allocation38_spill] sm:$0xff]  ;;  %v8345_v60 = vadd.f32 %v18952_v48, %v7655_v34 }
 0x44d   : > { %v19078_v18 = vpop.f32.mrf.mxu0  ;;  %v8477_v36 = vmax.f32 %v8413_v21, 0.0  ;;  %v8475_v4 = vmax.f32 %v8411_v55, 0.0  ;;  %v8415_v63 = vadd.f32 %v19070_v41, %v8339_v42  ;;  %v7651_v55 = vadd.f32 %v18988_v38, %v21415_v30  ;;  %v15728_v38 = vld [vmem:[%s20848_s5 + $0x274] ss:$8 sps:$4 sm:$0xff]   ;;  %v15737_v30 = vld [vmem:[%s20848_s5 + $0x264] ss:$8 sps:$4 sm:$0xff]  }
 0x44e   : > { %v15096_v29 = vpack.c.bf16 %v8482_v32, %v8480_v1  ;;  %12319 = vmatprep.subr.bf16.mxu0 %v15728_v38  ;;  %v8348_v42 = vadd.f32 %v18970_v26, %v7663_v49  ;;  %v8421_v1 = vadd.f32 %v19070_v41, %v8345_v60 }
 0x44f   : > { %v19085_v10 = vpop.f32.mrf.mxu0  ;;  %9367 = vmatmul.mubr.bf16.gmra.mxu1 %v21412_v12  ;;  %v15093_v46 = vpack.c.bf16 %v8477_v36, %v8475_v4  ;;  %v8420_v12 = vadd.f32 %v19040_v40, %v8344_v43  ;;  %v8486_v36 = vmax.f32 %v8422_v13, 0.0  ;;  %v8479_v47 = vmax.f32 %v8415_v63, 0.0  ;;  %v21419_v43 = vld [vmem:[#allocation107_spill] sm:$0xff]  ;;  %v21420_v13 = vld [vmem:[#allocation106_spill] sm:$0xff] }
 0x450   : > { %9940 = vmatmul.mubr.bf16.gmra.mxu0 %v21296_v2  ;;  %9376 = vmatprep.mubr.bf16.mxu1 %v21414_v14  ;;  %v7666_v2 = vpop.f32.mrf.mxu1  ;;  %v8343_v32 = vadd.f32 %v18936_v20, %v7651_v55  ;;  %v7665_v48 = vadd.f32 %v7664_v44, %v21419_v43  ;;  %v7661_v20 = vadd.f32 %v19053_v58, %v21420_v13  ;;  %v21422_v63 = vld [vmem:[#allocation87_spill] sm:$0xff]  ;;  %v15735_v44 = vld [vmem:[%s20848_s5 + $0x260] ss:$8 sps:$4 sm:$0xff]   ;;  %v8485_v55 = vmax.f32 %v8421_v1, 0.0 }
 0x451   : > { %11412 = vmatprep.mubr.bf16.mxu0 %v15094_v45  ;;  %v19094_v51 = vpop.f32.mrf.mxu0  ;;  %v8417_v45 = vadd.f32 %v19070_v41, %v8341_v62  ;;  %v7667_v33 = vadd.f32 %v7666_v2, %v18450_v5  ;;  %v15726_v5 = vld [vmem:[%s20848_s5 + $0x270] ss:$8 sps:$4 sm:$0xff]   ;;  %v8484_v4 = vmax.f32 %v8420_v12, 0.0  ;;  %v8424_v26 = vadd.f32 %v19040_v40, %v8348_v42  ;;  %v15746_v42 = vld [vmem:[%s20848_s5 + $0x254] ss:$8 sps:$4 sm:$0xff]  }
 0x452   : > { %v8419_v34 = vadd.f32 %v19070_v41, %v8343_v32  ;;  %v8349_v58 = vadd.f32 %v18978_v37, %v7665_v48  ;;  %v8347_v49 = vadd.f32 %v18964_v39, %v7661_v20  ;;  %v21423_v32 = vld [vmem:[#allocation85_spill] sm:$0xff]  ;;  %v15744_v39 = vld [vmem:[%s20848_s5 + $0x250] ss:$8 sps:$4 sm:$0xff]  }
 0x453   : > { %v19098_v7 = vpop.f32.mrf.mxu0  ;;  %v8481_v54 = vmax.f32 %v8417_v45, 0.0  ;;  %v8350_v62 = vadd.f32 %v18980_v57, %v7667_v33  ;;  %v15098_v57 = vpack.c.bf16 %v8486_v36, %v8484_v4  ;;  %v21424_v4 = vld [vmem:[#allocation37_spill] sm:$0xff] }
 0x454   : > { %v8483_v23 = vmax.f32 %v8419_v34, 0.0  ;;  %v21425_v48 = vld [vmem:[#allocation109_spill] sm:$0xff] }
 0x455   : > { %v19104_v21 = vpop.f32.mrf.mxu0  ;;  %v15095_v2 = vpack.c.bf16 %v8481_v54, %v8479_v47  ;;  %v8426_v45 = vadd.f32 %v19040_v40, %v8350_v62  ;;  %v8425_v54 = vadd.f32 %v19070_v41, %v8349_v58  ;;  %v8423_v62 = vadd.f32 %v19070_v41, %v8347_v49  ;;  %v21428_v49 = vld [vmem:[#allocation112_spill] sm:$0xff] }
 0x456   : > { %v15097_v38 = vpack.c.bf16 %v8485_v55, %v8483_v23 }
 0x457   : > { %v19111_v24 = vpop.f32.mrf.mxu0  ;;  %9377 = vmatmul.mubr.bf16.gmra.mxu1 %v21416_v53  ;;  %v8490_v12 = vmax.f32 %v8426_v45, 0.0  ;;  %v8487_v13 = vmax.f32 %v8423_v62, 0.0 }
 0x458   : > { %11413 = vmatmul.mubr.bf16.vlgmr.msra.gmra.mxu0 %v15093_v46  ;;  %9386 = vmatprep.mubr.bf16.mxu1 %v21418_v25 }
 0x459   : > { %11422 = vmatprep.mubr.bf16.mxu0 %v15096_v29  ;;  %v19124_v14 = vpop.f32.mrf.mxu0  ;;  %12320 = vmatpush1.bf16.msra.mxu0 %v15726_v5  ;;  %v21421_v29 = vld [vmem:[#allocation84_spill] sm:$0xff]  ;;  %v8488_v5 = vmax.f32 %v8424_v26, 0.0  ;;  %v21427_v26 = vld [vmem:[#allocation110_spill] sm:$0xff] }
 0x45a   : > { %12321 = vmatprep.subr.bf16.mxu0 %v15737_v30 }
 0x45b   : > { %v19128_v31 = vpop.f32.mrf.mxu0  ;;  %v15100_v36 = vpack.c.bf16 %v8490_v12, %v8488_v5 }
 0x45d   : > { %v19133_v46 = vpop.f32.mrf.mxu0  ;;  %12322 = vmatpush1.bf16.msra.mxu0 %v15735_v44 }
 0x45e   : > { %12323 = vmatprep.subr.bf16.mxu0 %v15746_v42 }
 0x45f   : > { %v19139_v33 = vpop.f32.mrf.mxu0  ;;  %9387 = vmatmul.mubr.bf16.gmra.mxu1 %v21421_v29 }
 0x460   : > { %11423 = vmatmul.mubr.bf16.gmra.mxu0 %v15095_v2  ;;  %9396 = vmatprep.mubr.bf16.mxu1 %v21422_v63  ;;  %v8489_v2 = vmax.f32 %v8425_v54, 0.0 }
 0x461   : > { %11432 = vmatprep.mubr.bf16.mxu0 %v15098_v57  ;;  %v19151_v53 = vpop.f32.mrf.mxu0  ;;  %v21426_v57 = vld [vmem:[#allocation91_spill] sm:$0xff]  ;;  %12324 = vmatpush1.bf16.msra.mxu0 %v15744_v39 }
 0x462   : > { %v15099_v44 = vpack.c.bf16 %v8489_v2, %v8487_v13 }
 0x463   : > { %v19154_v25 = vpop.f32.mrf.mxu0 }
 0x465   : > { %v19157_v60 = vpop.f32.mrf.mxu0 }
 0x467   : > { %v7670_v37 = vpop.f32.mrf.mxu1  ;;  %v19160_v47 = vpop.f32.mrf.mxu0  ;;  %9397 = vmatmul.mubr.bf16.gmra.mxu1 %v21423_v32 }
 0x468   : > { %11433 = vmatmul.mubr.bf16.gmra.mxu0 %v15097_v38  ;;  %9406 = vmatprep.mubr.bf16.mxu1 %v21424_v4  ;;  %v7671_v45 = vadd.f32 %v7670_v37, %v21425_v48  ;;  %v21432_v48 = vld [vmem:[#allocation93_spill] sm:$0xff] }
 0x469   : > { %11442 = vmatprep.mubr.bf16.mxu0 %v15100_v36  ;;  %v7672_v1 = vpop.f32.mrf.mxu1  ;;  %v19170_v43 = vpop.f32.mrf.mxu0  ;;  %v21429_v36 = vld [vmem:[#allocation88_spill] sm:$0xff] }
 0x46a   : > { %v7673_v34 = vadd.f32 %v7672_v1, %v21426_v57  ;;  %v8351_v12 = vadd.f32 %v18990_v6, %v7671_v45  ;;  %v15753_v6 = vld [vmem:[%s20848_s5 + $0x240] ss:$8 sps:$4 sm:$0xff]  }
 0x46b   : > { %v7674_v20 = vpop.f32.mrf.mxu1  ;;  %v19174_v29 = vpop.f32.mrf.mxu0 }
 0x46c   : > { %v7675_v63 = vadd.f32 %v7674_v20, %v21427_v26  ;;  %v8352_v30 = vadd.f32 %v18996_v28, %v7673_v34  ;;  %v21430_v28 = vld [vmem:[#allocation40_spill] sm:$0xff]  ;;  %v8427_v42 = vadd.f32 %v19070_v41, %v8351_v12  ;;  %v21433_v20 = vld [vmem:[#allocation114_spill] sm:$0xff] }
 0x46d   : > { %v7676_v55 = vpop.f32.mrf.mxu1  ;;  %v19178_v58 = vpop.f32.mrf.mxu0 }
 0x46e   : > { %v8353_v23 = vadd.f32 %v19006_v50, %v7675_v63  ;;  %v7677_v5 = vadd.f32 %v7676_v55, %v21428_v49  ;;  %v15755_v50 = vld [vmem:[%s20848_s5 + $0x244] ss:$8 sps:$4 sm:$0xff]   ;;  %v8428_v32 = vadd.f32 %v19040_v40, %v8352_v30 }
 0x46f   : > { %v7680_v38 = vpop.f32.mrf.mxu1  ;;  %v19183_v54 = vpop.f32.mrf.mxu0  ;;  %9407 = vmatmul.mubr.bf16.gmra.mxu1 %v21429_v36  ;;  %12325 = vmatprep.subr.bf16.mxu0 %v15755_v50 }
 0x470   : > { %11443 = vmatmul.mubr.bf16.gmra.mxu0 %v15099_v44  ;;  %v8429_v62 = vadd.f32 %v19070_v41, %v8353_v23  ;;  %v8354_v37 = vadd.f32 %v19008_v0, %v7677_v5  ;;  %9416 = vmatprep.mubr.bf16.mxu1 %v21430_v28  ;;  %v21431_v0 = vld [vmem:[#allocation113_spill] sm:$0xff]  ;;  %v8492_v63 = vmax.f32 %v8428_v32, 0.0  ;;  %v8491_v23 = vmax.f32 %v8427_v42, 0.0 }
 0x471   : > { %v7682_v4 = vpop.f32.mrf.mxu1  ;;  %v19196_v39 = vpop.f32.mrf.mxu0  ;;  %v7681_v1 = vadd.f32 %v7680_v38, %v21431_v0  ;;  %12326 = vmatpush1.bf16.msra.mxu0 %v15753_v6  ;;  %v21434_v38 = vld [vmem:[#allocation116_spill] sm:$0xff] }
 0x472   : > { %v8430_v2 = vadd.f32 %v19040_v40, %v8354_v37  ;;  %v7683_v45 = vadd.f32 %v7682_v4, %v21432_v48  ;;  %v8493_v13 = vmax.f32 %v8429_v62, 0.0  ;;  %v21435_v62 = vld [vmem:[#allocation20_spill] sm:$0xff]  ;;  %v21436_v4 = vld [vmem:[#allocation22_spill] sm:$0xff] }
 0x473   : > { %v7684_v57 = vpop.f32.mrf.mxu1  ;;  %v19202_v34 = vpop.f32.mrf.mxu0  ;;  %v8355_v49 = vadd.f32 %v19019_v19, %v7681_v1  ;;  %v15762_v19 = vld [vmem:[%s20848_s5 + $0x230] ss:$8 sps:$4 sm:$0xff]  }
 0x474   : > { %v7685_v26 = vadd.f32 %v7684_v57, %v21433_v20  ;;  %v8356_v44 = vadd.f32 %v19027_v52, %v7683_v45  ;;  %v8494_v12 = vmax.f32 %v8430_v2, 0.0  ;;  %v15101_v50 = vpack.c.bf16 %v8493_v13, %v8491_v23  ;;  %v21437_v2 = vld [vmem:[#allocation117_spill] sm:$0xff]  ;;  %v21438_v57 = vld [vmem:[#allocation95_spill] sm:$0xff] }
 0x475   : > { %v7686_v30 = vpop.f32.mrf.mxu1  ;;  %v19206_v55 = vpop.f32.mrf.mxu0 }
 0x476   : > { %v8357_v5 = vadd.f32 %v19036_v9, %v7685_v26  ;;  %v7687_v36 = vadd.f32 %v7686_v30, %v21434_v38  ;;  %v15102_v6 = vpack.c.bf16 %v8494_v12, %v8492_v63  ;;  %v15764_v9 = vld [vmem:[%s20848_s5 + $0x234] ss:$8 sps:$4 sm:$0xff]   ;;  %v8432_v42 = vadd.f32 %v19040_v40, %v8356_v44  ;;  %v21439_v44 = vld [vmem:[#allocation57_spill] sm:$0xff] }
 0x477   : > { %v7690_v37 = vpop.f32.mrf.mxu1  ;;  %v19211_v28 = vpop.f32.mrf.mxu0  ;;  %9417 = vmatmul.mubr.bf16.gmra.mxu1 %v21435_v62  ;;  %12327 = vmatprep.subr.bf16.mxu0 %v15764_v9 }
 0x478   : > { %v8433_v52 = vadd.f32 %v19070_v41, %v8357_v5  ;;  %v8358_v32 = vadd.f32 %v19044_v17, %v7687_v36  ;;  %9426 = vmatprep.mubr.bf16.mxu1 %v21436_v4  ;;  %v7691_v0 = vadd.f32 %v7690_v37, %v21437_v2  ;;  %11452 = vmatprep.mubr.bf16.mxu0 %v15102_v6  ;;  %v8496_v12 = vmax.f32 %v8432_v42, 0.0  ;;  %v21440_v6 = vld [vmem:[#allocation24_spill] sm:$0xff]  ;;  %v21442_v42 = vld [vmem:[#allocation81_spill] sm:$0xff] }
 0x479   : > { %v7692_v1 = vpop.f32.mrf.mxu1  ;;  %v19225_v48 = vpop.f32.mrf.mxu0  ;;  %v8431_v17 = vadd.f32 %v19070_v41, %v8355_v49  ;;  %11453 = vmatmul.mubr.bf16.gmra.mxu0 %v15101_v50  ;;  %v15771_v2 = vld [vmem:[%s20848_s5 + $0x220] ss:$8 sps:$4 sm:$0xff]  }
 0x47a   : > { %v8434_v45 = vadd.f32 %v19040_v40, %v8358_v32  ;;  %v7693_v13 = vadd.f32 %v7692_v1, %v21438_v57  ;;  %12328 = vmatpush1.bf16.msra.mxu0 %v15762_v19  ;;  %v8497_v63 = vmax.f32 %v8433_v52, 0.0  ;;  %v8359_v23 = vadd.f32 %v19055_v56, %v7691_v0  ;;  %v21441_v52 = vld [vmem:[#allocation21_spill] sm:$0xff] }
 0x47b   : > { %v7694_v20 = vpop.f32.mrf.mxu1  ;;  %v19230_v26 = vpop.f32.mrf.mxu0  ;;  %v8495_v37 = vmax.f32 %v8431_v17, 0.0  ;;  %v21443_v57 = vld [vmem:[#allocation25_spill] sm:$0xff] }
 0x47c   : > { %v7695_v30 = vadd.f32 %v7694_v20, %v21439_v44  ;;  %v8360_v5 = vadd.f32 %v19065_v15, %v7693_v13  ;;  %v8498_v36 = vmax.f32 %v8434_v45, 0.0  ;;  %v8435_v0 = vadd.f32 %v19070_v41, %v8359_v23  ;;  %v21444_v20 = vld [vmem:[#allocation56_spill] sm:$0xff]  ;;  %v21445_v23 = vld [vmem:[#allocation63_spill] sm:$0xff] }
 0x47d   : > { %v7696_v38 = vpop.f32.mrf.mxu1  ;;  %v19235_v49 = vpop.f32.mrf.mxu0  ;;  %v15103_v9 = vpack.c.bf16 %v8497_v63, %v8495_v37 }
 0x47e   : > { %v8361_v62 = vadd.f32 %v19072_v3, %v7695_v30  ;;  %v7697_v50 = vadd.f32 %v7696_v38, %v21440_v6  ;;  %v15104_v19 = vpack.c.bf16 %v8498_v36, %v8496_v12  ;;  %v15773_v3 = vld [vmem:[%s20848_s5 + $0x224] ss:$8 sps:$4 sm:$0xff]   ;;  %v8436_v1 = vadd.f32 %v19040_v40, %v8360_v5  ;;  %v15711_v5 = vld [vmem:[%s20848_s5 + $0x70] ss:$8 sps:$4 sm:$0xff]  }
 0x47f   : > { %v7700_v32 = vpop.f32.mrf.mxu1  ;;  %v19239_v4 = vpop.f32.mrf.mxu0  ;;  %9427 = vmatmul.mubr.bf16.gmra.mxu1 %v21441_v52  ;;  %12329 = vmatprep.subr.bf16.mxu0 %v15773_v3  ;;  %v8499_v52 = vmax.f32 %v8435_v0, 0.0  ;;  %v21447_v3 = vld [vmem:[#allocation68_spill] sm:$0xff] }
 0x480   : > { %v8437_v56 = vadd.f32 %v19070_v41, %v8361_v62  ;;  %v8362_v15 = vadd.f32 %v19078_v18, %v7697_v50  ;;  %10334 = vmatprep.mubr.bf16.mxu1 %v21442_v42  ;;  %11462 = vmatprep.mubr.bf16.mxu0 %v15104_v19  ;;  %v7701_v13 = vadd.f32 %v7700_v32, %v21443_v57  ;;  %v8500_v36 = vmax.f32 %v8436_v1, 0.0  ;;  %v15716_v32 = vld [vmem:[%s20848_s5 + $0x64] ss:$8 sps:$4 sm:$0xff]   ;;  %v15779_v0 = vld [vmem:[%s20848_s5 + $0x214] ss:$8 sps:$4 sm:$0xff]  }
 0x481   : > { %v7702_v17 = vpop.f32.mrf.mxu1  ;;  %v19253_v45 = vpop.f32.mrf.mxu0  ;;  %11463 = vmatmul.mubr.bf16.gmra.mxu0 %v15103_v9  ;;  %v21448_v57 = vld [vmem:[#allocation105_spill] sm:$0xff] }
 0x482   : > { %v8438_v18 = vadd.f32 %v19040_v40, %v8362_v15  ;;  %v7703_v63 = vadd.f32 %v7702_v17, %v21444_v20  ;;  %12330 = vmatpush1.bf16.msra.mxu0 %v15771_v2  ;;  %v8501_v12 = vmax.f32 %v8437_v56, 0.0  ;;  %v8363_v19 = vadd.f32 %v19085_v10, %v7701_v13  ;;  %v21446_v56 = vld [vmem:[#allocation48_spill] sm:$0xff] }
 0x483   : > { %v7704_v44 = vpop.f32.mrf.mxu1  ;;  %v19258_v30 = vpop.f32.mrf.mxu0  ;;  %v15714_v10 = vld [vmem:[%s20848_s5 + $0x60] ss:$8 sps:$4 sm:$0xff]   ;;  %12331 = vmatprep.subr.bf16.mxu0 %v15779_v0 }
 0x484   : > { %v7705_v38 = vadd.f32 %v7704_v44, %v21445_v23  ;;  %v8364_v37 = vadd.f32 %v19094_v51, %v7703_v63  ;;  %v8502_v50 = vmax.f32 %v8438_v18, 0.0  ;;  %v15105_v1 = vpack.c.bf16 %v8501_v12, %v8499_v52  ;;  %v21449_v20 = vld [vmem:[#allocation44_spill] sm:$0xff] }
 0x485   : > { %v7706_v62 = vpop.f32.mrf.mxu1  ;;  %v19265_v6 = vpop.f32.mrf.mxu0  ;;  %v15719_v12 = vld [vmem:[%s20848_s5 + $0x54] ss:$8 sps:$4 sm:$0xff]   ;;  %v8439_v23 = vadd.f32 %v19070_v41, %v8363_v19 }
 0x486   : > { %v8365_v9 = vadd.f32 %v19098_v7, %v7705_v38  ;;  %v7707_v15 = vadd.f32 %v7706_v62, %v21446_v56  ;;  %v15106_v51 = vpack.c.bf16 %v8502_v50, %v8500_v36  ;;  %v15777_v7 = vld [vmem:[%s20848_s5 + $0x210] ss:$8 sps:$4 sm:$0xff]   ;;  %v8440_v13 = vadd.f32 %v19040_v40, %v8364_v37 }
 0x487   : > { %v7710_v42 = vpop.f32.mrf.mxu1  ;;  %v19273_v2 = vpop.f32.mrf.mxu0  ;;  %10335 = vmatmul.mubr.bf16.vlgmr.msra.gmra.mxu1 %v21447_v3  ;;  %12332 = vmatpush1.bf16.msra.mxu0 %v15777_v7 }
 0x488   : > { %v8441_v17 = vadd.f32 %v19070_v41, %v8365_v9  ;;  %v8366_v18 = vadd.f32 %v19104_v21, %v7707_v15  ;;  %10344 = vmatprep.mubr.bf16.mxu1 %v21448_v57  ;;  %11894 = vmatpush1.bf16.msra.mxu1 %v15711_v5  ;;  %v7711_v63 = vadd.f32 %v7710_v42, %v21449_v20  ;;  %v21450_v5 = vld [vmem:[#allocation62_spill] sm:$0xff]  ;;  %v8504_v9 = vmax.f32 %v8440_v13, 0.0  ;;  %v21453_v20 = vld [vmem:[#allocation108_spill] sm:$0xff] }
 0x489   : > { %11472 = vmatprep.mubr.bf16.mxu0 %v15106_v51  ;;  %v7712_v21 = vpop.f32.mrf.mxu1  ;;  %v19290_v44 = vpop.f32.mrf.mxu0  ;;  %11895 = vmatprep.subr.bf16.mxu1 %v15716_v32  ;;  %v15717_v32 = vld [vmem:[%s20848_s5 + $0x50] ss:$8 sps:$4 sm:$0xff]   ;;  %v15722_v51 = vld [vmem:[%s20848_s5 + $0x44] ss:$8 sps:$4 sm:$0xff]  }
 0x48a   : > { %v8442_v38 = vadd.f32 %v19040_v40, %v8366_v18  ;;  %v7713_v36 = vadd.f32 %v7712_v21, %v21450_v5  ;;  %11473 = vmatmul.mubr.bf16.gmra.mxu0 %v15105_v1  ;;  %v8505_v50 = vmax.f32 %v8441_v17, 0.0  ;;  %v8367_v19 = vadd.f32 %v19111_v24, %v7711_v63  ;;  %v21451_v17 = vld [vmem:[#allocation94_spill] sm:$0xff]  ;;  %v21452_v24 = vld [vmem:[#allocation23_spill] sm:$0xff] }
 0x48b   : > { %v7714_v37 = vpop.f32.mrf.mxu1  ;;  %v19298_v62 = vpop.f32.mrf.mxu0  ;;  %v15780_v63 = vld [vmem:[%s20848_s5 + $0x200] ss:$8 sps:$4 sm:$0xff]   ;;  %v15782_v21 = vld [vmem:[%s20848_s5 + $0x204] ss:$8 sps:$4 sm:$0xff]   ;;  %v15725_v5 = vld [vmem:[%s20848_s5 + $0x34] ss:$8 sps:$4 sm:$0xff]  }
 0x48c   : > { %v7715_v52 = vadd.f32 %v7714_v37, %v18576_v11  ;;  %11896 = vmatpush1.bf16.msra.mxu1 %v15714_v10  ;;  %v8368_v56 = vadd.f32 %v19124_v14, %v7713_v36  ;;  %v8506_v3 = vmax.f32 %v8442_v38, 0.0  ;;  %v8503_v11 = vmax.f32 %v8439_v23, 0.0  ;;  %12333 = vmatprep.subr.bf16.mxu0 %v15782_v21 }
 0x48d   : > { %v7716_v15 = vpop.f32.mrf.mxu1  ;;  %v19306_v42 = vpop.f32.mrf.mxu0  ;;  %11897 = vmatprep.subr.bf16.mxu1 %v15719_v12  ;;  %v8443_v12 = vadd.f32 %v19070_v41, %v8367_v19  ;;  %12334 = vmatpush1.bf16.msra.mxu0 %v15780_v63 }
 0x48e   : > { %v8369_v1 = vadd.f32 %v19128_v31, %v7715_v52  ;;  %v7717_v18 = vadd.f32 %v7716_v15, %v21451_v17  ;;  %v15108_v14 = vpack.c.bf16 %v8506_v3, %v8504_v9  ;;  %v15107_v7 = vpack.c.bf16 %v8505_v50, %v8503_v11  ;;  %v15720_v31 = vld [vmem:[%s20848_s5 + $0x40] ss:$8 sps:$4 sm:$0xff]   ;;  %v15731_v11 = vld [vmem:[%s20848_s5 + $0x24] ss:$8 sps:$4 sm:$0xff]  }
 0x48f   : > { %v7720_v57 = vpop.f32.mrf.mxu1  ;;  %v19313_v10 = vpop.f32.mrf.mxu0  ;;  %10345 = vmatmul.mubr.bf16.gmra.mxu1 %v21452_v24  ;;  %v8444_v23 = vadd.f32 %v19040_v40, %v8368_v56  ;;  %v15723_v56 = vld [vmem:[%s20848_s5 + $0x30] ss:$8 sps:$4 sm:$0xff]  }
 0x490   : > { %v8445_v0 = vadd.f32 %v19070_v41, %v8369_v1  ;;  %v8370_v13 = vadd.f32 %v19133_v46, %v7717_v18  ;;  %10354 = vmatprep.mubr.bf16.mxu1 %v21453_v20  ;;  %11898 = vmatpush1.bf16.msra.mxu1 %v15717_v32  ;;  %v7721_v37 = vadd.f32 %v7720_v57, %v18595_v16  ;;  %v8507_v1 = vmax.f32 %v8443_v12, 0.0  ;;  %v21455_v20 = vld [vmem:[#allocation111_spill] sm:$0xff] }
 0x491   : > { %11482 = vmatprep.mubr.bf16.mxu0 %v15108_v14  ;;  %v7722_v46 = vpop.f32.mrf.mxu1  ;;  %v19330_v38 = vpop.f32.mrf.mxu0  ;;  %11899 = vmatprep.subr.bf16.mxu1 %v15722_v51  ;;  %v8508_v15 = vmax.f32 %v8444_v23, 0.0  ;;  %v15734_v12 = vld [vmem:[%s20848_s5 + $0x14] ss:$8 sps:$4 sm:$0xff]  }
 0x492   : > { %v8446_v36 = vadd.f32 %v19040_v40, %v8370_v13  ;;  %v7723_v50 = vadd.f32 %v7722_v46, %v18605_v59  ;;  %11483 = vmatmul.mubr.bf16.gmra.mxu0 %v15107_v7  ;;  %v8509_v9 = vmax.f32 %v8445_v0, 0.0 }
 0x493   : > { %v7724_v52 = vpop.f32.mrf.mxu1  ;;  %v19338_v32 = vpop.f32.mrf.mxu0 }
 0x494   : > { %v7725_v19 = vadd.f32 %v7724_v52, %v18613_v27  ;;  %11900 = vmatpush1.bf16.msra.mxu1 %v15720_v31  ;;  %v8372_v3 = vadd.f32 %v19151_v53, %v7723_v50  ;;  %v8510_v59 = vmax.f32 %v8446_v36, 0.0  ;;  %v8371_v27 = vadd.f32 %v19139_v33, %v7721_v37  ;;  %v21454_v53 = vld [vmem:[#allocation47_spill] sm:$0xff]  ;;  %v15729_v33 = vld [vmem:[%s20848_s5 + $0x20] ss:$8 sps:$4 sm:$0xff]  }
 0x495   : > { %v7726_v16 = vpop.f32.mrf.mxu1  ;;  %v19345_v51 = vpop.f32.mrf.mxu0  ;;  %11901 = vmatprep.subr.bf16.mxu1 %v15725_v5  ;;  %v15109_v7 = vpack.c.bf16 %v8509_v9, %v8507_v1  ;;  %v21456_v50 = vld [vmem:[#allocation52_spill] sm:$0xff] }
 0x496   : > { %v8373_v17 = vadd.f32 %v19154_v25, %v7725_v19  ;;  %v7727_v18 = vadd.f32 %v7726_v16, %v18624_v8  ;;  %v15110_v14 = vpack.c.bf16 %v8510_v59, %v8508_v15  ;;  %v15783_v8 = vld [vmem:[%s20848_s5 + $0x2f0] ss:$8 sps:$4 sm:$0xff]   ;;  %v15785_v25 = vld [vmem:[%s20848_s5 + $0x2f4] ss:$8 sps:$4 sm:$0xff]   ;;  %v8448_v31 = vadd.f32 %v19040_v40, %v8372_v3  ;;  %v15740_v59 = vld [vmem:[%s20848_s5 + $0x4] ss:$8 sps:$4 sm:$0xff]  }
 0x497   : > { %v7730_v57 = vpop.f32.mrf.mxu1  ;;  %v19353_v24 = vpop.f32.mrf.mxu0  ;;  %10355 = vmatmul.mubr.bf16.gmra.mxu1 %v21454_v53  ;;  %v8447_v23 = vadd.f32 %v19070_v41, %v8371_v27  ;;  %12335 = vmatprep.subr.bf16.mxu0 %v15785_v25  ;;  %v15732_v9 = vld [vmem:[%s20848_s5 + $0x10] ss:$8 sps:$4 sm:$0xff]  }
 0x498   : > { %v8449_v0 = vadd.f32 %v19070_v41, %v8373_v17  ;;  %v8374_v13 = vadd.f32 %v19157_v60, %v7727_v18  ;;  %10364 = vmatprep.mubr.bf16.mxu1 %v21455_v20  ;;  %11902 = vmatpush1.bf16.msra.mxu1 %v15723_v56  ;;  %v7731_v63 = vadd.f32 %v7730_v57, %v18632_v61  ;;  %v8512_v19 = vmax.f32 %v8448_v31, 0.0  ;;  %v21457_v27 = vld [vmem:[#allocation46_spill] sm:$0xff]  ;;  %v15743_v31 = vld [vmem:[%s20848_s5 + $0xf4] ss:$8 sps:$4 sm:$0xff]  }
 0x499   : > { %11492 = vmatprep.mubr.bf16.mxu0 %v15110_v14  ;;  %v7732_v60 = vpop.f32.mrf.mxu1  ;;  %v19370_v21 = vpop.f32.mrf.mxu0  ;;  %11903 = vmatprep.subr.bf16.mxu1 %v15731_v11  ;;  %v8511_v11 = vmax.f32 %v8447_v23, 0.0  ;;  %v15788_v20 = vld [vmem:[%s20848_s5 + $0x2e4] ss:$8 sps:$4 sm:$0xff]  }
 0x49a   : > { %v8450_v46 = vadd.f32 %v19040_v40, %v8374_v13  ;;  %v7733_v5 = vadd.f32 %v7732_v60, %v18642_v35  ;;  %11493 = vmatmul.mubr.bf16.gmra.mxu0 %v15109_v7  ;;  %v8513_v61 = vmax.f32 %v8449_v0, 0.0  ;;  %v8375_v56 = vadd.f32 %v19160_v47, %v7731_v63  ;;  %v21458_v47 = vld [vmem:[#allocation51_spill] sm:$0xff]  ;;  %v15786_v13 = vld [vmem:[%s20848_s5 + $0x2e0] ss:$8 sps:$4 sm:$0xff]  }
 0x49b   : > { %v7734_v36 = vpop.f32.mrf.mxu1  ;;  %v19378_v37 = vpop.f32.mrf.mxu0  ;;  %12336 = vmatpush2.bf16.msra.mxu0 %v15783_v8  ;;  %v21459_v0 = vld [vmem:[#allocation115_spill] sm:$0xff]  ;;  %v21460_v60 = vld [vmem:[#allocation69_spill] sm:$0xff] }
 0x49c   : > { %v7735_v52 = vadd.f32 %v7734_v36, %v21456_v50  ;;  %11904 = vmatpush1.bf16.msra.mxu1 %v15729_v33  ;;  %v8376_v15 = vadd.f32 %v19170_v43, %v7733_v5  ;;  %v8514_v16 = vmax.f32 %v8450_v46, 0.0  ;;  %v15111_v53 = vpack.c.bf16 %v8513_v61, %v8511_v11  ;;  %v21461_v23 = vld [vmem:[#allocation53_spill] sm:$0xff]  ;;  %12337 = vmatprep.subr.bf16.mxu0 %v15788_v20  ;;  %v21462_v50 = vld [vmem:[#allocation71_spill] sm:$0xff] }
 0x49d   : > { %v7736_v35 = vpop.f32.mrf.mxu1  ;;  %v19386_v3 = vpop.f32.mrf.mxu0  ;;  %11905 = vmatprep.subr.bf16.mxu1 %v15734_v12  ;;  %v8451_v33 = vadd.f32 %v19070_v41, %v8375_v56 }
 0x49e   : > { %v8377_v1 = vadd.f32 %v19174_v29, %v7735_v52  ;;  %v7737_v17 = vadd.f32 %v7736_v35, %v21457_v27  ;;  %v15112_v43 = vpack.c.bf16 %v8514_v16, %v8512_v19  ;;  %v15738_v29 = vld [vmem:[%s20848_s5] ss:$8 sps:$4 sm:$0xff]   ;;  %v8452_v8 = vadd.f32 %v19040_v40, %v8376_v15 }
 0x49f   : > { %v7740_v18 = vpop.f32.mrf.mxu1  ;;  %v19393_v57 = vpop.f32.mrf.mxu0  ;;  %10365 = vmatmul.mubr.bf16.gmra.mxu1 %v21458_v47  ;;  %12338 = vmatpush2.bf16.msra.mxu0 %v15786_v13  ;;  %v8515_v11 = vmax.f32 %v8451_v33, 0.0  ;;  %v15791_v13 = vld [vmem:[%s20848_s5 + $0x2d4] ss:$8 sps:$4 sm:$0xff]  }
 0x4a0   : > { %v8453_v14 = vadd.f32 %v19070_v41, %v8377_v1  ;;  %v8378_v7 = vadd.f32 %v19178_v58, %v7737_v17  ;;  %10374 = vmatprep.mubr.bf16.mxu1 %v21459_v0  ;;  %11906 = vmatpush1.bf16.msra.mxu1 %v15732_v9  ;;  %v7741_v12 = vadd.f32 %v7740_v18, %v21460_v60  ;;  %v15741_v9 = vld [vmem:[%s20848_s5 + $0xf0] ss:$8 sps:$4 sm:$0xff]   ;;  %v8516_v19 = vmax.f32 %v8452_v8, 0.0 }
 0x4a1   : > { %11502 = vmatprep.mubr.bf16.mxu0 %v15112_v43  ;;  %v7742_v58 = vpop.f32.mrf.mxu1  ;;  %v19410_v25 = vpop.f32.mrf.mxu0  ;;  %11907 = vmatprep.subr.bf16.mxu1 %v15740_v59  ;;  %v15749_v59 = vld [vmem:[%s20848_s5 + $0xe4] ss:$8 sps:$4 sm:$0xff]   ;;  %v21463_v17 = vld [vmem:[#allocation119_spill] sm:$0xff]  ;;  %v21466_v33 = vld [vmem:[#allocation120_spill] sm:$0xff] }
 0x4a2   : > { %v8454_v63 = vadd.f32 %v19040_v40, %v8378_v7  ;;  %v7743_v46 = vadd.f32 %v7742_v58, %v21461_v23  ;;  %11503 = vmatmul.mubr.bf16.gmra.mxu0 %v15111_v53  ;;  %v8517_v61 = vmax.f32 %v8453_v14, 0.0  ;;  %v8379_v1 = vadd.f32 %v19183_v54, %v7741_v12  ;;  %v15747_v54 = vld [vmem:[%s20848_s5 + $0xe0] ss:$8 sps:$4 sm:$0xff]   ;;  %12339 = vmatprep.subr.bf16.mxu0 %v15791_v13 }
 0x4a3   : > { %v7744_v5 = vpop.f32.mrf.mxu1  ;;  %v19418_v36 = vpop.f32.mrf.mxu0  ;;  %v21467_v12 = vld [vmem:[#allocation70_spill] sm:$0xff] }
 0x4a4   : > { %v7745_v52 = vadd.f32 %v7744_v5, %v21462_v50  ;;  %11908 = vmatpush1.bf16.msra.mxu1 %v15738_v29  ;;  %v8380_v56 = vadd.f32 %v19196_v39, %v7743_v46  ;;  %v8518_v16 = vmax.f32 %v8454_v63, 0.0  ;;  %v21464_v39 = vld [vmem:[#allocation55_spill] sm:$0xff]  ;;  %v15113_v14 = vpack.c.bf16 %v8517_v61, %v8515_v11  ;;  %v21468_v50 = vld [vmem:[#allocation73_spill] sm:$0xff] }
 0x4a5   : > { %v7746_v15 = vpop.f32.mrf.mxu1  ;;  %v19425_v35 = vpop.f32.mrf.mxu0  ;;  %11909 = vmatprep.subr.bf16.mxu1 %v15743_v31  ;;  %v21465_v29 = vld [vmem:[#allocation39_spill] sm:$0xff]  ;;  %v8455_v63 = vadd.f32 %v19070_v41, %v8379_v1  ;;  %v15758_v1 = vld [vmem:[%s20848_s5 + $0xc4] ss:$8 sps:$4 sm:$0xff]  }
 0x4a6   : > { %v8381_v27 = vadd.f32 %v19202_v34, %v7745_v52  ;;  %v7747_v18 = vadd.f32 %v7746_v15, %v21463_v17  ;;  %v15114_v53 = vpack.c.bf16 %v8518_v16, %v8516_v19  ;;  %v15789_v34 = vld [vmem:[%s20848_s5 + $0x2d0] ss:$8 sps:$4 sm:$0xff]   ;;  %v8456_v20 = vadd.f32 %v19040_v40, %v8380_v56  ;;  %v15752_v31 = vld [vmem:[%s20848_s5 + $0xd4] ss:$8 sps:$4 sm:$0xff]  }
 0x4a7   : > { %v7750_v47 = vpop.f32.mrf.mxu1  ;;  %v19433_v43 = vpop.f32.mrf.mxu0  ;;  %10375 = vmatmul.mubr.bf16.gmra.mxu1 %v21464_v39  ;;  %12340 = vmatpush2.bf16.msra.mxu0 %v15789_v34  ;;  %v15794_v34 = vld [vmem:[%s20848_s5 + $0x2c4] ss:$8 sps:$4 sm:$0xff]  }
 0x4a8   : > { %v8457_v7 = vadd.f32 %v19070_v41, %v8381_v27  ;;  %v8382_v0 = vadd.f32 %v19206_v55, %v7747_v18  ;;  %10384 = vmatprep.mubr.bf16.mxu1 %v21465_v29  ;;  %11910 = vmatpush2.bf16.msra.mxu1 %v15741_v9  ;;  %v7751_v8 = vadd.f32 %v7750_v47, %v21466_v33  ;;  %v15750_v9 = vld [vmem:[%s20848_s5 + $0xd0] ss:$8 sps:$4 sm:$0xff]   ;;  %v8520_v19 = vmax.f32 %v8456_v20, 0.0 }
 0x4a9   : > { %11512 = vmatprep.mubr.bf16.mxu0 %v15114_v53  ;;  %v7752_v55 = vpop.f32.mrf.mxu1  ;;  %v19450_v58 = vpop.f32.mrf.mxu0  ;;  %11911 = vmatprep.subr.bf16.mxu1 %v15749_v59  ;;  %v8519_v27 = vmax.f32 %v8455_v63, 0.0  ;;  %v21469_v18 = vld [vmem:[#allocation122_spill] sm:$0xff]  ;;  %v21471_v29 = vld [vmem:[#allocation92_spill] sm:$0xff] }
 0x4aa   : > { %v8458_v60 = vadd.f32 %v19040_v40, %v8382_v0  ;;  %v7753_v23 = vadd.f32 %v7752_v55, %v21467_v12  ;;  %11513 = vmatmul.mubr.bf16.gmra.mxu0 %v15113_v14  ;;  %v8521_v61 = vmax.f32 %v8457_v7, 0.0  ;;  %v8383_v56 = vadd.f32 %v19211_v28, %v7751_v8  ;;  %v21470_v28 = vld [vmem:[#allocation90_spill] sm:$0xff]  ;;  %v15761_v8 = vld [vmem:[%s20848_s5 + $0xb4] ss:$8 sps:$4 sm:$0xff]   ;;  %12341 = vmatprep.subr.bf16.mxu0 %v15794_v34 }
 0x4ab   : > { %v7754_v46 = vpop.f32.mrf.mxu1  ;;  %v19458_v5 = vpop.f32.mrf.mxu0 }
 0x4ac   : > { %v7755_v52 = vadd.f32 %v7754_v46, %v21468_v50  ;;  %11912 = vmatpush2.bf16.msra.mxu1 %v15747_v54  ;;  %v8384_v15 = vadd.f32 %v19225_v48, %v7753_v23  ;;  %v8522_v11 = vmax.f32 %v8458_v60, 0.0  ;;  %v15115_v14 = vpack.c.bf16 %v8521_v61, %v8519_v27  ;;  %v15792_v54 = vld [vmem:[%s20848_s5 + $0x2c0] ss:$8 sps:$4 sm:$0xff]   ;;  %v21474_v50 = vld [vmem:[#allocation59_spill] sm:$0xff] }
 0x4ad   : > { %v7756_v16 = vpop.f32.mrf.mxu1  ;;  %v19466_v59 = vpop.f32.mrf.mxu0  ;;  %11913 = vmatprep.subr.bf16.mxu1 %v15752_v31  ;;  %v8459_v13 = vadd.f32 %v19070_v41, %v8383_v56  ;;  %v21472_v31 = vld [vmem:[#allocation123_spill] sm:$0xff]  ;;  %v21473_v60 = vld [vmem:[#allocation72_spill] sm:$0xff]  ;;  %12342 = vmatpush2.bf16.msra.mxu0 %v15792_v54 }
 0x4ae   : > { %v8385_v17 = vadd.f32 %v19230_v26, %v7755_v52  ;;  %v7757_v47 = vadd.f32 %v7756_v16, %v21469_v18  ;;  %v15116_v48 = vpack.c.bf16 %v8522_v11, %v8520_v19  ;;  %v15756_v26 = vld [vmem:[%s20848_s5 + $0xc0] ss:$8 sps:$4 sm:$0xff]   ;;  %v8460_v20 = vadd.f32 %v19040_v40, %v8384_v15  ;;  %v15797_v54 = vld [vmem:[%s20848_s5 + $0x2b4] ss:$8 sps:$4 sm:$0xff]  }
 0x4af   : > { %v7760_v39 = vpop.f32.mrf.mxu1  ;;  %v19473_v53 = vpop.f32.mrf.mxu0  ;;  %10385 = vmatmul.mubr.bf16.gmra.mxu1 %v21470_v28  ;;  %v8523_v27 = vmax.f32 %v8459_v13, 0.0  ;;  %v21478_v13 = vld [vmem:[#allocation125_spill] sm:$0xff]  ;;  %12343 = vmatprep.subr.bf16.mxu0 %v15797_v54 }
 0x4b0   : > { %v8461_v7 = vadd.f32 %v19070_v41, %v8385_v17  ;;  %v8386_v0 = vadd.f32 %v19235_v49, %v7757_v47  ;;  %10394 = vmatprep.mubr.bf16.mxu1 %v21471_v29  ;;  %11914 = vmatpush2.bf16.msra.mxu1 %v15750_v9  ;;  %v7761_v63 = vadd.f32 %v7760_v39, %v21472_v31  ;;  %v15759_v9 = vld [vmem:[%s20848_s5 + $0xb0] ss:$8 sps:$4 sm:$0xff]   ;;  %v8524_v19 = vmax.f32 %v8460_v20, 0.0 }
 0x4b1   : > { %11522 = vmatprep.mubr.bf16.mxu0 %v15116_v48  ;;  %v7762_v49 = vpop.f32.mrf.mxu1  ;;  %v19490_v33 = vpop.f32.mrf.mxu0  ;;  %11915 = vmatprep.subr.bf16.mxu1 %v15758_v1  ;;  %v15767_v1 = vld [vmem:[%s20848_s5 + $0xa4] ss:$8 sps:$4 sm:$0xff]   ;;  %v21475_v47 = vld [vmem:[#allocation124_spill] sm:$0xff] }
 0x4b2   : > { %v8462_v55 = vadd.f32 %v19040_v40, %v8386_v0  ;;  %v7763_v12 = vadd.f32 %v7762_v49, %v21473_v60  ;;  %11523 = vmatmul.mubr.bf16.gmra.mxu0 %v15115_v14  ;;  %v8525_v61 = vmax.f32 %v8461_v7, 0.0  ;;  %v8387_v17 = vadd.f32 %v19239_v4, %v7761_v63  ;;  %v15765_v4 = vld [vmem:[%s20848_s5 + $0xa0] ss:$8 sps:$4 sm:$0xff]  }
 0x4b3   : > { %v7764_v23 = vpop.f32.mrf.mxu1  ;;  %v19498_v46 = vpop.f32.mrf.mxu0  ;;  %v21479_v63 = vld [vmem:[#allocation58_spill] sm:$0xff] }
 0x4b4   : > { %v7765_v52 = vadd.f32 %v7764_v23, %v21474_v50  ;;  %11916 = vmatpush2.bf16.msra.mxu1 %v15756_v26  ;;  %v8388_v56 = vadd.f32 %v19253_v45, %v7763_v12  ;;  %v8526_v11 = vmax.f32 %v8462_v55, 0.0  ;;  %v21476_v45 = vld [vmem:[#allocation26_spill] sm:$0xff]  ;;  %v15117_v7 = vpack.c.bf16 %v8525_v61, %v8523_v27  ;;  %v21477_v26 = vld [vmem:[#allocation65_spill] sm:$0xff] }
 0x4b5   : > { %v7766_v15 = vpop.f32.mrf.mxu1  ;;  %v19505_v16 = vpop.f32.mrf.mxu0  ;;  %11917 = vmatprep.subr.bf16.mxu1 %v15761_v8  ;;  %v15770_v8 = vld [vmem:[%s20848_s5 + $0x94] ss:$8 sps:$4 sm:$0xff]   ;;  %v8463_v55 = vadd.f32 %v19070_v41, %v8387_v17  ;;  %v21480_v50 = vld [vmem:[#allocation6_spill] sm:$0xff] }
 0x4b6   : > { %v8389_v18 = vadd.f32 %v19258_v30, %v7765_v52  ;;  %v7767_v39 = vadd.f32 %v7766_v15, %v21475_v47  ;;  %v15118_v14 = vpack.c.bf16 %v8526_v11, %v8524_v19  ;;  %v15795_v30 = vld [vmem:[%s20848_s5 + $0x2b0] ss:$8 sps:$4 sm:$0xff]   ;;  %v8464_v34 = vadd.f32 %v19040_v40, %v8388_v56  ;;  %v15776_v17 = vld [vmem:[%s20848_s5 + $0x84] ss:$8 sps:$4 sm:$0xff]  }
 0x4b7   : > { %v7770_v28 = vpop.f32.mrf.mxu1  ;;  %v19513_v48 = vpop.f32.mrf.mxu0  ;;  %10395 = vmatmul.mubr.bf16.gmra.mxu1 %v21476_v45  ;;  %12344 = vmatpush2.bf16.msra.mxu0 %v15795_v30  ;;  %v15800_v30 = vld [vmem:[%s20848_s5 + $0x2a4] ss:$8 sps:$4 sm:$0xff]  }
 0x4b8   : > { %v8465_v0 = vadd.f32 %v19070_v41, %v8389_v18  ;;  %v8390_v29 = vadd.f32 %v19265_v6, %v7767_v39  ;;  %10404 = vmatprep.mubr.bf16.mxu1 %v21477_v26  ;;  %11918 = vmatpush2.bf16.msra.mxu1 %v15759_v9  ;;  %v7771_v20 = vadd.f32 %v7770_v28, %v21478_v13  ;;  %v15768_v9 = vld [vmem:[%s20848_s5 + $0x90] ss:$8 sps:$4 sm:$0xff]   ;;  %v8528_v19 = vmax.f32 %v8464_v34, 0.0 }
 0x4b9   : > { %11532 = vmatprep.mubr.bf16.mxu0 %v15118_v14  ;;  %v7772_v6 = vpop.f32.mrf.mxu1  ;;  %v19530_v49 = vpop.f32.mrf.mxu0  ;;  %11919 = vmatprep.subr.bf16.mxu1 %v15767_v1  ;;  %v8527_v18 = vmax.f32 %v8463_v55, 0.0  ;;  %v21481_v39 = vld [vmem:[#allocation78_spill] sm:$0xff]  ;;  %v21485_v55 = vld [vmem:[#allocation7_spill] sm:$0xff] }
 0x4ba   : > { %v8466_v31 = vadd.f32 %v19040_v40, %v8390_v29  ;;  %v7773_v60 = vadd.f32 %v7772_v6, %v21479_v63  ;;  %11533 = vmatmul.mubr.bf16.gmra.mxu0 %v15117_v7  ;;  %v8529_v61 = vmax.f32 %v8465_v0, 0.0  ;;  %v8391_v56 = vadd.f32 %v19273_v2, %v7771_v20  ;;  %v21482_v2 = vld [vmem:[#allocation49_spill] sm:$0xff]  ;;  %v21483_v26 = vld [vmem:[#allocation50_spill] sm:$0xff]  ;;  %v21484_v6 = vld [vmem:[#allocation8_spill] sm:$0xff]  ;;  %12345 = vmatprep.subr.bf16.mxu0 %v15800_v30 }
 0x4bb   : > { %v7774_v12 = vpop.f32.mrf.mxu1  ;;  %v19538_v23 = vpop.f32.mrf.mxu0 }
 0x4bc   : > { %v7775_v52 = vadd.f32 %v7774_v12, %v21480_v50  ;;  %11920 = vmatpush2.bf16.msra.mxu1 %v15765_v4  ;;  %v8392_v15 = vadd.f32 %v19290_v44, %v7773_v60  ;;  %v8530_v27 = vmax.f32 %v8466_v31, 0.0  ;;  %v15119_v7 = vpack.c.bf16 %v8529_v61, %v8527_v18  ;;  %v15798_v4 = vld [vmem:[%s20848_s5 + $0x2a0] ss:$8 sps:$4 sm:$0xff]  }
 0x4bd   : > { %v7776_v11 = vpop.f32.mrf.mxu1  ;;  %v19546_v1 = vpop.f32.mrf.mxu0  ;;  %11921 = vmatprep.subr.bf16.mxu1 %v15770_v8  ;;  %v8467_v54 = vadd.f32 %v19070_v41, %v8391_v56  ;;  %12346 = vmatpush2.bf16.msra.mxu0 %v15798_v4  ;;  %v21486_v50 = vld [vmem:[#allocation60_spill] sm:$0xff]  ;;  %v21487_v18 = vld [vmem:[#allocation10_spill] sm:$0xff] }
 0x4be   : > { %v8393_v47 = vadd.f32 %v19298_v62, %v7775_v52  ;;  %v7777_v28 = vadd.f32 %v7776_v11, %v21481_v39  ;;  %v15120_v44 = vpack.c.bf16 %v8530_v27, %v8528_v19  ;;  %v15774_v62 = vld [vmem:[%s20848_s5 + $0x80] ss:$8 sps:$4 sm:$0xff]   ;;  %v8468_v34 = vadd.f32 %v19040_v40, %v8392_v15 }
 0x4bf   : > { %v7780_v45 = vpop.f32.mrf.mxu1  ;;  %v19553_v14 = vpop.f32.mrf.mxu0  ;;  %10405 = vmatmul.mubr.bf16.gmra.mxu1 %v21482_v2  ;;  %v8531_v11 = vmax.f32 %v8467_v54, 0.0 }
 0x4c0   : > { %v8469_v0 = vadd.f32 %v19070_v41, %v8393_v47  ;;  %v8394_v29 = vadd.f32 %v19306_v42, %v7777_v28  ;;  %10414 = vmatprep.mubr.bf16.mxu1 %v21483_v26  ;;  %11922 = vmatpush2.bf16.msra.mxu1 %v15768_v9  ;;  %v7781_v8 = vadd.f32 %v7780_v45, %v21484_v6  ;;  %v8532_v9 = vmax.f32 %v8468_v34, 0.0  ;;  %v15801_v6 = vld [vmem:[%s20848_s5 + $0x290] ss:$8 sps:$4 sm:$0xff]  }
 0x4c1   : > { %11542 = vmatprep.mubr.bf16.mxu0 %v15120_v44  ;;  %v7782_v42 = vpop.f32.mrf.mxu1  ;;  %v19570_v13 = vpop.f32.mrf.mxu0  ;;  %11923 = vmatprep.subr.bf16.mxu1 %v15776_v17 }
 0x4c2   : > { %v8470_v20 = vadd.f32 %v19040_v40, %v8394_v29  ;;  %v7783_v31 = vadd.f32 %v7782_v42, %v21485_v55  ;;  %11543 = vmatmul.mubr.bf16.gmra.mxu0 %v15119_v7  ;;  %v8533_v12 = vmax.f32 %v8469_v0, 0.0  ;;  %v8395_v27 = vadd.f32 %v19313_v10, %v7781_v8  ;;  %v21489_v10 = vld [vmem:[#allocation67_spill] sm:$0xff] }
 0x4c3   : > { %v7784_v63 = vpop.f32.mrf.mxu1  ;;  %v19575_v60 = vpop.f32.mrf.mxu0 }
 0x4c4   : > { %v8396_v61 = vadd.f32 %v19330_v38, %v7783_v31  ;;  %v7785_v52 = vadd.f32 %v7784_v63, %v21486_v50  ;;  %11924 = vmatpush2.bf16.msra.mxu1 %v15774_v62  ;;  %v8534_v15 = vmax.f32 %v8470_v20, 0.0  ;;  %v21488_v38 = vld [vmem:[#allocation43_spill] sm:$0xff]  ;;  %v15121_v44 = vpack.c.bf16 %v8533_v12, %v8531_v11  ;;  %v21490_v12 = vld [vmem:[#allocation64_spill] sm:$0xff] }
 0x4c5   : > { %v7786_v19 = vpop.f32.mrf.mxu1  ;;  %v19579_v56 = vpop.f32.mrf.mxu0  ;;  %v8471_v62 = vadd.f32 %v19070_v41, %v8395_v27 }
 0x4c6   : > { %v8397_v17 = vadd.f32 %v19338_v32, %v7785_v52  ;;  %v7787_v47 = vadd.f32 %v7786_v19, %v21487_v18  ;;  %v8472_v39 = vadd.f32 %v19040_v40, %v8396_v61  ;;  %v15122_v2 = vpack.c.bf16 %v8534_v15, %v8532_v9  ;;  %v21491_v52 = vld [vmem:[#allocation118_spill] sm:$0xff] }
 0x4c7   : > { %v9278_v28 = vpop.f32.mrf.mxu1  ;;  %10415 = vmatmul.mubr.bf16.gmra.mxu1 %v21488_v38  ;;  %v8535_v8 = vmax.f32 %v8471_v62, 0.0  ;;  %v15806_v15 = vld [vmem:[%s20848_s5 + $0x284] ss:$8 sps:$4 sm:$0xff]  }
 0x4c8   : > { %v19585_v45 = vpop.f32.mrf.mxu0  ;;  %v8473_v7 = vadd.f32 %v19070_v41, %v8397_v17  ;;  %v8398_v0 = vadd.f32 %v19345_v51, %v7787_v47  ;;  %v19591_v29 = vadd.f32 %v19353_v24, %v9278_v28  ;;  %10424 = vmatprep.mubr.bf16.mxu1 %v21489_v10  ;;  %11552 = vmatprep.mubr.bf16.mxu0 %v15122_v2  ;;  %v8536_v54 = vmax.f32 %v8472_v39, 0.0  ;;  %v15803_v41 = vld [vmem:[%s20848_s5 + $0x294] ss:$8 sps:$4 sm:$0xff]   ;;  %v21494_v38 = vld [vmem:[#allocation54_spill] sm:$0xff] }
 0x4c9   : > { %v9280_v32 = vpop.f32.mrf.mxu1  ;;  %12347 = vmatprep.subr.bf16.mxu0 %v15803_v41 }
 0x4ca   : > { %v19594_v26 = vpop.f32.mrf.mxu0  ;;  %v8474_v4 = vadd.f32 %v19040_v40, %v8398_v0  ;;  %v19599_v30 = vadd.f32 %v19370_v21, %v9280_v32  ;;  %11553 = vmatmul.mubr.bf16.gmra.mxu0 %v15121_v44  ;;  %v8537_v24 = vmax.f32 %v8473_v7, 0.0  ;;  %v21495_v44 = vld [vmem:[#allocation121_spill] sm:$0xff] }
 0x4cb   : > { %v9282_v34 = vpop.f32.mrf.mxu1  ;;  %12348 = vmatpush2.bf16.msra.mxu0 %v15801_v6 }
 0x4cc   : > { %v19601_v51 = vpop.f32.mrf.mxu0  ;;  %v19604_v42 = vadd.f32 %v19378_v37, %v9282_v34  ;;  %v8538_v20 = vmax.f32 %v8474_v4, 0.0  ;;  %v15123_v61 = vpack.c.bf16 %v8537_v24, %v8535_v8  ;;  %12349 = vmatprep.subr.bf16.mxu0 %v15806_v15  ;;  %v21500_v24 = vld [vmem:[#allocation96_spill] sm:$0xff] }
 0x4cd   : > { %v9284_v40 = vpop.f32.mrf.mxu1 }
 0x4ce   : > { %v19612_v21 = vpop.f32.mrf.mxu0  ;;  %v19615_v55 = vadd.f32 %v19386_v3, %v9284_v40  ;;  %v15124_v31 = vpack.c.bf16 %v8538_v20, %v8536_v54  ;;  %v21501_v20 = vld [vmem:[#allocation75_spill] sm:$0xff] }
 0x4cf   : > { %v9288_v37 = vpop.f32.mrf.mxu1  ;;  %10425 = vmatmul.mubr.bf16.gmra.mxu1 %v21490_v12 }
 0x4d0   : > { %v19617_v63 = vpop.f32.mrf.mxu0  ;;  %v19621_v50 = vadd.f32 %v19393_v57, %v9288_v37  ;;  %10434 = vmatprep.mubr.bf16.mxu1 %v21491_v52  ;;  %11562 = vmatprep.mubr.bf16.mxu0 %v15124_v31  ;;  %v15804_v57 = vld [vmem:[%s20848_s5 + $0x280] ss:$8 sps:$4 sm:$0xff]  }
 0x4d1   : > { %v9290_v9 = vpop.f32.mrf.mxu1  ;;  %12350 = vmatpush2.bf16.msra.mxu0 %v15804_v57  ;;  %v21506_v52 = vld [vmem:[#allocation45_spill] sm:$0xff] }
 0x4d2   : > { %v19624_v19 = vpop.f32.mrf.mxu0  ;;  %v19627_v3 = vadd.f32 %v19410_v25, %v9290_v9  ;;  %11563 = vmatmul.mubr.bf16.gmra.mxu0 %v15123_v61 }
 0x4d3   : > { %v9292_v11 = vpop.f32.mrf.mxu1 }
 0x4d4   : > { %v19632_v27 = vpop.f32.mrf.mxu0  ;;  %v19638_v17 = vadd.f32 %v19418_v36, %v9292_v11 }
 0x4d5   : > { %v9294_v18 = vpop.f32.mrf.mxu1 }
 0x4d6   : > { %v19640_v47 = vpop.f32.mrf.mxu0  ;;  %v19643_v25 = vadd.f32 %v19425_v35, %v9294_v18 }
 0x4d7   : > { %21492 = vst [vmem:[#allocation9_spill] sm:$0xff] %v19640_v47  ;;  %v9298_v39 = vpop.f32.mrf.mxu1  ;;  %10435 = vmatmul.mubr.bf16.gmra.mxu1 %v21494_v38  ;;  %v21512_v38 = vld [vmem:[#allocation74_spill] sm:$0xff] }
 0x4d8   : > { %v19645_v28 = vpop.f32.mrf.mxu0  ;;  %v19649_v2 = vadd.f32 %v19433_v43, %v9298_v39  ;;  %10444 = vmatprep.mubr.bf16.mxu1 %v21495_v44  ;;  %v21513_v44 = vld [vmem:[#allocation77_spill] sm:$0xff] }
 0x4d9   : > { %21493 = vst [vmem:[#allocation11_spill] sm:$0xff] %v19645_v28  ;;  %v9300_v36 = vpop.f32.mrf.mxu1 }
 0x4da   : > { %v19652_v7 = vpop.f32.mrf.mxu0  ;;  %v19655_v0 = vadd.f32 %v19450_v58, %v9300_v36 }
 0x4db   : > { %21496 = vst [vmem:[#allocation14_spill] sm:$0xff] %v19652_v7  ;;  %v9302_v10 = vpop.f32.mrf.mxu1 }
 0x4dc   : > { %v19657_v32 = vpop.f32.mrf.mxu0  ;;  %v19660_v35 = vadd.f32 %v19458_v5, %v9302_v10 }
 0x4dd   : > { %21497 = vst [vmem:[#allocation12_spill] sm:$0xff] %v19657_v32  ;;  %v9304_v62 = vpop.f32.mrf.mxu1 }
 0x4de   : > { %v19662_v4 = vpop.f32.mrf.mxu0  ;;  %v19665_v43 = vadd.f32 %v19466_v59, %v9304_v62 }
 0x4df   : > { %21498 = vst [vmem:[#allocation97_spill] sm:$0xff] %v19662_v4  ;;  %v9308_v54 = vpop.f32.mrf.mxu1  ;;  %10445 = vmatmul.mubr.bf16.gmra.mxu1 %v21500_v24 }
 0x4e0   : > { %v19667_v34 = vpop.f32.mrf.mxu0  ;;  %v19671_v58 = vadd.f32 %v19473_v53, %v9308_v54  ;;  %10454 = vmatprep.mubr.bf16.mxu1 %v21501_v20 }
 0x4e1   : > { %21499 = vst [vmem:[#allocation79_spill] sm:$0xff] %v19667_v34  ;;  %v9310_v6 = vpop.f32.mrf.mxu1 }
 0x4e2   : > { %v19674_v41 = vpop.f32.mrf.mxu0  ;;  %v19677_v5 = vadd.f32 %v19490_v33, %v9310_v6  ;;  %v21507_v33 = vld [vmem:[#allocation61_spill] sm:$0xff] }
 0x4e3   : > { %21502 = vst [vmem:[#allocation100_spill] sm:$0xff] %v19674_v41  ;;  %v9312_v40 = vpop.f32.mrf.mxu1 }
 0x4e4   : > { %v19679_v8 = vpop.f32.mrf.mxu0  ;;  %v19682_v59 = vadd.f32 %v19498_v46, %v9312_v40 }
 0x4e5   : > { %21503 = vst [vmem:[#allocation82_spill] sm:$0xff] %v19679_v8  ;;  %v9314_v31 = vpop.f32.mrf.mxu1 }
 0x4e6   : > { %v19684_v37 = vpop.f32.mrf.mxu0  ;;  %v19687_v53 = vadd.f32 %v19505_v16, %v9314_v31  ;;  %v21518_v31 = vld [vmem:[#allocation5_spill] sm:$0xff] }
 0x4e7   : > { %21504 = vst [vmem:[#allocation99_spill] sm:$0xff] %v19684_v37  ;;  %v19689_v12 = vpop.f32.mrf.mxu1  ;;  %10455 = vmatmul.mubr.bf16.gmra.mxu1 %v21506_v52  ;;  %v21519_v52 = vld [vmem:[#allocation80_spill] sm:$0xff] }
 0x4e8   : > { %v19691_v61 = vpop.f32.mrf.mxu0  ;;  %10464 = vmatprep.mubr.bf16.mxu1 %v21507_v33 }
 0x4e9   : > { %21505 = vst [vmem:[#allocation102_spill] sm:$0xff] %v19691_v61  ;;  %v19695_v9 = vpop.f32.mrf.mxu1 }
 0x4ea   : > { %v19697_v15 = vpop.f32.mrf.mxu0 }
 0x4eb   : > { %21508 = vst [vmem:[#allocation101_spill] sm:$0xff] %v19697_v15  ;;  %v19699_v46 = vpop.f32.mrf.mxu1 }
 0x4ec   : > { %v19701_v11 = vpop.f32.mrf.mxu0 }
 0x4ed   : > { %21509 = vst [vmem:[#allocation104_spill] sm:$0xff] %v19701_v11  ;;  %v19703_v57 = vpop.f32.mrf.mxu1 }
 0x4ee   : > { %v19705_v16 = vpop.f32.mrf.mxu0 }
 0x4ef   : > { %21510 = vst [vmem:[#allocation103_spill] sm:$0xff] %v19705_v16  ;;  %v19707_v18 = vpop.f32.mrf.mxu1  ;;  %10465 = vmatmul.mubr.bf16.gmra.mxu1 %v21512_v38 }
 0x4f0   : > { %v19709_v39 = vpop.f32.mrf.mxu0  ;;  %10474 = vmatprep.mubr.bf16.mxu1 %v21513_v44 }
 0x4f1   : > { %21511 = vst [vmem:[#allocation29_spill] sm:$0xff] %v19709_v39  ;;  %v19713_v36 = vpop.f32.mrf.mxu1 }
 0x4f2   : > { %v19715_v10 = vpop.f32.mrf.mxu0 }
 0x4f3   : > { %21514 = vst [vmem:[#allocation30_spill] sm:$0xff] %v19715_v10  ;;  %v19717_v62 = vpop.f32.mrf.mxu1 }
 0x4f4   : > { %v19719_v54 = vpop.f32.mrf.mxu0 }
 0x4f5   : > { %21515 = vst [vmem:[#allocation76_spill] sm:$0xff] %v19719_v54  ;;  %v19721_v24 = vpop.f32.mrf.mxu1 }
 0x4f6   : > { %v19723_v20 = vpop.f32.mrf.mxu0 }
 0x4f7   : > { %21516 = vst [vmem:[#allocation18_spill] sm:$0xff] %v19723_v20  ;;  %v19725_v6 = vpop.f32.mrf.mxu1  ;;  %10475 = vmatmul.mubr.bf16.gmra.mxu1 %v21518_v31  ;;  %v21525_v31 = vld [vmem:[#allocation42_spill] sm:$0xff] }
 0x4f8   : > { %v19727_v40 = vpop.f32.mrf.mxu0  ;;  %10484 = vmatprep.mubr.bf16.mxu1 %v21519_v52 }
 0x4f9   : > { %21517 = vst [vmem:[#allocation32_spill] sm:$0xff] %v19727_v40  ;;  %v19731_v33 = vpop.f32.mrf.mxu1  ;;  %v21524_v40 = vld [vmem:[#allocation98_spill] sm:$0xff] }
 0x4fa   : > { %v19733_v38 = vpop.f32.mrf.mxu0 }
 0x4fb   : > { %21520 = vst [vmem:[#allocation16_spill] sm:$0xff] %v19733_v38  ;;  %v19735_v44 = vpop.f32.mrf.mxu1 }
 0x4fc   : > { %v19737_v10 = vpop.f32.mrf.mxu0 }
 0x4fd   : > { %21521 = vst [vmem:[#allocation34_spill] sm:$0xff] %v19737_v10  ;;  %v19739_v54 = vpop.f32.mrf.mxu1 }
 0x4fe   : > { %v19741_v39 = vpop.f32.mrf.mxu0 }
 0x4ff   : > { %21522 = vst [vmem:[#allocation15_spill] sm:$0xff] %v19741_v39  ;;  %v19743_v20 = vpop.f32.mrf.mxu1  ;;  %10485 = vmatmul.mubr.bf16.gmra.mxu1 %v21524_v40 }
 0x500   : > { %v19745_v16 = vpop.f32.mrf.mxu0  ;;  %11925 = vmatprep.mubr.bf16.mxu1 %v21525_v31 }
 0x501   : > { %21523 = vst [vmem:[#allocation13_spill] sm:$0xff] %v19745_v16  ;;  %v19749_v52 = vpop.f32.mrf.mxu1  ;;  %v21531_v16 = vld [vmem:[#allocation41_spill] sm:$0xff] }
 0x502   : > { %v19751_v11 = vpop.f32.mrf.mxu0 }
 0x503   : > { %21526 = vst [vmem:[#allocation31_spill] sm:$0xff] %v19751_v11  ;;  %v19753_v38 = vpop.f32.mrf.mxu1 }
 0x504   : > { %v19755_v15 = vpop.f32.mrf.mxu0 }
 0x505   : > { %21527 = vst [vmem:[#allocation66_spill] sm:$0xff] %v19755_v15  ;;  %v19757_v10 = vpop.f32.mrf.mxu1 }
 0x506   : > { %v19759_v61 = vpop.f32.mrf.mxu0 }
 0x507   : > { %21528 = vst [vmem:[#allocation36_spill] sm:$0xff] %v19759_v61  ;;  %v19761_v39 = vpop.f32.mrf.mxu1  ;;  %11926 = vmatmul.mubr.bf16.vlgmr.msra.gmra.mxu1 %v21531_v16 }
 0x508   : > { %21529 = vst [vmem:[#allocation17_spill] sm:$0xff] %v19761_v39  ;;  %v19763_v37 = vpop.f32.mrf.mxu0  ;;  %11935 = vmatprep.mubr.bf16.mxu1 %v21525_v31 }
 0x509   : > { %21530 = vst [vmem:[#allocation33_spill] sm:$0xff] %v19763_v37  ;;  %v19767_v40 = vpop.f32.mrf.mxu1 }
 0x50a   : > { %21532 = vst [vmem:[#allocation86_spill] sm:$0xff] %v19767_v40  ;;  %v19769_v8 = vpop.f32.mrf.mxu0 }
 0x50b   : > { %21533 = vst [vmem:[#allocation35_spill] sm:$0xff] %v19769_v8  ;;  %v19771_v11 = vpop.f32.mrf.mxu1 }
 0x50c   : > { %21534 = vst [vmem:[#allocation19_spill] sm:$0xff] %v19771_v11  ;;  %v19773_v41 = vpop.f32.mrf.mxu0 }
 0x50d   : > { %21535 = vst [vmem:[#allocation83_spill] sm:$0xff] %v19773_v41  ;;  %v19775_v15 = vpop.f32.mrf.mxu1 }
 0x50e   : > { %21536 = vst [vmem:[#allocation89_spill] sm:$0xff] %v19775_v15  ;;  %v19777_v34 = vpop.f32.mrf.mxu0 }
 0x50f   : > { %21537 = vst [vmem:[#allocation38_spill] sm:$0xff] %v19777_v34  ;;  %v19779_v61 = vpop.f32.mrf.mxu1  ;;  %11936 = vmatmul.mubr.bf16.gmra.mxu1 %v21531_v16 }
 0x510   : > { %21538 = vst [vmem:[#allocation107_spill] sm:$0xff] %v19779_v61  ;;  %v19781_v4 = vpop.f32.mrf.mxu0  ;;  %11945 = vmatprep.mubr.bf16.mxu1 %v21525_v31 }
 0x511   : > { %21539 = vst [vmem:[#allocation106_spill] sm:$0xff] %v19781_v4  ;;  %v19785_v37 = vpop.f32.mrf.mxu1 }
 0x512   : > { %21540 = vst [vmem:[#allocation84_spill] sm:$0xff] %v19785_v37  ;;  %v19787_v32 = vpop.f32.mrf.mxu0 }
 0x513   : > { %21541 = vst [vmem:[#allocation87_spill] sm:$0xff] %v19787_v32  ;;  %v19789_v8 = vpop.f32.mrf.mxu1 }
 0x514   : > { %21542 = vst [vmem:[#allocation85_spill] sm:$0xff] %v19789_v8  ;;  %v19791_v11 = vpop.f32.mrf.mxu0 }
 0x515   : > { %21543 = vst [vmem:[#allocation37_spill] sm:$0xff] %v19791_v11  ;;  %v19793_v41 = vpop.f32.mrf.mxu1 }
 0x516   : > { %21544 = vst [vmem:[#allocation109_spill] sm:$0xff] %v19793_v41  ;;  %v19795_v15 = vpop.f32.mrf.mxu0 }
 0x517   : > { %21545 = vst [vmem:[#allocation91_spill] sm:$0xff] %v19795_v15  ;;  %v19797_v34 = vpop.f32.mrf.mxu1  ;;  %11946 = vmatmul.mubr.bf16.gmra.mxu1 %v21531_v16 }
 0x518   : > { %21546 = vst [vmem:[#allocation110_spill] sm:$0xff] %v19797_v34  ;;  %11955 = vmatprep.mubr.bf16.mxu1 %v21525_v31  ;;  %v19803_v61 = vpop.f32.mrf.mxu0 }
 0x519   : > { %v19801_v4 = vpop.f32.mrf.mxu1  ;;  %21548 = vst [vmem:[#allocation88_spill] sm:$0xff] %v19803_v61 }
 0x51a   : > { %21547 = vst [vmem:[#allocation112_spill] sm:$0xff] %v19801_v4  ;;  %v19809_v8 = vpop.f32.mrf.mxu0 }
 0x51b   : > { %v19805_v37 = vpop.f32.mrf.mxu1  ;;  %21551 = vst [vmem:[#allocation93_spill] sm:$0xff] %v19809_v8 }
 0x51c   : > { %21549 = vst [vmem:[#allocation40_spill] sm:$0xff] %v19805_v37  ;;  %v19816_v34 = vpop.f32.mrf.mxu0 }
 0x51d   : > { %v19807_v32 = vpop.f32.mrf.mxu1  ;;  %21554 = vst [vmem:[#allocation20_spill] sm:$0xff] %v19816_v34 }
 0x51e   : > { %21550 = vst [vmem:[#allocation113_spill] sm:$0xff] %v19807_v32  ;;  %v19822_v4 = vpop.f32.mrf.mxu0 }
 0x51f   : > { %v19811_v11 = vpop.f32.mrf.mxu1  ;;  %11956 = vmatmul.mubr.bf16.gmra.mxu1 %v21531_v16  ;;  %21557 = vst [vmem:[#allocation95_spill] sm:$0xff] %v19822_v4 }
 0x520   : > { %21552 = vst [vmem:[#allocation114_spill] sm:$0xff] %v19811_v11  ;;  %v19828_v32 = vpop.f32.mrf.mxu0 }
 0x521   : > { %v19814_v15 = vpop.f32.mrf.mxu1  ;;  %21560 = vst [vmem:[#allocation21_spill] sm:$0xff] %v19828_v32 }
 0x522   : > { %21553 = vst [vmem:[#allocation116_spill] sm:$0xff] %v19814_v15  ;;  %v19834_v16 = vpop.f32.mrf.mxu0 }
 0x523   : > { %v19818_v41 = vpop.f32.mrf.mxu1  ;;  %21563 = vst [vmem:[#allocation56_spill] sm:$0xff] %v19834_v16 }
 0x524   : > { %21555 = vst [vmem:[#allocation22_spill] sm:$0xff] %v19818_v41  ;;  %v19840_v41 = vpop.f32.mrf.mxu0 }
 0x525   : > { %v19820_v31 = vpop.f32.mrf.mxu1  ;;  %21566 = vst [vmem:[#allocation68_spill] sm:$0xff] %v19840_v41 }
 0x526   : > { %21556 = vst [vmem:[#allocation117_spill] sm:$0xff] %v19820_v31 }
 0x527   : > { %v19824_v61 = vpop.f32.mrf.mxu1 }
 0x528   : > { %21558 = vst [vmem:[#allocation57_spill] sm:$0xff] %v19824_v61  ;;  %v19846_v61 = vpop.f32.mrf.mxu0 }
 0x529   : > { %v19826_v37 = vpop.f32.mrf.mxu1  ;;  %21569 = vst [vmem:[#allocation62_spill] sm:$0xff] %v19846_v61 }
 0x52a   : > { %21559 = vst [vmem:[#allocation24_spill] sm:$0xff] %v19826_v37 }
 0x52b   : > { %v19830_v8 = vpop.f32.mrf.mxu1 }
 0x52c   : > { %21561 = vst [vmem:[#allocation81_spill] sm:$0xff] %v19830_v8  ;;  %v19852_v8 = vpop.f32.mrf.mxu0 }
 0x52d   : > { %v19832_v11 = vpop.f32.mrf.mxu1  ;;  %21572 = vst [vmem:[#allocation108_spill] sm:$0xff] %v19852_v8  ;;  %v10559_v8 = vld [vmem:[%s20847_s4] sm:$0x3] }
 0x52e   : > { %21562 = vst [vmem:[#allocation25_spill] sm:$0xff] %v19832_v11 }
 0x52f   : > { %v19836_v15 = vpop.f32.mrf.mxu1 }
 0x530   : > { %21564 = vst [vmem:[#allocation63_spill] sm:$0xff] %v19836_v15  ;;  %v19858_v15 = vpop.f32.mrf.mxu0 }
 0x531   : > { %v19838_v34 = vpop.f32.mrf.mxu1  ;;  %21575 = vst [vmem:[#allocation52_spill] sm:$0xff] %v19858_v15  ;;  %v19877_v15 = vrot.slane %v10559_v8, %v21410_v22 }
 0x532   : > { %21565 = vst [vmem:[#allocation48_spill] sm:$0xff] %v19838_v34 }
 0x533   : > { %v19842_v31 = vpop.f32.mrf.mxu1 }
 0x534   : > { %21567 = vst [vmem:[#allocation105_spill] sm:$0xff] %v19842_v31  ;;  %v19864_v31 = vpop.f32.mrf.mxu0 }
 0x535   : > { %v19844_v4 = vpop.f32.mrf.mxu1  ;;  %21578 = vst [vmem:[#allocation115_spill] sm:$0xff] %v19864_v31  ;;  %v21582_v31 = vld [vmem:[#allocation28_spill] sm:$0xff] }
 0x536   : > { %21568 = vst [vmem:[#allocation44_spill] sm:$0xff] %v19844_v4 }
 0x537   : > { %v19848_v37 = vpop.f32.mrf.mxu1 }
 0x538   : > { %21570 = vst [vmem:[#allocation94_spill] sm:$0xff] %v19848_v37  ;;  %v19881_v37 = vrot.slane %v10559_v8, %v21582_v31 }
 0x539   : > { %v19850_v32 = vpop.f32.mrf.mxu1 }
 0x53a   : > { %21571 = vst [vmem:[#allocation23_spill] sm:$0xff] %v19850_v32  ;;  %v19873_v32 = vpop.f32.mrf.mxu0 }
 0x53b   : > { %v19854_v11 = vpop.f32.mrf.mxu1  ;;  %21581 = vst [vmem:[#allocation71_spill] sm:$0xff] %v19873_v32 }
 0x53c   : > { %21573 = vst [vmem:[#allocation47_spill] sm:$0xff] %v19854_v11 }
 0x53d   : > { %v19856_v16 = vpop.f32.mrf.mxu1 }
 0x53e   : > { %21574 = vst [vmem:[#allocation111_spill] sm:$0xff] %v19856_v16 }
 0x53f   : > { %v19860_v34 = vpop.f32.mrf.mxu1 }
 0x540   : > { %21576 = vst [vmem:[#allocation46_spill] sm:$0xff] %v19860_v34 }
 0x541   : > { %v19862_v41 = vpop.f32.mrf.mxu1 }
 0x542   : > { %21577 = vst [vmem:[#allocation51_spill] sm:$0xff] %v19862_v41 }
 0x543   : > { %v19866_v4 = vpop.f32.mrf.mxu1 }
 0x544   : > { %21579 = vst [vmem:[#allocation69_spill] sm:$0xff] %v19866_v4  ;;  %v19883_v4 = vpop.f32.mrf.mxu0 }
 0x545   : > { %v19868_v61 = vpop.f32.mrf.mxu1  ;;  %21583 = vst [vmem:[#allocation119_spill] sm:$0xff] %v19883_v4 }
 0x546   : > { %21580 = vst [vmem:[#allocation53_spill] sm:$0xff] %v19868_v61  ;;  %v19890_v22 = vpop.f32.mrf.mxu0 }
 0x547   : > { %v10336_v11 = vpop.f32.mrf.mxu1  ;;  %21584 = vst [vmem:[#allocation55_spill] sm:$0xff] %v19890_v22 }
 0x548   : > { %v10495_v16 = vadd.f32 %v10336_v11, %v19591_v29 }
 0x549   : > { %v10338_v34 = vpop.f32.mrf.mxu1 }
 0x54a   : > { %v10496_v41 = vadd.f32 %v10338_v34, %v19599_v30  ;;  %v10571_v7 = vadd.f32 %v19877_v15, %v10495_v16 }
 0x54b   : > { %v10340_v61 = vpop.f32.mrf.mxu1 }
 0x54c   : > { %v10497_v40 = vadd.f32 %v10340_v61, %v19604_v42  ;;  %v10572_v28 = vadd.f32 %v19881_v37, %v10496_v41  ;;  %v10635_v34 = vmax.f32 %v10571_v7, 0.0  ;;  %v19895_v41 = vpop.f32.mrf.mxu0 }
 0x54d   : > { %v10342_v32 = vpop.f32.mrf.mxu1 }
 0x54e   : > { %v10573_v29 = vadd.f32 %v19877_v15, %v10497_v40  ;;  %v10498_v11 = vadd.f32 %v10342_v32, %v19615_v55  ;;  %v10636_v16 = vmax.f32 %v10572_v28, 0.0  ;;  %v19902_v28 = vpop.f32.mrf.mxu0 }
 0x54f   : > { %v10346_v30 = vpop.f32.mrf.mxu1 }
 0x550   : > { %v10637_v8 = vmax.f32 %v10573_v29, 0.0  ;;  %v10574_v31 = vadd.f32 %v19881_v37, %v10498_v11  ;;  %v10499_v4 = vadd.f32 %v10346_v30, %v19621_v50  ;;  %v19906_v30 = vpop.f32.mrf.mxu0 }
 0x551   : > { %v10348_v39 = vpop.f32.mrf.mxu1 }
 0x552   : > { %v15125_v47 = vpack.c.bf16 %v10637_v8, %v10635_v34  ;;  %v10638_v42 = vmax.f32 %v10574_v31, 0.0  ;;  %v10500_v61 = vadd.f32 %v10348_v39, %v19627_v3  ;;  %v10575_v55 = vadd.f32 %v19877_v15, %v10499_v4 }
 0x553   : > { %v10350_v40 = vpop.f32.mrf.mxu1 }
 0x554   : > { %v10501_v32 = vadd.f32 %v10350_v40, %v19638_v17  ;;  %v15126_v22 = vpack.c.bf16 %v10638_v42, %v10636_v16  ;;  %v10576_v29 = vadd.f32 %v19881_v37, %v10500_v61  ;;  %v10639_v39 = vmax.f32 %v10575_v55, 0.0  ;;  %v19911_v55 = vpop.f32.mrf.mxu0 }
 0x555   : > { %v10352_v7 = vpop.f32.mrf.mxu1 }
 0x556   : > { %v10577_v11 = vadd.f32 %v19877_v15, %v10501_v32  ;;  %v10502_v50 = vadd.f32 %v10352_v7, %v19643_v25  ;;  %11965 = vmatprep.mubr.bf16.mxu1 %v15126_v22  ;;  %12351 = vmatprep.mubr.bf16.mxu0 %v15126_v22  ;;  %v10640_v8 = vmax.f32 %v10576_v29, 0.0 }
 0x557   : > { %v10356_v3 = vpop.f32.mrf.mxu1  ;;  %11966 = vmatmul.mubr.bf16.gmra.mxu1 %v15125_v47  ;;  %12352 = vmatmul.mubr.bf16.vlgmr.msra.gmra.mxu0 %v15125_v47 }
 0x558   : > { %v10641_v31 = vmax.f32 %v10577_v11, 0.0  ;;  %v10578_v4 = vadd.f32 %v19881_v37, %v10502_v50  ;;  %v10503_v17 = vadd.f32 %v10356_v3, %v19649_v2 }
 0x559   : > { %v10358_v34 = vpop.f32.mrf.mxu1 }
 0x55a   : > { %v15127_v16 = vpack.c.bf16 %v10641_v31, %v10639_v39  ;;  %v10642_v42 = vmax.f32 %v10578_v4, 0.0  ;;  %v10504_v25 = vadd.f32 %v10358_v34, %v19655_v0  ;;  %v10579_v61 = vadd.f32 %v19877_v15, %v10503_v17  ;;  %v19918_v39 = vpop.f32.mrf.mxu0 }
 0x55b   : > { %v10360_v22 = vpop.f32.mrf.mxu1 }
 0x55c   : > { %v10505_v40 = vadd.f32 %v10360_v22, %v19660_v35  ;;  %v15128_v47 = vpack.c.bf16 %v10642_v42, %v10640_v8  ;;  %v10580_v7 = vadd.f32 %v19881_v37, %v10504_v25  ;;  %v10643_v0 = vmax.f32 %v10579_v61, 0.0  ;;  %v19925_v61 = vpop.f32.mrf.mxu0 }
 0x55d   : > { %v10362_v32 = vpop.f32.mrf.mxu1  ;;  %v9832_v22 = vadd.f32 %v19513_v48, %v19689_v12 }
 0x55e   : > { %v10581_v2 = vadd.f32 %v19877_v15, %v10505_v40  ;;  %v10506_v11 = vadd.f32 %v10362_v32, %v19665_v43  ;;  %11975 = vmatprep.mubr.bf16.mxu1 %v15128_v47  ;;  %12361 = vmatprep.mubr.bf16.mxu0 %v15128_v47  ;;  %v10644_v4 = vmax.f32 %v10580_v7, 0.0 }
 0x55f   : > { %v10366_v29 = vpop.f32.mrf.mxu1  ;;  %11976 = vmatmul.mubr.bf16.gmra.mxu1 %v15127_v16  ;;  %12362 = vmatmul.mubr.bf16.gmra.mxu0 %v15127_v16 }
 0x560   : > { %v10645_v50 = vmax.f32 %v10581_v2, 0.0  ;;  %v10582_v3 = vadd.f32 %v19881_v37, %v10506_v11  ;;  %v10507_v35 = vadd.f32 %v10366_v29, %v19671_v58  ;;  %v9836_v11 = vadd.f32 %v19538_v23, %v19699_v46  ;;  %v19935_v29 = vpop.f32.mrf.mxu0 }
 0x561   : > { %v10368_v31 = vpop.f32.mrf.mxu1 }
 0x562   : > { %v15129_v17 = vpack.c.bf16 %v10645_v50, %v10643_v0  ;;  %v10646_v34 = vmax.f32 %v10582_v3, 0.0  ;;  %v10508_v8 = vadd.f32 %v10368_v31, %v19677_v5  ;;  %v10583_v42 = vadd.f32 %v19877_v15, %v10507_v35 }
 0x563   : > { %v10370_v43 = vpop.f32.mrf.mxu1  ;;  %v9834_v5 = vadd.f32 %v19530_v49, %v19695_v9  ;;  %v9838_v49 = vadd.f32 %v19546_v1, %v19703_v57  ;;  %v9844_v1 = vadd.f32 %v19570_v13, %v19713_v36  ;;  %v9848_v13 = vadd.f32 %v19579_v56, %v19721_v24 }
 0x564   : > { %v10509_v25 = vadd.f32 %v10370_v43, %v19682_v59  ;;  %v15130_v16 = vpack.c.bf16 %v10646_v34, %v10644_v4  ;;  %v10584_v40 = vadd.f32 %v19881_v37, %v10508_v8  ;;  %v10647_v59 = vmax.f32 %v10583_v42, 0.0  ;;  %v19942_v8 = vpop.f32.mrf.mxu0 }
 0x565   : > { %v10372_v58 = vpop.f32.mrf.mxu1  ;;  %v9842_v34 = vadd.f32 %v19553_v14, %v19707_v18  ;;  %v9854_v56 = vadd.f32 %v19594_v26, %v19731_v33  ;;  %v9858_v26 = vadd.f32 %v19612_v21, %v19739_v54  ;;  %v9864_v21 = vadd.f32 %v19624_v19, %v19749_v52  ;;  %v21585_v19 = vld [vmem:[#allocation9_spill] sm:$0xff] }
 0x566   : > { %v10585_v47 = vadd.f32 %v19877_v15, %v10509_v25  ;;  %v10510_v32 = vadd.f32 %v10372_v58, %v19687_v53  ;;  %11985 = vmatprep.mubr.bf16.mxu1 %v15130_v16  ;;  %12371 = vmatprep.mubr.bf16.mxu0 %v15130_v16  ;;  %v10648_v53 = vmax.f32 %v10584_v40, 0.0  ;;  %v19951_v58 = vpop.f32.mrf.mxu0  ;;  %v9868_v52 = vadd.f32 %v21585_v19, %v19757_v10 }
 0x567   : > { %v10376_v7 = vpop.f32.mrf.mxu1  ;;  %11986 = vmatmul.mubr.bf16.gmra.mxu1 %v15129_v17  ;;  %12372 = vmatmul.mubr.bf16.gmra.mxu0 %v15129_v17 }
 0x568   : > { %v10649_v2 = vmax.f32 %v10585_v47, 0.0  ;;  %v10586_v48 = vadd.f32 %v19881_v37, %v10510_v32  ;;  %v10511_v12 = vadd.f32 %v10376_v7, %v9832_v22  ;;  %v9846_v22 = vadd.f32 %v19575_v60, %v19717_v62 }
 0x569   : > { %v10378_v0 = vpop.f32.mrf.mxu1 }
 0x56a   : > { %v15131_v50 = vpack.c.bf16 %v10649_v2, %v10647_v59  ;;  %v10650_v3 = vmax.f32 %v10586_v48, 0.0  ;;  %v10512_v35 = vadd.f32 %v10378_v0, %v9834_v5  ;;  %v10587_v9 = vadd.f32 %v19877_v15, %v10511_v12 }
 0x56b   : > { %v10380_v31 = vpop.f32.mrf.mxu1  ;;  %v9852_v12 = vadd.f32 %v19585_v45, %v19725_v6 }
 0x56c   : > { %v10513_v4 = vadd.f32 %v10380_v31, %v9836_v11  ;;  %v15132_v17 = vpack.c.bf16 %v10650_v3, %v10648_v53  ;;  %v10588_v46 = vadd.f32 %v19881_v37, %v10512_v35  ;;  %v10651_v25 = vmax.f32 %v10587_v9, 0.0  ;;  %v19958_v11 = vpop.f32.mrf.mxu0 }
 0x56d   : > { %v10382_v23 = vpop.f32.mrf.mxu1  ;;  %v9856_v35 = vadd.f32 %v19601_v51, %v19735_v44 }
 0x56e   : > { %v10589_v43 = vadd.f32 %v19877_v15, %v10513_v4  ;;  %v10514_v42 = vadd.f32 %v10382_v23, %v9838_v49  ;;  %11995 = vmatprep.mubr.bf16.mxu1 %v15132_v17  ;;  %12381 = vmatprep.mubr.bf16.mxu0 %v15132_v17  ;;  %v10652_v47 = vmax.f32 %v10588_v46, 0.0  ;;  %v19967_v31 = vpop.f32.mrf.mxu0 }
 0x56f   : > { %v10386_v57 = vpop.f32.mrf.mxu1  ;;  %11996 = vmatmul.mubr.bf16.gmra.mxu1 %v15131_v50  ;;  %12382 = vmatmul.mubr.bf16.gmra.mxu0 %v15131_v50 }
 0x570   : > { %v10653_v16 = vmax.f32 %v10589_v43, 0.0  ;;  %v10590_v14 = vadd.f32 %v19881_v37, %v10514_v42  ;;  %v10515_v18 = vadd.f32 %v10386_v57, %v9842_v34  ;;  %v9862_v42 = vadd.f32 %v19617_v63, %v19743_v20 }
 0x571   : > { %v10388_v40 = vpop.f32.mrf.mxu1 }
 0x572   : > { %v15133_v32 = vpack.c.bf16 %v10653_v16, %v10651_v25  ;;  %v10654_v5 = vmax.f32 %v10590_v14, 0.0  ;;  %v10516_v7 = vadd.f32 %v10388_v40, %v9844_v1  ;;  %v10591_v36 = vadd.f32 %v19877_v15, %v10515_v18  ;;  %v19974_v1 = vpop.f32.mrf.mxu0 }
 0x573   : > { %v10390_v59 = vpop.f32.mrf.mxu1  ;;  %v9866_v18 = vadd.f32 %v19632_v27, %v19753_v38 }
 0x574   : > { %v10517_v2 = vadd.f32 %v10390_v59, %v9846_v22  ;;  %v15134_v48 = vpack.c.bf16 %v10654_v5, %v10652_v47  ;;  %v10592_v62 = vadd.f32 %v19881_v37, %v10516_v7  ;;  %v10655_v50 = vmax.f32 %v10591_v36, 0.0  ;;  %v19983_v22 = vpop.f32.mrf.mxu0 }
 0x575   : > { %v10392_v60 = vpop.f32.mrf.mxu1 }
 0x576   : > { %v10593_v0 = vadd.f32 %v19877_v15, %v10517_v2  ;;  %v10518_v53 = vadd.f32 %v10392_v60, %v9848_v13  ;;  %12005 = vmatprep.mubr.bf16.mxu1 %v15134_v48  ;;  %12391 = vmatprep.mubr.bf16.mxu0 %v15134_v48  ;;  %v10656_v9 = vmax.f32 %v10592_v62, 0.0  ;;  %v21586_v48 = vld [vmem:[#allocation17_spill] sm:$0xff]  ;;  %v19990_v62 = vpop.f32.mrf.mxu0 }
 0x577   : > { %v10396_v24 = vpop.f32.mrf.mxu1  ;;  %12006 = vmatmul.mubr.bf16.gmra.mxu1 %v15133_v32  ;;  %12392 = vmatmul.mubr.bf16.gmra.mxu0 %v15133_v32 }
 0x578   : > { %v10657_v3 = vmax.f32 %v10593_v0, 0.0  ;;  %v10594_v45 = vadd.f32 %v19881_v37, %v10518_v53  ;;  %v10519_v6 = vadd.f32 %v10396_v24, %v9852_v12  ;;  %v21587_v12 = vld [vmem:[#allocation11_spill] sm:$0xff]  ;;  %v21589_v24 = vld [vmem:[#allocation14_spill] sm:$0xff] }
 0x579   : > { %v10398_v49 = vpop.f32.mrf.mxu1  ;;  %v9872_v60 = vadd.f32 %v21587_v12, %v21586_v48  ;;  %v21600_v48 = vld [vmem:[#allocation82_spill] sm:$0xff] }
 0x57a   : > { %v15135_v4 = vpack.c.bf16 %v10657_v3, %v10655_v50  ;;  %v10658_v17 = vmax.f32 %v10594_v45, 0.0  ;;  %v10520_v34 = vadd.f32 %v10398_v49, %v9854_v56  ;;  %v10595_v33 = vadd.f32 %v19877_v15, %v10519_v6  ;;  %v21588_v56 = vld [vmem:[#allocation86_spill] sm:$0xff]  ;;  %v21590_v49 = vld [vmem:[#allocation19_spill] sm:$0xff] }
 0x57b   : > { %v10400_v23 = vpop.f32.mrf.mxu1  ;;  %v9874_v10 = vadd.f32 %v21589_v24, %v21588_v56 }
 0x57c   : > { %v10521_v46 = vadd.f32 %v10400_v23, %v9856_v35  ;;  %v15136_v43 = vpack.c.bf16 %v10658_v17, %v10656_v9  ;;  %v10596_v44 = vadd.f32 %v19881_v37, %v10520_v34  ;;  %v10659_v16 = vmax.f32 %v10595_v33, 0.0  ;;  %v21591_v9 = vld [vmem:[#allocation12_spill] sm:$0xff]  ;;  %v19999_v17 = vpop.f32.mrf.mxu0 }
 0x57d   : > { %v10402_v51 = vpop.f32.mrf.mxu1 }
 0x57e   : > { %v10597_v57 = vadd.f32 %v19877_v15, %v10521_v46  ;;  %v10522_v25 = vadd.f32 %v10402_v51, %v9858_v26  ;;  %12015 = vmatprep.mubr.bf16.mxu1 %v15136_v43  ;;  %12401 = vmatprep.mubr.bf16.mxu0 %v15136_v43  ;;  %v10660_v47 = vmax.f32 %v10596_v44, 0.0  ;;  %v21593_v51 = vld [vmem:[#allocation97_spill] sm:$0xff] }
 0x57f   : > { %v10406_v54 = vpop.f32.mrf.mxu1  ;;  %12016 = vmatmul.mubr.bf16.gmra.mxu1 %v15135_v4  ;;  %12402 = vmatmul.mubr.bf16.gmra.mxu0 %v15135_v4  ;;  %v9876_v4 = vadd.f32 %v21591_v9, %v21590_v49  ;;  %v21604_v49 = vld [vmem:[#allocation110_spill] sm:$0xff] }
 0x580   : > { %v10661_v14 = vmax.f32 %v10597_v57, 0.0  ;;  %v10598_v63 = vadd.f32 %v19881_v37, %v10522_v25  ;;  %v10523_v20 = vadd.f32 %v10406_v54, %v9862_v42  ;;  %v21592_v42 = vld [vmem:[#allocation89_spill] sm:$0xff]  ;;  %v21594_v54 = vld [vmem:[#allocation107_spill] sm:$0xff]  ;;  %v21605_v9 = vld [vmem:[#allocation102_spill] sm:$0xff] }
 0x581   : > { %v10408_v40 = vpop.f32.mrf.mxu1  ;;  %v9878_v44 = vadd.f32 %v21593_v51, %v21592_v42  ;;  %v21608_v42 = vld [vmem:[#allocation101_spill] sm:$0xff] }
 0x582   : > { %v15137_v32 = vpack.c.bf16 %v10661_v14, %v10659_v16  ;;  %v10662_v5 = vmax.f32 %v10598_v63, 0.0  ;;  %v10524_v7 = vadd.f32 %v10408_v40, %v9864_v21  ;;  %v10599_v13 = vadd.f32 %v19877_v15, %v10523_v20  ;;  %v21595_v16 = vld [vmem:[#allocation79_spill] sm:$0xff]  ;;  %v20006_v63 = vpop.f32.mrf.mxu0 }
 0x583   : > { %v10410_v59 = vpop.f32.mrf.mxu1  ;;  %v9882_v14 = vadd.f32 %v21595_v16, %v21594_v54  ;;  %21596 = vst [vmem:[#allocation39_spill] sm:$0xff] %v20006_v63  ;;  %v21609_v16 = vld [vmem:[#allocation40_spill] sm:$0xff] }
 0x584   : > { %v10525_v36 = vadd.f32 %v10410_v59, %v9866_v18  ;;  %v15138_v2 = vpack.c.bf16 %v10662_v5, %v10660_v47  ;;  %v10600_v38 = vadd.f32 %v19881_v37, %v10524_v7  ;;  %v10663_v3 = vmax.f32 %v10599_v13, 0.0  ;;  %v21598_v5 = vld [vmem:[#allocation100_spill] sm:$0xff] }
 0x585   : > { %v10412_v27 = vpop.f32.mrf.mxu1 }
 0x586   : > { %v10601_v0 = vadd.f32 %v19877_v15, %v10525_v36  ;;  %v10526_v53 = vadd.f32 %v10412_v27, %v9868_v52  ;;  %12025 = vmatprep.mubr.bf16.mxu1 %v15138_v2  ;;  %12411 = vmatprep.mubr.bf16.mxu0 %v15138_v2  ;;  %v10664_v23 = vmax.f32 %v10600_v38, 0.0  ;;  %v21599_v2 = vld [vmem:[#allocation85_spill] sm:$0xff] }
 0x587   : > { %v10416_v50 = vpop.f32.mrf.mxu1  ;;  %12026 = vmatmul.mubr.bf16.gmra.mxu1 %v15137_v32  ;;  %12412 = vmatmul.mubr.bf16.gmra.mxu0 %v15137_v32  ;;  %v21597_v32 = vld [vmem:[#allocation84_spill] sm:$0xff]  ;;  %v9886_v12 = vadd.f32 %v21600_v48, %v21599_v2 }
 0x588   : > { %v10665_v45 = vmax.f32 %v10601_v0, 0.0  ;;  %v10602_v6 = vadd.f32 %v19881_v37, %v10526_v53  ;;  %v10527_v35 = vadd.f32 %v10416_v50, %v9872_v60  ;;  %v9884_v7 = vadd.f32 %v21598_v5, %v21597_v32  ;;  %v20015_v60 = vpop.f32.mrf.mxu0  ;;  %v21603_v50 = vld [vmem:[#allocation99_spill] sm:$0xff] }
 0x589   : > { %v10418_v34 = vpop.f32.mrf.mxu1  ;;  %21601 = vst [vmem:[#allocation120_spill] sm:$0xff] %v20015_v60 }
 0x58a   : > { %v15139_v26 = vpack.c.bf16 %v10665_v45, %v10663_v3  ;;  %v10666_v33 = vmax.f32 %v10602_v6, 0.0  ;;  %v10528_v46 = vadd.f32 %v10418_v34, %v9874_v10  ;;  %v10603_v57 = vadd.f32 %v19877_v15, %v10527_v35  ;;  %v21602_v10 = vld [vmem:[#allocation109_spill] sm:$0xff]  ;;  %v20022_v34 = vpop.f32.mrf.mxu0 }
 0x58b   : > { %v10420_v43 = vpop.f32.mrf.mxu1  ;;  %v9888_v3 = vadd.f32 %v21603_v50, %v21602_v10  ;;  %21606 = vst [vmem:[#allocation70_spill] sm:$0xff] %v20022_v34  ;;  %v21617_v50 = vld [vmem:[#allocation116_spill] sm:$0xff] }
 0x58c   : > { %v10529_v25 = vadd.f32 %v10420_v43, %v9876_v4  ;;  %v15140_v21 = vpack.c.bf16 %v10666_v33, %v10664_v23  ;;  %v10604_v18 = vadd.f32 %v19881_v37, %v10528_v46  ;;  %v10667_v19 = vmax.f32 %v10603_v57, 0.0  ;;  %v21607_v43 = vld [vmem:[#allocation112_spill] sm:$0xff] }
 0x58d   : > { %v10422_v20 = vpop.f32.mrf.mxu1  ;;  %v9892_v4 = vadd.f32 %v21605_v9, %v21604_v49  ;;  %v9894_v51 = vadd.f32 %v21608_v42, %v21607_v43 }
 0x58e   : > { %v10605_v40 = vadd.f32 %v19877_v15, %v10529_v25  ;;  %v10530_v47 = vadd.f32 %v10422_v20, %v9878_v44  ;;  %12035 = vmatprep.mubr.bf16.mxu1 %v15140_v21  ;;  %12421 = vmatprep.mubr.bf16.mxu0 %v15140_v21  ;;  %v10668_v38 = vmax.f32 %v10604_v18, 0.0  ;;  %v20031_v18 = vpop.f32.mrf.mxu0 }
 0x58f   : > { %v10426_v59 = vpop.f32.mrf.mxu1  ;;  %12036 = vmatmul.mubr.bf16.gmra.mxu1 %v15139_v26  ;;  %12422 = vmatmul.mubr.bf16.gmra.mxu0 %v15139_v26  ;;  %21611 = vst [vmem:[#allocation73_spill] sm:$0xff] %v20031_v18 }
 0x590   : > { %v10669_v52 = vmax.f32 %v10605_v40, 0.0  ;;  %v10606_v13 = vadd.f32 %v19881_v37, %v10530_v47  ;;  %v10531_v36 = vadd.f32 %v10426_v59, %v9882_v14  ;;  %v21610_v14 = vld [vmem:[#allocation104_spill] sm:$0xff] }
 0x591   : > { %v10428_v27 = vpop.f32.mrf.mxu1  ;;  %v9896_v20 = vadd.f32 %v21610_v14, %v21609_v16 }
 0x592   : > { %v15141_v0 = vpack.c.bf16 %v10669_v52, %v10667_v19  ;;  %v10670_v53 = vmax.f32 %v10606_v13, 0.0  ;;  %v10532_v56 = vadd.f32 %v10428_v27, %v9884_v7  ;;  %v10607_v45 = vadd.f32 %v19877_v15, %v10531_v36  ;;  %v21612_v19 = vld [vmem:[#allocation113_spill] sm:$0xff]  ;;  %v21613_v52 = vld [vmem:[#allocation103_spill] sm:$0xff] }
 0x593   : > { %v10430_v24 = vpop.f32.mrf.mxu1  ;;  %v9898_v13 = vadd.f32 %v21613_v52, %v21612_v19  ;;  %v21615_v27 = vld [vmem:[#allocation29_spill] sm:$0xff] }
 0x594   : > { %v10533_v6 = vadd.f32 %v10430_v24, %v9886_v12  ;;  %v15142_v35 = vpack.c.bf16 %v10670_v53, %v10668_v38  ;;  %v10608_v26 = vadd.f32 %v19881_v37, %v10532_v56  ;;  %v10671_v57 = vmax.f32 %v10607_v45, 0.0  ;;  %v21614_v12 = vld [vmem:[#allocation114_spill] sm:$0xff] }
 0x595   : > { %v10432_v23 = vpop.f32.mrf.mxu1  ;;  %v9902_v38 = vadd.f32 %v21615_v27, %v21614_v12 }
 0x596   : > { %v10609_v33 = vadd.f32 %v19877_v15, %v10533_v6  ;;  %v10534_v46 = vadd.f32 %v10432_v23, %v9888_v3  ;;  %12045 = vmatprep.mubr.bf16.mxu1 %v15142_v35  ;;  %12431 = vmatprep.mubr.bf16.mxu0 %v15142_v35  ;;  %v10672_v47 = vmax.f32 %v10608_v26, 0.0  ;;  %v21618_v3 = vld [vmem:[#allocation30_spill] sm:$0xff]  ;;  %v21620_v26 = vld [vmem:[#allocation76_spill] sm:$0xff] }
 0x597   : > { %v10436_v44 = vpop.f32.mrf.mxu1  ;;  %12046 = vmatmul.mubr.bf16.gmra.mxu1 %v15141_v0  ;;  %12432 = vmatmul.mubr.bf16.gmra.mxu0 %v15141_v0  ;;  %v20038_v0 = vpop.f32.mrf.mxu0  ;;  %v9904_v45 = vadd.f32 %v21618_v3, %v21617_v50  ;;  %v21619_v23 = vld [vmem:[#allocation22_spill] sm:$0xff] }
 0x598   : > { %v10673_v25 = vmax.f32 %v10609_v33, 0.0  ;;  %v10610_v21 = vadd.f32 %v19881_v37, %v10534_v46  ;;  %v10535_v54 = vadd.f32 %v10436_v44, %v9892_v4  ;;  %21616 = vst [vmem:[#allocation122_spill] sm:$0xff] %v20038_v0  ;;  %v9906_v33 = vadd.f32 %v21620_v26, %v21619_v23  ;;  %v21632_v23 = vld [vmem:[#allocation25_spill] sm:$0xff]  ;;  %v21633_v26 = vld [vmem:[#allocation15_spill] sm:$0xff] }
 0x599   : > { %v10438_v40 = vpop.f32.mrf.mxu1  ;;  %v20047_v46 = vpop.f32.mrf.mxu0 }
 0x59a   : > { %v15143_v32 = vpack.c.bf16 %v10673_v25, %v10671_v57  ;;  %v10674_v5 = vmax.f32 %v10610_v21, 0.0  ;;  %v10536_v7 = vadd.f32 %v10438_v40, %v9894_v51  ;;  %v10611_v36 = vadd.f32 %v19877_v15, %v10535_v54  ;;  %21621 = vst [vmem:[#allocation90_spill] sm:$0xff] %v20047_v46  ;;  %v21622_v21 = vld [vmem:[#allocation117_spill] sm:$0xff]  ;;  %v21623_v54 = vld [vmem:[#allocation18_spill] sm:$0xff] }
 0x59b   : > { %v10440_v59 = vpop.f32.mrf.mxu1  ;;  %v9908_v16 = vadd.f32 %v21623_v54, %v21622_v21 }
 0x59c   : > { %v10537_v2 = vadd.f32 %v10440_v59, %v9896_v20  ;;  %v15144_v48 = vpack.c.bf16 %v10674_v5, %v10672_v47  ;;  %v10612_v56 = vadd.f32 %v19881_v37, %v10536_v7  ;;  %v10675_v35 = vmax.f32 %v10611_v36, 0.0  ;;  %v21624_v47 = vld [vmem:[#allocation57_spill] sm:$0xff]  ;;  %v20054_v7 = vpop.f32.mrf.mxu0  ;;  %v21627_v36 = vld [vmem:[#allocation24_spill] sm:$0xff] }
 0x59d   : > { %v10442_v53 = vpop.f32.mrf.mxu1  ;;  %21626 = vst [vmem:[#allocation92_spill] sm:$0xff] %v20054_v7 }
 0x59e   : > { %v10613_v24 = vadd.f32 %v19877_v15, %v10537_v2  ;;  %v10538_v10 = vadd.f32 %v10442_v53, %v9898_v13  ;;  %12055 = vmatprep.mubr.bf16.mxu1 %v15144_v48  ;;  %12441 = vmatprep.mubr.bf16.mxu0 %v15144_v48  ;;  %v10676_v42 = vmax.f32 %v10612_v56, 0.0  ;;  %v21628_v2 = vld [vmem:[#allocation16_spill] sm:$0xff]  ;;  %v20063_v3 = vpop.f32.mrf.mxu0 }
 0x59f   : > { %v10446_v6 = vpop.f32.mrf.mxu1  ;;  %12056 = vmatmul.mubr.bf16.gmra.mxu1 %v15143_v32  ;;  %12442 = vmatmul.mubr.bf16.gmra.mxu0 %v15143_v32  ;;  %v21625_v32 = vld [vmem:[#allocation32_spill] sm:$0xff]  ;;  %v9914_v48 = vadd.f32 %v21628_v2, %v21627_v36  ;;  %21631 = vst [vmem:[#allocation123_spill] sm:$0xff] %v20063_v3  ;;  %v21639_v36 = vld [vmem:[#allocation105_spill] sm:$0xff]  ;;  %v21640_v2 = vld [vmem:[#allocation66_spill] sm:$0xff] }
 0x5a0   : > { %v10677_v49 = vmax.f32 %v10613_v24, 0.0  ;;  %v10614_v9 = vadd.f32 %v19881_v37, %v10538_v10  ;;  %v10539_v4 = vadd.f32 %v10446_v6, %v9902_v38  ;;  %v9912_v5 = vadd.f32 %v21625_v32, %v21624_v47  ;;  %v21629_v24 = vld [vmem:[#allocation81_spill] sm:$0xff]  ;;  %v21630_v10 = vld [vmem:[#allocation34_spill] sm:$0xff]  ;;  %v20070_v21 = vpop.f32.mrf.mxu0  ;;  %v21638_v47 = vld [vmem:[#allocation31_spill] sm:$0xff] }
 0x5a1   : > { %v10448_v43 = vpop.f32.mrf.mxu1  ;;  %v9916_v50 = vadd.f32 %v21630_v10, %v21629_v24  ;;  %21636 = vst [vmem:[#allocation72_spill] sm:$0xff] %v20070_v21 }
 0x5a2   : > { %v15145_v51 = vpack.c.bf16 %v10677_v49, %v10675_v35  ;;  %v10678_v44 = vmax.f32 %v10614_v9, 0.0  ;;  %v10540_v57 = vadd.f32 %v10448_v43, %v9904_v45  ;;  %v10615_v14 = vadd.f32 %v19877_v15, %v10539_v4 }
 0x5a3   : > { %v10450_v25 = vpop.f32.mrf.mxu1 }
 0x5a4   : > { %v10541_v20 = vadd.f32 %v10450_v25, %v9906_v33  ;;  %v15146_v40 = vpack.c.bf16 %v10678_v44, %v10676_v42  ;;  %v10616_v19 = vadd.f32 %v19881_v37, %v10540_v57  ;;  %v10679_v27 = vmax.f32 %v10615_v14, 0.0  ;;  %v21634_v44 = vld [vmem:[#allocation63_spill] sm:$0xff]  ;;  %v21635_v57 = vld [vmem:[#allocation13_spill] sm:$0xff] }
 0x5a5   : > { %v10452_v59 = vpop.f32.mrf.mxu1  ;;  %v9918_v33 = vadd.f32 %v21633_v26, %v21632_v23  ;;  %v9922_v25 = vadd.f32 %v21635_v57, %v21634_v44  ;;  %v21645_v26 = vld [vmem:[#allocation94_spill] sm:$0xff]  ;;  %v21647_v57 = vld [vmem:[#allocation23_spill] sm:$0xff] }
 0x5a6   : > { %v10617_v52 = vadd.f32 %v19877_v15, %v10541_v20  ;;  %v10542_v13 = vadd.f32 %v10452_v59, %v9908_v16  ;;  %12065 = vmatprep.mubr.bf16.mxu1 %v15146_v40  ;;  %12451 = vmatprep.mubr.bf16.mxu0 %v15146_v40  ;;  %v10680_v6 = vmax.f32 %v10616_v19, 0.0  ;;  %v21637_v40 = vld [vmem:[#allocation48_spill] sm:$0xff] }
 0x5a7   : > { %v10456_v12 = vpop.f32.mrf.mxu1  ;;  %12066 = vmatmul.mubr.bf16.gmra.mxu1 %v15145_v51  ;;  %12452 = vmatmul.mubr.bf16.gmra.mxu0 %v15145_v51  ;;  %v9924_v32 = vadd.f32 %v21638_v47, %v21637_v40 }
 0x5a8   : > { %v10681_v38 = vmax.f32 %v10617_v52, 0.0  ;;  %v10618_v53 = vadd.f32 %v19881_v37, %v10542_v13  ;;  %v10543_v56 = vadd.f32 %v10456_v12, %v9912_v5  ;;  %v20079_v12 = vpop.f32.mrf.mxu0 }
 0x5a9   : > { %v10458_v45 = vpop.f32.mrf.mxu1  ;;  %21641 = vst [vmem:[#allocation59_spill] sm:$0xff] %v20079_v12 }
 0x5aa   : > { %v15147_v35 = vpack.c.bf16 %v10681_v38, %v10679_v27  ;;  %v10682_v49 = vmax.f32 %v10618_v53, 0.0  ;;  %v10544_v9 = vadd.f32 %v10458_v45, %v9914_v48  ;;  %v10619_v43 = vadd.f32 %v19877_v15, %v10543_v56  ;;  %v21643_v45 = vld [vmem:[#allocation36_spill] sm:$0xff] }
 0x5ab   : > { %v10460_v4 = vpop.f32.mrf.mxu1  ;;  %v9926_v48 = vadd.f32 %v21640_v2, %v21639_v36 }
 0x5ac   : > { %v10545_v42 = vadd.f32 %v10460_v4, %v9916_v50  ;;  %v15148_v51 = vpack.c.bf16 %v10682_v49, %v10680_v6  ;;  %v10620_v16 = vadd.f32 %v19881_v37, %v10544_v9  ;;  %v10683_v59 = vmax.f32 %v10619_v43, 0.0  ;;  %v21642_v50 = vld [vmem:[#allocation44_spill] sm:$0xff]  ;;  %v20084_v4 = vpop.f32.mrf.mxu0 }
 0x5ad   : > { %v10462_v54 = vpop.f32.mrf.mxu1  ;;  %v9928_v6 = vadd.f32 %v21643_v45, %v21642_v50  ;;  %21644 = vst [vmem:[#allocation124_spill] sm:$0xff] %v20084_v4 }
 0x5ae   : > { %v10621_v14 = vadd.f32 %v19877_v15, %v10545_v42  ;;  %v10546_v20 = vadd.f32 %v10462_v54, %v9918_v33  ;;  %12075 = vmatprep.mubr.bf16.mxu1 %v15148_v51  ;;  %12461 = vmatprep.mubr.bf16.mxu0 %v15148_v51  ;;  %v10684_v38 = vmax.f32 %v10620_v16, 0.0  ;;  %v21646_v33 = vld [vmem:[#allocation33_spill] sm:$0xff] }
 0x5af   : > { %v10466_v5 = vpop.f32.mrf.mxu1  ;;  %12076 = vmatmul.mubr.bf16.gmra.mxu1 %v15147_v35  ;;  %12462 = vmatmul.mubr.bf16.gmra.mxu0 %v15147_v35  ;;  %v9932_v43 = vadd.f32 %v21646_v33, %v21645_v26 }
 0x5b0   : > { %v10685_v19 = vmax.f32 %v10621_v14, 0.0  ;;  %v10622_v52 = vadd.f32 %v19881_v37, %v10546_v20  ;;  %v10547_v13 = vadd.f32 %v10466_v5, %v9922_v25  ;;  %v21648_v25 = vld [vmem:[#allocation35_spill] sm:$0xff] }
 0x5b1   : > { %v10468_v27 = vpop.f32.mrf.mxu1  ;;  %v9934_v54 = vadd.f32 %v21648_v25, %v21647_v57  ;;  %v21650_v5 = vld [vmem:[#allocation83_spill] sm:$0xff] }
 0x5b2   : > { %v15149_v53 = vpack.c.bf16 %v10685_v19, %v10683_v59  ;;  %v10686_v56 = vmax.f32 %v10622_v52, 0.0  ;;  %v10548_v24 = vadd.f32 %v10468_v27, %v9924_v32  ;;  %v10623_v35 = vadd.f32 %v19877_v15, %v10547_v13  ;;  %v21649_v32 = vld [vmem:[#allocation47_spill] sm:$0xff]  ;;  %v20095_v19 = vpop.f32.mrf.mxu0 }
 0x5b3   : > { %v10470_v10 = vpop.f32.mrf.mxu1  ;;  %v9936_v59 = vadd.f32 %v21650_v5, %v21649_v32  ;;  %21651 = vst [vmem:[#allocation26_spill] sm:$0xff] %v20095_v19 }
 0x5b4   : > { %v10549_v49 = vadd.f32 %v10470_v10, %v9926_v48  ;;  %v15150_v9 = vpack.c.bf16 %v10686_v56, %v10684_v38  ;;  %v10624_v42 = vadd.f32 %v19881_v37, %v10548_v24  ;;  %v10687_v14 = vmax.f32 %v10623_v35, 0.0  ;;  %v21652_v38 = vld [vmem:[#allocation111_spill] sm:$0xff]  ;;  %v21653_v56 = vld [vmem:[#allocation38_spill] sm:$0xff]  ;;  %v20100_v45 = vpop.f32.mrf.mxu0 }
 0x5b5   : > { %v10472_v23 = vpop.f32.mrf.mxu1  ;;  %v9938_v24 = vadd.f32 %v21653_v56, %v21652_v38  ;;  %21654 = vst [vmem:[#allocation65_spill] sm:$0xff] %v20100_v45  ;;  %v21655_v35 = vld [vmem:[#allocation46_spill] sm:$0xff] }
 0x5b6   : > { %v10625_v51 = vadd.f32 %v19877_v15, %v10549_v49  ;;  %v10550_v44 = vadd.f32 %v10472_v23, %v9928_v6  ;;  %12471 = vmatprep.mubr.bf16.mxu0 %v15150_v9  ;;  %v10688_v13 = vmax.f32 %v10624_v42, 0.0  ;;  %v21656_v49 = vld [vmem:[#allocation106_spill] sm:$0xff]  ;;  %v21658_v42 = vld [vmem:[#allocation87_spill] sm:$0xff] }
 0x5b7   : > { %v10476_v16 = vpop.f32.mrf.mxu1  ;;  %12472 = vmatmul.mubr.bf16.gmra.mxu0 %v15149_v53  ;;  %v9942_v9 = vadd.f32 %v21656_v49, %v21655_v35 }
 0x5b8   : > { %v10689_v20 = vmax.f32 %v10625_v51, 0.0  ;;  %v10626_v40 = vadd.f32 %v19881_v37, %v10550_v44  ;;  %v10551_v47 = vadd.f32 %v10476_v16, %v9932_v43  ;;  %v21657_v43 = vld [vmem:[#allocation51_spill] sm:$0xff] }
 0x5b9   : > { %v10478_v52 = vpop.f32.mrf.mxu1  ;;  %v9944_v51 = vadd.f32 %v21658_v42, %v21657_v43 }
 0x5ba   : > { %v15151_v36 = vpack.c.bf16 %v10689_v20, %v10687_v14  ;;  %v10690_v2 = vmax.f32 %v10626_v40, 0.0  ;;  %v10552_v48 = vadd.f32 %v10478_v52, %v9934_v54  ;;  %v10627_v53 = vadd.f32 %v19877_v15, %v10551_v47  ;;  %v21659_v14 = vld [vmem:[#allocation69_spill] sm:$0xff]  ;;  %v20111_v47 = vpop.f32.mrf.mxu0 }
 0x5bb   : > { %v10480_v27 = vpop.f32.mrf.mxu1  ;;  %v21660_v20 = vld [vmem:[#allocation37_spill] sm:$0xff]  ;;  %21661 = vst [vmem:[#allocation125_spill] sm:$0xff] %v20111_v47 }
 0x5bc   : > { %v10553_v10 = vadd.f32 %v10480_v27, %v9936_v59  ;;  %v15152_v50 = vpack.c.bf16 %v10690_v2, %v10688_v13  ;;  %v10628_v23 = vadd.f32 %v19881_v37, %v10552_v48  ;;  %v10691_v57 = vmax.f32 %v10627_v53, 0.0  ;;  %v21662_v48 = vld [vmem:[#allocation53_spill] sm:$0xff]  ;;  %v21663_v27 = vld [vmem:[#allocation91_spill] sm:$0xff]  ;;  %v20116_v53 = vpop.f32.mrf.mxu0 }
 0x5bd   : > { %v10482_v6 = vpop.f32.mrf.mxu1  ;;  %v9946_v40 = vadd.f32 %v21660_v20, %v21659_v14  ;;  %v9948_v38 = vadd.f32 %v21663_v27, %v21662_v48  ;;  %21664 = vst [vmem:[#allocation58_spill] sm:$0xff] %v20116_v53 }
 0x5be   : > { %v10629_v26 = vadd.f32 %v19877_v15, %v10553_v10  ;;  %v10554_v33 = vadd.f32 %v10482_v6, %v9938_v24  ;;  %12481 = vmatprep.mubr.bf16.mxu0 %v15152_v50  ;;  %v10692_v5 = vmax.f32 %v10628_v23, 0.0 }
 0x5bf   : > { %v10486_v44 = vpop.f32.mrf.mxu1  ;;  %12482 = vmatmul.mubr.bf16.gmra.mxu0 %v15151_v36 }
 0x5c0   : > { %v10693_v25 = vmax.f32 %v10629_v26, 0.0  ;;  %v10630_v54 = vadd.f32 %v19881_v37, %v10554_v33  ;;  %v10555_v16 = vadd.f32 %v10486_v44, %v9942_v9  ;;  %v20121_v26 = vpop.f32.mrf.mxu0 }
 0x5c1   : > { %v10488_v32 = vpop.f32.mrf.mxu1  ;;  %21665 = vst [vmem:[#allocation6_spill] sm:$0xff] %v20121_v26 }
 0x5c2   : > { %v15153_v59 = vpack.c.bf16 %v10693_v25, %v10691_v57  ;;  %v10694_v52 = vmax.f32 %v10630_v54, 0.0  ;;  %v10556_v13 = vadd.f32 %v10488_v32, %v9944_v51  ;;  %v10631_v36 = vadd.f32 %v19877_v15, %v10555_v16  ;;  %v20123_v44 = vpop.f32.mrf.mxu0 }
 0x5c3   : > { %v10490_v2 = vpop.f32.mrf.mxu1  ;;  %21666 = vst [vmem:[#allocation78_spill] sm:$0xff] %v20123_v44 }
 0x5c4   : > { %v10557_v56 = vadd.f32 %v10490_v2, %v9946_v40  ;;  %v15154_v24 = vpack.c.bf16 %v10694_v52, %v10692_v5  ;;  %v10632_v50 = vadd.f32 %v19881_v37, %v10556_v13  ;;  %v10695_v49 = vmax.f32 %v10631_v36, 0.0  ;;  %v20125_v57 = vpop.f32.mrf.mxu0 }
 0x5c5   : > { %v10492_v10 = vpop.f32.mrf.mxu1  ;;  %21667 = vst [vmem:[#allocation49_spill] sm:$0xff] %v20125_v57 }
 0x5c6   : > { %v10633_v6 = vadd.f32 %v19877_v15, %v10557_v56  ;;  %v10558_v35 = vadd.f32 %v10492_v10, %v9948_v38  ;;  %12491 = vmatprep.mubr.bf16.mxu0 %v15154_v24  ;;  %v10696_v33 = vmax.f32 %v10632_v50, 0.0  ;;  %v20127_v15 = vpop.f32.mrf.mxu0 }
 0x5c7   : > { %12492 = vmatmul.mubr.bf16.gmra.mxu0 %v15153_v59  ;;  %21668 = vst [vmem:[#allocation50_spill] sm:$0xff] %v20127_v15  ;;  %v11927_v54 = vpop.f32.mrf.mxu1 }
 0x5c8   : > { %v10697_v9 = vmax.f32 %v10633_v6, 0.0  ;;  %v10634_v23 = vadd.f32 %v19881_v37, %v10558_v35  ;;  %v20129_v25 = vpop.f32.mrf.mxu0 }
 0x5c9   : > { %21669 = vst [vmem:[#allocation8_spill] sm:$0xff] %v20129_v25  ;;  %v11929_v37 = vpop.f32.mrf.mxu1 }
 0x5ca   : > { %v15155_v43 = vpack.c.bf16 %v10697_v9, %v10695_v49  ;;  %v10698_v42 = vmax.f32 %v10634_v23, 0.0  ;;  %v20131_v16 = vpop.f32.mrf.mxu0 }
 0x5cb   : > { %21670 = vst [vmem:[#allocation7_spill] sm:$0xff] %v20131_v16  ;;  %v11931_v20 = vpop.f32.mrf.mxu1 }
 0x5cc   : > { %v15156_v51 = vpack.c.bf16 %v10698_v42, %v10696_v33  ;;  %v20133_v14 = vpop.f32.mrf.mxu0 }
 0x5cd   : > { %21671 = vst [vmem:[#allocation60_spill] sm:$0xff] %v20133_v14  ;;  %v11933_v32 = vpop.f32.mrf.mxu1 }
 0x5ce   : > { %12501 = vmatprep.mubr.bf16.mxu0 %v15156_v51  ;;  %v20135_v40 = vpop.f32.mrf.mxu0 }
 0x5cf   : > { %12502 = vmatmul.mubr.bf16.gmra.mxu0 %v15155_v43  ;;  %21672 = vst [vmem:[#allocation10_spill] sm:$0xff] %v20135_v40  ;;  %v11937_v59 = vpop.f32.mrf.mxu1 }
 0x5d0   : > { %v20137_v5 = vpop.f32.mrf.mxu0 }
 0x5d1   : > { %21673 = vst [vmem:[#allocation43_spill] sm:$0xff] %v20137_v5  ;;  %v11939_v13 = vpop.f32.mrf.mxu1  ;;  %v21686_v5 = vld [vmem:[#allocation93_spill] sm:$0xff] }
 0x5d2   : > { %v20139_v52 = vpop.f32.mrf.mxu0 }
 0x5d3   : > { %21674 = vst [vmem:[#allocation67_spill] sm:$0xff] %v20139_v52  ;;  %v11941_v48 = vpop.f32.mrf.mxu1 }
 0x5d4   : > { %v20141_v2 = vpop.f32.mrf.mxu0 }
 0x5d5   : > { %21675 = vst [vmem:[#allocation64_spill] sm:$0xff] %v20141_v2  ;;  %v11943_v38 = vpop.f32.mrf.mxu1 }
 0x5d6   : > { %v20143_v27 = vpop.f32.mrf.mxu0 }
 0x5d7   : > { %21676 = vst [vmem:[#allocation118_spill] sm:$0xff] %v20143_v27  ;;  %v11947_v56 = vpop.f32.mrf.mxu1 }
 0x5d8   : > { %v20145_v36 = vpop.f32.mrf.mxu0 }
 0x5d9   : > { %21677 = vst [vmem:[#allocation54_spill] sm:$0xff] %v20145_v36  ;;  %v11949_v10 = vpop.f32.mrf.mxu1 }
 0x5da   : > { %v20147_v24 = vpop.f32.mrf.mxu0 }
 0x5db   : > { %21678 = vst [vmem:[#allocation121_spill] sm:$0xff] %v20147_v24  ;;  %v11951_v6 = vpop.f32.mrf.mxu1  ;;  %v21685_v24 = vld [vmem:[#allocation88_spill] sm:$0xff] }
 0x5dc   : > { %v20149_v50 = vpop.f32.mrf.mxu0  ;;  %v11928_v2 = vadd.f32 %v11927_v54, %v21685_v24  ;;  %v21688_v54 = vld [vmem:[#allocation95_spill] sm:$0xff] }
 0x5dd   : > { %21679 = vst [vmem:[#allocation96_spill] sm:$0xff] %v20149_v50  ;;  %v11953_v49 = vpop.f32.mrf.mxu1  ;;  %v11934_v24 = vadd.f32 %v11933_v32, %v21688_v54 }
 0x5de   : > { %v20151_v35 = vpop.f32.mrf.mxu0 }
 0x5df   : > { %21680 = vst [vmem:[#allocation75_spill] sm:$0xff] %v20151_v35  ;;  %v11957_v23 = vpop.f32.mrf.mxu1  ;;  %v11930_v35 = vadd.f32 %v11929_v37, %v21686_v5  ;;  %v21689_v37 = vld [vmem:[#allocation21_spill] sm:$0xff] }
 0x5e0   : > { %v20153_v9 = vpop.f32.mrf.mxu0  ;;  %v11938_v5 = vadd.f32 %v11937_v59, %v21689_v37 }
 0x5e1   : > { %21681 = vst [vmem:[#allocation45_spill] sm:$0xff] %v20153_v9  ;;  %v11959_v43 = vpop.f32.mrf.mxu1 }
 0x5e2   : > { %v20155_v33 = vpop.f32.mrf.mxu0 }
 0x5e3   : > { %21682 = vst [vmem:[#allocation61_spill] sm:$0xff] %v20155_v33  ;;  %v11961_v51 = vpop.f32.mrf.mxu1  ;;  %v21687_v33 = vld [vmem:[#allocation20_spill] sm:$0xff] }
 0x5e4   : > { %v20157_v42 = vpop.f32.mrf.mxu0  ;;  %v11932_v16 = vadd.f32 %v11931_v20, %v21687_v33  ;;  %v21690_v20 = vld [vmem:[#allocation56_spill] sm:$0xff] }
 0x5e5   : > { %21683 = vst [vmem:[#allocation74_spill] sm:$0xff] %v20157_v42  ;;  %v11963_v27 = vpop.f32.mrf.mxu1 }
 0x5e6   : > { %v20159_v36 = vpop.f32.mrf.mxu0 }
 0x5e7   : > { %21684 = vst [vmem:[#allocation77_spill] sm:$0xff] %v20159_v36 }
 0x617   : > { %v20162_v52 = vpop.f32.mrf.mxu1  ;;  %v12353_v50 = vpop.f32.mrf.mxu0 }
 0x618   : > { %v20165_v40 = vadd.f32 %v12353_v50, %v11928_v2 }
 0x619   : > { %v20167_v9 = vpop.f32.mrf.mxu1  ;;  %v12355_v14 = vpop.f32.mrf.mxu0 }
 0x61a   : > { %v20170_v25 = vadd.f32 %v12355_v14, %v11930_v35  ;;  %v11940_v14 = vadd.f32 %v11939_v13, %v21690_v20  ;;  %v21693_v13 = vld [vmem:[#allocation108_spill] sm:$0xff] }
 0x61b   : > { %v20172_v42 = vpop.f32.mrf.mxu1  ;;  %v12357_v36 = vpop.f32.mrf.mxu0 }
 0x61c   : > { %v20174_v15 = vadd.f32 %v12357_v36, %v11932_v16  ;;  %v21691_v36 = vld [vmem:[#allocation68_spill] sm:$0xff] }
 0x61d   : > { %v20177_v57 = vpop.f32.mrf.mxu1  ;;  %v12359_v44 = vpop.f32.mrf.mxu0  ;;  %v11942_v53 = vadd.f32 %v11941_v48, %v21691_v36  ;;  %v21694_v48 = vld [vmem:[#allocation52_spill] sm:$0xff] }
 0x61e   : > { %v20180_v2 = vadd.f32 %v12359_v44, %v11934_v24  ;;  %v21692_v44 = vld [vmem:[#allocation62_spill] sm:$0xff] }
 0x61f   : > { %v20182_v50 = vpop.f32.mrf.mxu1  ;;  %v12363_v26 = vpop.f32.mrf.mxu0  ;;  %v11944_v24 = vadd.f32 %v11943_v38, %v21692_v44 }
 0x620   : > { %v20185_v35 = vadd.f32 %v12363_v26, %v11938_v5  ;;  %v11948_v26 = vadd.f32 %v11947_v56, %v21693_v13 }
 0x621   : > { %v20187_v33 = vpop.f32.mrf.mxu1  ;;  %v12365_v16 = vpop.f32.mrf.mxu0 }
 0x622   : > { %v20190_v32 = vadd.f32 %v12365_v16, %v11940_v14  ;;  %v11950_v14 = vadd.f32 %v11949_v10, %v21694_v48  ;;  %v21697_v10 = vld [vmem:[#allocation119_spill] sm:$0xff] }
 0x623   : > { %v20192_v54 = vpop.f32.mrf.mxu1  ;;  %v12367_v47 = vpop.f32.mrf.mxu0 }
 0x624   : > { %v20194_v59 = vadd.f32 %v12367_v47, %v11942_v53  ;;  %v21695_v53 = vld [vmem:[#allocation115_spill] sm:$0xff] }
 0x625   : > { %v20197_v37 = vpop.f32.mrf.mxu1  ;;  %v12369_v45 = vpop.f32.mrf.mxu0  ;;  %v11952_v4 = vadd.f32 %v11951_v6, %v21695_v53  ;;  %v21698_v6 = vld [vmem:[#allocation55_spill] sm:$0xff] }
 0x626   : > { %v20200_v5 = vadd.f32 %v12369_v45, %v11944_v24  ;;  %v21696_v45 = vld [vmem:[#allocation71_spill] sm:$0xff] }
 0x627   : > { %v20202_v20 = vpop.f32.mrf.mxu1  ;;  %v12373_v19 = vpop.f32.mrf.mxu0  ;;  %v11954_v24 = vadd.f32 %v11953_v49, %v21696_v45 }
 0x628   : > { %v20205_v16 = vadd.f32 %v12373_v19, %v11948_v26  ;;  %v11958_v19 = vadd.f32 %v11957_v23, %v21697_v10 }
 0x629   : > { %v20207_v36 = vpop.f32.mrf.mxu1  ;;  %v12375_v47 = vpop.f32.mrf.mxu0 }
 0x62a   : > { %v20210_v38 = vadd.f32 %v12375_v47, %v11950_v14  ;;  %v11960_v14 = vadd.f32 %v11959_v43, %v21698_v6 }
 0x62b   : > { %v20212_v44 = vpop.f32.mrf.mxu1  ;;  %v12377_v12 = vpop.f32.mrf.mxu0 }
 0x62c   : > { %v20214_v56 = vadd.f32 %v12377_v12, %v11952_v4  ;;  %v11962_v4 = vadd.f32 %v11961_v51, %v19895_v41 }
 0x62d   : > { %v20217_v13 = vpop.f32.mrf.mxu1  ;;  %v12379_v21 = vpop.f32.mrf.mxu0 }
 0x62e   : > { %v20220_v26 = vadd.f32 %v12379_v21, %v11954_v24  ;;  %v11964_v21 = vadd.f32 %v11963_v27, %v19902_v28 }
 0x62f   : > { %v20222_v48 = vpop.f32.mrf.mxu1  ;;  %v12383_v3 = vpop.f32.mrf.mxu0 }
 0x630   : > { %v20225_v47 = vadd.f32 %v12383_v3, %v11958_v19 }
 0x631   : > { %v20227_v53 = vpop.f32.mrf.mxu1  ;;  %v12385_v12 = vpop.f32.mrf.mxu0 }
 0x632   : > { %21699 = vst [vmem:[#allocation5_spill] sm:$0xff] %v20227_v53  ;;  %v20230_v49 = vadd.f32 %v12385_v12, %v11960_v14  ;;  %v21707_v12 = vld [vmem:[#allocation27_spill] sm:$0xff] }
 0x633   : > { %v20232_v45 = vpop.f32.mrf.mxu1  ;;  %v12387_v7 = vpop.f32.mrf.mxu0 }
 0x634   : > { %21700 = vst [vmem:[#allocation80_spill] sm:$0xff] %v20232_v45  ;;  %v20234_v23 = vadd.f32 %v12387_v7, %v11962_v4  ;;  %v12576_v7 = vld [vmem:[%s20849_s6] sm:$0x3] }
 0x635   : > { %v20237_v24 = vpop.f32.mrf.mxu1  ;;  %v12389_v10 = vpop.f32.mrf.mxu0  ;;  %v20261_v4 = vrot.slane %v12576_v7, %v21707_v12 }
 0x636   : > { %21701 = vst [vmem:[#allocation98_spill] sm:$0xff] %v20237_v24  ;;  %v20239_v43 = vadd.f32 %v12389_v10, %v11964_v21  ;;  %v21708_v21 = vld [vmem:[#allocation28_spill] sm:$0xff] }
 0x637   : > { %v20241_v3 = vpop.f32.mrf.mxu1  ;;  %v20243_v19 = vpop.f32.mrf.mxu0  ;;  %v20264_v10 = vrot.slane %v12576_v7, %v21708_v21  ;;  %v14759_v7 = vld [vmem:[%s20850_s7 + $0x1] ss:$4 sm:$0x3] }
 0x638   : > { %21702 = vst [vmem:[#allocation42_spill] sm:$0xff] %v20239_v43  ;;  %21703 = vst [vmem:[#allocation41_spill] sm:$0xff] %v20241_v3  ;;  %v20300_v60 = vrot.slane %v14759_v7, %v21707_v12  ;;  %v12592_v43 = vadd.f32 %v20261_v4, %v20185_v35  ;;  %v12594_v35 = vadd.f32 %v20261_v4, %v20194_v59 }
 0x639   : > { %v20245_v6 = vpop.f32.mrf.mxu1  ;;  %v20247_v41 = vpop.f32.mrf.mxu0 }
 0x63a   : > { %21704 = vst [vmem:[#allocation9_spill] sm:$0xff] %v20245_v6  ;;  %21714 = vst [vmem:[#allocation97_spill] sm:$0xff] %v20300_v60 }
 0x63b   : > { %v20252_v51 = vpop.f32.mrf.mxu1  ;;  %v20254_v28 = vpop.f32.mrf.mxu0 }
 0x63c   : > { %21705 = vst [vmem:[#allocation17_spill] sm:$0xff] %v20252_v51  ;;  %v12588_v51 = vadd.f32 %v20261_v4, %v20165_v40  ;;  %v14760_v40 = vld [vmem:[%s20850_s7 + $0x2] ss:$4 sm:$0x3] }
 0x63d   : > { %v20256_v27 = vpop.f32.mrf.mxu1  ;;  %v20258_v14 = vpop.f32.mrf.mxu0  ;;  %v20323_v63 = vrot.slane %v14760_v40, %v21707_v12 }
 0x63e   : > { %21706 = vst [vmem:[#allocation11_spill] sm:$0xff] %v20256_v27  ;;  %v12716_v27 = vld [vmem:[%s20850_s7] ss:$4 sm:$0x3] }
 0x63f   : > { %v20266_v46 = vpop.f32.mrf.mxu1  ;;  %v20268_v6 = vpop.f32.mrf.mxu0  ;;  %v20294_v34 = vrot.slane %v12716_v27, %v21707_v12  ;;  %v20297_v45 = vrot.slane %v12716_v27, %v21708_v21  ;;  %v20314_v27 = vrot.slane %v14759_v7, %v21708_v21  ;;  %21718 = vst [vmem:[#allocation100_spill] sm:$0xff] %v20323_v63 }
 0x640   : > { %21709 = vst [vmem:[#allocation86_spill] sm:$0xff] %v20266_v46  ;;  %v12589_v46 = vadd.f32 %v20264_v10, %v20170_v25 }
 0x641   : > { %v20270_v0 = vpop.f32.mrf.mxu1  ;;  %v20272_v3 = vpop.f32.mrf.mxu0 }
 0x642   : > { %21710 = vst [vmem:[#allocation14_spill] sm:$0xff] %v20270_v0  ;;  %21711 = vst [vmem:[#allocation19_spill] sm:$0xff] %v20272_v3  ;;  %v12590_v0 = vadd.f32 %v20261_v4, %v20174_v15  ;;  %v14761_v15 = vld [vmem:[%s20850_s7 + $0x3] ss:$4 sm:$0x3]  ;;  %v12591_v3 = vadd.f32 %v20264_v10, %v20180_v2  ;;  %v12653_v53 = vmax.f32 %v12589_v46, 0.0 }
 0x643   : > { %v20284_v18 = vpop.f32.mrf.mxu1  ;;  %v20286_v24 = vpop.f32.mrf.mxu0  ;;  %v20331_v7 = vrot.slane %v14761_v15, %v21707_v12  ;;  %v20334_v46 = vrot.slane %v14761_v15, %v21708_v21 }
 0x644   : > { %21712 = vst [vmem:[#allocation12_spill] sm:$0xff] %v20284_v18  ;;  %21713 = vst [vmem:[#allocation89_spill] sm:$0xff] %v20286_v24  ;;  %v12652_v24 = vmax.f32 %v12588_v51, 0.0  ;;  %v20326_v51 = vrot.slane %v14760_v40, %v21708_v21  ;;  %v12654_v2 = vmax.f32 %v12590_v0, 0.0  ;;  %v12595_v40 = vadd.f32 %v20264_v10, %v20200_v5 }
 0x645   : > { %v20302_v25 = vpop.f32.mrf.mxu1  ;;  %v20304_v18 = vpop.f32.mrf.mxu0  ;;  %21720 = vst [vmem:[#allocation82_spill] sm:$0xff] %v20331_v7  ;;  %21721 = vst [vmem:[#allocation109_spill] sm:$0xff] %v20334_v46  ;;  %v12596_v0 = vadd.f32 %v20261_v4, %v20205_v16  ;;  %v11972_v21 = vadd.f32 %v20172_v42, %v19918_v39  ;;  %v12597_v16 = vadd.f32 %v20264_v10, %v20210_v38  ;;  %v12658_v42 = vmax.f32 %v12594_v35, 0.0 }
 0x646   : > { %21715 = vst [vmem:[#allocation107_spill] sm:$0xff] %v20302_v25  ;;  %21716 = vst [vmem:[#allocation79_spill] sm:$0xff] %v20304_v18  ;;  %v12593_v25 = vadd.f32 %v20264_v10, %v20190_v32  ;;  %v11968_v32 = vadd.f32 %v20162_v52, %v19906_v30  ;;  %v20349_v12 = vmul.f32 %v20294_v34, %v12652_v24  ;;  %v12655_v30 = vmax.f32 %v12591_v3, 0.0 }
 0x647   : > { %v20318_v60 = vpop.f32.mrf.mxu1  ;;  %v20320_v18 = vpop.f32.mrf.mxu0  ;;  %21719 = vst [vmem:[#allocation85_spill] sm:$0xff] %v20326_v51  ;;  %v12656_v52 = vmax.f32 %v12592_v43, 0.0  ;;  %v20365_v24 = vmul.f32 %v20294_v34, %v12654_v2  ;;  %v11978_v39 = vadd.f32 %v20182_v50, %v19935_v29  ;;  %v12659_v38 = vmax.f32 %v12595_v40, 0.0 }
 0x648   : > { %21717 = vst [vmem:[#allocation84_spill] sm:$0xff] %v20318_v60  ;;  %v11970_v60 = vadd.f32 %v20167_v9, %v19911_v55  ;;  %v20354_v55 = vmul.f32 %v20297_v45, %v12653_v53  ;;  %v11974_v9 = vadd.f32 %v20177_v57, %v19925_v61  ;;  %v12657_v5 = vmax.f32 %v12593_v25, 0.0 }
 0x649   : > { %v20344_v51 = vpop.f32.mrf.mxu1  ;;  %v20346_v59 = vpop.f32.mrf.mxu0  ;;  %v12598_v53 = vadd.f32 %v20261_v4, %v20214_v56  ;;  %v11980_v61 = vadd.f32 %v20187_v33, %v19942_v8  ;;  %v11982_v57 = vadd.f32 %v20192_v54, %v19951_v58  ;;  %v12660_v43 = vmax.f32 %v12596_v0, 0.0 }
 0x64a   : > { %v20380_v2 = vmul.f32 %v20297_v45, %v12655_v30  ;;  %v20383_v29 = vmul.f32 %v20294_v34, %v12656_v52  ;;  %v11984_v50 = vadd.f32 %v20197_v37, %v19958_v11  ;;  %v12528_v8 = vadd.f32 %v20243_v19, %v11968_v32 }
 0x64b   : > { %v20360_v15 = vpop.f32.mrf.mxu1  ;;  %v20362_v46 = vpop.f32.mrf.mxu0  ;;  %v20389_v33 = vmul.f32 %v20297_v45, %v12657_v5  ;;  %v11988_v58 = vadd.f32 %v20202_v20, %v19967_v31  ;;  %v12661_v54 = vmax.f32 %v12597_v16, 0.0  ;;  %v12599_v56 = vadd.f32 %v20264_v10, %v20220_v26 }
 0x64c   : > { %v20400_v0 = vmul.f32 %v20294_v34, %v12658_v42  ;;  %v11990_v11 = vadd.f32 %v20207_v36, %v19974_v1  ;;  %v12662_v37 = vmax.f32 %v12598_v53, 0.0  ;;  %v12600_v19 = vadd.f32 %v20261_v4, %v20225_v47  ;;  %v21724_v42 = vld [vmem:[#allocation39_spill] sm:$0xff]  ;;  %v21725_v53 = vld [vmem:[#allocation5_spill] sm:$0xff] }
 0x64d   : > { %v20375_v3 = vpop.f32.mrf.mxu1  ;;  %v20377_v25 = vpop.f32.mrf.mxu0  ;;  %v20407_v31 = vmul.f32 %v20297_v45, %v12659_v38  ;;  %v20410_v20 = vmul.f32 %v20294_v34, %v12660_v43  ;;  %v20414_v26 = vadd.f32 %v20212_v44, %v19983_v22  ;;  %v12529_v32 = vadd.f32 %v20247_v41, %v11970_v60  ;;  %v21727_v43 = vld [vmem:[#allocation19_spill] sm:$0xff] }
 0x64e   : > { %v20423_v1 = vadd.f32 %v20217_v13, %v19990_v62  ;;  %v12601_v36 = vadd.f32 %v20264_v10, %v20230_v49  ;;  %v12604_v47 = vadd.f32 %v20261_v4, %v12528_v8  ;;  %v12530_v5 = vadd.f32 %v20254_v28, %v11972_v21 }
 0x64f   : > { %v20395_v35 = vpop.f32.mrf.mxu1  ;;  %v20397_v40 = vpop.f32.mrf.mxu0  ;;  %v20430_v22 = vmul.f32 %v20297_v45, %v12661_v54  ;;  %v12663_v44 = vmax.f32 %v12599_v56, 0.0  ;;  %v12602_v60 = vadd.f32 %v20261_v4, %v20234_v23  ;;  %v12531_v41 = vadd.f32 %v20258_v14, %v11974_v9  ;;  %v21726_v23 = vld [vmem:[#allocation42_spill] sm:$0xff] }
 0x650   : > { %v20440_v13 = vmul.f32 %v20294_v34, %v12662_v37  ;;  %v20444_v49 = vadd.f32 %v20222_v48, %v19999_v17  ;;  %v12664_v28 = vmax.f32 %v12600_v19, 0.0  ;;  %v12532_v21 = vadd.f32 %v20268_v6, %v11978_v39  ;;  %v21729_v48 = vld [vmem:[#allocation120_spill] sm:$0xff] }
 0x651   : > { %v20417_v30 = vpop.f32.mrf.mxu1  ;;  %v20419_v52 = vpop.f32.mrf.mxu0  ;;  %v20449_v38 = vadd.f32 %v21725_v53, %v21724_v42  ;;  %v12603_v14 = vadd.f32 %v20264_v10, %v21726_v23  ;;  %v12605_v9 = vadd.f32 %v20264_v10, %v12529_v32  ;;  %v12533_v8 = vadd.f32 %v21727_v43, %v11980_v61  ;;  %v21730_v37 = vld [vmem:[#allocation80_spill] sm:$0xff]  ;;  %v21732_v23 = vld [vmem:[#allocation89_spill] sm:$0xff] }
 0x652   : > { %21723 = vst [vmem:[#allocation110_spill] sm:$0xff] %v20440_v13  ;;  %v12665_v17 = vmax.f32 %v12601_v36, 0.0  ;;  %v20461_v19 = vadd.f32 %v21730_v37, %v21729_v48  ;;  %v12668_v6 = vmax.f32 %v12604_v47, 0.0  ;;  %v12606_v39 = vadd.f32 %v20261_v4, %v12530_v5  ;;  %v21735_v48 = vld [vmem:[#allocation70_spill] sm:$0xff] }
 0x653   : > { %v20435_v16 = vpop.f32.mrf.mxu1  ;;  %v20437_v62 = vpop.f32.mrf.mxu0  ;;  %v20465_v42 = vmul.f32 %v20297_v45, %v12663_v44  ;;  %v12666_v53 = vmax.f32 %v12602_v60, 0.0  ;;  %v12607_v32 = vadd.f32 %v20264_v10, %v12531_v41  ;;  %v12534_v61 = vadd.f32 %v21732_v23, %v11982_v57  ;;  %v21736_v37 = vld [vmem:[#allocation98_spill] sm:$0xff]  ;;  %v21737_v44 = vld [vmem:[#allocation79_spill] sm:$0xff] }
 0x654   : > { %21722 = vst [vmem:[#allocation99_spill] sm:$0xff] %v20435_v16  ;;  %v20474_v36 = vmul.f32 %v20294_v34, %v12664_v28  ;;  %v20478_v47 = vadd.f32 %v21736_v37, %v21735_v48  ;;  %v12608_v5 = vadd.f32 %v20261_v4, %v12532_v21  ;;  %v12535_v63 = vadd.f32 %v21737_v44, %v11984_v50  ;;  %v21741_v48 = vld [vmem:[#allocation41_spill] sm:$0xff]  ;;  %v21744_v44 = vld [vmem:[#allocation122_spill] sm:$0xff] }
 0x655   : > { %v20455_v54 = vpop.f32.mrf.mxu1  ;;  %v20457_v56 = vpop.f32.mrf.mxu0  ;;  %21731 = vst [vmem:[#allocation112_spill] sm:$0xff] %v20465_v42  ;;  %v12667_v60 = vmax.f32 %v12603_v14, 0.0  ;;  %v12609_v41 = vadd.f32 %v20264_v10, %v12533_v8  ;;  %v12536_v57 = vadd.f32 %v20320_v18, %v11988_v58  ;;  %v20489_v28 = vmul.f32 %v20297_v45, %v12665_v17  ;;  %v21742_v42 = vld [vmem:[#allocation97_spill] sm:$0xff] }
 0x656   : > { %21728 = vst [vmem:[#allocation102_spill] sm:$0xff] %v20455_v54  ;;  %21734 = vst [vmem:[#allocation40_spill] sm:$0xff] %v20474_v36  ;;  %v12669_v54 = vmax.f32 %v12605_v9, 0.0  ;;  %v21740_v36 = vld [vmem:[#allocation73_spill] sm:$0xff]  ;;  %v12757_v21 = vmul.f32 %v21742_v42, %v12668_v6  ;;  %v12670_v13 = vmax.f32 %v12606_v39, 0.0  ;;  %v20495_v50 = vmul.f32 %v20294_v34, %v12666_v53 }
 0x657   : > { %v20469_v43 = vpop.f32.mrf.mxu1  ;;  %v20471_v7 = vpop.f32.mrf.mxu0  ;;  %21739 = vst [vmem:[#allocation113_spill] sm:$0xff] %v20489_v28  ;;  %v12008_v37 = vadd.f32 %v21741_v48, %v21740_v36  ;;  %v12671_v14 = vmax.f32 %v12607_v32, 0.0  ;;  %v12610_v9 = vadd.f32 %v20261_v4, %v12534_v61  ;;  %v12537_v18 = vadd.f32 %v20346_v59, %v11990_v11  ;;  %v21745_v17 = vld [vmem:[#allocation9_spill] sm:$0xff]  ;;  %v21746_v28 = vld [vmem:[#allocation90_spill] sm:$0xff] }
 0x658   : > { %21733 = vst [vmem:[#allocation101_spill] sm:$0xff] %v20469_v43  ;;  %21743 = vst [vmem:[#allocation103_spill] sm:$0xff] %v20495_v50  ;;  %v21747_v16 = vld [vmem:[#allocation17_spill] sm:$0xff]  ;;  %v12672_v48 = vmax.f32 %v12608_v5, 0.0  ;;  %v12611_v6 = vadd.f32 %v20264_v10, %v12535_v63  ;;  %v20507_v34 = vmul.f32 %v20297_v45, %v12667_v60  ;;  %v12758_v39 = vmul.f32 %v20314_v27, %v12669_v54  ;;  %v21752_v5 = vld [vmem:[#allocation86_spill] sm:$0xff] }
 0x659   : > { %v20484_v23 = vpop.f32.mrf.mxu1  ;;  %v20486_v43 = vpop.f32.mrf.mxu0  ;;  %v12012_v36 = vadd.f32 %v21747_v16, %v21746_v28  ;;  %v12673_v53 = vmax.f32 %v12609_v41, 0.0  ;;  %v12612_v59 = vadd.f32 %v20261_v4, %v12536_v57  ;;  %v12759_v61 = vmul.f32 %v21742_v42, %v12670_v13  ;;  %v21751_v16 = vld [vmem:[#allocation123_spill] sm:$0xff] }
 0x65a   : > { %21738 = vst [vmem:[#allocation104_spill] sm:$0xff] %v20484_v23  ;;  %v12010_v23 = vadd.f32 %v21745_v17, %v21744_v44  ;;  %21748 = vst [vmem:[#allocation114_spill] sm:$0xff] %v20507_v34  ;;  %v21749_v44 = vld [vmem:[#allocation92_spill] sm:$0xff]  ;;  %v21750_v17 = vld [vmem:[#allocation11_spill] sm:$0xff]  ;;  %v20518_v28 = vadd.f32 %v21752_v5, %v21751_v16  ;;  %v20521_v63 = vadd.f32 %v12757_v21, %v20349_v12  ;;  %v12674_v54 = vmax.f32 %v12610_v9, 0.0 }
 0x65b   : > { %v20499_v58 = vpop.f32.mrf.mxu1  ;;  %v12437_v8 = vpop.f32.mrf.mxu0  ;;  %v12014_v50 = vadd.f32 %v21750_v17, %v21749_v44  ;;  %v12760_v45 = vmul.f32 %v20314_v27, %v12671_v14  ;;  %v12613_v60 = vadd.f32 %v20264_v10, %v12537_v18  ;;  %v12538_v41 = vadd.f32 %v20362_v46, %v20414_v26  ;;  %v21755_v17 = vld [vmem:[#allocation72_spill] sm:$0xff]  ;;  %v21756_v34 = vld [vmem:[#allocation14_spill] sm:$0xff] }
 0x65c   : > { %21753 = vst [vmem:[#allocation29_spill] sm:$0xff] %v20521_v63  ;;  %v12761_v44 = vmul.f32 %v21742_v42, %v12672_v48  ;;  %v12020_v16 = vadd.f32 %v21756_v34, %v21755_v17  ;;  %v12675_v5 = vmax.f32 %v12611_v6, 0.0  ;;  %v12539_v12 = vadd.f32 %v20377_v25, %v20423_v1  ;;  %v21757_v48 = vld [vmem:[#allocation59_spill] sm:$0xff]  ;;  %v21758_v63 = vld [vmem:[#allocation12_spill] sm:$0xff] }
 0x65d   : > { %v20511_v11 = vpop.f32.mrf.mxu1  ;;  %v12439_v32 = vpop.f32.mrf.mxu0  ;;  %v12762_v21 = vmul.f32 %v20314_v27, %v12673_v53  ;;  %v12676_v14 = vmax.f32 %v12612_v59, 0.0  ;;  %v12540_v9 = vadd.f32 %v20397_v40, %v20444_v49  ;;  %v20538_v46 = vadd.f32 %v12758_v39, %v20354_v55  ;;  %v21759_v6 = vld [vmem:[#allocation124_spill] sm:$0xff]  ;;  %v21760_v17 = vld [vmem:[#allocation107_spill] sm:$0xff]  ;;  %v21761_v59 = vld [vmem:[#allocation26_spill] sm:$0xff] }
 0x65e   : > { %v20541_v26 = vadd.f32 %v12759_v61, %v20365_v24  ;;  %v12022_v34 = vadd.f32 %v21758_v63, %v21757_v48  ;;  %v12541_v25 = vadd.f32 %v20419_v52, %v20449_v38  ;;  %v20554_v40 = vadd.f32 %v12760_v45, %v20380_v2  ;;  %v21762_v61 = vld [vmem:[#allocation84_spill] sm:$0xff]  ;;  %v21763_v38 = vld [vmem:[#allocation65_spill] sm:$0xff] }
 0x65f   : > { %v20527_v57 = vpop.f32.mrf.mxu1  ;;  %v12443_v13 = vpop.f32.mrf.mxu0  ;;  %v12763_v55 = vmul.f32 %v21742_v42, %v12674_v54  ;;  %v12677_v49 = vmax.f32 %v12613_v60, 0.0  ;;  %v12614_v24 = vadd.f32 %v20261_v4, %v12538_v41  ;;  %v12764_v53 = vmul.f32 %v20314_v27, %v12675_v5  ;;  %v21764_v5 = vld [vmem:[#allocation125_spill] sm:$0xff] }
 0x660   : > { %21754 = vst [vmem:[#allocation116_spill] sm:$0xff] %v20527_v57  ;;  %v20547_v57 = vadd.f32 %v21760_v17, %v21759_v6  ;;  %v20561_v63 = vadd.f32 %v21762_v61, %v21761_v59  ;;  %v12615_v48 = vadd.f32 %v20264_v10, %v12539_v12  ;;  %v20565_v52 = vadd.f32 %v12761_v44, %v20383_v29 }
 0x661   : > { %v12445_v18 = vpop.f32.mrf.mxu0  ;;  %v20551_v1 = vpop.f32.mrf.mxu1  ;;  %v12765_v2 = vmul.f32 %v21742_v42, %v12676_v14  ;;  %v20570_v45 = vadd.f32 %v20344_v51, %v21763_v38  ;;  %v12616_v54 = vadd.f32 %v20261_v4, %v12540_v9  ;;  %v20574_v41 = vadd.f32 %v12762_v21, %v20389_v33  ;;  %v21769_v38 = vld [vmem:[#allocation99_spill] sm:$0xff] }
 0x662   : > { %v20578_v6 = vadd.f32 %v20360_v15, %v21764_v5  ;;  %v12617_v12 = vadd.f32 %v20264_v10, %v12541_v25  ;;  %v12542_v29 = vadd.f32 %v20437_v62, %v20461_v19  ;;  %v12544_v44 = vadd.f32 %v20471_v7, %v12008_v37  ;;  %v21765_v25 = vld [vmem:[#allocation58_spill] sm:$0xff] }
 0x663   : > { %v12447_v39 = vpop.f32.mrf.mxu0  ;;  %v20584_v14 = vpop.f32.mrf.mxu1  ;;  %v20587_v51 = vadd.f32 %v12763_v55, %v20400_v0  ;;  %v12766_v9 = vmul.f32 %v20314_v27, %v12677_v49  ;;  %v12678_v33 = vmax.f32 %v12614_v24, 0.0  ;;  %v12545_v21 = vadd.f32 %v20486_v43, %v12010_v23  ;;  %v21766_v43 = vld [vmem:[#allocation6_spill] sm:$0xff] }
 0x664   : > { %v20592_v15 = vadd.f32 %v12764_v53, %v20407_v31  ;;  %v20596_v59 = vadd.f32 %v20375_v3, %v21765_v25  ;;  %v12679_v62 = vmax.f32 %v12615_v48, 0.0  ;;  %v12546_v7 = vadd.f32 %v12437_v8, %v12012_v36  ;;  %v21767_v36 = vld [vmem:[#allocation78_spill] sm:$0xff] }
 0x665   : > { %v12449_v60 = vpop.f32.mrf.mxu0  ;;  %v20599_v19 = vadd.f32 %v12765_v2, %v20410_v20  ;;  %v12680_v0 = vmax.f32 %v12616_v54, 0.0  ;;  %v12543_v37 = vadd.f32 %v20457_v56, %v20478_v47  ;;  %v12547_v55 = vadd.f32 %v12439_v32, %v12014_v50  ;;  %v20609_v53 = vpop.f32.mrf.mxu1  ;;  %v21768_v2 = vld [vmem:[#allocation49_spill] sm:$0xff] }
 0x666   : > { %v20605_v23 = vadd.f32 %v20395_v35, %v21766_v43  ;;  %v12681_v31 = vmax.f32 %v12617_v12, 0.0  ;;  %v12618_v24 = vadd.f32 %v20261_v4, %v12542_v29  ;;  %v12620_v3 = vadd.f32 %v20261_v4, %v12544_v44 }
 0x667   : > { %v12453_v17 = vpop.f32.mrf.mxu0  ;;  %v20612_v20 = vadd.f32 %v12766_v9, %v20430_v22  ;;  %v12767_v8 = vmul.f32 %v21742_v42, %v12678_v33  ;;  %v12621_v56 = vadd.f32 %v20264_v10, %v12545_v21  ;;  %v12548_v47 = vadd.f32 %v12443_v13, %v20518_v28  ;;  %v12067_v9 = vpop.f32.mrf.mxu1  ;;  %v21770_v33 = vld [vmem:[#allocation110_spill] sm:$0xff] }
 0x668   : > { %v12768_v35 = vmul.f32 %v20314_v27, %v12679_v62  ;;  %v20622_v32 = vadd.f32 %v20417_v30, %v21767_v36  ;;  %v12622_v61 = vadd.f32 %v20261_v4, %v12546_v7  ;;  %v12549_v48 = vadd.f32 %v12445_v18, %v12020_v16  ;;  %v21771_v7 = vld [vmem:[#allocation112_spill] sm:$0xff]  ;;  %v21777_v36 = vld [vmem:[#allocation113_spill] sm:$0xff] }
 0x669   : > { %v12455_v49 = vpop.f32.mrf.mxu0  ;;  %v12769_v22 = vmul.f32 %v21742_v42, %v12680_v0  ;;  %v20628_v54 = vadd.f32 %v21769_v38, %v21768_v2  ;;  %v12619_v5 = vadd.f32 %v20264_v10, %v12543_v37  ;;  %v12623_v28 = vadd.f32 %v20264_v10, %v12547_v55  ;;  %v21772_v37 = vld [vmem:[#allocation50_spill] sm:$0xff]  ;;  %v21779_v38 = vld [vmem:[#allocation100_spill] sm:$0xff] }
 0x66a   : > { %v12770_v12 = vmul.f32 %v20314_v27, %v12681_v31  ;;  %v12682_v29 = vmax.f32 %v12618_v24, 0.0  ;;  %v12684_v30 = vmax.f32 %v12620_v3, 0.0  ;;  %v12550_v44 = vadd.f32 %v12447_v39, %v12022_v34  ;;  %v21773_v55 = vld [vmem:[#allocation102_spill] sm:$0xff]  ;;  %v21774_v39 = vld [vmem:[#allocation40_spill] sm:$0xff] }
 0x66b   : > { %v20617_v50 = vpop.f32.mrf.mxu0  ;;  %v20636_v16 = vadd.f32 %v12767_v8, %v21770_v33  ;;  %v12685_v18 = vmax.f32 %v12621_v56, 0.0  ;;  %v12624_v21 = vadd.f32 %v20261_v4, %v12548_v47  ;;  %v12551_v25 = vadd.f32 %v12449_v60, %v20547_v57  ;;  %v21775_v8 = vld [vmem:[#allocation8_spill] sm:$0xff]  ;;  %v21776_v56 = vld [vmem:[#allocation101_spill] sm:$0xff]  ;;  %v12069_v33 = vpop.f32.mrf.mxu1 }
 0x66c   : > { %v20643_v0 = vadd.f32 %v12768_v35, %v21771_v7  ;;  %v20647_v43 = vadd.f32 %v21773_v55, %v21772_v37  ;;  %v12686_v31 = vmax.f32 %v12622_v61, 0.0  ;;  %v12625_v34 = vadd.f32 %v20264_v10, %v12549_v48 }
 0x66d   : > { %v20632_v13 = vpop.f32.mrf.mxu0  ;;  %v20651_v24 = vadd.f32 %v12769_v22, %v21774_v39  ;;  %v12683_v3 = vmax.f32 %v12619_v5, 0.0  ;;  %v12048_v47 = vadd.f32 %v21776_v56, %v21775_v8  ;;  %v12687_v57 = vmax.f32 %v12623_v28, 0.0  ;;  %v21780_v22 = vld [vmem:[#allocation85_spill] sm:$0xff]  ;;  %v21781_v39 = vld [vmem:[#allocation7_spill] sm:$0xff]  ;;  %v21783_v56 = vld [vmem:[#allocation60_spill] sm:$0xff] }
 0x66e   : > { %v20658_v35 = vadd.f32 %v12770_v12, %v21777_v36  ;;  %v20661_v2 = vmul.f32 %v21742_v42, %v12682_v29  ;;  %v12802_v61 = vmul.f32 %v21779_v38, %v12684_v30  ;;  %v12626_v48 = vadd.f32 %v20261_v4, %v12550_v44  ;;  %v21782_v12 = vld [vmem:[#allocation104_spill] sm:$0xff]  ;;  %v21786_v36 = vld [vmem:[#allocation43_spill] sm:$0xff] }
 0x66f   : > { %v20640_v62 = vpop.f32.mrf.mxu0  ;;  %v12803_v7 = vmul.f32 %v21780_v22, %v12685_v18  ;;  %v12688_v5 = vmax.f32 %v12624_v21, 0.0  ;;  %v12627_v37 = vadd.f32 %v20264_v10, %v12551_v25  ;;  %v12552_v28 = vadd.f32 %v12453_v17, %v20561_v63  ;;  %v21785_v18 = vld [vmem:[#allocation10_spill] sm:$0xff] }
 0x670   : > { %21778 = vst [vmem:[#allocation30_spill] sm:$0xff] %v20661_v2  ;;  %v12050_v8 = vadd.f32 %v21782_v12, %v21781_v39  ;;  %v12052_v42 = vadd.f32 %v20499_v58, %v21783_v56  ;;  %v12804_v29 = vmul.f32 %v21779_v38, %v12686_v31  ;;  %v12689_v30 = vmax.f32 %v12625_v34, 0.0  ;;  %v21787_v39 = vld [vmem:[#allocation116_spill] sm:$0xff]  ;;  %v21788_v2 = vld [vmem:[#allocation67_spill] sm:$0xff]  ;;  %v12071_v34 = vpop.f32.mrf.mxu1  ;;  %v21789_v56 = vld [vmem:[#allocation29_spill] sm:$0xff] }
 0x671   : > { %v20655_v60 = vpop.f32.mrf.mxu0  ;;  %v20676_v44 = vmul.f32 %v20314_v27, %v12683_v3  ;;  %v12054_v21 = vadd.f32 %v20511_v11, %v21785_v18  ;;  %v12805_v25 = vmul.f32 %v21780_v22, %v12687_v57  ;;  %v12553_v63 = vadd.f32 %v12455_v49, %v20570_v45  ;;  %v21790_v18 = vld [vmem:[#allocation64_spill] sm:$0xff] }
 0x672   : > { %v12058_v12 = vadd.f32 %v21787_v39, %v21786_v36  ;;  %v12060_v58 = vadd.f32 %v20551_v1, %v21788_v2  ;;  %v12690_v31 = vmax.f32 %v12626_v48, 0.0  ;;  %v12818_v27 = vadd.f32 %v12802_v61, %v21789_v56  ;;  %v21791_v2 = vld [vmem:[#allocation118_spill] sm:$0xff]  ;;  %v21793_v56 = vld [vmem:[#allocation121_spill] sm:$0xff] }
 0x673   : > { %v20668_v55 = vpop.f32.mrf.mxu0  ;;  %21784 = vst [vmem:[#allocation22_spill] sm:$0xff] %v20676_v44  ;;  %v12806_v3 = vmul.f32 %v21779_v38, %v12688_v5  ;;  %v12691_v44 = vmax.f32 %v12627_v37, 0.0  ;;  %v12628_v11 = vadd.f32 %v20261_v4, %v12552_v28  ;;  %v12819_v45 = vadd.f32 %v12803_v7, %v20538_v46  ;;  %v21792_v28 = vld [vmem:[#allocation54_spill] sm:$0xff] }
 0x674   : > { %v12807_v49 = vmul.f32 %v21780_v22, %v12689_v30  ;;  %v12062_v36 = vadd.f32 %v20584_v14, %v21790_v18  ;;  %v12820_v1 = vadd.f32 %v12804_v29, %v20541_v26  ;;  %v20698_v48 = vadd.f32 %v20609_v53, %v21791_v2  ;;  %v12073_v14 = vpop.f32.mrf.mxu1  ;;  %v21794_v18 = vld [vmem:[#allocation96_spill] sm:$0xff] }
 0x675   : > { %v20682_v17 = vpop.f32.mrf.mxu0  ;;  %v12629_v61 = vadd.f32 %v20264_v10, %v12553_v63  ;;  %v12554_v5 = vadd.f32 %v20617_v50, %v20578_v6  ;;  %v12821_v46 = vadd.f32 %v12805_v25, %v20554_v40  ;;  %v12808_v7 = vmul.f32 %v21779_v38, %v12690_v31 }
 0x676   : > { %v20706_v30 = vadd.f32 %v12067_v9, %v21792_v28  ;;  %v12809_v53 = vmul.f32 %v21780_v22, %v12691_v44  ;;  %v12692_v29 = vmax.f32 %v12628_v11, 0.0  ;;  %v20711_v63 = vadd.f32 %v12069_v33, %v21793_v56  ;;  %v21798_v56 = vld [vmem:[#allocation45_spill] sm:$0xff] }
 0x677   : > { %v12473_v57 = vpop.f32.mrf.mxu0  ;;  %v20714_v6 = vadd.f32 %v12806_v3, %v20565_v52  ;;  %v20718_v9 = vadd.f32 %v12807_v49, %v20574_v41  ;;  %v12693_v31 = vmax.f32 %v12629_v61, 0.0  ;;  %v12630_v44 = vadd.f32 %v20261_v4, %v12554_v5  ;;  %v21795_v49 = vld [vmem:[#allocation75_spill] sm:$0xff] }
 0x678   : > { %v12560_v39 = vadd.f32 %v12473_v57, %v12048_v47  ;;  %v12555_v33 = vadd.f32 %v20632_v13, %v20596_v59  ;;  %v12810_v41 = vmul.f32 %v21779_v38, %v12692_v29  ;;  %v20732_v61 = vadd.f32 %v12073_v14, %v21795_v49 }
 0x679   : > { %v12475_v37 = vpop.f32.mrf.mxu0  ;;  %v20736_v28 = vadd.f32 %v12809_v53, %v20592_v15 }
 0x67a   : > { %v12636_v26 = vadd.f32 %v20261_v4, %v12560_v39  ;;  %v12561_v47 = vadd.f32 %v12475_v37, %v12050_v8  ;;  %v20721_v8 = vadd.f32 %v12071_v34, %v21794_v18  ;;  %v12077_v39 = vpop.f32.mrf.mxu1  ;;  %v21796_v37 = vld [vmem:[#allocation82_spill] sm:$0xff]  ;;  %v12631_v29 = vadd.f32 %v20264_v10, %v12555_v33 }
 0x67b   : > { %v12477_v57 = vpop.f32.mrf.mxu0  ;;  %v20743_v14 = vadd.f32 %v12077_v39, %v21798_v56 }
 0x67c   : > { %v12700_v40 = vmax.f32 %v12636_v26, 0.0  ;;  %v12637_v50 = vadd.f32 %v20264_v10, %v12561_v47  ;;  %v12562_v25 = vadd.f32 %v12477_v57, %v12052_v42  ;;  %v20728_v42 = vadd.f32 %v12808_v7, %v20587_v51  ;;  %v21797_v47 = vld [vmem:[#allocation109_spill] sm:$0xff] }
 0x67d   : > { %v12479_v11 = vpop.f32.mrf.mxu0  ;;  %v12811_v51 = vmul.f32 %v21780_v22, %v12693_v31  ;;  %v12694_v7 = vmax.f32 %v12630_v44, 0.0  ;;  %v20750_v31 = vadd.f32 %v12810_v41, %v20599_v19  ;;  %v12079_v44 = vpop.f32.mrf.mxu1 }
 0x67e   : > { %v12701_v52 = vmax.f32 %v12637_v50, 0.0  ;;  %v12638_v3 = vadd.f32 %v20261_v4, %v12562_v25  ;;  %v12563_v2 = vadd.f32 %v12479_v11, %v12054_v21  ;;  %v12847_v5 = vmul.f32 %v21796_v37, %v12700_v40 }
 0x67f   : > { %v12483_v34 = vpop.f32.mrf.mxu0  ;;  %v20759_v41 = vmul.f32 %v21779_v38, %v12694_v7  ;;  %v12827_v56 = vadd.f32 %v12811_v51, %v20612_v20 }
 0x680   : > { %v12702_v59 = vmax.f32 %v12638_v3, 0.0  ;;  %v12639_v13 = vadd.f32 %v20264_v10, %v12563_v2  ;;  %v12564_v26 = vadd.f32 %v12483_v34, %v12058_v12  ;;  %v12848_v21 = vmul.f32 %v21797_v47, %v12701_v52 }
 0x681   : > { %v12485_v57 = vpop.f32.mrf.mxu0  ;;  %v12556_v12 = vadd.f32 %v20640_v62, %v20605_v23  ;;  %v12863_v18 = vadd.f32 %v12847_v5, %v12818_v27  ;;  %v12695_v2 = vmax.f32 %v12631_v29, 0.0 }
 0x682   : > { %v12849_v40 = vmul.f32 %v21796_v37, %v12702_v59  ;;  %v12703_v50 = vmax.f32 %v12639_v13, 0.0  ;;  %v12640_v15 = vadd.f32 %v20261_v4, %v12564_v26  ;;  %v12565_v53 = vadd.f32 %v12485_v57, %v12060_v58  ;;  %v21799_v59 = vld [vmem:[#allocation61_spill] sm:$0xff]  ;;  %v12081_v57 = vpop.f32.mrf.mxu1 }
 0x683   : > { %v12487_v25 = vpop.f32.mrf.mxu0  ;;  %v12864_v11 = vadd.f32 %v12848_v21, %v12819_v45  ;;  %v12557_v58 = vadd.f32 %v20655_v60, %v20622_v32  ;;  %v12632_v5 = vadd.f32 %v20261_v4, %v12556_v12 }
 0x684   : > { %v12850_v33 = vmul.f32 %v21797_v47, %v12703_v50  ;;  %v12704_v39 = vmax.f32 %v12640_v15, 0.0  ;;  %v12641_v52 = vadd.f32 %v20264_v10, %v12565_v53  ;;  %v12566_v3 = vadd.f32 %v12487_v25, %v12062_v36 }
 0x685   : > { %v12489_v49 = vpop.f32.mrf.mxu0  ;;  %v12879_v34 = vadd.f32 %v12864_v11, %v12863_v18  ;;  %v12865_v23 = vadd.f32 %v12849_v40, %v12820_v1  ;;  %v12080_v36 = vadd.f32 %v12079_v44, %v21799_v59  ;;  %v12558_v40 = vadd.f32 %v20668_v55, %v20628_v54  ;;  %v21801_v59 = vld [vmem:[#allocation77_spill] sm:$0xff] }
 0x686   : > { %v12705_v62 = vmax.f32 %v12641_v52, 0.0  ;;  %v12642_v27 = vadd.f32 %v20261_v4, %v12566_v3  ;;  %v12567_v19 = vadd.f32 %v12489_v49, %v20698_v48  ;;  %v12866_v45 = vadd.f32 %v12850_v33, %v12821_v46  ;;  %v21800_v33 = vld [vmem:[#allocation74_spill] sm:$0xff]  ;;  %v12083_v3 = vpop.f32.mrf.mxu1 }
 0x687   : > { %12880 = vadd.xlane.f32.xlu0 %v12879_v34  ;;  %v12493_v13 = vpop.f32.mrf.mxu0  ;;  %v12851_v32 = vmul.f32 %v21796_v37, %v12704_v39  ;;  %v12813_v48 = vmul.f32 %v21780_v22, %v12695_v2  ;;  %v12633_v46 = vadd.f32 %v20264_v10, %v12557_v58  ;;  %v12696_v44 = vmax.f32 %v12632_v5, 0.0 }
 0x688   : > { %v12706_v60 = vmax.f32 %v12642_v27, 0.0  ;;  %v12643_v1 = vadd.f32 %v20264_v10, %v12567_v19  ;;  %v12568_v26 = vadd.f32 %v12493_v13, %v20706_v30  ;;  %v12882_v21 = vadd.f32 %v12866_v45, %v12865_v23 }
 0x689   : > { %v12495_v7 = vpop.f32.mrf.mxu0  ;;  %v12852_v29 = vmul.f32 %v21797_v47, %v12705_v62  ;;  %v12559_v30 = vadd.f32 %v20682_v17, %v20647_v43  ;;  %v12867_v18 = vadd.f32 %v12851_v32, %v20714_v6  ;;  %v12082_v39 = vadd.f32 %v12081_v57, %v21800_v33  ;;  %v21804_v33 = vld [vmem:[#allocation114_spill] sm:$0xff] }
 0x68a   : > { %v12707_v50 = vmax.f32 %v12643_v1, 0.0  ;;  %v12644_v15 = vadd.f32 %v20261_v4, %v12568_v26  ;;  %v12569_v53 = vadd.f32 %v12495_v7, %v20711_v63  ;;  %v12853_v12 = vmul.f32 %v21796_v37, %v12706_v60 }
 0x68b   : > { %12883 = vadd.xlane.f32.xlu0 %v12882_v21  ;;  %v12497_v25 = vpop.f32.mrf.mxu0  ;;  %v12868_v20 = vadd.f32 %v12852_v29, %v20718_v9  ;;  %v12697_v63 = vmax.f32 %v12633_v46, 0.0  ;;  %v12634_v52 = vadd.f32 %v20261_v4, %v12558_v40  ;;  %v12635_v58 = vadd.f32 %v20264_v10, %v12559_v30 }
 0x68c   : > { %v12854_v51 = vmul.f32 %v21797_v47, %v12707_v50  ;;  %v12708_v11 = vmax.f32 %v12644_v15, 0.0  ;;  %v12645_v54 = vadd.f32 %v20264_v10, %v12569_v53  ;;  %v12570_v55 = vadd.f32 %v12497_v25, %v20721_v8 }
 0x68d   : > { %v12499_v43 = vpop.f32.mrf.mxu0  ;;  %v12885_v17 = vadd.f32 %v12868_v20, %v12867_v18  ;;  %v12869_v34 = vadd.f32 %v12853_v12, %v20728_v42  ;;  %v12814_v5 = vmul.f32 %v21779_v38, %v12696_v44  ;;  %v12084_v13 = vadd.f32 %v12083_v3, %v21801_v59 }
 0x68e   : > { %v12709_v2 = vmax.f32 %v12645_v54, 0.0  ;;  %v12646_v6 = vadd.f32 %v20261_v4, %v12570_v55  ;;  %v12571_v9 = vadd.f32 %v12499_v43, %v20732_v61  ;;  %v12855_v49 = vmul.f32 %v21796_v37, %v12708_v11 }
 0x68f   : > { %12886 = vadd.xlane.f32.xlu1 %v12885_v17  ;;  %v12503_v8 = vpop.f32.mrf.mxu0  ;;  %v12870_v23 = vadd.f32 %v12854_v51, %v20736_v28  ;;  %v12815_v61 = vmul.f32 %v21780_v22, %v12697_v63  ;;  %v12698_v1 = vmax.f32 %v12634_v52, 0.0  ;;  %v12699_v21 = vmax.f32 %v12635_v58, 0.0 }
 0x690   : > { %v12856_v62 = vmul.f32 %v21797_v47, %v12709_v2  ;;  %v12710_v27 = vmax.f32 %v12646_v6, 0.0  ;;  %v12647_v19 = vadd.f32 %v20264_v10, %v12571_v9  ;;  %v12572_v45 = vadd.f32 %v12503_v8, %v20743_v14 }
 0x691   : > { %v12505_v32 = vpop.f32.mrf.mxu0  ;;  %v12888_v60 = vadd.f32 %v12870_v23, %v12869_v34  ;;  %v12871_v14 = vadd.f32 %v12855_v49, %v20750_v31  ;;  %v12828_v12 = vadd.f32 %v20759_v41, %v20636_v16  ;;  %v12830_v25 = vadd.f32 %v12814_v5, %v20651_v24  ;;  %v21802_v41 = vld [vmem:[#allocation103_spill] sm:$0xff]  ;;  %v14762_v49 = vld [vmem:[#allocation4] ss:$0 sm:$0xff] }
 0x692   : > { %v12711_v26 = vmax.f32 %v12647_v19, 0.0  ;;  %v12648_v42 = vadd.f32 %v20261_v4, %v12572_v45  ;;  %v12573_v28 = vadd.f32 %v12505_v32, %v12080_v36  ;;  %v12857_v46 = vmul.f32 %v21796_v37, %v12710_v27 }
 0x693   : > { %12889 = vadd.xlane.f32.xlu1 %v12888_v60  ;;  %v12507_v7 = vpop.f32.mrf.mxu0  ;;  %v12872_v29 = vadd.f32 %v12856_v62, %v12827_v56  ;;  %v12829_v36 = vadd.f32 %v12813_v48, %v20643_v0  ;;  %v12816_v51 = vmul.f32 %v21779_v38, %v12698_v1  ;;  %v12831_v55 = vadd.f32 %v12815_v61, %v20658_v35  ;;  %v21803_v48 = vld [vmem:[#allocation30_spill] sm:$0xff] }
 0x694   : > { %v12858_v57 = vmul.f32 %v21797_v47, %v12711_v26  ;;  %v12712_v40 = vmax.f32 %v12648_v42, 0.0  ;;  %v12649_v50 = vadd.f32 %v20264_v10, %v12573_v28  ;;  %v12574_v15 = vadd.f32 %v12507_v7, %v12082_v39 }
 0x695   : > { %v12509_v53 = vpop.f32.mrf.mxu0  ;;  %v12891_v30 = vadd.f32 %v12872_v29, %v12871_v14  ;;  %v12873_v11 = vadd.f32 %v12857_v46, %v12828_v12  ;;  %v12817_v44 = vmul.f32 %v21780_v22, %v12699_v21  ;;  %v12787_v63 = vadd.f32 %v21803_v48, %v21802_v41 }
 0x696   : > { %v12859_v18 = vmul.f32 %v21796_v37, %v12712_v40  ;;  %v12713_v20 = vmax.f32 %v12649_v50, 0.0  ;;  %v12650_v31 = vadd.f32 %v20261_v4, %v12574_v15  ;;  %v12575_v56 = vadd.f32 %v12509_v53, %v12084_v13  ;;  %v21805_v4 = vld [vmem:[#allocation22_spill] sm:$0xff] }
 0x697   : > { %12892 = vadd.xlane.f32.xlu0 %v12891_v30  ;;  %v12874_v54 = vadd.f32 %v12858_v57, %v12829_v36  ;;  %v12788_v39 = vadd.f32 %v21805_v4, %v21804_v33  ;;  %v12832_v2 = vadd.f32 %v12816_v51, %v12787_v63 }
 0x698   : > { %v12860_v16 = vmul.f32 %v21797_v47, %v12713_v20  ;;  %v12714_v0 = vmax.f32 %v12650_v31, 0.0  ;;  %v12651_v24 = vadd.f32 %v20264_v10, %v12575_v56  ;;  %v12875_v52 = vadd.f32 %v12859_v18, %v12830_v25 }
 0x699   : > { %v12894_v43 = vadd.f32 %v12874_v54, %v12873_v11  ;;  %v12833_v6 = vadd.f32 %v12817_v44, %v12788_v39 }
 0x69a   : > { %v12861_v38 = vmul.f32 %v21796_v37, %v12714_v0  ;;  %v12715_v17 = vmax.f32 %v12651_v24, 0.0  ;;  %v12876_v3 = vadd.f32 %v12860_v16, %v12831_v55 }
 0x69b   : > { %12895 = vadd.xlane.f32.xlu1 %v12894_v43 }
 0x69c   : > { %v12862_v35 = vmul.f32 %v21797_v47, %v12715_v17  ;;  %v12897_v22 = vadd.f32 %v12876_v3, %v12875_v52  ;;  %v12877_v10 = vadd.f32 %v12861_v38, %v12832_v2 }
 0x69e   : > { %12898 = vadd.xlane.f32.xlu0 %v12897_v22  ;;  %v12878_v9 = vadd.f32 %v12862_v35, %v12833_v6 }
 0x6a0   : > { %v12900_v58 = vadd.f32 %v12878_v9, %v12877_v10 }
 0x6a2   : > { %12901 = vadd.xlane.f32.xlu1 %v12900_v58 }
 0x710   : > { %v12881_v8 = vpop.xlane.xlu0 %12880 }
 0x711   : > { %v12910_v34 = vadd.f32 %v14762_v49, %v12881_v8 }
 0x713   : > { %v14763_v23 = vmul.f32 -1.442695, %v12910_v34 }
 0x714   : > { %v12884_v62 = vpop.xlane.xlu0 %12883 }
 0x715   : > { %15807 = vpow2.f32 %v14763_v23  ;;  %v12911_v37 = vadd.f32 %v14762_v49, %v12884_v62 }
 0x717   : > { %v14764_v27 = vmul.f32 -1.442695, %v12911_v37 }
 0x718   : > { %v12887_v19 = vpop.xlane.xlu1 %12886 }
 0x719   : > { %15809 = vpow2.f32 %v14764_v27  ;;  %v12912_v47 = vadd.f32 %v14762_v49, %v12887_v19 }
 0x71b   : > { %v14765_v45 = vmul.f32 -1.442695, %v12912_v47 }
 0x71c   : > { %v12890_v5 = vpop.xlane.xlu1 %12889 }
 0x71d   : > { %15811 = vpow2.f32 %v14765_v45  ;;  %v12913_v61 = vadd.f32 %v14762_v49, %v12890_v5 }
 0x71f   : > { %v14766_v59 = vmul.f32 -1.442695, %v12913_v61 }
 0x720   : > { %v12893_v13 = vpop.xlane.xlu0 %12892 }
 0x721   : > { %15813 = vpow2.f32 %v14766_v59  ;;  %v12914_v32 = vadd.f32 %v14762_v49, %v12893_v13 }
 0x722   : > { %v15808_v60 = vpop.eup %15807 }
 0x723   : > { %v12942_v1 = vadd.f32 1.0, %v15808_v60  ;;  %v14767_v26 = vmul.f32 -1.442695, %v12914_v32 }
 0x724   : > { %v12896_v42 = vpop.xlane.xlu1 %12895 }
 0x725   : > { %15815 = vrcp.f32 %v12942_v1  ;;  %v12915_v28 = vadd.f32 %v14762_v49, %v12896_v42 }
 0x726   : > { %v15810_v21 = vpop.eup %15809  ;;  %15817 = vpow2.f32 %v14767_v26 }
 0x727   : > { %v12943_v46 = vadd.f32 1.0, %v15810_v21  ;;  %v14768_v7 = vmul.f32 -1.442695, %v12915_v28  ;;  %v12899_v14 = vpop.xlane.xlu0 %12898 }
 0x728   : > { %v12916_v29 = vadd.f32 %v14762_v49, %v12899_v14 }
 0x729   : > { %15819 = vrcp.f32 %v12943_v46 }
 0x72a   : > { %v15812_v57 = vpop.eup %15811  ;;  %15821 = vpow2.f32 %v14768_v7  ;;  %v14769_v40 = vmul.f32 -1.442695, %v12916_v29 }
 0x72b   : > { %v12944_v50 = vadd.f32 1.0, %v15812_v57  ;;  %v12902_v15 = vpop.xlane.xlu1 %12901 }
 0x72c   : > { %15823 = vpow2.f32 %v14769_v40  ;;  %v12917_v53 = vadd.f32 %v14762_v49, %v12902_v15 }
 0x72d   : > { %15825 = vrcp.f32 %v12944_v50 }
 0x72e   : > { %v15814_v30 = vpop.eup %15813  ;;  %v14770_v12 = vmul.f32 -1.442695, %v12917_v53 }
 0x72f   : > { %v12945_v36 = vadd.f32 1.0, %v15814_v30 }
 0x730   : > { %15827 = vpow2.f32 %v14770_v12 }
 0x731   : > { %15829 = vrcp.f32 %v12945_v36 }
 0x732   : > { %v15816_v25 = vpop.eup %15815 }
 0x733   : > { %v15818_v18 = vpop.eup %15817  ;;  %12967 = vst.msk [vmem:[%s20822_s19] sm:$0xff] %vm12966_vm1, %v15816_v25 }
 0x734   : > { %v12946_v20 = vadd.f32 1.0, %v15818_v18 }
 0x736   : > { %v15820_v31 = vpop.eup %15819  ;;  %15831 = vrcp.f32 %v12946_v20 }
 0x737   : > { %v15822_v56 = vpop.eup %15821  ;;  %12968 = vst.msk [vmem:[%s20822_s19 + $0x8] sm:$0xff] %vm12966_vm1, %v15820_v31 }
 0x738   : > { %v12947_v51 = vadd.f32 1.0, %v15822_v56 }
 0x739   : > { %v15824_v11 = vpop.eup %15823 }
 0x73a   : > { %v15826_v54 = vpop.eup %15825  ;;  %15833 = vrcp.f32 %v12947_v51  ;;  %v12948_v55 = vadd.f32 1.0, %v15824_v11 }
 0x73b   : > { %12969 = vst.msk [vmem:[%s20822_s19 + $0x10] sm:$0xff] %vm12966_vm1, %v15826_v54 }
 0x73c   : > { %15835 = vrcp.f32 %v12948_v55 }
 0x73d   : > { %v15828_v44 = vpop.eup %15827 }
 0x73e   : > { %v15830_v16 = vpop.eup %15829  ;;  %v12949_v0 = vadd.f32 1.0, %v15828_v44 }
 0x73f   : > { %12970 = vst.msk [vmem:[%s20822_s19 + $0x18] sm:$0xff] %vm12966_vm1, %v15830_v16 }
 0x740   : > { %15837 = vrcp.f32 %v12949_v0 }
 0x743   : > { %v15832_v24 = vpop.eup %15831 }
 0x744   : > { %12971 = vst.msk [vmem:[%s20822_s19 + $0x20] sm:$0xff] %vm12966_vm1, %v15832_v24 }
 0x747   : > { %v15834_v41 = vpop.eup %15833 }
 0x748   : > { %12972 = vst.msk [vmem:[%s20822_s19 + $0x28] sm:$0xff] %vm12966_vm1, %v15834_v41 }
 0x749   : > { %v15836_v48 = vpop.eup %15835 }
 0x74a   : > { %12973 = vst.msk [vmem:[%s20822_s19 + $0x30] sm:$0xff] %vm12966_vm1, %v15836_v48 }
 0x74d   : > { %v15838_v63 = vpop.eup %15837 }
 0x74e   : > { %12974 = vst.msk [vmem:[%s20822_s19 + $0x38] sm:$0xff] %vm12966_vm1, %v15838_v63 }
 0x74f PF: > { %s21_s11 = sadd.s32 1, %s15851_s11  }
 0x750   : > { %p18_p5 = scmp.ge.s32.totalorder %s21_s11, 4  }
 0x752   :  { %20 = sbr.rel (!%p18_p5) target bundleno = 3 (0x3), region = 106 }

</bundles_post_ra>
